<compile_context>
chip_gen: v5e
topology: v5e:2x2
jax: 0.10.0
libtpu: 0.0.40
codegen_flags: <defaults>
</compile_context>

<pallas_src>
import math
import functools

import jax
import jax.numpy as jnp
import numpy as np
from jax.experimental import pallas as pl
from jax.experimental.pallas import tpu as pltpu


# -----------------------------------------------------------------------------
# Pallas kernel: temporal self-attention on a (C, F, n) block in native layout.
#   x_ref, o_ref : (C, F, TS)     -- conv layout, spatial n on the lane axis
#   wqkv_ref     : (3*C*F, C*F)   -- kron(fused [q;k;v]^T, I_F), scale in wq, bf16
#   wo_ref       : (C*F, C*F)     -- kron(wo^T, I_F), bf16
# -----------------------------------------------------------------------------
def _time_attn_kernel(x_ref, wqkv_ref, wo_ref, o_ref, *, F, C):
    N = x_ref.shape[-1]
    CF = C * F
    cdt = wqkv_ref.dtype  # MXU operand dtype (bf16 by default)

    # (C, F, N) -> (C*F, N) is layout-preserving when F == 8 (full sublane tile
    # merges into the major dim), so this is a free view, not a relayout.
    x2 = x_ref[...].reshape(CF, N).astype(cdt)

    # Fused QKV projection: one well-filled MXU matmul (K = C*F), f32 accum.
    qkv = jnp.dot(wqkv_ref[...], x2, preferred_element_type=jnp.float32)  # (3CF, N)
    # Slices are 256-row (sublane-tile) aligned -> no tile-boundary crossing.
    q3 = qkv[0 * CF:1 * CF, :].reshape(C, F, N)   # softmax scale already folded in
    k3 = qkv[1 * CF:2 * CF, :].reshape(C, F, N)
    v3 = qkv[2 * CF:3 * CF, :].reshape(C, F, N)

    # Scores for all F x F (query, key) time pairs via XLU sublane rotations:
    # offset o pairs query step f with key step (f -/+ o) mod F.  The *same*
    # rotation is later applied to v, so roll's sign convention cannot affect
    # correctness.  Everything keeps spatial n lane-dense; reductions are over
    # the leading C axis (cheap slab adds), softmax is purely elementwise.
    s = []
    for o in range(F):
        k_rot = pltpu.roll(k3, shift=o, axis=1) if o else k3
        s.append(jnp.sum(q3 * k_rot, axis=0))                 # (F, N), f32

    m = functools.reduce(jnp.maximum, s)                      # running max, (F, N)
    p = [jnp.exp(si - m) for si in s]                         # EUP
    denom = functools.reduce(jnp.add, p)
    inv = pl.reciprocal(denom, approx=True)                   # EUP vrcp slot

    # Attention-weighted V (VPU broadcast-multiply-accumulate, n on lanes).
    # Multiplying inv into the small (F, N) weights first keeps the big
    # (C, F, N) accumulator to one mul + one add per offset.
    acc = (p[0] * inv)[None] * v3
    for o in range(1, F):
        v_rot = pltpu.roll(v3, shift=o, axis=1)
        acc = acc + (p[o] * inv)[None] * v_rot                # (C, F, N), f32

    # Output projection (MXU) + single lane-dense, unmasked block store.
    out = jnp.dot(wo_ref[...], acc.reshape(CF, N).astype(cdt),
                  preferred_element_type=jnp.float32)         # (CF, N)
    o_ref[...] = out.reshape(C, F, N).astype(o_ref.dtype)


def _pick_spatial_tile(S, B):
    # Largest lane-dense tile that divides S; fall back to the full extent
    # (full-extent blocks are exempt from the (8,128) divisibility rule).
    for cand in (1024, 512, 256, 128):
        if S % cand == 0:
            ts = cand
            break
    else:
        return S
    # Guarantee >= 2 grid steps where possible so megacore / dual-TC (v7x)
    # sharding of the "parallel" axes has work to split.
    while B * (S // ts) < 2 and ts % 256 == 0:
        ts //= 2
    return ts


# -----------------------------------------------------------------------------
# RearrangeTimeCentric wrapper: only *free* reshapes outside the kernel.
# -----------------------------------------------------------------------------
def rearrange_time_centric(x, wq, wk, wv, wo, *, mxu_dtype=jnp.bfloat16,
                           spatial_tile=None):
    """x: (B, C, F, *spatial) -> same shape, temporal attention applied over (f, c)."""
    B, C, F = x.shape[0], x.shape[1], x.shape[2]
    spatial = x.shape[3:]
    S = int(np.prod(spatial)) if spatial else 1

    # 'b c f ...' stays in place: merging trailing spatial dims is a free,
    # layout-preserving reshape (no HBM transpose round trip).
    x4 = x.reshape(B, C, F, S)

    scale = 1.0 / math.sqrt(C)
    eye_f = jnp.eye(F, dtype=jnp.float32)
    # Fused [q;k;v] projection (pre-transposed, softmax scale folded into wq),
    # Kronecker-expanded with I_F so a single matmul contracts over C*F rows of
    # the natively-laid-out block and emits q/k/v already in (C, F, n) layout.
    # NOTE: kron blow-up is F x; fine for small C*F (fits VMEM easily here) and
    # MXU is not the binding unit of this kernel.
    wqkv_t = jnp.concatenate([(wq * scale).T, wk.T, wv.T], axis=0)     # (3C, C)
    wqkv_big = jnp.kron(wqkv_t, eye_f).astype(mxu_dtype)               # (3CF, CF)
    wo_big = jnp.kron(wo.T, eye_f).astype(mxu_dtype)                   # (CF, CF)

    ts = spatial_tile if spatial_tile is not None else _pick_spatial_tile(S, B)
    assert S % ts == 0  # TODO(synk): pad/mask ragged spatial tiles instead of asserting
    grid = (B, S // ts)

    kernel = functools.partial(_time_attn_kernel, F=F, C=C)
    y4 = pl.pallas_call(
        kernel,
        out_shape=jax.ShapeDtypeStruct((B, C, F, S), x.dtype),
        grid_spec=pltpu.PrefetchScalarGridSpec(
            num_scalar_prefetch=0,
            grid=grid,
            in_specs=[
                pl.BlockSpec((None, C, F, ts), lambda b, s: (b, 0, 0, s)),
                # constant block index -> the pipeline DMAs the weights once
                pl.BlockSpec((3 * C * F, C * F), lambda b, s: (0, 0)),
                pl.BlockSpec((C * F, C * F), lambda b, s: (0, 0)),
            ],
            out_specs=pl.BlockSpec((None, C, F, ts), lambda b, s: (b, 0, 0, s)),
        ),
        compiler_params=pltpu.CompilerParams(
            dimension_semantics=("parallel", "parallel"),
            # 1024-lane tiles use ~15 MiB of intermediates; raise v5e's 16 MiB
            # default scoped-VMEM budget while staying well under v7x's 64 MiB.
            vmem_limit_bytes=48 * 1024 * 1024,
        ),
    )(x4, wqkv_big, wo_big)

    return y4.reshape(x.shape)


# -----------------------------------------------------------------------------
# Reference: the module's rearrange/pack semantics with explicit transposes,
# using the same precision policy (bf16 MXU operands, f32 accum / softmax).
# -----------------------------------------------------------------------------
def _reference(x, wq, wk, wv, wo, *, mxu_dtype=jnp.bfloat16):
    B, C, F = x.shape[0], x.shape[1], x.shape[2]
    spatial = x.shape[3:]
    nd = x.ndim
    scale = 1.0 / math.sqrt(C)
    hi = jax.lax.Precision.HIGHEST

    perm = (0,) + tuple(range(3, nd)) + (2, 1)          # 'b c f ... -> b ... f c'
    xr = jnp.transpose(x, perm).reshape(-1, F, C)       # pack '* f c'
    cast = lambda a: a.astype(mxu_dtype)

    q = jnp.einsum('nfc,cd->nfd', cast(xr), cast(wq * scale),
                   preferred_element_type=jnp.float32)
    k = jnp.einsum('nfc,cd->nfd', cast(xr), cast(wk),
                   preferred_element_type=jnp.float32)
    v = jnp.einsum('nfc,cd->nfd', cast(xr), cast(wv),
                   preferred_element_type=jnp.float32)
    s = jnp.einsum('nfd,ngd->nfg', q, k, precision=hi,
                   preferred_element_type=jnp.float32)
    p = jax.nn.softmax(s, axis=-1)
    o = jnp.einsum('nfg,ngd->nfd', p, v, precision=hi,
                   preferred_element_type=jnp.float32)
    out = jnp.einsum('nfd,dc->nfc', cast(o), cast(wo),
                     preferred_element_type=jnp.float32)

    yr = out.reshape((B,) + spatial + (F, C))            # unpack
    inv = (0, nd - 1, nd - 2) + tuple(range(1, nd - 2))  # 'b ... f c -> b c f ...'
    return jnp.transpose(yr, inv).astype(x.dtype)


if __name__ == "__main__":
    key = jax.random.PRNGKey(0)
    kx, kq, kk, kv, ko = jax.random.split(key, 5)

    # conv-style video input implied by the forward: (b, c, f, h, w)
    B, C, F, H, W = 2, 32, 8, 16, 16
    x = jax.random.normal(kx, (B, C, F, H, W), dtype=jnp.float32)

    std = 1.0 / math.sqrt(C)
    wq = jax.random.normal(kq, (C, C), dtype=jnp.float32) * std
    wk = jax.random.normal(kk, (C, C), dtype=jnp.float32) * std
    wv = jax.random.normal(kv, (C, C), dtype=jnp.float32) * std
    wo = jax.random.normal(ko, (C, C), dtype=jnp.float32) * std

    fwd = jax.jit(rearrange_time_centric)
    out = jax.block_until_ready(fwd(x, wq, wk, wv, wo))
    ref = jax.block_until_ready(_reference(x, wq, wk, wv, wo))

    assert out.shape == x.shape
    # Tolerance covers pl.reciprocal(approx=True) and bf16-operand MXU
    # accumulation-order differences (the reference uses the same precision
    # policy; a full-f32 kernel path matches an f32 reference to ~1e-5).
    np.testing.assert_allclose(np.asarray(out), np.asarray(ref),
                               rtol=1e-2, atol=1e-2)
    print("KERNEL_OK")
</pallas_src>

<mosaic_0001>
module attributes {stable_mosaic.version = 11 : i64} {
  func.func @_time_attn_kernel(%arg0: i32, %arg1: i32, %arg2: memref<1x32x8x256xf32, #tpu.memory_space<vmem>>, %arg3: memref<768x256xbf16, #tpu.memory_space<vmem>>, %arg4: memref<256x256xbf16, #tpu.memory_space<vmem>>, %arg5: memref<1x32x8x256xf32, #tpu.memory_space<vmem>>) attributes {dimension_semantics = [#tpu.dimension_semantics<parallel>, #tpu.dimension_semantics<parallel>], iteration_bounds = array<i64: 2, 1>, scalar_prefetch = 0 : i64, scratch_operands = 0 : i64, tpu.core_type = #tpu.core_type<tc>, window_params = [{transform_indices = @transform_0, window_bounds = array<i64: 1, 32, 8, 256>}, {pipeline_mode = #tpu.pipeline_mode<synchronous>, transform_indices = @transform_1, window_bounds = array<i64: 768, 256>}, {pipeline_mode = #tpu.pipeline_mode<synchronous>, transform_indices = @transform_2, window_bounds = array<i64: 256, 256>}, {transform_indices = @transform_3, window_bounds = array<i64: 1, 32, 8, 256>}]} {
    %c0 = arith.constant 0 : index
    %c0_0 = arith.constant 0 : index
    %c0_1 = arith.constant 0 : index
    %c0_2 = arith.constant 0 : index
    %0 = vector.load %arg2[%c0, %c0_0, %c0_1, %c0_2] : memref<1x32x8x256xf32, #tpu.memory_space<vmem>>, vector<1x32x8x256xf32>
    %1 = vector.shape_cast %0 : vector<1x32x8x256xf32> to vector<32x8x256xf32>
    %2 = vector.shape_cast %1 : vector<32x8x256xf32> to vector<256x256xf32>
    %3 = arith.truncf %2 : vector<256x256xf32> to vector<256x256xbf16>
    %c0_3 = arith.constant 0 : index
    %c0_4 = arith.constant 0 : index
    %4 = vector.load %arg3[%c0_3, %c0_4] : memref<768x256xbf16, #tpu.memory_space<vmem>>, vector<768x256xbf16>
    %cst = arith.constant dense<0.000000e+00> : vector<768x256xf32>
    %5 = tpu.matmul %4, %3, %cst {dimension_numbers = #tpu.dot_dimension_numbers<[1], [0], [0], [1], [0, 0, 1, 1], [], []>} : vector<768x256xbf16>, vector<256x256xbf16>, vector<768x256xf32> -> vector<768x256xf32>
    %6 = vector.extract_strided_slice %5 {offsets = [0, 0], sizes = [256, 256], strides = [1, 1]} : vector<768x256xf32> to vector<256x256xf32>
    %7 = vector.shape_cast %6 : vector<256x256xf32> to vector<32x8x256xf32>
    %8 = vector.extract_strided_slice %5 {offsets = [256, 0], sizes = [256, 256], strides = [1, 1]} : vector<768x256xf32> to vector<256x256xf32>
    %9 = vector.shape_cast %8 : vector<256x256xf32> to vector<32x8x256xf32>
    %10 = vector.extract_strided_slice %5 {offsets = [512, 0], sizes = [256, 256], strides = [1, 1]} : vector<768x256xf32> to vector<256x256xf32>
    %11 = vector.shape_cast %10 : vector<256x256xf32> to vector<32x8x256xf32>
    %12 = arith.mulf %7, %9 : vector<32x8x256xf32>
    %cst_5 = arith.constant dense<0.000000e+00> : vector<8x256xf32>
    %13 = vector.multi_reduction <add>, %12, %cst_5 [0] : vector<32x8x256xf32> to vector<8x256xf32>
    %c1_i32 = arith.constant 1 : i32
    %14 = tpu.dynamic_rotate %9 by %c1_i32 dim 1 : vector<32x8x256xf32>, i32 -> vector<32x8x256xf32>
    %15 = arith.mulf %7, %14 : vector<32x8x256xf32>
    %cst_6 = arith.constant dense<0.000000e+00> : vector<8x256xf32>
    %16 = vector.multi_reduction <add>, %15, %cst_6 [0] : vector<32x8x256xf32> to vector<8x256xf32>
    %c2_i32 = arith.constant 2 : i32
    %17 = tpu.dynamic_rotate %9 by %c2_i32 dim 1 : vector<32x8x256xf32>, i32 -> vector<32x8x256xf32>
    %18 = arith.mulf %7, %17 : vector<32x8x256xf32>
    %cst_7 = arith.constant dense<0.000000e+00> : vector<8x256xf32>
    %19 = vector.multi_reduction <add>, %18, %cst_7 [0] : vector<32x8x256xf32> to vector<8x256xf32>
    %c3_i32 = arith.constant 3 : i32
    %20 = tpu.dynamic_rotate %9 by %c3_i32 dim 1 : vector<32x8x256xf32>, i32 -> vector<32x8x256xf32>
    %21 = arith.mulf %7, %20 : vector<32x8x256xf32>
    %cst_8 = arith.constant dense<0.000000e+00> : vector<8x256xf32>
    %22 = vector.multi_reduction <add>, %21, %cst_8 [0] : vector<32x8x256xf32> to vector<8x256xf32>
    %c4_i32 = arith.constant 4 : i32
    %23 = tpu.dynamic_rotate %9 by %c4_i32 dim 1 : vector<32x8x256xf32>, i32 -> vector<32x8x256xf32>
    %24 = arith.mulf %7, %23 : vector<32x8x256xf32>
    %cst_9 = arith.constant dense<0.000000e+00> : vector<8x256xf32>
    %25 = vector.multi_reduction <add>, %24, %cst_9 [0] : vector<32x8x256xf32> to vector<8x256xf32>
    %c5_i32 = arith.constant 5 : i32
    %26 = tpu.dynamic_rotate %9 by %c5_i32 dim 1 : vector<32x8x256xf32>, i32 -> vector<32x8x256xf32>
    %27 = arith.mulf %7, %26 : vector<32x8x256xf32>
    %cst_10 = arith.constant dense<0.000000e+00> : vector<8x256xf32>
    %28 = vector.multi_reduction <add>, %27, %cst_10 [0] : vector<32x8x256xf32> to vector<8x256xf32>
    %c6_i32 = arith.constant 6 : i32
    %29 = tpu.dynamic_rotate %9 by %c6_i32 dim 1 : vector<32x8x256xf32>, i32 -> vector<32x8x256xf32>
    %30 = arith.mulf %7, %29 : vector<32x8x256xf32>
    %cst_11 = arith.constant dense<0.000000e+00> : vector<8x256xf32>
    %31 = vector.multi_reduction <add>, %30, %cst_11 [0] : vector<32x8x256xf32> to vector<8x256xf32>
    %c7_i32 = arith.constant 7 : i32
    %32 = tpu.dynamic_rotate %9 by %c7_i32 dim 1 : vector<32x8x256xf32>, i32 -> vector<32x8x256xf32>
    %33 = arith.mulf %7, %32 : vector<32x8x256xf32>
    %cst_12 = arith.constant dense<0.000000e+00> : vector<8x256xf32>
    %34 = vector.multi_reduction <add>, %33, %cst_12 [0] : vector<32x8x256xf32> to vector<8x256xf32>
    %35 = arith.maximumf %13, %16 : vector<8x256xf32>
    %36 = arith.maximumf %35, %19 : vector<8x256xf32>
    %37 = arith.maximumf %36, %22 : vector<8x256xf32>
    %38 = arith.maximumf %37, %25 : vector<8x256xf32>
    %39 = arith.maximumf %38, %28 : vector<8x256xf32>
    %40 = arith.maximumf %39, %31 : vector<8x256xf32>
    %41 = arith.maximumf %40, %34 : vector<8x256xf32>
    %42 = arith.subf %13, %41 : vector<8x256xf32>
    %43 = math.exp %42 : vector<8x256xf32>
    %44 = arith.subf %16, %41 : vector<8x256xf32>
    %45 = math.exp %44 : vector<8x256xf32>
    %46 = arith.subf %19, %41 : vector<8x256xf32>
    %47 = math.exp %46 : vector<8x256xf32>
    %48 = arith.subf %22, %41 : vector<8x256xf32>
    %49 = math.exp %48 : vector<8x256xf32>
    %50 = arith.subf %25, %41 : vector<8x256xf32>
    %51 = math.exp %50 : vector<8x256xf32>
    %52 = arith.subf %28, %41 : vector<8x256xf32>
    %53 = math.exp %52 : vector<8x256xf32>
    %54 = arith.subf %31, %41 : vector<8x256xf32>
    %55 = math.exp %54 : vector<8x256xf32>
    %56 = arith.subf %34, %41 : vector<8x256xf32>
    %57 = math.exp %56 : vector<8x256xf32>
    %58 = arith.addf %43, %45 : vector<8x256xf32>
    %59 = arith.addf %58, %47 : vector<8x256xf32>
    %60 = arith.addf %59, %49 : vector<8x256xf32>
    %61 = arith.addf %60, %51 : vector<8x256xf32>
    %62 = arith.addf %61, %53 : vector<8x256xf32>
    %63 = arith.addf %62, %55 : vector<8x256xf32>
    %64 = arith.addf %63, %57 : vector<8x256xf32>
    %65 = tpu.reciprocal %64 {approx = true} : vector<8x256xf32> -> vector<8x256xf32>
    %66 = arith.mulf %43, %65 : vector<8x256xf32>
    %67 = vector.shape_cast %66 : vector<8x256xf32> to vector<1x8x256xf32>
    %68 = vector.broadcast %67 : vector<1x8x256xf32> to vector<32x8x256xf32>
    %69 = arith.mulf %68, %11 : vector<32x8x256xf32>
    %c1_i32_13 = arith.constant 1 : i32
    %70 = tpu.dynamic_rotate %11 by %c1_i32_13 dim 1 : vector<32x8x256xf32>, i32 -> vector<32x8x256xf32>
    %71 = arith.mulf %45, %65 : vector<8x256xf32>
    %72 = vector.shape_cast %71 : vector<8x256xf32> to vector<1x8x256xf32>
    %73 = vector.broadcast %72 : vector<1x8x256xf32> to vector<32x8x256xf32>
    %74 = arith.mulf %73, %70 : vector<32x8x256xf32>
    %75 = arith.addf %69, %74 : vector<32x8x256xf32>
    %c2_i32_14 = arith.constant 2 : i32
    %76 = tpu.dynamic_rotate %11 by %c2_i32_14 dim 1 : vector<32x8x256xf32>, i32 -> vector<32x8x256xf32>
    %77 = arith.mulf %47, %65 : vector<8x256xf32>
    %78 = vector.shape_cast %77 : vector<8x256xf32> to vector<1x8x256xf32>
    %79 = vector.broadcast %78 : vector<1x8x256xf32> to vector<32x8x256xf32>
    %80 = arith.mulf %79, %76 : vector<32x8x256xf32>
    %81 = arith.addf %75, %80 : vector<32x8x256xf32>
    %c3_i32_15 = arith.constant 3 : i32
    %82 = tpu.dynamic_rotate %11 by %c3_i32_15 dim 1 : vector<32x8x256xf32>, i32 -> vector<32x8x256xf32>
    %83 = arith.mulf %49, %65 : vector<8x256xf32>
    %84 = vector.shape_cast %83 : vector<8x256xf32> to vector<1x8x256xf32>
    %85 = vector.broadcast %84 : vector<1x8x256xf32> to vector<32x8x256xf32>
    %86 = arith.mulf %85, %82 : vector<32x8x256xf32>
    %87 = arith.addf %81, %86 : vector<32x8x256xf32>
    %c4_i32_16 = arith.constant 4 : i32
    %88 = tpu.dynamic_rotate %11 by %c4_i32_16 dim 1 : vector<32x8x256xf32>, i32 -> vector<32x8x256xf32>
    %89 = arith.mulf %51, %65 : vector<8x256xf32>
    %90 = vector.shape_cast %89 : vector<8x256xf32> to vector<1x8x256xf32>
    %91 = vector.broadcast %90 : vector<1x8x256xf32> to vector<32x8x256xf32>
    %92 = arith.mulf %91, %88 : vector<32x8x256xf32>
    %93 = arith.addf %87, %92 : vector<32x8x256xf32>
    %c5_i32_17 = arith.constant 5 : i32
    %94 = tpu.dynamic_rotate %11 by %c5_i32_17 dim 1 : vector<32x8x256xf32>, i32 -> vector<32x8x256xf32>
    %95 = arith.mulf %53, %65 : vector<8x256xf32>
    %96 = vector.shape_cast %95 : vector<8x256xf32> to vector<1x8x256xf32>
    %97 = vector.broadcast %96 : vector<1x8x256xf32> to vector<32x8x256xf32>
    %98 = arith.mulf %97, %94 : vector<32x8x256xf32>
    %99 = arith.addf %93, %98 : vector<32x8x256xf32>
    %c6_i32_18 = arith.constant 6 : i32
    %100 = tpu.dynamic_rotate %11 by %c6_i32_18 dim 1 : vector<32x8x256xf32>, i32 -> vector<32x8x256xf32>
    %101 = arith.mulf %55, %65 : vector<8x256xf32>
    %102 = vector.shape_cast %101 : vector<8x256xf32> to vector<1x8x256xf32>
    %103 = vector.broadcast %102 : vector<1x8x256xf32> to vector<32x8x256xf32>
    %104 = arith.mulf %103, %100 : vector<32x8x256xf32>
    %105 = arith.addf %99, %104 : vector<32x8x256xf32>
    %c7_i32_19 = arith.constant 7 : i32
    %106 = tpu.dynamic_rotate %11 by %c7_i32_19 dim 1 : vector<32x8x256xf32>, i32 -> vector<32x8x256xf32>
    %107 = arith.mulf %57, %65 : vector<8x256xf32>
    %108 = vector.shape_cast %107 : vector<8x256xf32> to vector<1x8x256xf32>
    %109 = vector.broadcast %108 : vector<1x8x256xf32> to vector<32x8x256xf32>
    %110 = arith.mulf %109, %106 : vector<32x8x256xf32>
    %111 = arith.addf %105, %110 : vector<32x8x256xf32>
    %c0_20 = arith.constant 0 : index
    %c0_21 = arith.constant 0 : index
    %112 = vector.load %arg4[%c0_20, %c0_21] : memref<256x256xbf16, #tpu.memory_space<vmem>>, vector<256x256xbf16>
    %113 = vector.shape_cast %111 : vector<32x8x256xf32> to vector<256x256xf32>
    %114 = arith.truncf %113 : vector<256x256xf32> to vector<256x256xbf16>
    %cst_22 = arith.constant dense<0.000000e+00> : vector<256x256xf32>
    %115 = tpu.matmul %112, %114, %cst_22 {dimension_numbers = #tpu.dot_dimension_numbers<[1], [0], [0], [1], [0, 0, 1, 1], [], []>} : vector<256x256xbf16>, vector<256x256xbf16>, vector<256x256xf32> -> vector<256x256xf32>
    %116 = vector.shape_cast %115 : vector<256x256xf32> to vector<32x8x256xf32>
    %c0_23 = arith.constant 0 : index
    %c0_24 = arith.constant 0 : index
    %c0_25 = arith.constant 0 : index
    %c0_26 = arith.constant 0 : index
    %117 = vector.load %arg5[%c0_23, %c0_24, %c0_25, %c0_26] : memref<1x32x8x256xf32, #tpu.memory_space<vmem>>, vector<1x32x8x256xf32>
    %118 = vector.shape_cast %117 : vector<1x32x8x256xf32> to vector<32x8x256xf32>
    %119 = vector.shape_cast %116 : vector<32x8x256xf32> to vector<1x32x8x256xf32>
    tpu.vector_store %arg5[%c0_23, %c0_24, %c0_25, %c0_26], %119 {strides = array<i32>} : memref<1x32x8x256xf32, #tpu.memory_space<vmem>>, vector<1x32x8x256xf32>,
    return
  }
  func.func @transform_0(%arg0: i32, %arg1: i32) -> (i32, i32, i32, i32) {
    %c0_i32 = arith.constant 0 : i32
    %c0_i32_0 = arith.constant 0 : i32
    %c0_i32_1 = arith.constant 0 : i32
    return %arg0, %c0_i32, %c0_i32_0, %arg1 : i32, i32, i32, i32
  }
  func.func @transform_1(%arg0: i32, %arg1: i32) -> (i32, i32) {
    %c0_i32 = arith.constant 0 : i32
    %c0_i32_0 = arith.constant 0 : i32
    %c0_i32_1 = arith.constant 0 : i32
    return %c0_i32, %c0_i32_0 : i32, i32
  }
  func.func @transform_2(%arg0: i32, %arg1: i32) -> (i32, i32) {
    %c0_i32 = arith.constant 0 : i32
    %c0_i32_0 = arith.constant 0 : i32
    %c0_i32_1 = arith.constant 0 : i32
    return %c0_i32, %c0_i32_0 : i32, i32
  }
  func.func @transform_3(%arg0: i32, %arg1: i32) -> (i32, i32, i32, i32) {
    %c0_i32 = arith.constant 0 : i32
    %c0_i32_0 = arith.constant 0 : i32
    %c0_i32_1 = arith.constant 0 : i32
    return %arg0, %c0_i32, %c0_i32_0, %arg1 : i32, i32, i32, i32
  }
}

</mosaic_0001>

<bundles_post_ra>
// kernel: rearrange_time_centric.1
= control target key start
LH: loop header
LB: loop body
LE: loop exit
PB: predicated region body
PF: predicated region fallthrough
CT: control target
= control target key end

     0   :  { %s6324_s12 = smov 0   ;;  %s6326_s13 = smov 0   ;;  %s10092_s0 = inlined_call_operand.vmem [shape: f32[2,32,8,256], index: 0, kind: input, shape index: {}]   ;;  %s10093_s1 = inlined_call_operand.vmem [shape: bf16[768,256], index: 1, kind: input, shape index: {}]   ;;  %s10094_s2 = inlined_call_operand.vmem [shape: bf16[256,256], index: 2, kind: input, shape index: {}]   ;;  %s10095_s3 = inlined_call_operand.vmem [shape: f32[2,32,8,256], index: 3, kind: output, shape index: {}]  }
   0x1   :  { %s6328_s14 = smov 0  }
   0x2 LB: > { %s25_s15 = sadd.s32 1, %s6298_s13  ;;  %p5571_p0 = scmp.ge.s32.totalorder %s6302_s14, 1  ;;  %s6302_s14 = sphi %s6328_s14, %s13_s14   ;;  %s6298_s13 = sphi %s6326_s13, %s10356_s13   ;;  %s6294_s12 = sphi %s6324_s12, %s10355_s12  }
   0x3   : > { %p27_p1 = scmp.ge.s32.totalorder %s25_s15, 2  ;;  %p158_p2 = scmp.lt.s32.totalorder %s6302_s14, 3 }
   0x5   : > { %s10358_s15 = smov (%p27_p1, %s25_s15), 0  ;;  %p159_p3 = pnand %p5571_p0, %p158_p2 }
   0x7   : > { %162 = sbr.rel (%p159_p3) target bundleno = 1668 (0x684), region = 32 }
   0xc   : > { %p191_p4 = scmp.lt.s32.totalorder %s6294_s12, 1 }
   0xe   : > { %s10360_s12 = smov (!%p191_p4, %s6294_s12), 1 }
   0xf   : > { %s6090_s16 = sshll.u32 %s10360_s12, 9 }
  0x10   : > { %s6350_s19 = scalar_lea.vmem %s10092_s0, %s6090_s16  ;;  %s9933_s11 = scalar_lea.vmem %s10095_s3, %s6090_s16 }
  0x11   : > { %v238_v0 = vld [vmem:[%s6350_s19 + $0xe0] sm:$0xff]  ;;  %v240_v1 = vld [vmem:[%s6350_s19 + $0xf0] sm:$0xff]  ;;  %v239_v5 = vld [vmem:[%s6350_s19 + $0xe8] sm:$0xff] }
  0x12   : > { %v270_v2 = vld [vmem:[%s6350_s19 + $0x1e0] sm:$0xff]  ;;  %v288_v3 = vpack.c.bf16 %v240_v1, %v238_v0  ;;  %v272_v4 = vld [vmem:[%s6350_s19 + $0x1f0] sm:$0xff]  ;;  %v241_v6 = vld [vmem:[%s6350_s19 + $0xf8] sm:$0xff] }
  0x13   : > { %v304_v7 = vpack.c.bf16 %v272_v4, %v270_v2  ;;  %v289_v8 = vpack.c.bf16 %v241_v6, %v239_v5  ;;  %v271_v9 = vld [vmem:[%s6350_s19 + $0x1e8] sm:$0xff]  ;;  %v273_v10 = vld [vmem:[%s6350_s19 + $0x1f8] sm:$0xff]  ;;  %v234_v11 = vld [vmem:[%s6350_s19 + $0xc0] sm:$0xff] }
  0x14   : > { %882 = vmatpush.bf16.msra.mxu0 %v288_v3  ;;  %v305_v12 = vpack.c.bf16 %v273_v10, %v271_v9  ;;  %v236_v13 = vld [vmem:[%s6350_s19 + $0xd0] sm:$0xff]  ;;  %v266_v14 = vld [vmem:[%s6350_s19 + $0x1c0] sm:$0xff]  ;;  %v235_v18 = vld [vmem:[%s6350_s19 + $0xc8] sm:$0xff] }
  0x15   : > { %v268_v15 = vld [vmem:[%s6350_s19 + $0x1d0] sm:$0xff]  ;;  %1131 = vmatpush.bf16.msra.mxu1 %v304_v7  ;;  %1380 = vmatpush.bf16.msra.mxu2 %v289_v8  ;;  %v286_v16 = vpack.c.bf16 %v236_v13, %v234_v11  ;;  %v237_v19 = vld [vmem:[%s6350_s19 + $0xd8] sm:$0xff]  ;;  %v267_v20 = vld [vmem:[%s6350_s19 + $0x1c8] sm:$0xff] }
  0x16   : > { %v302_v17 = vpack.c.bf16 %v268_v15, %v266_v14  ;;  %1629 = vmatpush.bf16.msra.mxu3 %v305_v12  ;;  %v287_v21 = vpack.c.bf16 %v237_v19, %v235_v18  ;;  %v269_v22 = vld [vmem:[%s6350_s19 + $0x1d8] sm:$0xff]  ;;  %v230_v23 = vld [vmem:[%s6350_s19 + $0xa0] sm:$0xff]  ;;  %v232_v24 = vld [vmem:[%s6350_s19 + $0xb0] sm:$0xff] }
  0x17   : > { %v303_v25 = vpack.c.bf16 %v269_v22, %v267_v20  ;;  %v262_v26 = vld [vmem:[%s6350_s19 + $0x1a0] sm:$0xff]  ;;  %v264_v27 = vld [vmem:[%s6350_s19 + $0x1b0] sm:$0xff]  ;;  %v231_v28 = vld [vmem:[%s6350_s19 + $0xa8] sm:$0xff]  ;;  %v284_v29 = vpack.c.bf16 %v232_v24, %v230_v23 }
  0x18   : > { %883 = vmatpush.bf16.msra.mxu0 %v286_v16  ;;  %v233_v30 = vld [vmem:[%s6350_s19 + $0xb8] sm:$0xff]  ;;  %v263_v31 = vld [vmem:[%s6350_s19 + $0x1a8] sm:$0xff]  ;;  %v300_v33 = vpack.c.bf16 %v264_v27, %v262_v26  ;;  %v226_v35 = vld [vmem:[%s6350_s19 + $0x80] sm:$0xff] }
  0x19   : > { %v265_v32 = vld [vmem:[%s6350_s19 + $0x1b8] sm:$0xff]  ;;  %1132 = vmatpush.bf16.msra.mxu1 %v302_v17  ;;  %1381 = vmatpush.bf16.msra.mxu2 %v287_v21  ;;  %v285_v34 = vpack.c.bf16 %v233_v30, %v231_v28  ;;  %v228_v36 = vld [vmem:[%s6350_s19 + $0x90] sm:$0xff]  ;;  %v258_v37 = vld [vmem:[%s6350_s19 + $0x180] sm:$0xff] }
  0x1a   : > { %1630 = vmatpush.bf16.msra.mxu3 %v303_v25  ;;  %v301_v38 = vpack.c.bf16 %v265_v32, %v263_v31  ;;  %v260_v39 = vld [vmem:[%s6350_s19 + $0x190] sm:$0xff]  ;;  %v227_v40 = vld [vmem:[%s6350_s19 + $0x88] sm:$0xff]  ;;  %v229_v41 = vld [vmem:[%s6350_s19 + $0x98] sm:$0xff]  ;;  %v282_v44 = vpack.c.bf16 %v228_v36, %v226_v35 }
  0x1b   : > { %v259_v42 = vld [vmem:[%s6350_s19 + $0x188] sm:$0xff]  ;;  %v261_v43 = vld [vmem:[%s6350_s19 + $0x198] sm:$0xff]  ;;  %v298_v45 = vpack.c.bf16 %v260_v39, %v258_v37  ;;  %v283_v46 = vpack.c.bf16 %v229_v41, %v227_v40  ;;  %v222_v47 = vld [vmem:[%s6350_s19 + $0x60] sm:$0xff] }
  0x1c   : > { %884 = vmatpush.bf16.msra.mxu0 %v284_v29  ;;  %v224_v48 = vld [vmem:[%s6350_s19 + $0x70] sm:$0xff]  ;;  %v254_v49 = vld [vmem:[%s6350_s19 + $0x160] sm:$0xff]  ;;  %v299_v50 = vpack.c.bf16 %v261_v43, %v259_v42  ;;  %v223_v52 = vld [vmem:[%s6350_s19 + $0x68] sm:$0xff] }
  0x1d   : > { %1133 = vmatpush.bf16.msra.mxu1 %v300_v33  ;;  %1382 = vmatpush.bf16.msra.mxu2 %v285_v34  ;;  %v256_v51 = vld [vmem:[%s6350_s19 + $0x170] sm:$0xff]  ;;  %v225_v53 = vld [vmem:[%s6350_s19 + $0x78] sm:$0xff]  ;;  %v255_v54 = vld [vmem:[%s6350_s19 + $0x168] sm:$0xff]  ;;  %v280_v56 = vpack.c.bf16 %v224_v48, %v222_v47 }
  0x1e   : > { %1631 = vmatpush.bf16.msra.mxu3 %v301_v38  ;;  %v257_v55 = vld [vmem:[%s6350_s19 + $0x178] sm:$0xff]  ;;  %v296_v57 = vpack.c.bf16 %v256_v51, %v254_v49  ;;  %v281_v58 = vpack.c.bf16 %v225_v53, %v223_v52  ;;  %v218_v59 = vld [vmem:[%s6350_s19 + $0x40] sm:$0xff]  ;;  %v220_v60 = vld [vmem:[%s6350_s19 + $0x50] sm:$0xff] }
  0x1f   : > { %v250_v61 = vld [vmem:[%s6350_s19 + $0x140] sm:$0xff]  ;;  %v297_v62 = vpack.c.bf16 %v257_v55, %v255_v54  ;;  %v252_v63 = vld [vmem:[%s6350_s19 + $0x150] sm:$0xff]  ;;  %v219_v0 = vld [vmem:[%s6350_s19 + $0x48] sm:$0xff]  ;;  %v278_v4 = vpack.c.bf16 %v220_v60, %v218_v59 }
  0x20   : > { %885 = vmatpush.bf16.msra.mxu0 %v282_v44  ;;  %v221_v1 = vld [vmem:[%s6350_s19 + $0x58] sm:$0xff]  ;;  %v251_v2 = vld [vmem:[%s6350_s19 + $0x148] sm:$0xff]  ;;  %v294_v5 = vpack.c.bf16 %v252_v63, %v250_v61  ;;  %v214_v7 = vld [vmem:[%s6350_s19 + $0x20] sm:$0xff] }
  0x21   : > { %1134 = vmatpush.bf16.msra.mxu1 %v298_v45  ;;  %1383 = vmatpush.bf16.msra.mxu2 %v283_v46  ;;  %v253_v3 = vld [vmem:[%s6350_s19 + $0x158] sm:$0xff]  ;;  %v279_v6 = vpack.c.bf16 %v221_v1, %v219_v0  ;;  %v216_v8 = vld [vmem:[%s6350_s19 + $0x30] sm:$0xff]  ;;  %v246_v9 = vld [vmem:[%s6350_s19 + $0x120] sm:$0xff] }
  0x22   : > { %1632 = vmatpush.bf16.msra.mxu3 %v299_v50  ;;  %v295_v10 = vpack.c.bf16 %v253_v3, %v251_v2  ;;  %v248_v11 = vld [vmem:[%s6350_s19 + $0x130] sm:$0xff]  ;;  %v215_v12 = vld [vmem:[%s6350_s19 + $0x28] sm:$0xff]  ;;  %v217_v13 = vld [vmem:[%s6350_s19 + $0x38] sm:$0xff]  ;;  %v276_v16 = vpack.c.bf16 %v216_v8, %v214_v7 }
  0x23   : > { %v247_v14 = vld [vmem:[%s6350_s19 + $0x128] sm:$0xff]  ;;  %v249_v15 = vld [vmem:[%s6350_s19 + $0x138] sm:$0xff]  ;;  %v292_v17 = vpack.c.bf16 %v248_v11, %v246_v9  ;;  %v277_v18 = vpack.c.bf16 %v217_v13, %v215_v12  ;;  %v210_v19 = vld [vmem:[%s6350_s19] sm:$0xff] }
  0x24   : > { %886 = vmatpush.bf16.msra.mxu0 %v280_v56  ;;  %v212_v20 = vld [vmem:[%s6350_s19 + $0x10] sm:$0xff]  ;;  %v242_v21 = vld [vmem:[%s6350_s19 + $0x100] sm:$0xff]  ;;  %v293_v22 = vpack.c.bf16 %v249_v15, %v247_v14  ;;  %v211_v24 = vld [vmem:[%s6350_s19 + $0x8] sm:$0xff] }
  0x25   : > { %1135 = vmatpush.bf16.msra.mxu1 %v296_v57  ;;  %1384 = vmatpush.bf16.msra.mxu2 %v281_v58  ;;  %v244_v23 = vld [vmem:[%s6350_s19 + $0x110] sm:$0xff]  ;;  %v213_v25 = vld [vmem:[%s6350_s19 + $0x18] sm:$0xff]  ;;  %v243_v26 = vld [vmem:[%s6350_s19 + $0x108] sm:$0xff]  ;;  %v274_v28 = vpack.c.bf16 %v212_v20, %v210_v19 }
  0x26   : > { %1633 = vmatpush.bf16.msra.mxu3 %v297_v62  ;;  %v245_v27 = vld [vmem:[%s6350_s19 + $0x118] sm:$0xff]  ;;  %v5578_v29 = vld [vmem:[%s10093_s1] sm:$0xf]  ;;  %v6093_v30 = vld [vmem:[%s10093_s1 + $0x4] sm:$0xf0]  ;;  %v290_v31 = vpack.c.bf16 %v244_v23, %v242_v21  ;;  %v275_v32 = vpack.c.bf16 %v213_v25, %v211_v24 }
  0x27   : > { %v6092_v33 = vld [vmem:[%s10093_s1 + $0x4] sm:$0xf]  ;;  %v5580_v34 = vld [vmem:[%s10093_s1 + $0x8] sm:$0xf0]  ;;  %v291_v35 = vpack.c.bf16 %v245_v27, %v243_v26  ;;  %v5579_v36 = vor.u32 %v6093_v30, %v5578_v29  ;;  %v5586_v38 = vld [vmem:[%s10093_s1 + $0x10] sm:$0xf] }
  0x28   : > { %887 = vmatpush.bf16.msra.mxu0 %v278_v4  ;;  %v5583_v37 = vor.u32 %v6092_v33, %v5580_v34  ;;  %v6095_v39 = vld [vmem:[%s10093_s1 + $0x14] sm:$0xf0]  ;;  %v6094_v40 = vld [vmem:[%s10093_s1 + $0x14] sm:$0xf]  ;;  %v5588_v41 = vld [vmem:[%s10093_s1 + $0x18] sm:$0xf0] }
  0x29   : > { %1136 = vmatpush.bf16.msra.mxu1 %v294_v5  ;;  %1385 = vmatpush.bf16.msra.mxu2 %v279_v6  ;;  %v5587_v42 = vor.u32 %v6095_v39, %v5586_v38  ;;  %v5591_v43 = vor.u32 %v6094_v40, %v5588_v41  ;;  %v5594_v44 = vld [vmem:[%s10093_s1 + $0x20] sm:$0xf]  ;;  %v6097_v45 = vld [vmem:[%s10093_s1 + $0x24] sm:$0xf0]  ;;  %v6096_v46 = vld [vmem:[%s10093_s1 + $0x24] sm:$0xf] }
  0x2a   : > { %1634 = vmatpush.bf16.msra.mxu3 %v295_v10  ;;  %v5596_v47 = vld [vmem:[%s10093_s1 + $0x28] sm:$0xf0]  ;;  %v5595_v48 = vor.u32 %v6097_v45, %v5594_v44  ;;  %v5602_v50 = vld [vmem:[%s10093_s1 + $0x30] sm:$0xf]  ;;  %v6099_v51 = vld [vmem:[%s10093_s1 + $0x34] sm:$0xf0] }
  0x2b   : > { %v5599_v49 = vor.u32 %v6096_v46, %v5596_v47  ;;  %v6098_v52 = vld [vmem:[%s10093_s1 + $0x34] sm:$0xf]  ;;  %v5604_v53 = vld [vmem:[%s10093_s1 + $0x38] sm:$0xf0]  ;;  %v5603_v54 = vor.u32 %v6099_v51, %v5602_v50  ;;  %v5610_v56 = vld [vmem:[%s10093_s1 + $0x40] sm:$0xf] }
  0x2c   : > { %888 = vmatpush.bf16.msra.mxu0 %v276_v16  ;;  %v5607_v55 = vor.u32 %v6098_v52, %v5604_v53  ;;  %v6101_v57 = vld [vmem:[%s10093_s1 + $0x44] sm:$0xf0]  ;;  %v6100_v58 = vld [vmem:[%s10093_s1 + $0x44] sm:$0xf]  ;;  %v5612_v59 = vld [vmem:[%s10093_s1 + $0x48] sm:$0xf0] }
  0x2d   : > { %1137 = vmatpush.bf16.msra.mxu1 %v292_v17  ;;  %1386 = vmatpush.bf16.msra.mxu2 %v277_v18  ;;  %v5611_v60 = vor.u32 %v6101_v57, %v5610_v56  ;;  %v5615_v61 = vor.u32 %v6100_v58, %v5612_v59  ;;  %v5618_v62 = vld [vmem:[%s10093_s1 + $0x50] sm:$0xf]  ;;  %v6103_v63 = vld [vmem:[%s10093_s1 + $0x54] sm:$0xf0]  ;;  %v6102_v0 = vld [vmem:[%s10093_s1 + $0x54] sm:$0xf] }
  0x2e   : > { %1635 = vmatpush.bf16.msra.mxu3 %v293_v22  ;;  %v5620_v1 = vld [vmem:[%s10093_s1 + $0x58] sm:$0xf0]  ;;  %v5619_v2 = vor.u32 %v6103_v63, %v5618_v62  ;;  %v5626_v4 = vld [vmem:[%s10093_s1 + $0x60] sm:$0xf]  ;;  %v6105_v5 = vld [vmem:[%s10093_s1 + $0x64] sm:$0xf0] }
  0x2f   : > { %v5623_v3 = vor.u32 %v6102_v0, %v5620_v1  ;;  %v6104_v6 = vld [vmem:[%s10093_s1 + $0x64] sm:$0xf]  ;;  %v5628_v7 = vld [vmem:[%s10093_s1 + $0x68] sm:$0xf0]  ;;  %v5627_v8 = vor.u32 %v6105_v5, %v5626_v4  ;;  %v5634_v10 = vld [vmem:[%s10093_s1 + $0x70] sm:$0xf] }
  0x30   : > { %889 = vmatpush.bf16.msra.mxu0 %v274_v28  ;;  %v5631_v9 = vor.u32 %v6104_v6, %v5628_v7  ;;  %v6107_v11 = vld [vmem:[%s10093_s1 + $0x74] sm:$0xf0]  ;;  %v6106_v12 = vld [vmem:[%s10093_s1 + $0x74] sm:$0xf]  ;;  %v5636_v13 = vld [vmem:[%s10093_s1 + $0x78] sm:$0xf0] }
  0x31   : > { %1138 = vmatpush.bf16.msra.mxu1 %v290_v31  ;;  %1387 = vmatpush.bf16.msra.mxu2 %v275_v32  ;;  %v5635_v14 = vor.u32 %v6107_v11, %v5634_v10  ;;  %v5639_v15 = vor.u32 %v6106_v12, %v5636_v13  ;;  %v5642_v16 = vld [vmem:[%s10093_s1 + $0x80] sm:$0xf]  ;;  %v6109_v17 = vld [vmem:[%s10093_s1 + $0x84] sm:$0xf0]  ;;  %v6108_v18 = vld [vmem:[%s10093_s1 + $0x84] sm:$0xf] }
  0x32   : > { %1636 = vmatpush.bf16.msra.mxu3 %v291_v35  ;;  %v5644_v19 = vld [vmem:[%s10093_s1 + $0x88] sm:$0xf0]  ;;  %v5643_v20 = vor.u32 %v6109_v17, %v5642_v16  ;;  %v5650_v31 = vld [vmem:[%s10093_s1 + $0x90] sm:$0xf]  ;;  %v6111_v32 = vld [vmem:[%s10093_s1 + $0x94] sm:$0xf0] }
  0x33   : > { %890 = vmatmul.bf16.vlgmr.msra.gmra.mxu0 %v5579_v36  ;;  %v5647_v22 = vor.u32 %v6108_v18, %v5644_v19  ;;  %v6110_v33 = vld [vmem:[%s10093_s1 + $0x94] sm:$0xf]  ;;  %v5652_v34 = vld [vmem:[%s10093_s1 + $0x98] sm:$0xf0]  ;;  %v6113_v50 = vld [vmem:[%s10093_s1 + $0xa4] sm:$0xf0] }
  0x34   : > { %1139 = vmatmul.bf16.vlgmr.msra.gmra.mxu1 %v5583_v37  ;;  %1388 = vmatmul.bf16.vlgmr.msra.gmra.mxu2 %v5579_v36  ;;  %v5651_v36 = vor.u32 %v6111_v32, %v5650_v31  ;;  %v5655_v39 = vor.u32 %v6110_v33, %v5652_v34  ;;  %v6112_v51 = vld [vmem:[%s10093_s1 + $0xa4] sm:$0xf]  ;;  %v5660_v52 = vld [vmem:[%s10093_s1 + $0xa8] sm:$0xf0]  ;;  %v6115_v4 = vld [vmem:[%s10093_s1 + $0xb4] sm:$0xf0] }
  0x35   : > { %1637 = vmatmul.bf16.vlgmr.msra.gmra.mxu3 %v5583_v37  ;;  %v5663_v57 = vor.u32 %v6112_v51, %v5660_v52  ;;  %v6114_v5 = vld [vmem:[%s10093_s1 + $0xb4] sm:$0xf]  ;;  %v5668_v6 = vld [vmem:[%s10093_s1 + $0xb8] sm:$0xf0] }
  0x36   : > { %v5671_v11 = vor.u32 %v6114_v5, %v5668_v6  ;;  %v6121_v5 = vld [vmem:[%s10093_s1 + $0xe4] sm:$0xf0]  ;;  %v6120_v6 = vld [vmem:[%s10093_s1 + $0xe4] sm:$0xf] }
  0x43   : > { %895 = vmatmul.bf16.gmra.mxu0 %v5587_v42 }
  0x44   : > { %1144 = vmatmul.bf16.gmra.mxu1 %v5591_v43  ;;  %1393 = vmatmul.bf16.gmra.mxu2 %v5587_v42 }
  0x45   : > { %1642 = vmatmul.bf16.gmra.mxu3 %v5591_v43 }
  0x53   : > { %900 = vmatmul.bf16.gmra.mxu0 %v5595_v48 }
  0x54   : > { %1149 = vmatmul.bf16.gmra.mxu1 %v5599_v49  ;;  %1398 = vmatmul.bf16.gmra.mxu2 %v5595_v48 }
  0x55   : > { %1647 = vmatmul.bf16.gmra.mxu3 %v5599_v49  ;;  %v5658_v49 = vld [vmem:[%s10093_s1 + $0xa0] sm:$0xf] }
  0x63   : > { %905 = vmatmul.bf16.gmra.mxu0 %v5603_v54 }
  0x64   : > { %1154 = vmatmul.bf16.gmra.mxu1 %v5607_v55  ;;  %1403 = vmatmul.bf16.gmra.mxu2 %v5603_v54  ;;  %v5659_v54 = vor.u32 %v6113_v50, %v5658_v49  ;;  %v5684_v49 = vld [vmem:[%s10093_s1 + $0xd8] sm:$0xf0] }
  0x65   : > { %1652 = vmatmul.bf16.gmra.mxu3 %v5607_v55 }
  0x73   : > { %910 = vmatmul.bf16.gmra.mxu0 %v5611_v60 }
  0x74   : > { %1159 = vmatmul.bf16.gmra.mxu1 %v5615_v61  ;;  %1408 = vmatmul.bf16.gmra.mxu2 %v5611_v60 }
  0x75   : > { %1657 = vmatmul.bf16.gmra.mxu3 %v5615_v61 }
  0x83   : > { %915 = vmatmul.bf16.gmra.mxu0 %v5619_v2 }
  0x84   : > { %1164 = vmatmul.bf16.gmra.mxu1 %v5623_v3  ;;  %1413 = vmatmul.bf16.gmra.mxu2 %v5619_v2 }
  0x85   : > { %1662 = vmatmul.bf16.gmra.mxu3 %v5623_v3  ;;  %v5666_v3 = vld [vmem:[%s10093_s1 + $0xb0] sm:$0xf] }
  0x93   : > { %920 = vmatmul.bf16.gmra.mxu0 %v5627_v8 }
  0x94   : > { %1169 = vmatmul.bf16.gmra.mxu1 %v5631_v9  ;;  %1418 = vmatmul.bf16.gmra.mxu2 %v5627_v8  ;;  %v5667_v8 = vor.u32 %v6115_v4, %v5666_v3  ;;  %v5690_v4 = vld [vmem:[%s10093_s1 + $0xe0] sm:$0xf] }
  0x95   : > { %1667 = vmatmul.bf16.gmra.mxu3 %v5631_v9 }
  0xa3   : > { %925 = vmatmul.bf16.gmra.mxu0 %v5635_v14 }
  0xa4   : > { %1174 = vmatmul.bf16.gmra.mxu1 %v5639_v15  ;;  %1423 = vmatmul.bf16.gmra.mxu2 %v5635_v14 }
  0xa5   : > { %1672 = vmatmul.bf16.gmra.mxu3 %v5639_v15 }
  0xb0   : > { %v891_v21 = vpop.f32.mrf.mxu0 }
  0xb1   : > { %v1140_v23 = vpop.f32.mrf.mxu1 }
  0xb2   : > { %v6524_v24 = vadd.f32 %v1140_v23, %v891_v21  ;;  %v5674_v21 = vld [vmem:[%s10093_s1 + $0xc0] sm:$0xf]  ;;  %v6116_v23 = vld [vmem:[%s10093_s1 + $0xc4] sm:$0xf] }
  0xb3   : > { %930 = vmatmul.bf16.gmra.mxu0 %v5643_v20 }
  0xb4   : > { %1179 = vmatmul.bf16.gmra.mxu1 %v5647_v22  ;;  %1428 = vmatmul.bf16.gmra.mxu2 %v5643_v20 }
  0xb5   : > { %1677 = vmatmul.bf16.gmra.mxu3 %v5647_v22  ;;  %v6117_v22 = vld [vmem:[%s10093_s1 + $0xc4] sm:$0xf0] }
  0xb7   : > { %v1389_v25 = vpop.f32.mrf.mxu2 }
  0xb8   : > { %v1638_v26 = vpop.f32.mrf.mxu3  ;;  %v893_v27 = vpop.f32.mrf.mxu0 }
  0xb9   : > { %v6526_v28 = vadd.f32 %v1638_v26, %v1389_v25  ;;  %v1142_v29 = vpop.f32.mrf.mxu1  ;;  %v5676_v25 = vld [vmem:[%s10093_s1 + $0xc8] sm:$0xf0] }
  0xba   : > { %v6528_v30 = vadd.f32 %v1142_v29, %v893_v27  ;;  %v5675_v27 = vor.u32 %v6117_v22, %v5674_v21  ;;  %v5679_v32 = vor.u32 %v6116_v23, %v5676_v25 }
  0xbf   : > { %v1391_v35 = vpop.f32.mrf.mxu2 }
  0xc0   : > { %v1640_v37 = vpop.f32.mrf.mxu3  ;;  %v896_v38 = vpop.f32.mrf.mxu0 }
  0xc1   : > { %v6542_v40 = vadd.f32 %v1640_v37, %v1391_v35  ;;  %v1145_v41 = vpop.f32.mrf.mxu1 }
  0xc2   : > { %v6544_v42 = vadd.f32 %v1145_v41, %v896_v38 }
  0xc3   : > { %935 = vmatmul.bf16.gmra.mxu0 %v5651_v36 }
  0xc4   : > { %1184 = vmatmul.bf16.gmra.mxu1 %v5655_v39  ;;  %1433 = vmatmul.bf16.gmra.mxu2 %v5651_v36 }
  0xc5   : > { %1682 = vmatmul.bf16.gmra.mxu3 %v5655_v39 }
  0xc7   : > { %v1394_v43 = vpop.f32.mrf.mxu2 }
  0xc8   : > { %v1643_v44 = vpop.f32.mrf.mxu3  ;;  %v898_v45 = vpop.f32.mrf.mxu0 }
  0xc9   : > { %v6546_v46 = vadd.f32 %v1643_v44, %v1394_v43  ;;  %v1147_v47 = vpop.f32.mrf.mxu1  ;;  %v5682_v44 = vld [vmem:[%s10093_s1 + $0xd0] sm:$0xf] }
  0xca   : > { %v6548_v48 = vadd.f32 %v1147_v47, %v898_v45  ;;  %v6119_v45 = vld [vmem:[%s10093_s1 + $0xd4] sm:$0xf0]  ;;  %v6118_v47 = vld [vmem:[%s10093_s1 + $0xd4] sm:$0xf] }
  0xcb   : > { %v5683_v51 = vor.u32 %v6119_v45, %v5682_v44 }
  0xcf   : > { %v1396_v53 = vpop.f32.mrf.mxu2 }
  0xd0   : > { %v1645_v55 = vpop.f32.mrf.mxu3  ;;  %v901_v56 = vpop.f32.mrf.mxu0 }
  0xd1   : > { %v6562_v58 = vadd.f32 %v1645_v55, %v1396_v53  ;;  %v1150_v59 = vpop.f32.mrf.mxu1 }
  0xd2   : > { %v6564_v60 = vadd.f32 %v1150_v59, %v901_v56 }
  0xd3   : > { %940 = vmatmul.bf16.gmra.mxu0 %v5659_v54 }
  0xd4   : > { %1189 = vmatmul.bf16.gmra.mxu1 %v5663_v57  ;;  %1438 = vmatmul.bf16.gmra.mxu2 %v5659_v54  ;;  %v5687_v54 = vor.u32 %v6118_v47, %v5684_v49 }
  0xd5   : > { %1687 = vmatmul.bf16.gmra.mxu3 %v5663_v57 }
  0xd7   : > { %v1399_v61 = vpop.f32.mrf.mxu2 }
  0xd8   : > { %v1648_v62 = vpop.f32.mrf.mxu3  ;;  %v903_v63 = vpop.f32.mrf.mxu0 }
  0xd9   : > { %v6566_v0 = vadd.f32 %v1648_v62, %v1399_v61  ;;  %v1152_v1 = vpop.f32.mrf.mxu1 }
  0xda   : > { %v6568_v2 = vadd.f32 %v1152_v1, %v903_v63 }
  0xdf   : > { %v1401_v7 = vpop.f32.mrf.mxu2 }
  0xe0   : > { %v1650_v9 = vpop.f32.mrf.mxu3  ;;  %v906_v10 = vpop.f32.mrf.mxu0 }
  0xe1   : > { %v6582_v12 = vadd.f32 %v1650_v9, %v1401_v7  ;;  %v1155_v13 = vpop.f32.mrf.mxu1  ;;  %v5692_v7 = vld [vmem:[%s10093_s1 + $0xe8] sm:$0xf0]  ;;  %v5691_v9 = vor.u32 %v6121_v5, %v5690_v4 }
  0xe2   : > { %v6584_v14 = vadd.f32 %v1155_v13, %v906_v10  ;;  %v5695_v13 = vor.u32 %v6120_v6, %v5692_v7 }
  0xe3   : > { %945 = vmatmul.bf16.gmra.mxu0 %v5667_v8 }
  0xe4   : > { %1194 = vmatmul.bf16.gmra.mxu1 %v5671_v11  ;;  %1443 = vmatmul.bf16.gmra.mxu2 %v5667_v8 }
  0xe5   : > { %1692 = vmatmul.bf16.gmra.mxu3 %v5671_v11 }
  0xe7   : > { %v1404_v15 = vpop.f32.mrf.mxu2 }
  0xe8   : > { %v1653_v16 = vpop.f32.mrf.mxu3  ;;  %v908_v17 = vpop.f32.mrf.mxu0 }
  0xe9   : > { %v6586_v18 = vadd.f32 %v1653_v16, %v1404_v15  ;;  %v1157_v19 = vpop.f32.mrf.mxu1 }
  0xea   : > { %v6588_v20 = vadd.f32 %v1157_v19, %v908_v17 }
  0xef   : > { %v1406_v26 = vpop.f32.mrf.mxu2 }
  0xf0   : > { %v1655_v29 = vpop.f32.mrf.mxu3  ;;  %v911_v31 = vpop.f32.mrf.mxu0 }
  0xf1   : > { %v6602_v33 = vadd.f32 %v1655_v29, %v1406_v26  ;;  %v1160_v34 = vpop.f32.mrf.mxu1  ;;  %v6123_v29 = vld [vmem:[%s10093_s1 + $0xf4] sm:$0xf0] }
  0xf2   : > { %v6604_v35 = vadd.f32 %v1160_v34, %v911_v31  ;;  %v6122_v31 = vld [vmem:[%s10093_s1 + $0xf4] sm:$0xf] }
  0xf3   : > { %950 = vmatmul.bf16.gmra.mxu0 %v5675_v27 }
  0xf4   : > { %1199 = vmatmul.bf16.gmra.mxu1 %v5679_v32  ;;  %1448 = vmatmul.bf16.gmra.mxu2 %v5675_v27  ;;  %v5698_v27 = vld [vmem:[%s10093_s1 + $0xf0] sm:$0xf] }
  0xf5   : > { %1697 = vmatmul.bf16.gmra.mxu3 %v5679_v32  ;;  %v5700_v32 = vld [vmem:[%s10093_s1 + $0xf8] sm:$0xf0] }
  0xf7   : > { %v1409_v36 = vpop.f32.mrf.mxu2 }
  0xf8   : > { %v1658_v37 = vpop.f32.mrf.mxu3  ;;  %v913_v38 = vpop.f32.mrf.mxu0 }
  0xf9   : > { %v6606_v39 = vadd.f32 %v1658_v37, %v1409_v36  ;;  %v1162_v41 = vpop.f32.mrf.mxu1  ;;  %v5699_v36 = vor.u32 %v6123_v29, %v5698_v27  ;;  %v6127_v27 = vld [vmem:[%s10093_s1 + $0x114] sm:$0xf0]  ;;  %v6126_v29 = vld [vmem:[%s10093_s1 + $0x114] sm:$0xf] }
  0xfa   : > { %v6608_v43 = vadd.f32 %v1162_v41, %v913_v38  ;;  %v5703_v41 = vor.u32 %v6122_v31, %v5700_v32  ;;  %v5716_v31 = vld [vmem:[%s10093_s1 + $0x118] sm:$0xf0] }
  0xff   : > { %v1411_v50 = vpop.f32.mrf.mxu2 }
 0x100   : > { %v1660_v52 = vpop.f32.mrf.mxu3  ;;  %v916_v53 = vpop.f32.mrf.mxu0 }
 0x101   : > { %v6622_v55 = vadd.f32 %v1660_v52, %v1411_v50  ;;  %v1165_v56 = vpop.f32.mrf.mxu1 }
 0x102   : > { %v6624_v57 = vadd.f32 %v1165_v56, %v916_v53  ;;  %v5706_v56 = vld [vmem:[%s10093_s1 + $0x100] sm:$0xf] }
 0x103   : > { %955 = vmatmul.bf16.gmra.mxu0 %v5683_v51 }
 0x104   : > { %1204 = vmatmul.bf16.gmra.mxu1 %v5687_v54  ;;  %1453 = vmatmul.bf16.gmra.mxu2 %v5683_v51 }
 0x105   : > { %1702 = vmatmul.bf16.gmra.mxu3 %v5687_v54 }
 0x107   : > { %v1414_v59 = vpop.f32.mrf.mxu2 }
 0x108   : > { %v1663_v61 = vpop.f32.mrf.mxu3  ;;  %v918_v62 = vpop.f32.mrf.mxu0 }
 0x109   : > { %v6626_v63 = vadd.f32 %v1663_v61, %v1414_v59  ;;  %v1167_v1 = vpop.f32.mrf.mxu1  ;;  %v6125_v59 = vld [vmem:[%s10093_s1 + $0x104] sm:$0xf0]  ;;  %v6124_v61 = vld [vmem:[%s10093_s1 + $0x104] sm:$0xf] }
 0x10a   : > { %v6628_v3 = vadd.f32 %v1167_v1, %v918_v62  ;;  %v5708_v62 = vld [vmem:[%s10093_s1 + $0x108] sm:$0xf0]  ;;  %v5707_v4 = vor.u32 %v6125_v59, %v5706_v56 }
 0x10b   : > { %v5711_v7 = vor.u32 %v6124_v61, %v5708_v62  ;;  %v5722_v62 = vld [vmem:[%s10093_s1 + $0x120] sm:$0xf] }
 0x10f   : > { %v1416_v8 = vpop.f32.mrf.mxu2 }
 0x110   : > { %v1665_v10 = vpop.f32.mrf.mxu3  ;;  %v921_v11 = vpop.f32.mrf.mxu0 }
 0x111   : > { %v6642_v15 = vadd.f32 %v1665_v10, %v1416_v8  ;;  %v1170_v16 = vpop.f32.mrf.mxu1 }
 0x112   : > { %v6644_v17 = vadd.f32 %v1170_v16, %v921_v11 }
 0x113   : > { %10167 = vst [vmem:[#allocation2_spill] sm:$0xff] %v6642_v15  ;;  %960 = vmatmul.bf16.gmra.mxu0 %v5691_v9 }
 0x114   : > { %10168 = vst [vmem:[#allocation3_spill] sm:$0xff] %v6644_v17  ;;  %1209 = vmatmul.bf16.gmra.mxu1 %v5695_v13  ;;  %1458 = vmatmul.bf16.gmra.mxu2 %v5691_v9 }
 0x115   : > { %1707 = vmatmul.bf16.gmra.mxu3 %v5695_v13 }
 0x117   : > { %v1419_v19 = vpop.f32.mrf.mxu2 }
 0x118   : > { %v1668_v21 = vpop.f32.mrf.mxu3  ;;  %v923_v22 = vpop.f32.mrf.mxu0 }
 0x119   : > { %v6646_v23 = vadd.f32 %v1668_v21, %v1419_v19  ;;  %v1172_v25 = vpop.f32.mrf.mxu1 }
 0x11a   : > { %v6648_v26 = vadd.f32 %v1172_v25, %v923_v22  ;;  %v5714_v25 = vld [vmem:[%s10093_s1 + $0x110] sm:$0xf] }
 0x11b   : > { %10169 = vst [vmem:[#allocation4_spill] sm:$0xff] %v6646_v23 }
 0x11c   : > { %10170 = vst [vmem:[#allocation5_spill] sm:$0xff] %v6648_v26 }
 0x11f   : > { %v1421_v34 = vpop.f32.mrf.mxu2 }
 0x120   : > { %v1670_v37 = vpop.f32.mrf.mxu3  ;;  %v926_v38 = vpop.f32.mrf.mxu0 }
 0x121   : > { %v6662_v44 = vadd.f32 %v1670_v37, %v1421_v34  ;;  %v1175_v45 = vpop.f32.mrf.mxu1  ;;  %v5715_v34 = vor.u32 %v6127_v27, %v5714_v25 }
 0x122   : > { %v6664_v47 = vadd.f32 %v1175_v45, %v926_v38  ;;  %v5719_v38 = vor.u32 %v6126_v29, %v5716_v31 }
 0x123   : > { %10171 = vst [vmem:[#allocation6_spill] sm:$0xff] %v6662_v44  ;;  %965 = vmatmul.bf16.gmra.mxu0 %v5699_v36 }
 0x124   : > { %10172 = vst [vmem:[#allocation7_spill] sm:$0xff] %v6664_v47  ;;  %1214 = vmatmul.bf16.gmra.mxu1 %v5703_v41  ;;  %1463 = vmatmul.bf16.gmra.mxu2 %v5699_v36 }
 0x125   : > { %1712 = vmatmul.bf16.gmra.mxu3 %v5703_v41 }
 0x127   : > { %v1424_v49 = vpop.f32.mrf.mxu2 }
 0x128   : > { %v1673_v50 = vpop.f32.mrf.mxu3  ;;  %v928_v51 = vpop.f32.mrf.mxu0 }
 0x129   : > { %v6666_v52 = vadd.f32 %v1673_v50, %v1424_v49  ;;  %v1177_v53 = vpop.f32.mrf.mxu1 }
 0x12a   : > { %v6668_v54 = vadd.f32 %v1177_v53, %v928_v51 }
 0x12b   : > { %10173 = vst [vmem:[#allocation8_spill] sm:$0xff] %v6666_v52 }
 0x12c   : > { %10174 = vst [vmem:[#allocation9_spill] sm:$0xff] %v6668_v54 }
 0x12f   : > { %v1426_v1 = vpop.f32.mrf.mxu2 }
 0x130   : > { %v1675_v5 = vpop.f32.mrf.mxu3  ;;  %v931_v6 = vpop.f32.mrf.mxu0 }
 0x131   : > { %v6682_v8 = vadd.f32 %v1675_v5, %v1426_v1  ;;  %v1180_v9 = vpop.f32.mrf.mxu1  ;;  %v6129_v1 = vld [vmem:[%s10093_s1 + $0x124] sm:$0xf0]  ;;  %v5724_v5 = vld [vmem:[%s10093_s1 + $0x128] sm:$0xf0] }
 0x132   : > { %v6684_v10 = vadd.f32 %v1180_v9, %v931_v6 }
 0x133   : > { %10175 = vst [vmem:[#allocation10_spill] sm:$0xff] %v6682_v8  ;;  %970 = vmatmul.bf16.gmra.mxu0 %v5707_v4 }
 0x134   : > { %10176 = vst [vmem:[#allocation11_spill] sm:$0xff] %v6684_v10  ;;  %1219 = vmatmul.bf16.gmra.mxu1 %v5711_v7  ;;  %1468 = vmatmul.bf16.gmra.mxu2 %v5707_v4  ;;  %v6128_v4 = vld [vmem:[%s10093_s1 + $0x124] sm:$0xf] }
 0x135   : > { %1717 = vmatmul.bf16.gmra.mxu3 %v5711_v7  ;;  %v5723_v7 = vor.u32 %v6129_v1, %v5722_v62 }
 0x137   : > { %v1429_v11 = vpop.f32.mrf.mxu2 }
 0x138   : > { %v1678_v13 = vpop.f32.mrf.mxu3  ;;  %v933_v16 = vpop.f32.mrf.mxu0 }
 0x139   : > { %v6686_v19 = vadd.f32 %v1678_v13, %v1429_v11  ;;  %v1182_v21 = vpop.f32.mrf.mxu1  ;;  %v5727_v13 = vor.u32 %v6128_v4, %v5724_v5 }
 0x13a   : > { %v6688_v22 = vadd.f32 %v1182_v21, %v933_v16 }
 0x13b   : > { %10177 = vst [vmem:[#allocation12_spill] sm:$0xff] %v6686_v19 }
 0x13c   : > { %10178 = vst [vmem:[#allocation13_spill] sm:$0xff] %v6688_v22 }
 0x13f   : > { %v1431_v32 = vpop.f32.mrf.mxu2 }
 0x140   : > { %v1680_v36 = vpop.f32.mrf.mxu3  ;;  %v936_v37 = vpop.f32.mrf.mxu0 }
 0x141   : > { %v6702_v41 = vadd.f32 %v1680_v36, %v1431_v32  ;;  %v1185_v45 = vpop.f32.mrf.mxu1 }
 0x142   : > { %v6704_v49 = vadd.f32 %v1185_v45, %v936_v37  ;;  %v5730_v37 = vld [vmem:[%s10093_s1 + $0x130] sm:$0xf]  ;;  %v6130_v45 = vld [vmem:[%s10093_s1 + $0x134] sm:$0xf] }
 0x143   : > { %10179 = vst [vmem:[#allocation14_spill] sm:$0xff] %v6702_v41  ;;  %975 = vmatmul.bf16.gmra.mxu0 %v5715_v34 }
 0x144   : > { %10180 = vst [vmem:[#allocation15_spill] sm:$0xff] %v6704_v49  ;;  %1224 = vmatmul.bf16.gmra.mxu1 %v5719_v38  ;;  %1473 = vmatmul.bf16.gmra.mxu2 %v5715_v34 }
 0x145   : > { %1722 = vmatmul.bf16.gmra.mxu3 %v5719_v38  ;;  %v6131_v38 = vld [vmem:[%s10093_s1 + $0x134] sm:$0xf0] }
 0x147   : > { %v1434_v50 = vpop.f32.mrf.mxu2 }
 0x148   : > { %v1683_v51 = vpop.f32.mrf.mxu3  ;;  %v938_v53 = vpop.f32.mrf.mxu0 }
 0x149   : > { %v6706_v56 = vadd.f32 %v1683_v51, %v1434_v50  ;;  %v1187_v59 = vpop.f32.mrf.mxu1  ;;  %v5732_v50 = vld [vmem:[%s10093_s1 + $0x138] sm:$0xf0] }
 0x14a   : > { %v6708_v61 = vadd.f32 %v1187_v59, %v938_v53  ;;  %v5731_v53 = vor.u32 %v6131_v38, %v5730_v37  ;;  %v5735_v1 = vor.u32 %v6130_v45, %v5732_v50  ;;  %v5740_v37 = vld [vmem:[%s10093_s1 + $0x148] sm:$0xf0] }
 0x14b   : > { %10181 = vst [vmem:[#allocation16_spill] sm:$0xff] %v6706_v56 }
 0x14c   : > { %10182 = vst [vmem:[#allocation17_spill] sm:$0xff] %v6708_v61 }
 0x14f   : > { %v1436_v6 = vpop.f32.mrf.mxu2 }
 0x150   : > { %v1685_v9 = vpop.f32.mrf.mxu3  ;;  %v941_v11 = vpop.f32.mrf.mxu0 }
 0x151   : > { %v6722_v16 = vadd.f32 %v1685_v9, %v1436_v6  ;;  %v1190_v21 = vpop.f32.mrf.mxu1 }
 0x152   : > { %v6724_v25 = vadd.f32 %v1190_v21, %v941_v11 }
 0x153   : > { %10183 = vst [vmem:[#allocation18_spill] sm:$0xff] %v6722_v16  ;;  %980 = vmatmul.bf16.gmra.mxu0 %v5723_v7 }
 0x154   : > { %10184 = vst [vmem:[#allocation19_spill] sm:$0xff] %v6724_v25  ;;  %1229 = vmatmul.bf16.gmra.mxu1 %v5727_v13  ;;  %1478 = vmatmul.bf16.gmra.mxu2 %v5723_v7 }
 0x155   : > { %1727 = vmatmul.bf16.gmra.mxu3 %v5727_v13 }
 0x157   : > { %v1439_v27 = vpop.f32.mrf.mxu2 }
 0x158   : > { %v1688_v29 = vpop.f32.mrf.mxu3  ;;  %v943_v31 = vpop.f32.mrf.mxu0 }
 0x159   : > { %v6726_v32 = vadd.f32 %v1688_v29, %v1439_v27  ;;  %v1192_v34 = vpop.f32.mrf.mxu1  ;;  %v5738_v29 = vld [vmem:[%s10093_s1 + $0x140] sm:$0xf] }
 0x15a   : > { %v6728_v36 = vadd.f32 %v1192_v34, %v943_v31  ;;  %v6133_v31 = vld [vmem:[%s10093_s1 + $0x144] sm:$0xf0]  ;;  %v6132_v34 = vld [vmem:[%s10093_s1 + $0x144] sm:$0xf] }
 0x15b   : > { %10185 = vst [vmem:[#allocation20_spill] sm:$0xff] %v6726_v32  ;;  %v5739_v45 = vor.u32 %v6133_v31, %v5738_v29  ;;  %v5746_v29 = vld [vmem:[%s10093_s1 + $0x150] sm:$0xf]  ;;  %v6135_v31 = vld [vmem:[%s10093_s1 + $0x154] sm:$0xf0] }
 0x15c   : > { %10186 = vst [vmem:[#allocation21_spill] sm:$0xff] %v6728_v36 }
 0x15f   : > { %v1441_v51 = vpop.f32.mrf.mxu2 }
 0x160   : > { %v1690_v59 = vpop.f32.mrf.mxu3  ;;  %v946_v62 = vpop.f32.mrf.mxu0 }
 0x161   : > { %v6742_v4 = vadd.f32 %v1690_v59, %v1441_v51  ;;  %v1195_v5 = vpop.f32.mrf.mxu1 }
 0x162   : > { %v6744_v6 = vadd.f32 %v1195_v5, %v946_v62 }
 0x163   : > { %10187 = vst [vmem:[#allocation22_spill] sm:$0xff] %v6742_v4  ;;  %985 = vmatmul.bf16.gmra.mxu0 %v5731_v53 }
 0x164   : > { %10188 = vst [vmem:[#allocation23_spill] sm:$0xff] %v6744_v6  ;;  %1234 = vmatmul.bf16.gmra.mxu1 %v5735_v1  ;;  %1483 = vmatmul.bf16.gmra.mxu2 %v5731_v53  ;;  %v5743_v53 = vor.u32 %v6132_v34, %v5740_v37  ;;  %v6134_v34 = vld [vmem:[%s10093_s1 + $0x154] sm:$0xf]  ;;  %v5748_v37 = vld [vmem:[%s10093_s1 + $0x158] sm:$0xf0] }
 0x165   : > { %1732 = vmatmul.bf16.gmra.mxu3 %v5735_v1 }
 0x167   : > { %v1444_v7 = vpop.f32.mrf.mxu2 }
 0x168   : > { %v1693_v9 = vpop.f32.mrf.mxu3  ;;  %v948_v11 = vpop.f32.mrf.mxu0 }
 0x169   : > { %v6746_v13 = vadd.f32 %v1693_v9, %v1444_v7  ;;  %v1197_v21 = vpop.f32.mrf.mxu1 }
 0x16a   : > { %v6748_v27 = vadd.f32 %v1197_v21, %v948_v11 }
 0x16b   : > { %10189 = vst [vmem:[#allocation24_spill] sm:$0xff] %v6746_v13 }
 0x16c   : > { %10190 = vst [vmem:[#allocation25_spill] sm:$0xff] %v6748_v27 }
 0x16f   : > { %v1446_v38 = vpop.f32.mrf.mxu2 }
 0x170   : > { %v1695_v50 = vpop.f32.mrf.mxu3  ;;  %v951_v51 = vpop.f32.mrf.mxu0 }
 0x171   : > { %v6762_v59 = vadd.f32 %v1695_v50, %v1446_v38  ;;  %v1200_v62 = vpop.f32.mrf.mxu1 }
 0x172   : > { %v6764_v1 = vadd.f32 %v1200_v62, %v951_v51 }
 0x173   : > { %10191 = vst [vmem:[#allocation26_spill] sm:$0xff] %v6762_v59  ;;  %990 = vmatmul.bf16.gmra.mxu0 %v5739_v45 }
 0x174   : > { %10192 = vst [vmem:[#allocation27_spill] sm:$0xff] %v6764_v1  ;;  %1239 = vmatmul.bf16.gmra.mxu1 %v5743_v53  ;;  %1488 = vmatmul.bf16.gmra.mxu2 %v5739_v45  ;;  %v5747_v45 = vor.u32 %v6135_v31, %v5746_v29  ;;  %v5754_v29 = vld [vmem:[%s10093_s1 + $0x160] sm:$0xf]  ;;  %v6137_v31 = vld [vmem:[%s10093_s1 + $0x164] sm:$0xf0] }
 0x175   : > { %1737 = vmatmul.bf16.gmra.mxu3 %v5743_v53  ;;  %v5751_v53 = vor.u32 %v6134_v34, %v5748_v37  ;;  %v6136_v34 = vld [vmem:[%s10093_s1 + $0x164] sm:$0xf]  ;;  %v5756_v37 = vld [vmem:[%s10093_s1 + $0x168] sm:$0xf0] }
 0x177   : > { %v1449_v5 = vpop.f32.mrf.mxu2 }
 0x178   : > { %v1698_v7 = vpop.f32.mrf.mxu3  ;;  %v953_v9 = vpop.f32.mrf.mxu0 }
 0x179   : > { %v6766_v11 = vadd.f32 %v1698_v7, %v1449_v5  ;;  %v1202_v21 = vpop.f32.mrf.mxu1 }
 0x17a   : > { %v6768_v27 = vadd.f32 %v1202_v21, %v953_v9 }
 0x17b   : > { %10193 = vst [vmem:[#allocation28_spill] sm:$0xff] %v6766_v11 }
 0x17c   : > { %10194 = vst [vmem:[#allocation29_spill] sm:$0xff] %v6768_v27 }
 0x17f   : > { %v1451_v38 = vpop.f32.mrf.mxu2 }
 0x180   : > { %v1700_v50 = vpop.f32.mrf.mxu3  ;;  %v956_v51 = vpop.f32.mrf.mxu0 }
 0x181   : > { %v6782_v62 = vadd.f32 %v1700_v50, %v1451_v38  ;;  %v1205_v5 = vpop.f32.mrf.mxu1  ;;  %v5759_v50 = vor.u32 %v6136_v34, %v5756_v37  ;;  %v6138_v34 = vld [vmem:[%s10093_s1 + $0x174] sm:$0xf]  ;;  %v5764_v37 = vld [vmem:[%s10093_s1 + $0x178] sm:$0xf0] }
 0x182   : > { %v6784_v7 = vadd.f32 %v1205_v5, %v956_v51 }
 0x183   : > { %10195 = vst [vmem:[#allocation30_spill] sm:$0xff] %v6782_v62  ;;  %995 = vmatmul.bf16.gmra.mxu0 %v5747_v45 }
 0x184   : > { %10196 = vst [vmem:[#allocation31_spill] sm:$0xff] %v6784_v7  ;;  %1244 = vmatmul.bf16.gmra.mxu1 %v5751_v53  ;;  %1493 = vmatmul.bf16.gmra.mxu2 %v5747_v45  ;;  %v5755_v45 = vor.u32 %v6137_v31, %v5754_v29  ;;  %v5762_v29 = vld [vmem:[%s10093_s1 + $0x170] sm:$0xf]  ;;  %v6139_v31 = vld [vmem:[%s10093_s1 + $0x174] sm:$0xf0] }
 0x185   : > { %1742 = vmatmul.bf16.gmra.mxu3 %v5751_v53 }
 0x187   : > { %v1454_v9 = vpop.f32.mrf.mxu2 }
 0x188   : > { %v1703_v21 = vpop.f32.mrf.mxu3  ;;  %v958_v27 = vpop.f32.mrf.mxu0 }
 0x189   : > { %v6786_v11 = vadd.f32 %v1703_v21, %v1454_v9  ;;  %v1207_v1 = vpop.f32.mrf.mxu1 }
 0x18a   : > { %v6788_v59 = vadd.f32 %v1207_v1, %v958_v27 }
 0x18b   : > { %10197 = vst [vmem:[#allocation32_spill] sm:$0xff] %v6786_v11 }
 0x18c   : > { %10198 = vst [vmem:[#allocation33_spill] sm:$0xff] %v6788_v59 }
 0x18f   : > { %v1456_v38 = vpop.f32.mrf.mxu2 }
 0x190   : > { %v1705_v27 = vpop.f32.mrf.mxu3  ;;  %v961_v1 = vpop.f32.mrf.mxu0 }
 0x191   : > { %v6802_v51 = vadd.f32 %v1705_v27, %v1456_v38  ;;  %v1210_v53 = vpop.f32.mrf.mxu1 }
 0x192   : > { %v6804_v5 = vadd.f32 %v1210_v53, %v961_v1 }
 0x193   : > { %10199 = vst [vmem:[#allocation34_spill] sm:$0xff] %v6802_v51  ;;  %1000 = vmatmul.bf16.gmra.mxu0 %v5755_v45 }
 0x194   : > { %10200 = vst [vmem:[#allocation35_spill] sm:$0xff] %v6804_v5  ;;  %1249 = vmatmul.bf16.gmra.mxu1 %v5759_v50  ;;  %1498 = vmatmul.bf16.gmra.mxu2 %v5755_v45  ;;  %v5763_v45 = vor.u32 %v6139_v31, %v5762_v29  ;;  %v5770_v29 = vld [vmem:[%s10093_s1 + $0x180] sm:$0xf]  ;;  %v6141_v31 = vld [vmem:[%s10093_s1 + $0x184] sm:$0xf0] }
 0x195   : > { %1747 = vmatmul.bf16.gmra.mxu3 %v5759_v50  ;;  %v5767_v50 = vor.u32 %v6138_v34, %v5764_v37  ;;  %v6140_v34 = vld [vmem:[%s10093_s1 + $0x184] sm:$0xf]  ;;  %v5772_v37 = vld [vmem:[%s10093_s1 + $0x188] sm:$0xf0] }
 0x197   : > { %v1459_v9 = vpop.f32.mrf.mxu2 }
 0x198   : > { %v1708_v21 = vpop.f32.mrf.mxu3  ;;  %v963_v59 = vpop.f32.mrf.mxu0 }
 0x199   : > { %v6806_v11 = vadd.f32 %v1708_v21, %v1459_v9  ;;  %v1212_v7 = vpop.f32.mrf.mxu1 }
 0x19b   : > { %10201 = vst [vmem:[#allocation36_spill] sm:$0xff] %v6806_v11 }
 0x19f   : > { %v6820_v38 = vpop.f32.mrf.mxu2 }
 0x1a0   : > { %10202 = vst [vmem:[#allocation37_spill] sm:$0xff] %v6820_v38  ;;  %v6822_v27 = vpop.f32.mrf.mxu3  ;;  %v966_v1 = vpop.f32.mrf.mxu0 }
 0x1a1   : > { %10203 = vst [vmem:[#allocation38_spill] sm:$0xff] %v6822_v27  ;;  %v1215_v53 = vpop.f32.mrf.mxu1 }
 0x1a2   : > { %v6824_v9 = vadd.f32 %v1215_v53, %v966_v1  ;;  %v5775_v53 = vor.u32 %v6140_v34, %v5772_v37  ;;  %v5778_v37 = vld [vmem:[%s10093_s1 + $0x190] sm:$0xf] }
 0x1a3   : > { %1005 = vmatmul.bf16.gmra.mxu0 %v5763_v45 }
 0x1a4   : > { %10204 = vst [vmem:[#allocation39_spill] sm:$0xff] %v6824_v9  ;;  %1254 = vmatmul.bf16.gmra.mxu1 %v5767_v50  ;;  %1503 = vmatmul.bf16.gmra.mxu2 %v5763_v45  ;;  %v5771_v45 = vor.u32 %v6141_v31, %v5770_v29 }
 0x1a5   : > { %1752 = vmatmul.bf16.gmra.mxu3 %v5767_v50 }
 0x1a7   : > { %v1464_v21 = vpop.f32.mrf.mxu2 }
 0x1a8   : > { %v1713_v11 = vpop.f32.mrf.mxu3  ;;  %v6826_v5 = vpop.f32.mrf.mxu0 }
 0x1a9   : > { %10205 = vst [vmem:[#allocation40_spill] sm:$0xff] %v6826_v5  ;;  %v6828_v51 = vadd.f32 %v1713_v11, %v1464_v21  ;;  %v6830_v62 = vpop.f32.mrf.mxu1 }
 0x1aa   : > { %10207 = vst [vmem:[#allocation42_spill] sm:$0xff] %v6830_v62 }
 0x1ab   : > { %10206 = vst [vmem:[#allocation41_spill] sm:$0xff] %v6828_v51 }
 0x1af   : > { %v6844_v11 = vpop.f32.mrf.mxu2 }
 0x1b0   : > { %10208 = vst [vmem:[#allocation43_spill] sm:$0xff] %v6844_v11  ;;  %v6846_v1 = vpop.f32.mrf.mxu3  ;;  %v971_v50 = vpop.f32.mrf.mxu0 }
 0x1b1   : > { %10209 = vst [vmem:[#allocation44_spill] sm:$0xff] %v6846_v1  ;;  %v1220_v21 = vpop.f32.mrf.mxu1 }
 0x1b2   : > { %v1221_v62 = vadd.f32 %v1220_v21, %v971_v50 }
 0x1b3   : > { %1010 = vmatmul.bf16.gmra.mxu0 %v5771_v45 }
 0x1b4   : > { %v1878_v5 = vmul.f32 %v1221_v62, %v6524_v24  ;;  %v2004_v51 = vrot.slane %v1221_v62, 7  ;;  %v2194_v9 = vrot.slane %v1221_v62, 6  ;;  %v2384_v27 = vrot.slane %v1221_v62, 5  ;;  %1259 = vmatmul.bf16.gmra.mxu1 %v5775_v53  ;;  %1508 = vmatmul.bf16.gmra.mxu2 %v5771_v45 }
 0x1b5   : > { %v2574_v38 = vrot.slane %v1221_v62, 4  ;;  %v2764_v13 = vrot.slane %v1221_v62, 3  ;;  %v2954_v6 = vrot.slane %v1221_v62, 2  ;;  %v3144_v4 = vrot.slane %v1221_v62, 1  ;;  %1757 = vmatmul.bf16.gmra.mxu3 %v5775_v53 }
 0x1b6   : > { %v2068_v29 = vmul.f32 %v2004_v51, %v6524_v24  ;;  %v2258_v31 = vmul.f32 %v2194_v9, %v6524_v24  ;;  %v2448_v34 = vmul.f32 %v2384_v27, %v6524_v24  ;;  %v6143_v51 = vld [vmem:[%s10093_s1 + $0x194] sm:$0xf0]  ;;  %v6142_v27 = vld [vmem:[%s10093_s1 + $0x194] sm:$0xf]  ;;  %v5780_v9 = vld [vmem:[%s10093_s1 + $0x198] sm:$0xf0] }
 0x1b7   : > { %v2638_v50 = vmul.f32 %v2574_v38, %v6524_v24  ;;  %v2828_v21 = vmul.f32 %v2764_v13, %v6524_v24  ;;  %v3018_v45 = vmul.f32 %v2954_v6, %v6524_v24  ;;  %v3208_v1 = vmul.f32 %v3144_v4, %v6524_v24  ;;  %v1469_v62 = vpop.f32.mrf.mxu2 }
 0x1b8   : > { %v1718_v38 = vpop.f32.mrf.mxu3  ;;  %v973_v53 = vpop.f32.mrf.mxu0  ;;  %v6868_v6 = vadd.f32 %v1212_v7, %v963_v59  ;;  %v5779_v4 = vor.u32 %v6143_v51, %v5778_v37  ;;  %v5783_v36 = vor.u32 %v6142_v27, %v5780_v9 }
 0x1b9   : > { %v1719_v13 = vadd.f32 %v1718_v38, %v1469_v62  ;;  %v1222_v11 = vpop.f32.mrf.mxu1 }
 0x1ba   : > { %10210 = vst [vmem:[#allocation45_spill] sm:$0xff] %v6868_v6  ;;  %v1223_v24 = vadd.f32 %v1222_v11, %v973_v53 }
 0x1bb   : > { %v1879_v32 = vmul.f32 %v1719_v13, %v6526_v28  ;;  %v2005_v25 = vrot.slane %v1719_v13, 7  ;;  %v2195_v16 = vrot.slane %v1719_v13, 6  ;;  %v2385_v61 = vrot.slane %v1719_v13, 5 }
 0x1bc   : > { %v2575_v56 = vrot.slane %v1719_v13, 4  ;;  %v2765_v49 = vrot.slane %v1719_v13, 3  ;;  %v2955_v41 = vrot.slane %v1719_v13, 2  ;;  %v3145_v22 = vrot.slane %v1719_v13, 1 }
 0x1bd   : > { %v2069_v19 = vmul.f32 %v2005_v25, %v6526_v28  ;;  %v2259_v10 = vmul.f32 %v2195_v16, %v6526_v28  ;;  %v2449_v62 = vmul.f32 %v2385_v61, %v6526_v28  ;;  %v1880_v59 = vmul.f32 %v1223_v24, %v6528_v30 }
 0x1be   : > { %v2639_v7 = vmul.f32 %v2575_v56, %v6526_v28  ;;  %v2829_v11 = vmul.f32 %v2765_v49, %v6526_v28  ;;  %v3019_v37 = vmul.f32 %v2955_v41, %v6526_v28  ;;  %v3209_v51 = vmul.f32 %v3145_v22, %v6526_v28 }
 0x1bf   : > { %v1942_v27 = vadd.f32 %v1880_v59, %v1878_v5  ;;  %v2006_v9 = vrot.slane %v1223_v24, 7  ;;  %v2196_v38 = vrot.slane %v1223_v24, 6  ;;  %v2386_v53 = vrot.slane %v1223_v24, 5  ;;  %v1471_v13 = vpop.f32.mrf.mxu2 }
 0x1c0   : > { %v2576_v25 = vrot.slane %v1223_v24, 4  ;;  %v2766_v6 = vrot.slane %v1223_v24, 3  ;;  %v2956_v16 = vrot.slane %v1223_v24, 2  ;;  %v3146_v8 = vrot.slane %v1223_v24, 1  ;;  %v1720_v61 = vpop.f32.mrf.mxu3  ;;  %v976_v54 = vpop.f32.mrf.mxu0 }
 0x1c1   : > { %v2070_v52 = vmul.f32 %v2006_v9, %v6528_v30  ;;  %v2260_v56 = vmul.f32 %v2196_v38, %v6528_v30  ;;  %v2450_v49 = vmul.f32 %v2386_v53, %v6528_v30  ;;  %v1721_v41 = vadd.f32 %v1720_v61, %v1471_v13  ;;  %v1225_v47 = vpop.f32.mrf.mxu1 }
 0x1c2   : > { %v2640_v28 = vmul.f32 %v2576_v25, %v6528_v30  ;;  %v2830_v22 = vmul.f32 %v2766_v6, %v6528_v30  ;;  %v3020_v5 = vmul.f32 %v2956_v16, %v6528_v30  ;;  %v3210_v59 = vmul.f32 %v3146_v8, %v6528_v30 }
 0x1c3   : > { %v2132_v44 = vadd.f32 %v2070_v52, %v2068_v29  ;;  %v2322_v24 = vadd.f32 %v2260_v56, %v2258_v31  ;;  %v2512_v26 = vadd.f32 %v2450_v49, %v2448_v34  ;;  %v1881_v23 = vmul.f32 %v1721_v41, %v6542_v40  ;;  %1015 = vmatmul.bf16.gmra.mxu0 %v5779_v4 }
 0x1c4   : > { %v2702_v9 = vadd.f32 %v2640_v28, %v2638_v50  ;;  %v2892_v38 = vadd.f32 %v2830_v22, %v2828_v21  ;;  %v3082_v17 = vadd.f32 %v3020_v5, %v3018_v45  ;;  %v3272_v53 = vadd.f32 %v3210_v59, %v3208_v1  ;;  %1264 = vmatmul.bf16.gmra.mxu1 %v5783_v36 }
 0x1c5   : > { %v1973_v13 = vadd.f32 %v1881_v23, %v1879_v32  ;;  %v2007_v61 = vrot.slane %v1721_v41, 7  ;;  %v2197_v25 = vrot.slane %v1721_v41, 6  ;;  %v2387_v15 = vrot.slane %v1721_v41, 5  ;;  %1513 = vmatmul.bf16.gmra.mxu2 %v5779_v4  ;;  %1762 = vmatmul.bf16.gmra.mxu3 %v5783_v36 }
 0x1c6   : > { %v2577_v6 = vrot.slane %v1721_v41, 4  ;;  %v2767_v16 = vrot.slane %v1721_v41, 3  ;;  %v2957_v30 = vrot.slane %v1721_v41, 2  ;;  %v3147_v52 = vrot.slane %v1721_v41, 1 }
 0x1c7   : > { %v2071_v8 = vmul.f32 %v2007_v61, %v6542_v40  ;;  %v2261_v29 = vmul.f32 %v2197_v25, %v6542_v40  ;;  %v2451_v31 = vmul.f32 %v2387_v15, %v6542_v40  ;;  %v1226_v34 = vadd.f32 %v1225_v47, %v976_v54  ;;  %v1474_v50 = vpop.f32.mrf.mxu2 }
 0x1c8   : > { %v2641_v1 = vmul.f32 %v2577_v6, %v6542_v40  ;;  %v2831_v23 = vmul.f32 %v2767_v16, %v6542_v40  ;;  %v3021_v32 = vmul.f32 %v2957_v30, %v6542_v40  ;;  %v3211_v36 = vmul.f32 %v3147_v52, %v6542_v40  ;;  %v1723_v21 = vpop.f32.mrf.mxu3  ;;  %v978_v45 = vpop.f32.mrf.mxu0 }
 0x1c9   : > { %v2163_v4 = vadd.f32 %v2071_v8, %v2069_v19  ;;  %v2353_v56 = vadd.f32 %v2261_v29, %v2259_v10  ;;  %v2543_v49 = vadd.f32 %v2451_v31, %v2449_v62  ;;  %v1882_v41 = vmul.f32 %v1226_v34, %v6544_v42  ;;  %v1227_v28 = vpop.f32.mrf.mxu1 }
 0x1ca   : > { %v2733_v22 = vadd.f32 %v2641_v1, %v2639_v7  ;;  %v2923_v15 = vadd.f32 %v2831_v23, %v2829_v11  ;;  %v3113_v47 = vadd.f32 %v3021_v32, %v3019_v37  ;;  %v3303_v54 = vadd.f32 %v3211_v36, %v3209_v51 }
 0x1cb   : > { %v1943_v5 = vadd.f32 %v1942_v27, %v1882_v41  ;;  %v2008_v59 = vrot.slane %v1226_v34, 7  ;;  %v2198_v61 = vrot.slane %v1226_v34, 6  ;;  %v2388_v25 = vrot.slane %v1226_v34, 5 }
 0x1cc   : > { %v2578_v6 = vrot.slane %v1226_v34, 4  ;;  %v2768_v16 = vrot.slane %v1226_v34, 3  ;;  %v2958_v30 = vrot.slane %v1226_v34, 2  ;;  %v3148_v40 = vrot.slane %v1226_v34, 1 }
 0x1cd   : > { %v2072_v52 = vmul.f32 %v2008_v59, %v6544_v42  ;;  %v2262_v10 = vmul.f32 %v2198_v61, %v6544_v42  ;;  %v2452_v19 = vmul.f32 %v2388_v25, %v6544_v42  ;;  %v1724_v62 = vadd.f32 %v1723_v21, %v1474_v50 }
 0x1ce   : > { %v2642_v7 = vmul.f32 %v2578_v6, %v6544_v42  ;;  %v2832_v11 = vmul.f32 %v2768_v16, %v6544_v42  ;;  %v3022_v37 = vmul.f32 %v2958_v30, %v6544_v42  ;;  %v3212_v51 = vmul.f32 %v3148_v40, %v6544_v42 }
 0x1cf   : > { %v2133_v27 = vadd.f32 %v2132_v44, %v2072_v52  ;;  %v2323_v8 = vadd.f32 %v2322_v24, %v2262_v10  ;;  %v2513_v29 = vadd.f32 %v2512_v26, %v2452_v19  ;;  %v1883_v31 = vmul.f32 %v1724_v62, %v6546_v46  ;;  %v1476_v34 = vpop.f32.mrf.mxu2 }
 0x1d0   : > { %v2703_v1 = vadd.f32 %v2702_v9, %v2642_v7  ;;  %v2893_v23 = vadd.f32 %v2892_v38, %v2832_v11  ;;  %v3083_v32 = vadd.f32 %v3082_v17, %v3022_v37  ;;  %v3273_v36 = vadd.f32 %v3272_v53, %v3212_v51  ;;  %v1725_v41 = vpop.f32.mrf.mxu3  ;;  %v981_v42 = vpop.f32.mrf.mxu0 }
 0x1d1   : > { %v1974_v50 = vadd.f32 %v1973_v13, %v1883_v31  ;;  %v2009_v21 = vrot.slane %v1724_v62, 7  ;;  %v2199_v59 = vrot.slane %v1724_v62, 6  ;;  %v2389_v61 = vrot.slane %v1724_v62, 5  ;;  %v1230_v38 = vpop.f32.mrf.mxu1 }
 0x1d2   : > { %v2579_v25 = vrot.slane %v1724_v62, 4  ;;  %v2769_v6 = vrot.slane %v1724_v62, 3  ;;  %v2959_v16 = vrot.slane %v1724_v62, 2  ;;  %v3149_v30 = vrot.slane %v1724_v62, 1 }
 0x1d3   : > { %v2073_v44 = vmul.f32 %v2009_v21, %v6546_v46  ;;  %v2263_v26 = vmul.f32 %v2199_v59, %v6546_v46  ;;  %v2453_v24 = vmul.f32 %v2389_v61, %v6546_v46  ;;  %v1228_v9 = vadd.f32 %v1227_v28, %v978_v45 }
 0x1d4   : > { %v2643_v17 = vmul.f32 %v2579_v25, %v6546_v46  ;;  %v2833_v53 = vmul.f32 %v2769_v6, %v6546_v46  ;;  %v3023_v13 = vmul.f32 %v2959_v16, %v6546_v46  ;;  %v3213_v40 = vmul.f32 %v3149_v30, %v6546_v46 }
 0x1d5   : > { %v2164_v52 = vadd.f32 %v2163_v4, %v2073_v44  ;;  %v2354_v10 = vadd.f32 %v2353_v56, %v2263_v26  ;;  %v2544_v19 = vadd.f32 %v2543_v49, %v2453_v24  ;;  %v1884_v62 = vmul.f32 %v1228_v9, %v6548_v48 }
 0x1d6   : > { %v2734_v7 = vadd.f32 %v2733_v22, %v2643_v17  ;;  %v2924_v11 = vadd.f32 %v2923_v15, %v2833_v53  ;;  %v3114_v37 = vadd.f32 %v3113_v47, %v3023_v13  ;;  %v3304_v51 = vadd.f32 %v3303_v54, %v3213_v40 }
 0x1d7   : > { %v1944_v31 = vadd.f32 %v1943_v5, %v1884_v62  ;;  %v2010_v45 = vrot.slane %v1228_v9, 7  ;;  %v2200_v28 = vrot.slane %v1228_v9, 6  ;;  %v2390_v21 = vrot.slane %v1228_v9, 5  ;;  %v6911_v59 = vpop.f32.mrf.mxu2 }
 0x1d8   : > { %v2580_v61 = vrot.slane %v1228_v9, 4  ;;  %v2770_v25 = vrot.slane %v1228_v9, 3  ;;  %v2960_v6 = vrot.slane %v1228_v9, 2  ;;  %v3150_v16 = vrot.slane %v1228_v9, 1  ;;  %v6913_v46 = vpop.f32.mrf.mxu3 }
 0x1d9   : > { %v2074_v4 = vmul.f32 %v2010_v45, %v6548_v48  ;;  %v2264_v56 = vmul.f32 %v2200_v28, %v6548_v48  ;;  %v2454_v49 = vmul.f32 %v2390_v21, %v6548_v48  ;;  %v1726_v22 = vadd.f32 %v1725_v41, %v1476_v34  ;;  %v6931_v41 = vpop.f32.mrf.mxu0 }
 0x1da   : > { %v2644_v15 = vmul.f32 %v2580_v61, %v6548_v48  ;;  %v2834_v47 = vmul.f32 %v2770_v25, %v6548_v48  ;;  %v3024_v54 = vmul.f32 %v2960_v6, %v6548_v48  ;;  %v3214_v5 = vmul.f32 %v3150_v16, %v6548_v48 }
 0x1db   : > { %v2134_v30 = vadd.f32 %v2133_v27, %v2074_v4  ;;  %v2324_v44 = vadd.f32 %v2323_v8, %v2264_v56  ;;  %v2514_v26 = vadd.f32 %v2513_v29, %v2454_v49  ;;  %v1885_v24 = vmul.f32 %v1726_v22, %v6562_v58  ;;  %v6935_v27 = vpop.f32.mrf.mxu1 }
 0x1dc   : > { %v6923_v9 = vadd.f32 %v2703_v1, %v2644_v15  ;;  %v6925_v17 = vadd.f32 %v2893_v23, %v2834_v47  ;;  %v6927_v53 = vadd.f32 %v3083_v32, %v3024_v54  ;;  %v6929_v34 = vadd.f32 %v3273_v36, %v3214_v5 }
 0x1dd   : > { %v6933_v13 = vadd.f32 %v1974_v50, %v1885_v24  ;;  %v2011_v40 = vrot.slane %v1726_v22, 7  ;;  %v2201_v62 = vrot.slane %v1726_v22, 6  ;;  %v2391_v48 = vrot.slane %v1726_v22, 5 }
 0x1de   : > { %v2581_v8 = vrot.slane %v1726_v22, 4  ;;  %v2771_v29 = vrot.slane %v1726_v22, 3  ;;  %v2961_v45 = vrot.slane %v1726_v22, 2  ;;  %v3151_v1 = vrot.slane %v1726_v22, 1 }
 0x1df   : > { %v2075_v23 = vmul.f32 %v2011_v40, %v6562_v58  ;;  %v2265_v32 = vmul.f32 %v2201_v62, %v6562_v58  ;;  %v2455_v36 = vmul.f32 %v2391_v48, %v6562_v58  ;;  %v1231_v28 = vadd.f32 %v1230_v38, %v981_v42  ;;  %v1481_v21 = vpop.f32.mrf.mxu2  ;;  %v5788_v40 = vld [vmem:[%s10093_s1 + $0x1a8] sm:$0xf0] }
 0x1e0   : > { %v2645_v50 = vmul.f32 %v2581_v8, %v6562_v58  ;;  %v2835_v61 = vmul.f32 %v2771_v29, %v6562_v58  ;;  %v3025_v25 = vmul.f32 %v2961_v45, %v6562_v58  ;;  %v3215_v6 = vmul.f32 %v3151_v1, %v6562_v58  ;;  %v1730_v16 = vpop.f32.mrf.mxu3  ;;  %v5786_v58 = vld [vmem:[%s10093_s1 + $0x1a0] sm:$0xf] }
 0x1e1   : > { %v6944_v4 = vadd.f32 %v2164_v52, %v2075_v23  ;;  %v6946_v56 = vadd.f32 %v2354_v10, %v2265_v32  ;;  %v6948_v49 = vadd.f32 %v2544_v19, %v2455_v36  ;;  %v1886_v22 = vmul.f32 %v1231_v28, %v6564_v60  ;;  %v6145_v52 = vld [vmem:[%s10093_s1 + $0x1a4] sm:$0xf0]  ;;  %v986_v32 = vpop.f32.mrf.mxu0  ;;  %v5794_v36 = vld [vmem:[%s10093_s1 + $0x1b0] sm:$0xf] }
 0x1e2   : > { %v6951_v15 = vadd.f32 %v2734_v7, %v2645_v50  ;;  %v6953_v42 = vadd.f32 %v2924_v11, %v2835_v61  ;;  %v6955_v38 = vadd.f32 %v3114_v37, %v3025_v25  ;;  %v6957_v47 = vadd.f32 %v3304_v51, %v3215_v6  ;;  %v6144_v11 = vld [vmem:[%s10093_s1 + $0x1a4] sm:$0xf] }
 0x1e3   : > { %v6965_v10 = vadd.f32 %v1944_v31, %v1886_v22  ;;  %v2012_v19 = vrot.slane %v1231_v28, 7  ;;  %v2202_v54 = vrot.slane %v1231_v28, 6  ;;  %v2392_v7 = vrot.slane %v1231_v28, 5  ;;  %v1235_v6 = vpop.f32.mrf.mxu1  ;;  %v6147_v22 = vld [vmem:[%s10093_s1 + $0x1b4] sm:$0xf0] }
 0x1e4   : > { %v2582_v37 = vrot.slane %v1231_v28, 4  ;;  %v2772_v51 = vrot.slane %v1231_v28, 3  ;;  %v2962_v5 = vrot.slane %v1231_v28, 2  ;;  %v3152_v24 = vrot.slane %v1231_v28, 1 }
 0x1e5   : > { %v2076_v62 = vmul.f32 %v2012_v19, %v6564_v60  ;;  %v2266_v31 = vmul.f32 %v2202_v54, %v6564_v60  ;;  %v2456_v48 = vmul.f32 %v2392_v7, %v6564_v60  ;;  %v5787_v8 = vor.u32 %v6145_v52, %v5786_v58 }
 0x1e6   : > { %v2646_v29 = vmul.f32 %v2582_v37, %v6564_v60  ;;  %v2836_v45 = vmul.f32 %v2772_v51, %v6564_v60  ;;  %v3026_v1 = vmul.f32 %v2962_v5, %v6564_v60  ;;  %v3216_v23 = vmul.f32 %v3152_v24, %v6564_v60  ;;  %v6146_v60 = vld [vmem:[%s10093_s1 + $0x1b4] sm:$0xf] }
 0x1e7   : > { %v6983_v28 = vadd.f32 %v2134_v30, %v2076_v62  ;;  %v6985_v50 = vadd.f32 %v2324_v44, %v2266_v31  ;;  %v6987_v61 = vadd.f32 %v2514_v26, %v2456_v48  ;;  %1020 = vmatmul.bf16.gmra.mxu0 %v5787_v8  ;;  %v5791_v25 = vor.u32 %v6144_v11, %v5788_v40  ;;  %v5796_v30 = vld [vmem:[%s10093_s1 + $0x1b8] sm:$0xf0]  ;;  %v1484_v58 = vpop.f32.mrf.mxu2 }
 0x1e8   : > { %v2705_v44 = vadd.f32 %v6923_v9, %v2646_v29  ;;  %v2895_v26 = vadd.f32 %v6925_v17, %v2836_v45  ;;  %v3085_v52 = vadd.f32 %v6927_v53, %v3026_v1  ;;  %v3275_v19 = vadd.f32 %v6929_v34, %v3216_v23  ;;  %1518 = vmatmul.bf16.gmra.mxu2 %v5787_v8  ;;  %v1733_v54 = vpop.f32.mrf.mxu3 }
 0x1e9   : > { %1269 = vmatmul.bf16.gmra.mxu1 %v5791_v25  ;;  %1767 = vmatmul.bf16.gmra.mxu3 %v5791_v25  ;;  %v1729_v7 = vadd.f32 %v6913_v46, %v6911_v59  ;;  %v1233_v11 = vadd.f32 %v6935_v27, %v6931_v41  ;;  %v7006_v37 = vadd.f32 %v1730_v16, %v1481_v21 }
 0x1ea   : > { %v7008_v51 = vadd.f32 %v1235_v6, %v986_v32  ;;  %v5795_v9 = vor.u32 %v6147_v22, %v5794_v36  ;;  %v7010_v17 = vor.u32 %v6146_v60, %v5796_v30  ;;  %v7012_v53 = vadd.f32 %v1733_v54, %v1484_v58 }
 0x1eb   : > { %v1887_v34 = vmul.f32 %v1729_v7, %v6566_v0  ;;  %v2013_v5 = vrot.slane %v1729_v7, 7  ;;  %v2203_v24 = vrot.slane %v1729_v7, 6  ;;  %v2393_v40 = vrot.slane %v1729_v7, 5 }
 0x1ec   : > { %v2583_v62 = vrot.slane %v1729_v7, 4  ;;  %v2773_v31 = vrot.slane %v1729_v7, 3  ;;  %v2963_v59 = vrot.slane %v1729_v7, 2  ;;  %v3153_v46 = vrot.slane %v1729_v7, 1 }
 0x1ed   : > { %v1976_v41 = vadd.f32 %v6933_v13, %v1887_v34  ;;  %v2077_v27 = vmul.f32 %v2013_v5, %v6566_v0  ;;  %v2267_v21 = vmul.f32 %v2203_v24, %v6566_v0  ;;  %v2457_v16 = vmul.f32 %v2393_v40, %v6566_v0 }
 0x1ee   : > { %v2647_v48 = vmul.f32 %v2583_v62, %v6566_v0  ;;  %v2837_v8 = vmul.f32 %v2773_v31, %v6566_v0  ;;  %v3027_v29 = vmul.f32 %v2963_v59, %v6566_v0  ;;  %v3217_v45 = vmul.f32 %v3153_v46, %v6566_v0 }
 0x1ef   : > { %v2166_v1 = vadd.f32 %v6944_v4, %v2077_v27  ;;  %v2356_v23 = vadd.f32 %v6946_v56, %v2267_v21  ;;  %v2546_v13 = vadd.f32 %v6948_v49, %v2457_v16  ;;  %v1888_v32 = vmul.f32 %v1233_v11, %v6568_v2 }
 0x1f0   : > { %v2736_v36 = vadd.f32 %v6951_v15, %v2647_v48  ;;  %v2926_v25 = vadd.f32 %v6953_v42, %v2837_v8  ;;  %v3116_v6 = vadd.f32 %v6955_v38, %v3027_v29  ;;  %v3306_v22 = vadd.f32 %v6957_v47, %v3217_v45 }
 0x1f1   : > { %v1946_v60 = vadd.f32 %v6965_v10, %v1888_v32  ;;  %v2014_v30 = vrot.slane %v1233_v11, 7  ;;  %v2204_v0 = vrot.slane %v1233_v11, 6  ;;  %v2394_v58 = vrot.slane %v1233_v11, 5  ;;  %v1237_v32 = vpop.f32.mrf.mxu1 }
 0x1f2   : > { %v2584_v4 = vrot.slane %v1233_v11, 4  ;;  %v2774_v54 = vrot.slane %v1233_v11, 3  ;;  %v2964_v56 = vrot.slane %v1233_v11, 2  ;;  %v3154_v7 = vrot.slane %v1233_v11, 1 }
 0x1f3   : > { %v2078_v49 = vmul.f32 %v2014_v30, %v6568_v2  ;;  %v2268_v34 = vmul.f32 %v2204_v0, %v6568_v2  ;;  %v2458_v15 = vmul.f32 %v2394_v58, %v6568_v2  ;;  %v1889_v42 = vmul.f32 %v7006_v37, %v6582_v12 }
 0x1f4   : > { %v2648_v38 = vmul.f32 %v2584_v4, %v6568_v2  ;;  %v2838_v47 = vmul.f32 %v2774_v54, %v6568_v2  ;;  %v3028_v10 = vmul.f32 %v2964_v56, %v6568_v2  ;;  %v3218_v5 = vmul.f32 %v3154_v7, %v6568_v2 }
 0x1f5   : > { %v2136_v24 = vadd.f32 %v6983_v28, %v2078_v49  ;;  %v2326_v11 = vadd.f32 %v6985_v50, %v2268_v34  ;;  %v2516_v40 = vadd.f32 %v6987_v61, %v2458_v15  ;;  %v1977_v62 = vadd.f32 %v1976_v41, %v1889_v42 }
 0x1f6   : > { %v2706_v31 = vadd.f32 %v2705_v44, %v2648_v38  ;;  %v2896_v59 = vadd.f32 %v2895_v26, %v2838_v47  ;;  %v3086_v46 = vadd.f32 %v3085_v52, %v3028_v10  ;;  %v3276_v27 = vadd.f32 %v3275_v19, %v3218_v5 }
 0x1f7   : > { %v2015_v21 = vrot.slane %v7006_v37, 7  ;;  %v2205_v16 = vrot.slane %v7006_v37, 6  ;;  %v2395_v48 = vrot.slane %v7006_v37, 5  ;;  %v2585_v8 = vrot.slane %v7006_v37, 4  ;;  %1025 = vmatmul.bf16.gmra.mxu0 %v5795_v9 }
 0x1f8   : > { %v2775_v2 = vrot.slane %v7006_v37, 3  ;;  %v2965_v28 = vrot.slane %v7006_v37, 2  ;;  %v3155_v50 = vrot.slane %v7006_v37, 1  ;;  %v1890_v61 = vmul.f32 %v7008_v51, %v6584_v14  ;;  %1523 = vmatmul.bf16.gmra.mxu2 %v5795_v9  ;;  %v988_v9 = vpop.f32.mrf.mxu0 }
 0x1f9   : > { %v2079_v44 = vmul.f32 %v2015_v21, %v6582_v12  ;;  %v2269_v26 = vmul.f32 %v2205_v16, %v6582_v12  ;;  %v2459_v52 = vmul.f32 %v2395_v48, %v6582_v12  ;;  %v2649_v19 = vmul.f32 %v2585_v8, %v6582_v12  ;;  %1274 = vmatmul.bf16.gmra.mxu1 %v7010_v17 }
 0x1fa   : > { %v2839_v41 = vmul.f32 %v2775_v2, %v6582_v12  ;;  %v3029_v29 = vmul.f32 %v2965_v28, %v6582_v12  ;;  %v3219_v37 = vmul.f32 %v3155_v50, %v6582_v12  ;;  %v1947_v45 = vadd.f32 %v1946_v60, %v1890_v61  ;;  %1772 = vmatmul.bf16.gmra.mxu3 %v7010_v17 }
 0x1fb   : > { %v2167_v30 = vadd.f32 %v2166_v1, %v2079_v44  ;;  %v2357_v0 = vadd.f32 %v2356_v23, %v2269_v26  ;;  %v2547_v58 = vadd.f32 %v2546_v13, %v2459_v52  ;;  %v2737_v4 = vadd.f32 %v2736_v36, %v2649_v19 }
 0x1fc   : > { %v2927_v54 = vadd.f32 %v2926_v25, %v2839_v41  ;;  %v3117_v56 = vadd.f32 %v3116_v6, %v3029_v29  ;;  %v3307_v7 = vadd.f32 %v3306_v22, %v3219_v37  ;;  %v2016_v49 = vrot.slane %v7008_v51, 7 }
 0x1fd   : > { %v2206_v34 = vrot.slane %v7008_v51, 6  ;;  %v2396_v15 = vrot.slane %v7008_v51, 5  ;;  %v2586_v12 = vrot.slane %v7008_v51, 4  ;;  %v2776_v60 = vrot.slane %v7008_v51, 3 }
 0x1fe   : > { %v2080_v17 = vmul.f32 %v2016_v49, %v6584_v14  ;;  %v2966_v1 = vrot.slane %v7008_v51, 2  ;;  %v3156_v23 = vrot.slane %v7008_v51, 1  ;;  %v1891_v13 = vmul.f32 %v7012_v53, %v6586_v18 }
 0x1ff   : > { %v2270_v36 = vmul.f32 %v2206_v34, %v6584_v14  ;;  %v2460_v25 = vmul.f32 %v2396_v15, %v6584_v14  ;;  %v2650_v6 = vmul.f32 %v2586_v12, %v6584_v14  ;;  %v2840_v22 = vmul.f32 %v2776_v60, %v6584_v14 }
 0x200   : > { %v2137_v42 = vadd.f32 %v2136_v24, %v2080_v17  ;;  %v3030_v38 = vmul.f32 %v2966_v1, %v6584_v14  ;;  %v3220_v47 = vmul.f32 %v3156_v23, %v6584_v14  ;;  %v1978_v10 = vadd.f32 %v1977_v62, %v1891_v13  ;;  %v1486_v14 = vpop.f32.mrf.mxu2  ;;  %v1735_v62 = vpop.f32.mrf.mxu3 }
 0x201   : > { %v2327_v5 = vadd.f32 %v2326_v11, %v2270_v36  ;;  %v2517_v21 = vadd.f32 %v2516_v40, %v2460_v25  ;;  %v2707_v51 = vadd.f32 %v2706_v31, %v2650_v6  ;;  %v2897_v16 = vadd.f32 %v2896_v59, %v2840_v22 }
 0x202   : > { %v3087_v48 = vadd.f32 %v3086_v46, %v3030_v38  ;;  %v3277_v8 = vadd.f32 %v3276_v27, %v3220_v47  ;;  %v2017_v2 = vrot.slane %v7012_v53, 7  ;;  %v2207_v28 = vrot.slane %v7012_v53, 6  ;;  %v991_v46 = vpop.f32.mrf.mxu0  ;;  %v1240_v27 = vpop.f32.mrf.mxu1 }
 0x203   : > { %v2397_v50 = vrot.slane %v7012_v53, 5  ;;  %v2587_v61 = vrot.slane %v7012_v53, 4  ;;  %v2777_v24 = vrot.slane %v7012_v53, 3  ;;  %v2967_v44 = vrot.slane %v7012_v53, 2 }
 0x204   : > { %v2081_v11 = vmul.f32 %v2017_v2, %v6586_v18  ;;  %v2271_v40 = vmul.f32 %v2207_v28, %v6586_v18  ;;  %v3157_v31 = vrot.slane %v7012_v53, 1  ;;  %v1238_v59 = vadd.f32 %v1237_v32, %v988_v9 }
 0x205   : > { %v2461_v26 = vmul.f32 %v2397_v50, %v6586_v18  ;;  %v2651_v52 = vmul.f32 %v2587_v61, %v6586_v18  ;;  %v2841_v19 = vmul.f32 %v2777_v24, %v6586_v18  ;;  %v3031_v41 = vmul.f32 %v2967_v44, %v6586_v18 }
 0x206   : > { %v2168_v29 = vadd.f32 %v2167_v30, %v2081_v11  ;;  %v2358_v37 = vadd.f32 %v2357_v0, %v2271_v40  ;;  %v3221_v49 = vmul.f32 %v3157_v31, %v6586_v18  ;;  %v1892_v34 = vmul.f32 %v1238_v59, %v6588_v20 }
 0x207   : > { %v2548_v15 = vadd.f32 %v2547_v58, %v2461_v26  ;;  %v2738_v12 = vadd.f32 %v2737_v4, %v2651_v52  ;;  %v2928_v53 = vadd.f32 %v2927_v54, %v2841_v19  ;;  %v3118_v9 = vadd.f32 %v3117_v56, %v3031_v41 }
 0x208   : > { %v3308_v32 = vadd.f32 %v3307_v7, %v3221_v49  ;;  %v1948_v60 = vadd.f32 %v1947_v45, %v1892_v34  ;;  %v2018_v17 = vrot.slane %v1238_v59, 7  ;;  %v2208_v1 = vrot.slane %v1238_v59, 6  ;;  %v7109_v61 = vpop.f32.mrf.mxu2  ;;  %v7111_v24 = vpop.f32.mrf.mxu3 }
 0x209   : > { %v2398_v23 = vrot.slane %v1238_v59, 5  ;;  %v2588_v13 = vrot.slane %v1238_v59, 4  ;;  %v2778_v36 = vrot.slane %v1238_v59, 3  ;;  %v2968_v25 = vrot.slane %v1238_v59, 2 }
 0x20a   : > { %v2082_v6 = vmul.f32 %v2018_v17, %v6588_v20  ;;  %v2272_v30 = vmul.f32 %v2208_v1, %v6588_v20  ;;  %v3158_v0 = vrot.slane %v1238_v59, 1  ;;  %v1736_v18 = vadd.f32 %v1735_v62, %v1486_v14  ;;  %v7117_v14 = vpop.f32.mrf.mxu0 }
 0x20b   : > { %v2462_v22 = vmul.f32 %v2398_v23, %v6588_v20  ;;  %v2652_v58 = vmul.f32 %v2588_v13, %v6588_v20  ;;  %v2842_v4 = vmul.f32 %v2778_v36, %v6588_v20  ;;  %v3032_v45 = vmul.f32 %v2968_v25, %v6588_v20  ;;  %v5802_v23 = vld [vmem:[%s10093_s1 + $0x1c0] sm:$0xf] }
 0x20c   : > { %v2138_v54 = vadd.f32 %v2137_v42, %v2082_v6  ;;  %v2328_v56 = vadd.f32 %v2327_v5, %v2272_v30  ;;  %v3222_v7 = vmul.f32 %v3158_v0, %v6588_v20  ;;  %v1893_v38 = vmul.f32 %v1736_v18, %v6602_v33  ;;  %v5804_v6 = vld [vmem:[%s10093_s1 + $0x1c8] sm:$0xf0] }
 0x20d   : > { %v7101_v47 = vadd.f32 %v2517_v21, %v2462_v22  ;;  %v7103_v2 = vadd.f32 %v2707_v51, %v2652_v58  ;;  %v7105_v28 = vadd.f32 %v2897_v16, %v2842_v4  ;;  %v7107_v50 = vadd.f32 %v3087_v48, %v3032_v45  ;;  %v7119_v21 = vpop.f32.mrf.mxu1 }
 0x20e   : > { %v7113_v44 = vadd.f32 %v3277_v8, %v3222_v7  ;;  %v7115_v42 = vadd.f32 %v1978_v10, %v1893_v38  ;;  %v2019_v5 = vrot.slane %v1736_v18, 7  ;;  %v2209_v20 = vrot.slane %v1736_v18, 6  ;;  %v5810_v38 = vld [vmem:[%s10093_s1 + $0x1d0] sm:$0xf] }
 0x20f   : > { %v2399_v51 = vrot.slane %v1736_v18, 5  ;;  %v2589_v62 = vrot.slane %v1736_v18, 4  ;;  %v2779_v16 = vrot.slane %v1736_v18, 3  ;;  %v2969_v11 = vrot.slane %v1736_v18, 2 }
 0x210   : > { %v2083_v48 = vmul.f32 %v2019_v5, %v6602_v33  ;;  %v2273_v40 = vmul.f32 %v2209_v20, %v6602_v33  ;;  %v3159_v31 = vrot.slane %v1736_v18, 1  ;;  %v1241_v59 = vadd.f32 %v1240_v27, %v991_v46  ;;  %v1491_v45 = vpop.f32.mrf.mxu2  ;;  %v1740_v7 = vpop.f32.mrf.mxu3 }
 0x211   : > { %v2463_v8 = vmul.f32 %v2399_v51, %v6602_v33  ;;  %v2653_v10 = vmul.f32 %v2589_v62, %v6602_v33  ;;  %v2843_v26 = vmul.f32 %v2779_v16, %v6602_v33  ;;  %v3033_v52 = vmul.f32 %v2969_v11, %v6602_v33 }
 0x212   : > { %v7127_v19 = vadd.f32 %v2168_v29, %v2083_v48  ;;  %v7129_v41 = vadd.f32 %v2358_v37, %v2273_v40  ;;  %v3223_v49 = vmul.f32 %v3159_v31, %v6602_v33  ;;  %v1894_v34 = vmul.f32 %v1241_v59, %v6604_v35  ;;  %v6149_v29 = vld [vmem:[%s10093_s1 + $0x1c4] sm:$0xf0]  ;;  %v996_v16 = vpop.f32.mrf.mxu0  ;;  %v6151_v48 = vld [vmem:[%s10093_s1 + $0x1d4] sm:$0xf0]  ;;  %v6150_v40 = vld [vmem:[%s10093_s1 + $0x1d4] sm:$0xf] }
 0x213   : > { %v7133_v17 = vadd.f32 %v2548_v15, %v2463_v8  ;;  %v7135_v1 = vadd.f32 %v2738_v12, %v2653_v10  ;;  %v7137_v46 = vadd.f32 %v2928_v53, %v2843_v26  ;;  %v7139_v27 = vadd.f32 %v3118_v9, %v3033_v52  ;;  %v6148_v12 = vld [vmem:[%s10093_s1 + $0x1c4] sm:$0xf] }
 0x214   : > { %v7147_v37 = vadd.f32 %v3308_v32, %v3223_v49  ;;  %v7149_v33 = vadd.f32 %v1948_v60, %v1894_v34  ;;  %v2020_v15 = vrot.slane %v1241_v59, 7  ;;  %v2210_v13 = vrot.slane %v1241_v59, 6 }
 0x215   : > { %v2400_v53 = vrot.slane %v1241_v59, 5  ;;  %v2590_v9 = vrot.slane %v1241_v59, 4  ;;  %v2780_v36 = vrot.slane %v1241_v59, 3  ;;  %v2970_v25 = vrot.slane %v1241_v59, 2  ;;  %v1245_v11 = vpop.f32.mrf.mxu1 }
 0x216   : > { %v2084_v30 = vmul.f32 %v2020_v15, %v6604_v35  ;;  %v2274_v32 = vmul.f32 %v2210_v13, %v6604_v35  ;;  %v3160_v60 = vrot.slane %v1241_v59, 1  ;;  %v5803_v0 = vor.u32 %v6149_v29, %v5802_v23 }
 0x217   : > { %v2464_v18 = vmul.f32 %v2400_v53, %v6604_v35  ;;  %v2654_v22 = vmul.f32 %v2590_v9, %v6604_v35  ;;  %v2844_v58 = vmul.f32 %v2780_v36, %v6604_v35  ;;  %v3034_v4 = vmul.f32 %v2970_v25, %v6604_v35 }
 0x218   : > { %v7166_v5 = vadd.f32 %v2138_v54, %v2084_v30  ;;  %v7168_v20 = vadd.f32 %v2328_v56, %v2274_v32  ;;  %v3224_v51 = vmul.f32 %v3160_v60, %v6604_v35  ;;  %1030 = vmatmul.bf16.gmra.mxu0 %v5803_v0  ;;  %v5807_v62 = vor.u32 %v6148_v12, %v5804_v6  ;;  %v5812_v54 = vld [vmem:[%s10093_s1 + $0x1d8] sm:$0xf0] }
 0x219   : > { %v2519_v56 = vadd.f32 %v7101_v47, %v2464_v18  ;;  %v2709_v35 = vadd.f32 %v7103_v2, %v2654_v22  ;;  %v2899_v31 = vadd.f32 %v7105_v28, %v2844_v58  ;;  %v3089_v59 = vadd.f32 %v7107_v50, %v3034_v4  ;;  %1528 = vmatmul.bf16.gmra.mxu2 %v5803_v0 }
 0x21a   : > { %v3279_v8 = vadd.f32 %v7113_v44, %v3224_v51  ;;  %1279 = vmatmul.bf16.gmra.mxu1 %v5807_v62  ;;  %1777 = vmatmul.bf16.gmra.mxu3 %v5807_v62  ;;  %v1739_v10 = vadd.f32 %v7111_v24, %v7109_v61  ;;  %v1243_v26 = vadd.f32 %v7119_v21, %v7117_v14 }
 0x21b   : > { %v7189_v52 = vadd.f32 %v1740_v7, %v1491_v45  ;;  %v7191_v47 = vadd.f32 %v1245_v11, %v996_v16  ;;  %v5811_v2 = vor.u32 %v6151_v48, %v5810_v38  ;;  %v7193_v49 = vor.u32 %v6150_v40, %v5812_v54 }
 0x21c   : > { %v1895_v28 = vmul.f32 %v1739_v10, %v6606_v39  ;;  %v2021_v50 = vrot.slane %v1739_v10, 7  ;;  %v2211_v34 = vrot.slane %v1739_v10, 6  ;;  %v2401_v44 = vrot.slane %v1739_v10, 5 }
 0x21d   : > { %v2591_v23 = vrot.slane %v1739_v10, 4  ;;  %v2781_v29 = vrot.slane %v1739_v10, 3  ;;  %v2971_v15 = vrot.slane %v1739_v10, 2  ;;  %v3161_v13 = vrot.slane %v1739_v10, 1 }
 0x21e   : > { %v1980_v61 = vadd.f32 %v7115_v42, %v1895_v28  ;;  %v2085_v24 = vmul.f32 %v2021_v50, %v6606_v39  ;;  %v2275_v14 = vmul.f32 %v2211_v34, %v6606_v39  ;;  %v2465_v21 = vmul.f32 %v2401_v44, %v6606_v39 }
 0x21f   : > { %v2655_v12 = vmul.f32 %v2591_v23, %v6606_v39  ;;  %v2845_v53 = vmul.f32 %v2781_v29, %v6606_v39  ;;  %v3035_v9 = vmul.f32 %v2971_v15, %v6606_v39  ;;  %v3225_v36 = vmul.f32 %v3161_v13, %v6606_v39  ;;  %v1494_v23 = vpop.f32.mrf.mxu2  ;;  %v1743_v29 = vpop.f32.mrf.mxu3 }
 0x220   : > { %v2170_v25 = vadd.f32 %v7127_v19, %v2085_v24  ;;  %v2360_v6 = vadd.f32 %v7129_v41, %v2275_v14  ;;  %v2550_v42 = vadd.f32 %v7133_v17, %v2465_v21  ;;  %v1896_v30 = vmul.f32 %v1243_v26, %v6608_v43  ;;  %v1247_v24 = vpop.f32.mrf.mxu1 }
 0x221   : > { %v2740_v32 = vadd.f32 %v7135_v1, %v2655_v12  ;;  %v2930_v60 = vadd.f32 %v7137_v46, %v2845_v53  ;;  %v3120_v0 = vadd.f32 %v7139_v27, %v3035_v9  ;;  %v3310_v18 = vadd.f32 %v7147_v37, %v3225_v36 }
 0x222   : > { %v1950_v22 = vadd.f32 %v7149_v33, %v1896_v30  ;;  %v2022_v58 = vrot.slane %v1243_v26, 7  ;;  %v2212_v39 = vrot.slane %v1243_v26, 6  ;;  %v2402_v4 = vrot.slane %v1243_v26, 5 }
 0x223   : > { %v2592_v19 = vrot.slane %v1243_v26, 4  ;;  %v2782_v45 = vrot.slane %v1243_v26, 3  ;;  %v2972_v41 = vrot.slane %v1243_v26, 2  ;;  %v3162_v7 = vrot.slane %v1243_v26, 1 }
 0x224   : > { %v2086_v17 = vmul.f32 %v2022_v58, %v6608_v43  ;;  %v2276_v38 = vmul.f32 %v2212_v39, %v6608_v43  ;;  %v2466_v1 = vmul.f32 %v2402_v4, %v6608_v43  ;;  %v1897_v46 = vmul.f32 %v7189_v52, %v6622_v55 }
 0x225   : > { %v2656_v27 = vmul.f32 %v2592_v19, %v6608_v43  ;;  %v2846_v37 = vmul.f32 %v2782_v45, %v6608_v43  ;;  %v3036_v33 = vmul.f32 %v2972_v41, %v6608_v43  ;;  %v3226_v51 = vmul.f32 %v3162_v7, %v6608_v43 }
 0x226   : > { %v2140_v62 = vadd.f32 %v7166_v5, %v2086_v17  ;;  %v2330_v16 = vadd.f32 %v7168_v20, %v2276_v38  ;;  %v2520_v11 = vadd.f32 %v2519_v56, %v2466_v1  ;;  %v1981_v48 = vadd.f32 %v1980_v61, %v1897_v46 }
 0x227   : > { %v2710_v40 = vadd.f32 %v2709_v35, %v2656_v27  ;;  %v2900_v54 = vadd.f32 %v2899_v31, %v2846_v37  ;;  %v3090_v10 = vadd.f32 %v3089_v59, %v3036_v33  ;;  %v3280_v26 = vadd.f32 %v3279_v8, %v3226_v51 }
 0x228   : > { %v2023_v28 = vrot.slane %v7189_v52, 7  ;;  %v2213_v50 = vrot.slane %v7189_v52, 6  ;;  %v2403_v34 = vrot.slane %v7189_v52, 5  ;;  %v2593_v44 = vrot.slane %v7189_v52, 4  ;;  %1035 = vmatmul.bf16.gmra.mxu0 %v5811_v2 }
 0x229   : > { %v2783_v43 = vrot.slane %v7189_v52, 3  ;;  %v2973_v5 = vrot.slane %v7189_v52, 2  ;;  %v3163_v20 = vrot.slane %v7189_v52, 1  ;;  %v1898_v56 = vmul.f32 %v7191_v47, %v6624_v57  ;;  %1533 = vmatmul.bf16.gmra.mxu2 %v5811_v2  ;;  %v998_v2 = vpop.f32.mrf.mxu0 }
 0x22a   : > { %v2087_v35 = vmul.f32 %v2023_v28, %v6622_v55  ;;  %v2277_v31 = vmul.f32 %v2213_v50, %v6622_v55  ;;  %v2467_v59 = vmul.f32 %v2403_v34, %v6622_v55  ;;  %v2657_v8 = vmul.f32 %v2593_v44, %v6622_v55  ;;  %1284 = vmatmul.bf16.gmra.mxu1 %v7193_v49  ;;  %v1496_v44 = vpop.f32.mrf.mxu2 }
 0x22b   : > { %v2847_v15 = vmul.f32 %v2783_v43, %v6622_v55  ;;  %v3037_v52 = vmul.f32 %v2973_v5, %v6622_v55  ;;  %v3227_v13 = vmul.f32 %v3163_v20, %v6622_v55  ;;  %v1951_v61 = vadd.f32 %v1950_v22, %v1898_v56  ;;  %1782 = vmatmul.bf16.gmra.mxu3 %v7193_v49 }
 0x22c   : > { %v2171_v14 = vadd.f32 %v2170_v25, %v2087_v35  ;;  %v2361_v21 = vadd.f32 %v2360_v6, %v2277_v31  ;;  %v2551_v12 = vadd.f32 %v2550_v42, %v2467_v59  ;;  %v2741_v53 = vadd.f32 %v2740_v32, %v2657_v8 }
 0x22d   : > { %v2931_v9 = vadd.f32 %v2930_v60, %v2847_v15  ;;  %v3121_v36 = vadd.f32 %v3120_v0, %v3037_v52  ;;  %v3311_v30 = vadd.f32 %v3310_v18, %v3227_v13  ;;  %v2024_v58 = vrot.slane %v7191_v47, 7 }
 0x22e   : > { %v2214_v39 = vrot.slane %v7191_v47, 6  ;;  %v2404_v4 = vrot.slane %v7191_v47, 5  ;;  %v2594_v55 = vrot.slane %v7191_v47, 4  ;;  %v2784_v22 = vrot.slane %v7191_v47, 3 }
 0x22f   : > { %v2088_v49 = vmul.f32 %v2024_v58, %v6624_v57  ;;  %v2974_v25 = vrot.slane %v7191_v47, 2  ;;  %v3164_v6 = vrot.slane %v7191_v47, 1  ;;  %v1744_v42 = vadd.f32 %v1743_v29, %v1494_v23 }
 0x230   : > { %v2278_v32 = vmul.f32 %v2214_v39, %v6624_v57  ;;  %v2468_v60 = vmul.f32 %v2404_v4, %v6624_v57  ;;  %v2658_v0 = vmul.f32 %v2594_v55, %v6624_v57  ;;  %v2848_v18 = vmul.f32 %v2784_v22, %v6624_v57 }
 0x231   : > { %v2141_v19 = vadd.f32 %v2140_v62, %v2088_v49  ;;  %v3038_v45 = vmul.f32 %v2974_v25, %v6624_v57  ;;  %v3228_v41 = vmul.f32 %v3164_v6, %v6624_v57  ;;  %v1899_v7 = vmul.f32 %v1744_v42, %v6626_v63  ;;  %v1745_v62 = vpop.f32.mrf.mxu3  ;;  %v1001_v56 = vpop.f32.mrf.mxu0 }
 0x232   : > { %v2331_v17 = vadd.f32 %v2330_v16, %v2278_v32  ;;  %v2521_v38 = vadd.f32 %v2520_v11, %v2468_v60  ;;  %v2711_v1 = vadd.f32 %v2710_v40, %v2658_v0  ;;  %v2901_v47 = vadd.f32 %v2900_v54, %v2848_v18  ;;  %v1250_v16 = vpop.f32.mrf.mxu1  ;;  %v7281_v0 = vpop.f32.mrf.mxu2 }
 0x233   : > { %v3091_v46 = vadd.f32 %v3090_v10, %v3038_v45  ;;  %v3281_v27 = vadd.f32 %v3280_v26, %v3228_v41  ;;  %v1982_v37 = vadd.f32 %v1981_v48, %v1899_v7  ;;  %v2025_v33 = vrot.slane %v1744_v42, 7 }
 0x234   : > { %v2215_v51 = vrot.slane %v1744_v42, 6  ;;  %v2405_v28 = vrot.slane %v1744_v42, 5  ;;  %v2595_v50 = vrot.slane %v1744_v42, 4  ;;  %v2785_v34 = vrot.slane %v1744_v42, 3 }
 0x235   : > { %v2089_v43 = vmul.f32 %v2025_v33, %v6626_v63  ;;  %v2975_v5 = vrot.slane %v1744_v42, 2  ;;  %v3165_v57 = vrot.slane %v1744_v42, 1  ;;  %v1248_v20 = vadd.f32 %v1247_v24, %v998_v2 }
 0x236   : > { %v2279_v11 = vmul.f32 %v2215_v51, %v6626_v63  ;;  %v2469_v40 = vmul.f32 %v2405_v28, %v6626_v63  ;;  %v2659_v48 = vmul.f32 %v2595_v50, %v6626_v63  ;;  %v2849_v54 = vmul.f32 %v2785_v34, %v6626_v63 }
 0x237   : > { %v2172_v10 = vadd.f32 %v2171_v14, %v2089_v43  ;;  %v3039_v26 = vmul.f32 %v2975_v5, %v6626_v63  ;;  %v3229_v35 = vmul.f32 %v3165_v57, %v6626_v63  ;;  %v1900_v31 = vmul.f32 %v1248_v20, %v6628_v3  ;;  %v10212_v57 = vld [vmem:[#allocation3_spill] sm:$0xff] }
 0x238   : > { %v2362_v59 = vadd.f32 %v2361_v21, %v2279_v11  ;;  %v2552_v8 = vadd.f32 %v2551_v12, %v2469_v40  ;;  %v2742_v23 = vadd.f32 %v2741_v53, %v2659_v48  ;;  %v2932_v29 = vadd.f32 %v2931_v9, %v2849_v54  ;;  %v5818_v48 = vld [vmem:[%s10093_s1 + $0x1e0] sm:$0xf]  ;;  %v6153_v54 = vld [vmem:[%s10093_s1 + $0x1e4] sm:$0xf0] }
 0x239   : > { %v3122_v15 = vadd.f32 %v3121_v36, %v3039_v26  ;;  %v3312_v52 = vadd.f32 %v3311_v30, %v3229_v35  ;;  %v1952_v13 = vadd.f32 %v1951_v61, %v1900_v31  ;;  %v2026_v2 = vrot.slane %v1248_v20, 7  ;;  %v10211_v30 = vld [vmem:[#allocation2_spill] sm:$0xff]  ;;  %v7283_v18 = vpop.f32.mrf.mxu3 }
 0x23a   : > { %v2216_v24 = vrot.slane %v1248_v20, 6  ;;  %v2406_v58 = vrot.slane %v1248_v20, 5  ;;  %v2596_v39 = vrot.slane %v1248_v20, 4  ;;  %v2786_v4 = vrot.slane %v1248_v20, 3  ;;  %v1252_v33 = vpop.f32.mrf.mxu1 }
 0x23b   : > { %v2090_v14 = vmul.f32 %v2026_v2, %v6628_v3  ;;  %v2976_v55 = vrot.slane %v1248_v20, 2  ;;  %v3166_v22 = vrot.slane %v1248_v20, 1  ;;  %v1746_v49 = vadd.f32 %v1745_v62, %v1496_v44 }
 0x23c   : > { %v2280_v63 = vmul.f32 %v2216_v24, %v6628_v3  ;;  %v2470_v21 = vmul.f32 %v2406_v58, %v6628_v3  ;;  %v2660_v12 = vmul.f32 %v2596_v39, %v6628_v3  ;;  %v2850_v53 = vmul.f32 %v2786_v4, %v6628_v3  ;;  %v5820_v24 = vld [vmem:[%s10093_s1 + $0x1e8] sm:$0xf0] }
 0x23d   : > { %v2142_v9 = vadd.f32 %v2141_v19, %v2090_v14  ;;  %v3040_v61 = vmul.f32 %v2976_v55, %v6628_v3  ;;  %v3230_v36 = vmul.f32 %v3166_v22, %v6628_v3  ;;  %v1901_v25 = vmul.f32 %v1746_v49, %v10211_v30  ;;  %v7287_v3 = vpop.f32.mrf.mxu0  ;;  %v1501_v22 = vpop.f32.mrf.mxu2 }
 0x23e   : > { %v7273_v6 = vadd.f32 %v2331_v17, %v2280_v63  ;;  %v7275_v42 = vadd.f32 %v2521_v38, %v2470_v21  ;;  %v7277_v32 = vadd.f32 %v2711_v1, %v2660_v12  ;;  %v7279_v60 = vadd.f32 %v2901_v47, %v2850_v53 }
 0x23f   : > { %v3092_v45 = vadd.f32 %v3091_v46, %v3040_v61  ;;  %v3282_v19 = vadd.f32 %v3281_v27, %v3230_v36  ;;  %v7285_v41 = vadd.f32 %v1982_v37, %v1901_v25  ;;  %v2027_v7 = vrot.slane %v1746_v49, 7  ;;  %v6155_v25 = vld [vmem:[%s10093_s1 + $0x1f4] sm:$0xf0] }
 0x240   : > { %v2217_v17 = vrot.slane %v1746_v49, 6  ;;  %v2407_v51 = vrot.slane %v1746_v49, 5  ;;  %v2597_v38 = vrot.slane %v1746_v49, 4  ;;  %v2787_v28 = vrot.slane %v1746_v49, 3 }
 0x241   : > { %v2091_v1 = vmul.f32 %v2027_v7, %v10211_v30  ;;  %v2977_v47 = vrot.slane %v1746_v49, 2  ;;  %v3167_v50 = vrot.slane %v1746_v49, 1  ;;  %v1251_v34 = vadd.f32 %v1250_v16, %v1001_v56  ;;  %v1750_v49 = vpop.f32.mrf.mxu3 }
 0x242   : > { %v2281_v44 = vmul.f32 %v2217_v17, %v10211_v30  ;;  %v2471_v46 = vmul.f32 %v2407_v51, %v10211_v30  ;;  %v2661_v27 = vmul.f32 %v2597_v38, %v10211_v30  ;;  %v2851_v37 = vmul.f32 %v2787_v28, %v10211_v30  ;;  %v1255_v36 = vpop.f32.mrf.mxu1 }
 0x243   : > { %v7294_v62 = vadd.f32 %v2172_v10, %v2091_v1  ;;  %v3041_v43 = vmul.f32 %v2977_v47, %v10211_v30  ;;  %v3231_v5 = vmul.f32 %v3167_v50, %v10211_v30  ;;  %v1902_v20 = vmul.f32 %v1251_v34, %v10212_v57  ;;  %v5826_v30 = vld [vmem:[%s10093_s1 + $0x1f0] sm:$0xf] }
 0x244   : > { %v7299_v11 = vadd.f32 %v2362_v59, %v2281_v44  ;;  %v7301_v40 = vadd.f32 %v2552_v8, %v2471_v46  ;;  %v7303_v56 = vadd.f32 %v2742_v23, %v2661_v27  ;;  %v7305_v16 = vadd.f32 %v2932_v29, %v2851_v37  ;;  %v6152_v59 = vld [vmem:[%s10093_s1 + $0x1e4] sm:$0xf] }
 0x245   : > { %v7313_v10 = vadd.f32 %v3122_v15, %v3041_v43  ;;  %v7315_v26 = vadd.f32 %v3312_v52, %v3231_v5  ;;  %v7317_v35 = vadd.f32 %v1952_v13, %v1902_v20  ;;  %v2028_v31 = vrot.slane %v1251_v34, 7  ;;  %v1006_v61 = vpop.f32.mrf.mxu0 }
 0x246   : > { %v2218_v8 = vrot.slane %v1251_v34, 6  ;;  %v2408_v23 = vrot.slane %v1251_v34, 5  ;;  %v2598_v29 = vrot.slane %v1251_v34, 4  ;;  %v2788_v2 = vrot.slane %v1251_v34, 3 }
 0x247   : > { %v2092_v15 = vmul.f32 %v2028_v31, %v10212_v57  ;;  %v2978_v58 = vrot.slane %v1251_v34, 2  ;;  %v3168_v52 = vrot.slane %v1251_v34, 1  ;;  %v5819_v39 = vor.u32 %v6153_v54, %v5818_v48  ;;  %v10214_v31 = vld [vmem:[#allocation5_spill] sm:$0xff] }
 0x248   : > { %v2282_v13 = vmul.f32 %v2218_v8, %v10212_v57  ;;  %v2472_v4 = vmul.f32 %v2408_v23, %v10212_v57  ;;  %v2662_v14 = vmul.f32 %v2598_v29, %v10212_v57  ;;  %v2852_v55 = vmul.f32 %v2788_v2, %v10212_v57 }
 0x249   : > { %v7330_v63 = vadd.f32 %v2142_v9, %v2092_v15  ;;  %v3042_v21 = vmul.f32 %v2978_v58, %v10212_v57  ;;  %v3232_v12 = vmul.f32 %v3168_v52, %v10212_v57  ;;  %1040 = vmatmul.bf16.gmra.mxu0 %v5819_v39  ;;  %v5823_v53 = vor.u32 %v6152_v59, %v5820_v24 }
 0x24a   : > { %v2333_v7 = vadd.f32 %v7273_v6, %v2282_v13  ;;  %v2523_v9 = vadd.f32 %v7275_v42, %v2472_v4  ;;  %v2713_v17 = vadd.f32 %v7277_v32, %v2662_v14  ;;  %v2903_v51 = vadd.f32 %v7279_v60, %v2852_v55  ;;  %1538 = vmatmul.bf16.gmra.mxu2 %v5819_v39  ;;  %v10213_v42 = vld [vmem:[#allocation4_spill] sm:$0xff] }
 0x24b   : > { %v3093_v38 = vadd.f32 %v3092_v45, %v3042_v21  ;;  %v3283_v28 = vadd.f32 %v3282_v19, %v3232_v12  ;;  %1289 = vmatmul.bf16.gmra.mxu1 %v5823_v53  ;;  %1787 = vmatmul.bf16.gmra.mxu3 %v5823_v53  ;;  %v1749_v1 = vadd.f32 %v7283_v18, %v7281_v0  ;;  %v7385_v53 = vpop.f32.mrf.mxu2 }
 0x24c   : > { %v1253_v47 = vadd.f32 %v1252_v33, %v7287_v3  ;;  %v7347_v50 = vadd.f32 %v1750_v49, %v1501_v22  ;;  %v7349_v34 = vadd.f32 %v1255_v36, %v1006_v61  ;;  %v5827_v6 = vor.u32 %v6155_v25, %v5826_v30  ;;  %v7387_v61 = vpop.f32.mrf.mxu3 }
 0x24d   : > { %v1903_v44 = vmul.f32 %v1749_v1, %v10213_v42  ;;  %v2029_v32 = vrot.slane %v1749_v1, 7  ;;  %v2219_v46 = vrot.slane %v1749_v1, 6  ;;  %v2409_v60 = vrot.slane %v1749_v1, 5 }
 0x24e   : > { %v2599_v27 = vrot.slane %v1749_v1, 4  ;;  %v2789_v45 = vrot.slane %v1749_v1, 3  ;;  %v2979_v19 = vrot.slane %v1749_v1, 2  ;;  %v3169_v37 = vrot.slane %v1749_v1, 1 }
 0x24f   : > { %v1984_v43 = vadd.f32 %v7285_v41, %v1903_v44  ;;  %v2093_v0 = vmul.f32 %v2029_v32, %v10213_v42  ;;  %v2283_v18 = vmul.f32 %v2219_v46, %v10213_v42  ;;  %v2473_v3 = vmul.f32 %v2409_v60, %v10213_v42 }
 0x250   : > { %v2663_v33 = vmul.f32 %v2599_v27, %v10213_v42  ;;  %v2853_v5 = vmul.f32 %v2789_v45, %v10213_v42  ;;  %v3043_v57 = vmul.f32 %v2979_v19, %v10213_v42  ;;  %v3233_v20 = vmul.f32 %v3169_v37, %v10213_v42  ;;  %v1257_v42 = vpop.f32.mrf.mxu1 }
 0x251   : > { %v2174_v48 = vadd.f32 %v7294_v62, %v2093_v0  ;;  %v2364_v54 = vadd.f32 %v7299_v11, %v2283_v18  ;;  %v2554_v41 = vadd.f32 %v7301_v40, %v2473_v3  ;;  %v1904_v59 = vmul.f32 %v1253_v47, %v10214_v31 }
 0x252   : > { %v2744_v8 = vadd.f32 %v7303_v56, %v2663_v33  ;;  %v2934_v23 = vadd.f32 %v7305_v16, %v2853_v5  ;;  %v3124_v29 = vadd.f32 %v7313_v10, %v3043_v57  ;;  %v3314_v2 = vadd.f32 %v7315_v26, %v3233_v20  ;;  %v10215_v16 = vld [vmem:[#allocation6_spill] sm:$0xff]  ;;  %v6154_v33 = vld [vmem:[%s10093_s1 + $0x1f4] sm:$0xf]  ;;  %v5828_v5 = vld [vmem:[%s10093_s1 + $0x1f8] sm:$0xf0] }
 0x253   : > { %v1954_v24 = vadd.f32 %v7317_v35, %v1904_v59  ;;  %v2030_v15 = vrot.slane %v1253_v47, 7  ;;  %v2220_v58 = vrot.slane %v1253_v47, 6  ;;  %v2410_v52 = vrot.slane %v1253_v47, 5 }
 0x254   : > { %v2600_v62 = vrot.slane %v1253_v47, 4  ;;  %v2790_v39 = vrot.slane %v1253_v47, 3  ;;  %v2980_v11 = vrot.slane %v1253_v47, 2  ;;  %v3170_v13 = vrot.slane %v1253_v47, 1  ;;  %v1008_v47 = vpop.f32.mrf.mxu0 }
 0x255   : > { %v2094_v40 = vmul.f32 %v2030_v15, %v10214_v31  ;;  %v2284_v4 = vmul.f32 %v2220_v58, %v10214_v31  ;;  %v2474_v56 = vmul.f32 %v2410_v52, %v10214_v31  ;;  %v1905_v10 = vmul.f32 %v7347_v50, %v10215_v16 }
 0x256   : > { %v2664_v26 = vmul.f32 %v2600_v62, %v10214_v31  ;;  %v2854_v35 = vmul.f32 %v2790_v39, %v10214_v31  ;;  %v3044_v14 = vmul.f32 %v2980_v11, %v10214_v31  ;;  %v3234_v55 = vmul.f32 %v3170_v13, %v10214_v31  ;;  %v1506_v39 = vpop.f32.mrf.mxu2  ;;  %v1755_v11 = vpop.f32.mrf.mxu3  ;;  %v5834_v13 = vld [vmem:[%s10093_s1 + $0x200] sm:$0xf] }
 0x257   : > { %v2144_v22 = vadd.f32 %v7330_v63, %v2094_v40  ;;  %v7379_v49 = vadd.f32 %v2333_v7, %v2284_v4  ;;  %v7381_v21 = vadd.f32 %v2523_v9, %v2474_v56  ;;  %v7383_v12 = vadd.f32 %v1984_v43, %v1905_v10  ;;  %v6157_v10 = vld [vmem:[%s10093_s1 + $0x204] sm:$0xf0] }
 0x258   : > { %v2714_v36 = vadd.f32 %v2713_v17, %v2664_v26  ;;  %v2904_v30 = vadd.f32 %v2903_v51, %v2854_v35  ;;  %v3094_v25 = vadd.f32 %v3093_v38, %v3044_v14  ;;  %v3284_v1 = vadd.f32 %v3283_v28, %v3234_v55  ;;  %v10216_v51 = vld [vmem:[#allocation7_spill] sm:$0xff]  ;;  %v6156_v26 = vld [vmem:[%s10093_s1 + $0x204] sm:$0xf] }
 0x259   : > { %v2031_v44 = vrot.slane %v7347_v50, 7  ;;  %v2221_v63 = vrot.slane %v7347_v50, 6  ;;  %v2411_v7 = vrot.slane %v7347_v50, 5  ;;  %v2601_v9 = vrot.slane %v7347_v50, 4  ;;  %1045 = vmatmul.bf16.gmra.mxu0 %v5827_v6  ;;  %v5836_v35 = vld [vmem:[%s10093_s1 + $0x208] sm:$0xf0] }
 0x25a   : > { %v2791_v32 = vrot.slane %v7347_v50, 3  ;;  %v2981_v46 = vrot.slane %v7347_v50, 2  ;;  %v3171_v17 = vrot.slane %v7347_v50, 1  ;;  %v1906_v38 = vmul.f32 %v7349_v34, %v10216_v51  ;;  %1543 = vmatmul.bf16.gmra.mxu2 %v5827_v6 }
 0x25b   : > { %v2095_v28 = vmul.f32 %v2031_v44, %v10215_v16  ;;  %v2285_v60 = vmul.f32 %v2221_v63, %v10215_v16  ;;  %v2475_v27 = vmul.f32 %v2411_v7, %v10215_v16  ;;  %v2665_v45 = vmul.f32 %v2601_v9, %v10215_v16 }
 0x25c   : > { %v2855_v19 = vmul.f32 %v2791_v32, %v10215_v16  ;;  %v3045_v37 = vmul.f32 %v2981_v46, %v10215_v16  ;;  %v3235_v43 = vmul.f32 %v3171_v17, %v10215_v16  ;;  %v7405_v0 = vadd.f32 %v1954_v24, %v1906_v38  ;;  %v1011_v56 = vpop.f32.mrf.mxu0  ;;  %v1260_v16 = vpop.f32.mrf.mxu1 }
 0x25d   : > { %v7407_v50 = vadd.f32 %v2174_v48, %v2095_v28  ;;  %v7409_v18 = vadd.f32 %v2364_v54, %v2285_v60  ;;  %v7411_v6 = vadd.f32 %v2554_v41, %v2475_v27  ;;  %v7413_v3 = vadd.f32 %v2744_v8, %v2665_v45  ;;  %v10217_v28 = vld [vmem:[#allocation8_spill] sm:$0xff] }
 0x25e   : > { %v7421_v57 = vadd.f32 %v2934_v23, %v2855_v19  ;;  %v7423_v20 = vadd.f32 %v3124_v29, %v3045_v37  ;;  %v7425_v48 = vadd.f32 %v3314_v2, %v3235_v43  ;;  %v2032_v54 = vrot.slane %v7349_v34, 7 }
 0x25f   : > { %v2222_v41 = vrot.slane %v7349_v34, 6  ;;  %v2412_v31 = vrot.slane %v7349_v34, 5  ;;  %v2602_v59 = vrot.slane %v7349_v34, 4  ;;  %v2792_v8 = vrot.slane %v7349_v34, 3 }
 0x260   : > { %v2096_v24 = vmul.f32 %v2032_v54, %v10216_v51  ;;  %v2982_v15 = vrot.slane %v7349_v34, 2  ;;  %v3172_v23 = vrot.slane %v7349_v34, 1  ;;  %v5831_v29 = vor.u32 %v6154_v33, %v5828_v5  ;;  %v10218_v54 = vld [vmem:[#allocation9_spill] sm:$0xff] }
 0x261   : > { %v2286_v2 = vmul.f32 %v2222_v41, %v10216_v51  ;;  %v2476_v58 = vmul.f32 %v2412_v31, %v10216_v51  ;;  %v2666_v52 = vmul.f32 %v2602_v59, %v10216_v51  ;;  %v2856_v62 = vmul.f32 %v2792_v8, %v10216_v51 }
 0x262   : > { %v7442_v40 = vadd.f32 %v2144_v22, %v2096_v24  ;;  %v3046_v4 = vmul.f32 %v2982_v15, %v10216_v51  ;;  %v3236_v34 = vmul.f32 %v3172_v23, %v10216_v51  ;;  %1294 = vmatmul.bf16.gmra.mxu1 %v5831_v29  ;;  %1792 = vmatmul.bf16.gmra.mxu3 %v5831_v29 }
 0x263   : > { %v2335_v14 = vadd.f32 %v7379_v49, %v2286_v2  ;;  %v2525_v55 = vadd.f32 %v7381_v21, %v2476_v58  ;;  %v2715_v22 = vadd.f32 %v2714_v36, %v2666_v52  ;;  %v2905_v44 = vadd.f32 %v2904_v30, %v2856_v62 }
 0x264   : > { %v3095_v63 = vadd.f32 %v3094_v25, %v3046_v4  ;;  %v3285_v7 = vadd.f32 %v3284_v1, %v3236_v34  ;;  %v1754_v9 = vadd.f32 %v7387_v61, %v7385_v53  ;;  %v1258_v32 = vadd.f32 %v1257_v42, %v1008_v47 }
 0x265   : > { %v7459_v46 = vadd.f32 %v1755_v11, %v1506_v39  ;;  %v7461_v17 = vadd.f32 %v1260_v16, %v1011_v56  ;;  %v5835_v51 = vor.u32 %v6157_v10, %v5834_v13  ;;  %v5839_v38 = vor.u32 %v6156_v26, %v5836_v35 }
 0x266   : > { %v1907_v60 = vmul.f32 %v1754_v9, %v10217_v28  ;;  %v2033_v27 = vrot.slane %v1754_v9, 7  ;;  %v2223_v49 = vrot.slane %v1754_v9, 6  ;;  %v2413_v45 = vrot.slane %v1754_v9, 5 }
 0x267   : > { %v2603_v21 = vrot.slane %v1754_v9, 4  ;;  %v2793_v36 = vrot.slane %v1754_v9, 3  ;;  %v2983_v30 = vrot.slane %v1754_v9, 2  ;;  %v3173_v25 = vrot.slane %v1754_v9, 1 }
 0x268   : > { %v1986_v1 = vadd.f32 %v7383_v12, %v1907_v60  ;;  %v2097_v53 = vmul.f32 %v2033_v27, %v10217_v28  ;;  %v2287_v61 = vmul.f32 %v2223_v49, %v10217_v28  ;;  %v2477_v47 = vmul.f32 %v2413_v45, %v10217_v28  ;;  %v1509_v49 = vpop.f32.mrf.mxu2  ;;  %v1758_v45 = vpop.f32.mrf.mxu3 }
 0x269   : > { %v2667_v42 = vmul.f32 %v2603_v21, %v10217_v28  ;;  %v2857_v19 = vmul.f32 %v2793_v36, %v10217_v28  ;;  %v3047_v37 = vmul.f32 %v2983_v30, %v10217_v28  ;;  %v3237_v43 = vmul.f32 %v3173_v25, %v10217_v28  ;;  %1050 = vmatmul.bf16.gmra.mxu0 %v5835_v51  ;;  %v1013_v30 = vpop.f32.mrf.mxu0  ;;  %v1262_v25 = vpop.f32.mrf.mxu1 }
 0x26a   : > { %v2176_v33 = vadd.f32 %v7407_v50, %v2097_v53  ;;  %v2366_v5 = vadd.f32 %v7409_v18, %v2287_v61  ;;  %v2556_v12 = vadd.f32 %v7411_v6, %v2477_v47  ;;  %v1908_v41 = vmul.f32 %v1258_v32, %v10218_v54  ;;  %1548 = vmatmul.bf16.gmra.mxu2 %v5835_v51 }
 0x26b   : > { %v2746_v31 = vadd.f32 %v7413_v3, %v2667_v42  ;;  %v2936_v59 = vadd.f32 %v7421_v57, %v2857_v19  ;;  %v3126_v8 = vadd.f32 %v7423_v20, %v3047_v37  ;;  %v3316_v24 = vadd.f32 %v7425_v48, %v3237_v43  ;;  %v10219_v57 = vld [vmem:[#allocation10_spill] sm:$0xff] }
 0x26c   : > { %v1956_v15 = vadd.f32 %v7405_v0, %v1908_v41  ;;  %v2034_v23 = vrot.slane %v1258_v32, 7  ;;  %v2224_v29 = vrot.slane %v1258_v32, 6  ;;  %v2414_v50 = vrot.slane %v1258_v32, 5 }
 0x26d   : > { %v2604_v2 = vrot.slane %v1258_v32, 4  ;;  %v2794_v18 = vrot.slane %v1258_v32, 3  ;;  %v2984_v58 = vrot.slane %v1258_v32, 2  ;;  %v3174_v6 = vrot.slane %v1258_v32, 1 }
 0x26e   : > { %v2098_v52 = vmul.f32 %v2034_v23, %v10218_v54  ;;  %v2288_v62 = vmul.f32 %v2224_v29, %v10218_v54  ;;  %v2478_v3 = vmul.f32 %v2414_v50, %v10218_v54  ;;  %v1909_v20 = vmul.f32 %v7459_v46, %v10219_v57 }
 0x26f   : > { %v2668_v48 = vmul.f32 %v2604_v2, %v10218_v54  ;;  %v2858_v0 = vmul.f32 %v2794_v18, %v10218_v54  ;;  %v3048_v39 = vmul.f32 %v2984_v58, %v10218_v54  ;;  %v3238_v11 = vmul.f32 %v3174_v6, %v10218_v54  ;;  %v10221_v58 = vld [vmem:[#allocation12_spill] sm:$0xff] }
 0x270   : > { %v2146_v13 = vadd.f32 %v7442_v40, %v2098_v52  ;;  %v2336_v4 = vadd.f32 %v2335_v14, %v2288_v62  ;;  %v2526_v34 = vadd.f32 %v2525_v55, %v2478_v3  ;;  %v1987_v56 = vadd.f32 %v1986_v1, %v1909_v20  ;;  %v10220_v55 = vld [vmem:[#allocation11_spill] sm:$0xff] }
 0x271   : > { %v2716_v16 = vadd.f32 %v2715_v22, %v2668_v48  ;;  %v2906_v10 = vadd.f32 %v2905_v44, %v2858_v0  ;;  %v3096_v26 = vadd.f32 %v3095_v63, %v3048_v39  ;;  %v3286_v35 = vadd.f32 %v3285_v7, %v3238_v11 }
 0x272   : > { %v2035_v9 = vrot.slane %v7459_v46, 7  ;;  %v2225_v32 = vrot.slane %v7459_v46, 6  ;;  %v2415_v51 = vrot.slane %v7459_v46, 5  ;;  %v2605_v28 = vrot.slane %v7459_v46, 4  ;;  %1299 = vmatmul.bf16.gmra.mxu1 %v5839_v38  ;;  %1797 = vmatmul.bf16.gmra.mxu3 %v5839_v38 }
 0x273   : > { %v2795_v60 = vrot.slane %v7459_v46, 3  ;;  %v2985_v40 = vrot.slane %v7459_v46, 2  ;;  %v3175_v14 = vrot.slane %v7459_v46, 1  ;;  %v1910_v22 = vmul.f32 %v7461_v17, %v10220_v55 }
 0x274   : > { %v2099_v44 = vmul.f32 %v2035_v9, %v10219_v57  ;;  %v2289_v63 = vmul.f32 %v2225_v32, %v10219_v57  ;;  %v2479_v7 = vmul.f32 %v2415_v51, %v10219_v57  ;;  %v2669_v27 = vmul.f32 %v2605_v28, %v10219_v57  ;;  %v1511_v51 = vpop.f32.mrf.mxu2 }
 0x275   : > { %v2859_v38 = vmul.f32 %v2795_v60, %v10219_v57  ;;  %v3049_v21 = vmul.f32 %v2985_v40, %v10219_v57  ;;  %v3239_v36 = vmul.f32 %v3175_v14, %v10219_v57  ;;  %v1957_v46 = vadd.f32 %v1956_v15, %v1910_v22 }
 0x276   : > { %v2177_v1 = vadd.f32 %v2176_v33, %v2099_v44  ;;  %v2367_v53 = vadd.f32 %v2366_v5, %v2289_v63  ;;  %v2557_v61 = vadd.f32 %v2556_v12, %v2479_v7  ;;  %v2747_v47 = vadd.f32 %v2746_v31, %v2669_v27  ;;  %v10222_v44 = vld [vmem:[#allocation13_spill] sm:$0xff] }
 0x277   : > { %v2937_v42 = vadd.f32 %v2936_v59, %v2859_v38  ;;  %v3127_v19 = vadd.f32 %v3126_v8, %v3049_v21  ;;  %v3317_v37 = vadd.f32 %v3316_v24, %v3239_v36  ;;  %v2036_v43 = vrot.slane %v7461_v17, 7 }
 0x278   : > { %v2226_v54 = vrot.slane %v7461_v17, 6  ;;  %v2416_v41 = vrot.slane %v7461_v17, 5  ;;  %v2606_v23 = vrot.slane %v7461_v17, 4  ;;  %v2796_v29 = vrot.slane %v7461_v17, 3 }
 0x279   : > { %v2100_v15 = vmul.f32 %v2036_v43, %v10220_v55  ;;  %v2986_v33 = vrot.slane %v7461_v17, 2  ;;  %v3176_v5 = vrot.slane %v7461_v17, 1  ;;  %v1759_v12 = vadd.f32 %v1758_v45, %v1509_v49 }
 0x27a   : > { %v2290_v31 = vmul.f32 %v2226_v54, %v10220_v55  ;;  %v2480_v59 = vmul.f32 %v2416_v41, %v10220_v55  ;;  %v2670_v8 = vmul.f32 %v2606_v23, %v10220_v55  ;;  %v2860_v24 = vmul.f32 %v2796_v29, %v10220_v55 }
 0x27b   : > { %v2147_v50 = vadd.f32 %v2146_v13, %v2100_v15  ;;  %v3050_v2 = vmul.f32 %v2986_v33, %v10220_v55  ;;  %v3240_v18 = vmul.f32 %v3176_v5, %v10220_v55  ;;  %v1911_v6 = vmul.f32 %v1759_v12, %v10221_v58  ;;  %v1760_v13 = vpop.f32.mrf.mxu3  ;;  %v1016_v55 = vpop.f32.mrf.mxu0 }
 0x27c   : > { %v2337_v52 = vadd.f32 %v2336_v4, %v2290_v31  ;;  %v2527_v62 = vadd.f32 %v2526_v34, %v2480_v59  ;;  %v2717_v3 = vadd.f32 %v2716_v16, %v2670_v8  ;;  %v2907_v17 = vadd.f32 %v2906_v10, %v2860_v24  ;;  %v1265_v4 = vpop.f32.mrf.mxu1  ;;  %v7546_v24 = vpop.f32.mrf.mxu2 }
 0x27d   : > { %v3097_v57 = vadd.f32 %v3096_v26, %v3050_v2  ;;  %v3287_v20 = vadd.f32 %v3286_v35, %v3240_v18  ;;  %v1988_v48 = vadd.f32 %v1987_v56, %v1911_v6  ;;  %v2037_v0 = vrot.slane %v1759_v12, 7 }
 0x27e   : > { %v2227_v39 = vrot.slane %v1759_v12, 6  ;;  %v2417_v11 = vrot.slane %v1759_v12, 5  ;;  %v2607_v9 = vrot.slane %v1759_v12, 4  ;;  %v2797_v32 = vrot.slane %v1759_v12, 3 }
 0x27f   : > { %v2101_v28 = vmul.f32 %v2037_v0, %v10221_v58  ;;  %v2987_v60 = vrot.slane %v1759_v12, 2  ;;  %v3177_v40 = vrot.slane %v1759_v12, 1  ;;  %v1263_v14 = vadd.f32 %v1262_v25, %v1013_v30 }
 0x280   : > { %v2291_v34 = vmul.f32 %v2227_v39, %v10221_v58  ;;  %v2481_v16 = vmul.f32 %v2417_v11, %v10221_v58  ;;  %v2671_v56 = vmul.f32 %v2607_v9, %v10221_v58  ;;  %v2861_v10 = vmul.f32 %v2797_v32, %v10221_v58 }
 0x281   : > { %v2178_v26 = vadd.f32 %v2177_v1, %v2101_v28  ;;  %v3051_v35 = vmul.f32 %v2987_v60, %v10221_v58  ;;  %v3241_v22 = vmul.f32 %v3177_v40, %v10221_v58  ;;  %v1912_v63 = vmul.f32 %v1263_v14, %v10222_v44 }
 0x282   : > { %v2368_v7 = vadd.f32 %v2367_v53, %v2291_v34  ;;  %v2558_v27 = vadd.f32 %v2557_v61, %v2481_v16  ;;  %v2748_v49 = vadd.f32 %v2747_v47, %v2671_v56  ;;  %v2938_v45 = vadd.f32 %v2937_v42, %v2861_v10  ;;  %v5842_v10 = vld [vmem:[%s10093_s1 + $0x210] sm:$0xf] }
 0x283   : > { %v3128_v38 = vadd.f32 %v3127_v19, %v3051_v35  ;;  %v3318_v21 = vadd.f32 %v3317_v37, %v3241_v22  ;;  %v1958_v36 = vadd.f32 %v1957_v46, %v1912_v63  ;;  %v2038_v30 = vrot.slane %v1263_v14, 7  ;;  %v10223_v37 = vld [vmem:[#allocation14_spill] sm:$0xff]  ;;  %v7548_v2 = vpop.f32.mrf.mxu3  ;;  %v7552_v0 = vpop.f32.mrf.mxu0 }
 0x284   : > { %v2228_v25 = vrot.slane %v1263_v14, 6  ;;  %v2418_v43 = vrot.slane %v1263_v14, 5  ;;  %v2608_v54 = vrot.slane %v1263_v14, 4  ;;  %v2798_v41 = vrot.slane %v1263_v14, 3  ;;  %v1267_v39 = vpop.f32.mrf.mxu1 }
 0x285   : > { %v2102_v1 = vmul.f32 %v2038_v30, %v10222_v44  ;;  %v2988_v23 = vrot.slane %v1263_v14, 2  ;;  %v3178_v29 = vrot.slane %v1263_v14, 1  ;;  %v1761_v15 = vadd.f32 %v1760_v13, %v1511_v51  ;;  %v10224_v14 = vld [vmem:[#allocation15_spill] sm:$0xff] }
 0x286   : > { %v2292_v33 = vmul.f32 %v2228_v25, %v10222_v44  ;;  %v2482_v53 = vmul.f32 %v2418_v43, %v10222_v44  ;;  %v2672_v61 = vmul.f32 %v2608_v54, %v10222_v44  ;;  %v2862_v47 = vmul.f32 %v2798_v41, %v10222_v44  ;;  %v5844_v25 = vld [vmem:[%s10093_s1 + $0x218] sm:$0xf0] }
 0x287   : > { %v2148_v42 = vadd.f32 %v2147_v50, %v2102_v1  ;;  %v3052_v46 = vmul.f32 %v2988_v23, %v10222_v44  ;;  %v3242_v19 = vmul.f32 %v3178_v29, %v10222_v44  ;;  %v1913_v5 = vmul.f32 %v1761_v15, %v10223_v37  ;;  %v1516_v29 = vpop.f32.mrf.mxu2 }
 0x288   : > { %v7538_v12 = vadd.f32 %v2337_v52, %v2292_v33  ;;  %v7540_v31 = vadd.f32 %v2527_v62, %v2482_v53  ;;  %v7542_v59 = vadd.f32 %v2717_v3, %v2672_v61  ;;  %v7544_v8 = vadd.f32 %v2907_v17, %v2862_v47 }
 0x289   : > { %v3098_v18 = vadd.f32 %v3097_v57, %v3052_v46  ;;  %v3288_v50 = vadd.f32 %v3287_v20, %v3242_v19  ;;  %v7550_v58 = vadd.f32 %v1988_v48, %v1913_v5  ;;  %v2039_v6 = vrot.slane %v1761_v15, 7  ;;  %v6161_v5 = vld [vmem:[%s10093_s1 + $0x224] sm:$0xf0] }
 0x28a   : > { %v2229_v52 = vrot.slane %v1761_v15, 6  ;;  %v2419_v11 = vrot.slane %v1761_v15, 5  ;;  %v2609_v62 = vrot.slane %v1761_v15, 4  ;;  %v2799_v9 = vrot.slane %v1761_v15, 3 }
 0x28b   : > { %v2103_v3 = vmul.f32 %v2039_v6, %v10223_v37  ;;  %v2989_v17 = vrot.slane %v1761_v15, 2  ;;  %v3179_v32 = vrot.slane %v1761_v15, 1  ;;  %v1266_v51 = vadd.f32 %v1265_v4, %v1016_v55  ;;  %v1765_v15 = vpop.f32.mrf.mxu3  ;;  %v1021_v46 = vpop.f32.mrf.mxu0 }
 0x28c   : > { %v2293_v13 = vmul.f32 %v2229_v52, %v10223_v37  ;;  %v2483_v57 = vmul.f32 %v2419_v11, %v10223_v37  ;;  %v2673_v20 = vmul.f32 %v2609_v62, %v10223_v37  ;;  %v2863_v48 = vmul.f32 %v2799_v9, %v10223_v37  ;;  %v1270_v19 = vpop.f32.mrf.mxu1 }
 0x28d   : > { %v7559_v28 = vadd.f32 %v2178_v26, %v2103_v3  ;;  %v3053_v60 = vmul.f32 %v2989_v17, %v10223_v37  ;;  %v3243_v40 = vmul.f32 %v3179_v32, %v10223_v37  ;;  %v1914_v34 = vmul.f32 %v1266_v51, %v10224_v14  ;;  %v6159_v26 = vld [vmem:[%s10093_s1 + $0x214] sm:$0xf0]  ;;  %v5850_v37 = vld [vmem:[%s10093_s1 + $0x220] sm:$0xf] }
 0x28e   : > { %v7564_v16 = vadd.f32 %v2368_v7, %v2293_v13  ;;  %v7566_v56 = vadd.f32 %v2558_v27, %v2483_v57  ;;  %v7568_v55 = vadd.f32 %v2748_v49, %v2673_v20  ;;  %v7570_v4 = vadd.f32 %v2938_v45, %v2863_v48  ;;  %v6158_v7 = vld [vmem:[%s10093_s1 + $0x214] sm:$0xf] }
 0x28f   : > { %v7578_v35 = vadd.f32 %v3128_v38, %v3053_v60  ;;  %v7580_v22 = vadd.f32 %v3318_v21, %v3243_v40  ;;  %v7582_v44 = vadd.f32 %v1958_v36, %v1914_v34  ;;  %v2040_v63 = vrot.slane %v1266_v51, 7 }
 0x290   : > { %v2230_v27 = vrot.slane %v1266_v51, 6  ;;  %v2420_v49 = vrot.slane %v1266_v51, 5  ;;  %v2610_v45 = vrot.slane %v1266_v51, 4  ;;  %v2800_v30 = vrot.slane %v1266_v51, 3 }
 0x291   : > { %v2104_v38 = vmul.f32 %v2040_v63, %v10224_v14  ;;  %v2990_v43 = vrot.slane %v1266_v51, 2  ;;  %v3180_v21 = vrot.slane %v1266_v51, 1  ;;  %v5843_v54 = vor.u32 %v6159_v26, %v5842_v10  ;;  %v10226_v63 = vld [vmem:[#allocation17_spill] sm:$0xff] }
 0x292   : > { %v2294_v36 = vmul.f32 %v2230_v27, %v10224_v14  ;;  %v2484_v41 = vmul.f32 %v2420_v49, %v10224_v14  ;;  %v2674_v1 = vmul.f32 %v2610_v45, %v10224_v14  ;;  %v2864_v23 = vmul.f32 %v2800_v30, %v10224_v14 }
 0x293   : > { %v7595_v33 = vadd.f32 %v2148_v42, %v2104_v38  ;;  %v3054_v53 = vmul.f32 %v2990_v43, %v10224_v14  ;;  %v3244_v61 = vmul.f32 %v3180_v21, %v10224_v14  ;;  %1055 = vmatmul.bf16.gmra.mxu0 %v5843_v54  ;;  %v5847_v47 = vor.u32 %v6158_v7, %v5844_v25 }
 0x294   : > { %v2339_v6 = vadd.f32 %v7538_v12, %v2294_v36  ;;  %v2529_v42 = vadd.f32 %v7540_v31, %v2484_v41  ;;  %v2719_v52 = vadd.f32 %v7542_v59, %v2674_v1  ;;  %v2909_v11 = vadd.f32 %v7544_v8, %v2864_v23  ;;  %1553 = vmatmul.bf16.gmra.mxu2 %v5843_v54  ;;  %v10225_v31 = vld [vmem:[#allocation16_spill] sm:$0xff] }
 0x295   : > { %v3099_v62 = vadd.f32 %v3098_v18, %v3054_v53  ;;  %v3289_v9 = vadd.f32 %v3288_v50, %v3244_v61  ;;  %1304 = vmatmul.bf16.gmra.mxu1 %v5847_v47  ;;  %1802 = vmatmul.bf16.gmra.mxu3 %v5847_v47  ;;  %v1764_v3 = vadd.f32 %v7548_v2, %v7546_v24  ;;  %v7650_v47 = vpop.f32.mrf.mxu2 }
 0x296   : > { %v1268_v17 = vadd.f32 %v1267_v39, %v7552_v0  ;;  %v7612_v32 = vadd.f32 %v1765_v15, %v1516_v29  ;;  %v7614_v51 = vadd.f32 %v1270_v19, %v1021_v46  ;;  %v5851_v12 = vor.u32 %v6161_v5, %v5850_v37  ;;  %v7652_v46 = vpop.f32.mrf.mxu3 }
 0x297   : > { %v1915_v13 = vmul.f32 %v1764_v3, %v10225_v31  ;;  %v2041_v59 = vrot.slane %v1764_v3, 7  ;;  %v2231_v57 = vrot.slane %v1764_v3, 6  ;;  %v2421_v8 = vrot.slane %v1764_v3, 5 }
 0x298   : > { %v2611_v20 = vrot.slane %v1764_v3, 4  ;;  %v2801_v18 = vrot.slane %v1764_v3, 3  ;;  %v2991_v50 = vrot.slane %v1764_v3, 2  ;;  %v3181_v48 = vrot.slane %v1764_v3, 1 }
 0x299   : > { %v1990_v60 = vadd.f32 %v7550_v58, %v1915_v13  ;;  %v2105_v24 = vmul.f32 %v2041_v59, %v10225_v31  ;;  %v2295_v2 = vmul.f32 %v2231_v57, %v10225_v31  ;;  %v2485_v0 = vmul.f32 %v2421_v8, %v10225_v31 }
 0x29a   : > { %v2675_v39 = vmul.f32 %v2611_v20, %v10225_v31  ;;  %v2865_v40 = vmul.f32 %v2801_v18, %v10225_v31  ;;  %v3055_v14 = vmul.f32 %v2991_v50, %v10225_v31  ;;  %v3245_v34 = vmul.f32 %v3181_v48, %v10225_v31  ;;  %v1272_v31 = vpop.f32.mrf.mxu1 }
 0x29b   : > { %v2180_v10 = vadd.f32 %v7559_v28, %v2105_v24  ;;  %v2370_v26 = vadd.f32 %v7564_v16, %v2295_v2  ;;  %v2560_v58 = vadd.f32 %v7566_v56, %v2485_v0  ;;  %v1916_v7 = vmul.f32 %v1268_v17, %v10226_v63 }
 0x29c   : > { %v2750_v27 = vadd.f32 %v7568_v55, %v2675_v39  ;;  %v2940_v49 = vadd.f32 %v7570_v4, %v2865_v40  ;;  %v3130_v45 = vadd.f32 %v7578_v35, %v3055_v14  ;;  %v3320_v30 = vadd.f32 %v7580_v22, %v3245_v34  ;;  %v10227_v4 = vld [vmem:[#allocation18_spill] sm:$0xff]  ;;  %v5852_v40 = vld [vmem:[%s10093_s1 + $0x228] sm:$0xf0] }
 0x29d   : > { %v1960_v25 = vadd.f32 %v7582_v44, %v1916_v7  ;;  %v2042_v38 = vrot.slane %v1268_v17, 7  ;;  %v2232_v43 = vrot.slane %v1268_v17, 6  ;;  %v2422_v21 = vrot.slane %v1268_v17, 5  ;;  %v6160_v39 = vld [vmem:[%s10093_s1 + $0x224] sm:$0xf] }
 0x29e   : > { %v2612_v28 = vrot.slane %v1268_v17, 4  ;;  %v2802_v54 = vrot.slane %v1268_v17, 3  ;;  %v2992_v16 = vrot.slane %v1268_v17, 2  ;;  %v3182_v36 = vrot.slane %v1268_v17, 1  ;;  %v1023_v17 = vpop.f32.mrf.mxu0 }
 0x29f   : > { %v2106_v56 = vmul.f32 %v2042_v38, %v10226_v63  ;;  %v2296_v41 = vmul.f32 %v2232_v43, %v10226_v63  ;;  %v2486_v55 = vmul.f32 %v2422_v21, %v10226_v63  ;;  %v1917_v35 = vmul.f32 %v7612_v32, %v10227_v4 }
 0x2a0   : > { %v2676_v22 = vmul.f32 %v2612_v28, %v10226_v63  ;;  %v2866_v44 = vmul.f32 %v2802_v54, %v10226_v63  ;;  %v3056_v1 = vmul.f32 %v2992_v16, %v10226_v63  ;;  %v3246_v23 = vmul.f32 %v3182_v36, %v10226_v63  ;;  %v1521_v54 = vpop.f32.mrf.mxu2  ;;  %v1770_v16 = vpop.f32.mrf.mxu3  ;;  %v5858_v36 = vld [vmem:[%s10093_s1 + $0x230] sm:$0xf] }
 0x2a1   : > { %v2150_v29 = vadd.f32 %v7595_v33, %v2106_v56  ;;  %v7644_v15 = vadd.f32 %v2339_v6, %v2296_v41  ;;  %v7646_v53 = vadd.f32 %v2529_v42, %v2486_v55  ;;  %v7648_v61 = vadd.f32 %v1990_v60, %v1917_v35  ;;  %v6163_v35 = vld [vmem:[%s10093_s1 + $0x234] sm:$0xf0] }
 0x2a2   : > { %v2720_v19 = vadd.f32 %v2719_v52, %v2676_v22  ;;  %v2910_v37 = vadd.f32 %v2909_v11, %v2866_v44  ;;  %v3100_v5 = vadd.f32 %v3099_v62, %v3056_v1  ;;  %v3290_v3 = vadd.f32 %v3289_v9, %v3246_v23  ;;  %v10228_v11 = vld [vmem:[#allocation19_spill] sm:$0xff]  ;;  %v6162_v22 = vld [vmem:[%s10093_s1 + $0x234] sm:$0xf]  ;;  %v5860_v44 = vld [vmem:[%s10093_s1 + $0x238] sm:$0xf0] }
 0x2a3   : > { %v2043_v13 = vrot.slane %v7612_v32, 7  ;;  %v2233_v33 = vrot.slane %v7612_v32, 6  ;;  %v2423_v6 = vrot.slane %v7612_v32, 5  ;;  %v2613_v42 = vrot.slane %v7612_v32, 4  ;;  %1060 = vmatmul.bf16.gmra.mxu0 %v5851_v12 }
 0x2a4   : > { %v2803_v59 = vrot.slane %v7612_v32, 3  ;;  %v2993_v57 = vrot.slane %v7612_v32, 2  ;;  %v3183_v52 = vrot.slane %v7612_v32, 1  ;;  %v1918_v62 = vmul.f32 %v7614_v51, %v10228_v11  ;;  %1558 = vmatmul.bf16.gmra.mxu2 %v5851_v12 }
 0x2a5   : > { %v2107_v9 = vmul.f32 %v2043_v13, %v10227_v4  ;;  %v2297_v8 = vmul.f32 %v2233_v33, %v10227_v4  ;;  %v2487_v20 = vmul.f32 %v2423_v6, %v10227_v4  ;;  %v2677_v18 = vmul.f32 %v2613_v42, %v10227_v4 }
 0x2a6   : > { %v2867_v50 = vmul.f32 %v2803_v59, %v10227_v4  ;;  %v3057_v48 = vmul.f32 %v2993_v57, %v10227_v4  ;;  %v3247_v60 = vmul.f32 %v3183_v52, %v10227_v4  ;;  %v7670_v24 = vadd.f32 %v1960_v25, %v1918_v62  ;;  %v1026_v55 = vpop.f32.mrf.mxu0  ;;  %v1275_v4 = vpop.f32.mrf.mxu1 }
 0x2a7   : > { %v7672_v32 = vadd.f32 %v2180_v10, %v2107_v9  ;;  %v7674_v2 = vadd.f32 %v2370_v26, %v2297_v8  ;;  %v7676_v12 = vadd.f32 %v2560_v58, %v2487_v20  ;;  %v7678_v0 = vadd.f32 %v2750_v27, %v2677_v18  ;;  %v10229_v9 = vld [vmem:[#allocation20_spill] sm:$0xff] }
 0x2a8   : > { %v7686_v14 = vadd.f32 %v2940_v49, %v2867_v50  ;;  %v7688_v34 = vadd.f32 %v3130_v45, %v3057_v48  ;;  %v7690_v10 = vadd.f32 %v3320_v30, %v3247_v60  ;;  %v2044_v26 = vrot.slane %v7614_v51, 7 }
 0x2a9   : > { %v2234_v58 = vrot.slane %v7614_v51, 6  ;;  %v2424_v63 = vrot.slane %v7614_v51, 5  ;;  %v2614_v7 = vrot.slane %v7614_v51, 4  ;;  %v2804_v27 = vrot.slane %v7614_v51, 3 }
 0x2aa   : > { %v2108_v25 = vmul.f32 %v2044_v26, %v10228_v11  ;;  %v2994_v38 = vrot.slane %v7614_v51, 2  ;;  %v3184_v49 = vrot.slane %v7614_v51, 1  ;;  %v5855_v45 = vor.u32 %v6160_v39, %v5852_v40  ;;  %v10230_v26 = vld [vmem:[#allocation21_spill] sm:$0xff] }
 0x2ab   : > { %v2298_v30 = vmul.f32 %v2234_v58, %v10228_v11  ;;  %v2488_v43 = vmul.f32 %v2424_v63, %v10228_v11  ;;  %v2678_v21 = vmul.f32 %v2614_v7, %v10228_v11  ;;  %v2868_v28 = vmul.f32 %v2804_v27, %v10228_v11 }
 0x2ac   : > { %v7707_v56 = vadd.f32 %v2150_v29, %v2108_v25  ;;  %v3058_v41 = vmul.f32 %v2994_v38, %v10228_v11  ;;  %v3248_v51 = vmul.f32 %v3184_v49, %v10228_v11  ;;  %1309 = vmatmul.bf16.gmra.mxu1 %v5855_v45  ;;  %1807 = vmatmul.bf16.gmra.mxu3 %v5855_v45 }
 0x2ad   : > { %v2341_v1 = vadd.f32 %v7644_v15, %v2298_v30  ;;  %v2531_v23 = vadd.f32 %v7646_v53, %v2488_v43  ;;  %v2721_v29 = vadd.f32 %v2720_v19, %v2678_v21  ;;  %v2911_v13 = vadd.f32 %v2910_v37, %v2868_v28 }
 0x2ae   : > { %v3101_v33 = vadd.f32 %v3100_v5, %v3058_v41  ;;  %v3291_v6 = vadd.f32 %v3290_v3, %v3248_v51  ;;  %v1769_v42 = vadd.f32 %v7652_v46, %v7650_v47  ;;  %v1273_v59 = vadd.f32 %v1272_v31, %v1023_v17 }
 0x2af   : > { %v7724_v57 = vadd.f32 %v1770_v16, %v1521_v54  ;;  %v7726_v52 = vadd.f32 %v1275_v4, %v1026_v55  ;;  %v5859_v11 = vor.u32 %v6163_v35, %v5858_v36  ;;  %v5863_v62 = vor.u32 %v6162_v22, %v5860_v44 }
 0x2b0   : > { %v1919_v8 = vmul.f32 %v1769_v42, %v10229_v9  ;;  %v2045_v20 = vrot.slane %v1769_v42, 7  ;;  %v2235_v15 = vrot.slane %v1769_v42, 6  ;;  %v2425_v18 = vrot.slane %v1769_v42, 5 }
 0x2b1   : > { %v2615_v53 = vrot.slane %v1769_v42, 4  ;;  %v2805_v19 = vrot.slane %v1769_v42, 3  ;;  %v2995_v37 = vrot.slane %v1769_v42, 2  ;;  %v3185_v5 = vrot.slane %v1769_v42, 1 }
 0x2b2   : > { %v1992_v3 = vadd.f32 %v7648_v61, %v1919_v8  ;;  %v2109_v47 = vmul.f32 %v2045_v20, %v10229_v9  ;;  %v2299_v46 = vmul.f32 %v2235_v15, %v10229_v9  ;;  %v2489_v17 = vmul.f32 %v2425_v18, %v10229_v9  ;;  %v1524_v15 = vpop.f32.mrf.mxu2  ;;  %v1773_v18 = vpop.f32.mrf.mxu3 }
 0x2b3   : > { %v2679_v31 = vmul.f32 %v2615_v53, %v10229_v9  ;;  %v2869_v50 = vmul.f32 %v2805_v19, %v10229_v9  ;;  %v3059_v48 = vmul.f32 %v2995_v37, %v10229_v9  ;;  %v3249_v60 = vmul.f32 %v3185_v5, %v10229_v9  ;;  %1065 = vmatmul.bf16.gmra.mxu0 %v5859_v11  ;;  %v1028_v37 = vpop.f32.mrf.mxu0  ;;  %v1277_v5 = vpop.f32.mrf.mxu1 }
 0x2b4   : > { %v2182_v39 = vadd.f32 %v7672_v32, %v2109_v47  ;;  %v2372_v40 = vadd.f32 %v7674_v2, %v2299_v46  ;;  %v2562_v61 = vadd.f32 %v7676_v12, %v2489_v17  ;;  %v1920_v58 = vmul.f32 %v1273_v59, %v10230_v26  ;;  %1563 = vmatmul.bf16.gmra.mxu2 %v5859_v11 }
 0x2b5   : > { %v2752_v63 = vadd.f32 %v7678_v0, %v2679_v31  ;;  %v2942_v7 = vadd.f32 %v7686_v14, %v2869_v50  ;;  %v3132_v27 = vadd.f32 %v7688_v34, %v3059_v48  ;;  %v3322_v25 = vadd.f32 %v7690_v10, %v3249_v60  ;;  %v10231_v14 = vld [vmem:[#allocation22_spill] sm:$0xff] }
 0x2b6   : > { %v1962_v38 = vadd.f32 %v7670_v24, %v1920_v58  ;;  %v2046_v49 = vrot.slane %v1273_v59, 7  ;;  %v2236_v45 = vrot.slane %v1273_v59, 6  ;;  %v2426_v32 = vrot.slane %v1273_v59, 5 }
 0x2b7   : > { %v2616_v30 = vrot.slane %v1273_v59, 4  ;;  %v2806_v2 = vrot.slane %v1273_v59, 3  ;;  %v2996_v43 = vrot.slane %v1273_v59, 2  ;;  %v3186_v12 = vrot.slane %v1273_v59, 1 }
 0x2b8   : > { %v2110_v21 = vmul.f32 %v2046_v49, %v10230_v26  ;;  %v2300_v28 = vmul.f32 %v2236_v45, %v10230_v26  ;;  %v2490_v0 = vmul.f32 %v2426_v32, %v10230_v26  ;;  %v1921_v34 = vmul.f32 %v7724_v57, %v10231_v14 }
 0x2b9   : > { %v2680_v10 = vmul.f32 %v2616_v30, %v10230_v26  ;;  %v2870_v24 = vmul.f32 %v2806_v2, %v10230_v26  ;;  %v3060_v54 = vmul.f32 %v2996_v43, %v10230_v26  ;;  %v3250_v16 = vmul.f32 %v3186_v12, %v10230_v26  ;;  %v10233_v43 = vld [vmem:[#allocation24_spill] sm:$0xff] }
 0x2ba   : > { %v2152_v36 = vadd.f32 %v7707_v56, %v2110_v21  ;;  %v2342_v41 = vadd.f32 %v2341_v1, %v2300_v28  ;;  %v2532_v51 = vadd.f32 %v2531_v23, %v2490_v0  ;;  %v1993_v55 = vadd.f32 %v1992_v3, %v1921_v34  ;;  %v10232_v23 = vld [vmem:[#allocation23_spill] sm:$0xff] }
 0x2bb   : > { %v2722_v4 = vadd.f32 %v2721_v29, %v2680_v10  ;;  %v2912_v35 = vadd.f32 %v2911_v13, %v2870_v24  ;;  %v3102_v22 = vadd.f32 %v3101_v33, %v3060_v54  ;;  %v3292_v44 = vadd.f32 %v3291_v6, %v3250_v16 }
 0x2bc   : > { %v2047_v42 = vrot.slane %v7724_v57, 7  ;;  %v2237_v59 = vrot.slane %v7724_v57, 6  ;;  %v2427_v11 = vrot.slane %v7724_v57, 5  ;;  %v2617_v9 = vrot.slane %v7724_v57, 4  ;;  %1314 = vmatmul.bf16.gmra.mxu1 %v5863_v62  ;;  %1812 = vmatmul.bf16.gmra.mxu3 %v5863_v62 }
 0x2bd   : > { %v2807_v8 = vrot.slane %v7724_v57, 3  ;;  %v2997_v56 = vrot.slane %v7724_v57, 2  ;;  %v3187_v1 = vrot.slane %v7724_v57, 1  ;;  %v1922_v29 = vmul.f32 %v7726_v52, %v10232_v23 }
 0x2be   : > { %v2111_v13 = vmul.f32 %v2047_v42, %v10231_v14  ;;  %v2301_v33 = vmul.f32 %v2237_v59, %v10231_v14  ;;  %v2491_v6 = vmul.f32 %v2427_v11, %v10231_v14  ;;  %v2681_v20 = vmul.f32 %v2617_v9, %v10231_v14  ;;  %v1526_v11 = vpop.f32.mrf.mxu2 }
 0x2bf   : > { %v2871_v62 = vmul.f32 %v2807_v8, %v10231_v14  ;;  %v3061_v53 = vmul.f32 %v2997_v56, %v10231_v14  ;;  %v3251_v19 = vmul.f32 %v3187_v1, %v10231_v14  ;;  %v1963_v57 = vadd.f32 %v1962_v38, %v1922_v29 }
 0x2c0   : > { %v2183_v3 = vadd.f32 %v2182_v39, %v2111_v13  ;;  %v2373_v47 = vadd.f32 %v2372_v40, %v2301_v33  ;;  %v2563_v46 = vadd.f32 %v2562_v61, %v2491_v6  ;;  %v2753_v17 = vadd.f32 %v2752_v63, %v2681_v20  ;;  %v10234_v13 = vld [vmem:[#allocation25_spill] sm:$0xff] }
 0x2c1   : > { %v2943_v31 = vadd.f32 %v2942_v7, %v2871_v62  ;;  %v3133_v50 = vadd.f32 %v3132_v27, %v3061_v53  ;;  %v3323_v48 = vadd.f32 %v3322_v25, %v3251_v19  ;;  %v2048_v60 = vrot.slane %v7726_v52, 7 }
 0x2c2   : > { %v2238_v26 = vrot.slane %v7726_v52, 6  ;;  %v2428_v58 = vrot.slane %v7726_v52, 5  ;;  %v2618_v49 = vrot.slane %v7726_v52, 4  ;;  %v2808_v45 = vrot.slane %v7726_v52, 3 }
 0x2c3   : > { %v2112_v38 = vmul.f32 %v2048_v60, %v10232_v23  ;;  %v2998_v39 = vrot.slane %v7726_v52, 2  ;;  %v3188_v40 = vrot.slane %v7726_v52, 1  ;;  %v1774_v61 = vadd.f32 %v1773_v18, %v1524_v15 }
 0x2c4   : > { %v2302_v63 = vmul.f32 %v2238_v26, %v10232_v23  ;;  %v2492_v7 = vmul.f32 %v2428_v58, %v10232_v23  ;;  %v2682_v27 = vmul.f32 %v2618_v49, %v10232_v23  ;;  %v2872_v25 = vmul.f32 %v2808_v45, %v10232_v23 }
 0x2c5   : > { %v2153_v32 = vadd.f32 %v2152_v36, %v2112_v38  ;;  %v3062_v30 = vmul.f32 %v2998_v39, %v10232_v23  ;;  %v3252_v2 = vmul.f32 %v3188_v40, %v10232_v23  ;;  %v1923_v12 = vmul.f32 %v1774_v61, %v10233_v43  ;;  %v1775_v36 = vpop.f32.mrf.mxu3  ;;  %v1031_v23 = vpop.f32.mrf.mxu0 }
 0x2c6   : > { %v2343_v21 = vadd.f32 %v2342_v41, %v2302_v63  ;;  %v2533_v28 = vadd.f32 %v2532_v51, %v2492_v7  ;;  %v2723_v0 = vadd.f32 %v2722_v4, %v2682_v27  ;;  %v2913_v52 = vadd.f32 %v2912_v35, %v2872_v25  ;;  %v1280_v41 = vpop.f32.mrf.mxu1  ;;  %v7811_v25 = vpop.f32.mrf.mxu2 }
 0x2c7   : > { %v3103_v14 = vadd.f32 %v3102_v22, %v3062_v30  ;;  %v3293_v34 = vadd.f32 %v3292_v44, %v3252_v2  ;;  %v1994_v10 = vadd.f32 %v1993_v55, %v1923_v12  ;;  %v2049_v24 = vrot.slane %v1774_v61, 7 }
 0x2c8   : > { %v2239_v54 = vrot.slane %v1774_v61, 6  ;;  %v2429_v16 = vrot.slane %v1774_v61, 5  ;;  %v2619_v42 = vrot.slane %v1774_v61, 4  ;;  %v2809_v59 = vrot.slane %v1774_v61, 3 }
 0x2c9   : > { %v2113_v9 = vmul.f32 %v2049_v24, %v10233_v43  ;;  %v2999_v8 = vrot.slane %v1774_v61, 2  ;;  %v3189_v56 = vrot.slane %v1774_v61, 1  ;;  %v1278_v1 = vadd.f32 %v1277_v5, %v1028_v37 }
 0x2ca   : > { %v2303_v51 = vmul.f32 %v2239_v54, %v10233_v43  ;;  %v2493_v4 = vmul.f32 %v2429_v16, %v10233_v43  ;;  %v2683_v55 = vmul.f32 %v2619_v42, %v10233_v43  ;;  %v2873_v35 = vmul.f32 %v2809_v59, %v10233_v43 }
 0x2cb   : > { %v2184_v22 = vadd.f32 %v2183_v3, %v2113_v9  ;;  %v3063_v44 = vmul.f32 %v2999_v8, %v10233_v43  ;;  %v3253_v29 = vmul.f32 %v3189_v56, %v10233_v43  ;;  %v1924_v33 = vmul.f32 %v1278_v1, %v10234_v13 }
 0x2cc   : > { %v2374_v6 = vadd.f32 %v2373_v47, %v2303_v51  ;;  %v2564_v20 = vadd.f32 %v2563_v46, %v2493_v4  ;;  %v2754_v15 = vadd.f32 %v2753_v17, %v2683_v55  ;;  %v2944_v18 = vadd.f32 %v2943_v31, %v2873_v35  ;;  %v5866_v35 = vld [vmem:[%s10093_s1 + $0x240] sm:$0xf] }
 0x2cd   : > { %v3134_v62 = vadd.f32 %v3133_v50, %v3063_v44  ;;  %v3324_v53 = vadd.f32 %v3323_v48, %v3253_v29  ;;  %v1964_v19 = vadd.f32 %v1963_v57, %v1924_v33  ;;  %v2050_v37 = vrot.slane %v1278_v1, 7  ;;  %v10235_v48 = vld [vmem:[#allocation26_spill] sm:$0xff]  ;;  %v7813_v30 = vpop.f32.mrf.mxu3  ;;  %v7817_v24 = vpop.f32.mrf.mxu0 }
 0x2ce   : > { %v2240_v5 = vrot.slane %v1278_v1, 6  ;;  %v2430_v60 = vrot.slane %v1278_v1, 5  ;;  %v2620_v26 = vrot.slane %v1278_v1, 4  ;;  %v2810_v58 = vrot.slane %v1278_v1, 3  ;;  %v1282_v54 = vpop.f32.mrf.mxu1 }
 0x2cf   : > { %v2114_v3 = vmul.f32 %v2050_v37, %v10234_v13  ;;  %v3000_v49 = vrot.slane %v1278_v1, 2  ;;  %v3190_v45 = vrot.slane %v1278_v1, 1  ;;  %v1776_v38 = vadd.f32 %v1775_v36, %v1526_v11  ;;  %v10236_v1 = vld [vmem:[#allocation27_spill] sm:$0xff] }
 0x2d0   : > { %v2304_v39 = vmul.f32 %v2240_v5, %v10234_v13  ;;  %v2494_v47 = vmul.f32 %v2430_v60, %v10234_v13  ;;  %v2684_v46 = vmul.f32 %v2620_v26, %v10234_v13  ;;  %v2874_v17 = vmul.f32 %v2810_v58, %v10234_v13  ;;  %v5868_v5 = vld [vmem:[%s10093_s1 + $0x248] sm:$0xf0] }
 0x2d1   : > { %v2154_v31 = vadd.f32 %v2153_v32, %v2114_v3  ;;  %v3064_v57 = vmul.f32 %v3000_v49, %v10234_v13  ;;  %v3254_v50 = vmul.f32 %v3190_v45, %v10234_v13  ;;  %v1925_v40 = vmul.f32 %v1776_v38, %v10235_v48  ;;  %v1531_v45 = vpop.f32.mrf.mxu2 }
 0x2d2   : > { %v7803_v61 = vadd.f32 %v2343_v21, %v2304_v39  ;;  %v7805_v63 = vadd.f32 %v2533_v28, %v2494_v47  ;;  %v7807_v7 = vadd.f32 %v2723_v0, %v2684_v46  ;;  %v7809_v27 = vadd.f32 %v2913_v52, %v2874_v17 }
 0x2d3   : > { %v3104_v2 = vadd.f32 %v3103_v14, %v3064_v57  ;;  %v3294_v32 = vadd.f32 %v3293_v34, %v3254_v50  ;;  %v7815_v43 = vadd.f32 %v1994_v10, %v1925_v40  ;;  %v2051_v12 = vrot.slane %v1776_v38, 7  ;;  %v6167_v40 = vld [vmem:[%s10093_s1 + $0x254] sm:$0xf0] }
 0x2d4   : > { %v2241_v21 = vrot.slane %v1776_v38, 6  ;;  %v2431_v16 = vrot.slane %v1776_v38, 5  ;;  %v2621_v28 = vrot.slane %v1776_v38, 4  ;;  %v2811_v42 = vrot.slane %v1776_v38, 3 }
 0x2d5   : > { %v2115_v0 = vmul.f32 %v2051_v12, %v10235_v48  ;;  %v3001_v52 = vrot.slane %v1776_v38, 2  ;;  %v3191_v59 = vrot.slane %v1776_v38, 1  ;;  %v1281_v11 = vadd.f32 %v1280_v41, %v1031_v23  ;;  %v1780_v38 = vpop.f32.mrf.mxu3  ;;  %v1036_v57 = vpop.f32.mrf.mxu0 }
 0x2d6   : > { %v2305_v36 = vmul.f32 %v2241_v21, %v10235_v48  ;;  %v2495_v14 = vmul.f32 %v2431_v16, %v10235_v48  ;;  %v2685_v34 = vmul.f32 %v2621_v28, %v10235_v48  ;;  %v2875_v10 = vmul.f32 %v2811_v42, %v10235_v48  ;;  %v1285_v50 = vpop.f32.mrf.mxu1 }
 0x2d7   : > { %v7824_v9 = vadd.f32 %v2184_v22, %v2115_v0  ;;  %v3065_v8 = vmul.f32 %v3001_v52, %v10235_v48  ;;  %v3255_v56 = vmul.f32 %v3191_v59, %v10235_v48  ;;  %v1926_v51 = vmul.f32 %v1281_v11, %v10236_v1  ;;  %v6165_v22 = vld [vmem:[%s10093_s1 + $0x244] sm:$0xf0]  ;;  %v5874_v48 = vld [vmem:[%s10093_s1 + $0x250] sm:$0xf] }
 0x2d8   : > { %v7829_v4 = vadd.f32 %v2374_v6, %v2305_v36  ;;  %v7831_v55 = vadd.f32 %v2564_v20, %v2495_v14  ;;  %v7833_v23 = vadd.f32 %v2754_v15, %v2685_v34  ;;  %v7835_v41 = vadd.f32 %v2944_v18, %v2875_v10  ;;  %v6164_v6 = vld [vmem:[%s10093_s1 + $0x244] sm:$0xf] }
 0x2d9   : > { %v7843_v44 = vadd.f32 %v3134_v62, %v3065_v8  ;;  %v7845_v29 = vadd.f32 %v3324_v53, %v3255_v56  ;;  %v7847_v13 = vadd.f32 %v1964_v19, %v1926_v51  ;;  %v2052_v33 = vrot.slane %v1281_v11, 7 }
 0x2da   : > { %v2242_v20 = vrot.slane %v1281_v11, 6  ;;  %v2432_v15 = vrot.slane %v1281_v11, 5  ;;  %v2622_v18 = vrot.slane %v1281_v11, 4  ;;  %v2812_v37 = vrot.slane %v1281_v11, 3 }
 0x2db   : > { %v2116_v62 = vmul.f32 %v2052_v33, %v10236_v1  ;;  %v3002_v60 = vrot.slane %v1281_v11, 2  ;;  %v3192_v53 = vrot.slane %v1281_v11, 1  ;;  %v5867_v26 = vor.u32 %v6165_v22, %v5866_v35  ;;  %v10238_v33 = vld [vmem:[#allocation29_spill] sm:$0xff] }
 0x2dc   : > { %v2306_v19 = vmul.f32 %v2242_v20, %v10236_v1  ;;  %v2496_v58 = vmul.f32 %v2432_v15, %v10236_v1  ;;  %v2686_v3 = vmul.f32 %v2622_v18, %v10236_v1  ;;  %v2876_v49 = vmul.f32 %v2812_v37, %v10236_v1 }
 0x2dd   : > { %v7860_v39 = vadd.f32 %v2154_v31, %v2116_v62  ;;  %v3066_v47 = vmul.f32 %v3002_v60, %v10236_v1  ;;  %v3256_v46 = vmul.f32 %v3192_v53, %v10236_v1  ;;  %1070 = vmatmul.bf16.gmra.mxu0 %v5867_v26  ;;  %v5871_v17 = vor.u32 %v6164_v6, %v5868_v5 }
 0x2de   : > { %v2345_v12 = vadd.f32 %v7803_v61, %v2306_v19  ;;  %v2535_v31 = vadd.f32 %v7805_v63, %v2496_v58  ;;  %v2725_v21 = vadd.f32 %v7807_v7, %v2686_v3  ;;  %v2915_v16 = vadd.f32 %v7809_v27, %v2876_v49  ;;  %1568 = vmatmul.bf16.gmra.mxu2 %v5867_v26  ;;  %v10237_v63 = vld [vmem:[#allocation28_spill] sm:$0xff]  ;;  %v7904_v3 = vpop.f32.mrf.mxu2 }
 0x2df   : > { %v3105_v28 = vadd.f32 %v3104_v2, %v3066_v47  ;;  %v3295_v42 = vadd.f32 %v3294_v32, %v3256_v46  ;;  %1319 = vmatmul.bf16.gmra.mxu1 %v5871_v17  ;;  %1817 = vmatmul.bf16.gmra.mxu3 %v5871_v17  ;;  %v1779_v0 = vadd.f32 %v7813_v30, %v7811_v25 }
 0x2e0   : > { %v1283_v52 = vadd.f32 %v1282_v54, %v7817_v24  ;;  %v7877_v59 = vadd.f32 %v1780_v38, %v1531_v45  ;;  %v7879_v11 = vadd.f32 %v1285_v50, %v1036_v57  ;;  %v5875_v61 = vor.u32 %v6167_v40, %v5874_v48 }
 0x2e1   : > { %v1927_v36 = vmul.f32 %v1779_v0, %v10237_v63  ;;  %v2053_v7 = vrot.slane %v1779_v0, 7  ;;  %v2243_v14 = vrot.slane %v1779_v0, 6  ;;  %v2433_v27 = vrot.slane %v1779_v0, 5 }
 0x2e2   : > { %v2623_v34 = vrot.slane %v1779_v0, 4  ;;  %v2813_v2 = vrot.slane %v1779_v0, 3  ;;  %v3003_v32 = vrot.slane %v1779_v0, 2  ;;  %v3193_v10 = vrot.slane %v1779_v0, 1 }
 0x2e3   : > { %v1996_v8 = vadd.f32 %v7815_v43, %v1927_v36  ;;  %v2117_v25 = vmul.f32 %v2053_v7, %v10237_v63  ;;  %v2307_v30 = vmul.f32 %v2243_v14, %v10237_v63  ;;  %v2497_v24 = vmul.f32 %v2433_v27, %v10237_v63 }
 0x2e4   : > { %v2687_v54 = vmul.f32 %v2623_v34, %v10237_v63  ;;  %v2877_v56 = vmul.f32 %v2813_v2, %v10237_v63  ;;  %v3067_v1 = vmul.f32 %v3003_v32, %v10237_v63  ;;  %v3257_v51 = vmul.f32 %v3193_v10, %v10237_v63  ;;  %v1287_v63 = vpop.f32.mrf.mxu1 }
 0x2e5   : > { %v2186_v35 = vadd.f32 %v7824_v9, %v2117_v25  ;;  %v2376_v22 = vadd.f32 %v7829_v4, %v2307_v30  ;;  %v2566_v43 = vadd.f32 %v7831_v55, %v2497_v24  ;;  %v1928_v6 = vmul.f32 %v1283_v52, %v10238_v33 }
 0x2e6   : > { %v2756_v20 = vadd.f32 %v7833_v23, %v2687_v54  ;;  %v2946_v15 = vadd.f32 %v7835_v41, %v2877_v56  ;;  %v3136_v18 = vadd.f32 %v7843_v44, %v3067_v1  ;;  %v3326_v37 = vadd.f32 %v7845_v29, %v3257_v51  ;;  %v10239_v41 = vld [vmem:[#allocation30_spill] sm:$0xff]  ;;  %v7906_v29 = vpop.f32.mrf.mxu3  ;;  %v6166_v54 = vld [vmem:[%s10093_s1 + $0x254] sm:$0xf]  ;;  %v5876_v56 = vld [vmem:[%s10093_s1 + $0x258] sm:$0xf0] }
 0x2e7   : > { %v1966_v5 = vadd.f32 %v7847_v13, %v1928_v6  ;;  %v2054_v62 = vrot.slane %v1283_v52, 7  ;;  %v2244_v60 = vrot.slane %v1283_v52, 6  ;;  %v2434_v53 = vrot.slane %v1283_v52, 5 }
 0x2e8   : > { %v2624_v9 = vrot.slane %v1283_v52, 4  ;;  %v2814_v26 = vrot.slane %v1283_v52, 3  ;;  %v3004_v4 = vrot.slane %v1283_v52, 2  ;;  %v3194_v19 = vrot.slane %v1283_v52, 1  ;;  %v1038_v52 = vpop.f32.mrf.mxu0 }
 0x2e9   : > { %v2118_v55 = vmul.f32 %v2054_v62, %v10238_v33  ;;  %v2308_v58 = vmul.f32 %v2244_v60, %v10238_v33  ;;  %v2498_v23 = vmul.f32 %v2434_v53, %v10238_v33  ;;  %v1929_v44 = vmul.f32 %v7877_v59, %v10239_v41 }
 0x2ea   : > { %v2688_v13 = vmul.f32 %v2624_v9, %v10238_v33  ;;  %v2878_v49 = vmul.f32 %v2814_v26, %v10238_v33  ;;  %v3068_v45 = vmul.f32 %v3004_v4, %v10238_v33  ;;  %v3258_v38 = vmul.f32 %v3194_v19, %v10238_v33  ;;  %v5882_v19 = vld [vmem:[%s10093_s1 + $0x260] sm:$0xf] }
 0x2eb   : > { %v2156_v47 = vadd.f32 %v7860_v39, %v2118_v55  ;;  %v2346_v46 = vadd.f32 %v2345_v12, %v2308_v58  ;;  %v2536_v17 = vadd.f32 %v2535_v31, %v2498_v23  ;;  %v7913_v57 = vadd.f32 %v1996_v8, %v1929_v44  ;;  %v6169_v44 = vld [vmem:[%s10093_s1 + $0x264] sm:$0xf0] }
 0x2ec   : > { %v2726_v50 = vadd.f32 %v2725_v21, %v2688_v13  ;;  %v2916_v48 = vadd.f32 %v2915_v16, %v2878_v49  ;;  %v3106_v40 = vadd.f32 %v3105_v28, %v3068_v45  ;;  %v3296_v0 = vadd.f32 %v3295_v42, %v3258_v38  ;;  %v10240_v21 = vld [vmem:[#allocation31_spill] sm:$0xff]  ;;  %v6168_v13 = vld [vmem:[%s10093_s1 + $0x264] sm:$0xf] }
 0x2ed   : > { %v2055_v36 = vrot.slane %v7877_v59, 7  ;;  %v2245_v7 = vrot.slane %v7877_v59, 6  ;;  %v2435_v14 = vrot.slane %v7877_v59, 5  ;;  %v2625_v27 = vrot.slane %v7877_v59, 4  ;;  %1075 = vmatmul.bf16.gmra.mxu0 %v5875_v61  ;;  %v5884_v49 = vld [vmem:[%s10093_s1 + $0x268] sm:$0xf0] }
 0x2ee   : > { %v2815_v39 = vrot.slane %v7877_v59, 3  ;;  %v3005_v12 = vrot.slane %v7877_v59, 2  ;;  %v3195_v31 = vrot.slane %v7877_v59, 1  ;;  %v1930_v16 = vmul.f32 %v7879_v11, %v10240_v21  ;;  %1573 = vmatmul.bf16.gmra.mxu2 %v5875_v61  ;;  %v1785_v62 = vpop.f32.mrf.mxu3 }
 0x2ef   : > { %v2119_v28 = vmul.f32 %v2055_v36, %v10239_v41  ;;  %v2309_v42 = vmul.f32 %v2245_v7, %v10239_v41  ;;  %v2499_v34 = vmul.f32 %v2435_v14, %v10239_v41  ;;  %v2689_v2 = vmul.f32 %v2625_v27, %v10239_v41 }
 0x2f0   : > { %v2879_v32 = vmul.f32 %v2815_v39, %v10239_v41  ;;  %v3069_v10 = vmul.f32 %v3005_v12, %v10239_v41  ;;  %v3259_v8 = vmul.f32 %v3195_v31, %v10239_v41  ;;  %v7931_v25 = vadd.f32 %v1966_v5, %v1930_v16  ;;  %v1536_v5 = vpop.f32.mrf.mxu2  ;;  %v1290_v41 = vpop.f32.mrf.mxu1 }
 0x2f1   : > { %v7933_v59 = vadd.f32 %v2186_v35, %v2119_v28  ;;  %v7935_v30 = vadd.f32 %v2376_v22, %v2309_v42  ;;  %v7937_v61 = vadd.f32 %v2566_v43, %v2499_v34  ;;  %v7939_v24 = vadd.f32 %v2756_v20, %v2689_v2  ;;  %v10241_v28 = vld [vmem:[#allocation32_spill] sm:$0xff] }
 0x2f2   : > { %v7947_v1 = vadd.f32 %v2946_v15, %v2879_v32  ;;  %v7949_v51 = vadd.f32 %v3136_v18, %v3069_v10  ;;  %v7951_v35 = vadd.f32 %v3326_v37, %v3259_v8  ;;  %v2056_v22 = vrot.slane %v7879_v11, 7 }
 0x2f3   : > { %v2246_v43 = vrot.slane %v7879_v11, 6  ;;  %v2436_v33 = vrot.slane %v7879_v11, 5  ;;  %v2626_v6 = vrot.slane %v7879_v11, 4  ;;  %v2816_v20 = vrot.slane %v7879_v11, 3 }
 0x2f4   : > { %v2120_v60 = vmul.f32 %v2056_v22, %v10240_v21  ;;  %v3006_v15 = vrot.slane %v7879_v11, 2  ;;  %v3196_v18 = vrot.slane %v7879_v11, 1  ;;  %v5879_v37 = vor.u32 %v6166_v54, %v5876_v56  ;;  %v1041_v11 = vpop.f32.mrf.mxu0 }
 0x2f5   : > { %v2310_v53 = vmul.f32 %v2246_v43, %v10240_v21  ;;  %v2500_v9 = vmul.f32 %v2436_v33, %v10240_v21  ;;  %v2690_v26 = vmul.f32 %v2626_v6, %v10240_v21  ;;  %v2880_v4 = vmul.f32 %v2816_v20, %v10240_v21  ;;  %v10242_v33 = vld [vmem:[#allocation33_spill] sm:$0xff] }
 0x2f6   : > { %v7968_v55 = vadd.f32 %v2156_v47, %v2120_v60  ;;  %v3070_v58 = vmul.f32 %v3006_v15, %v10240_v21  ;;  %v3260_v23 = vmul.f32 %v3196_v18, %v10240_v21  ;;  %1324 = vmatmul.bf16.gmra.mxu1 %v5879_v37  ;;  %1822 = vmatmul.bf16.gmra.mxu3 %v5879_v37  ;;  %v7998_v56 = vpop.f32.mrf.mxu3 }
 0x2f7   : > { %v2347_v45 = vadd.f32 %v2346_v46, %v2310_v53  ;;  %v2537_v38 = vadd.f32 %v2536_v17, %v2500_v9  ;;  %v2727_v47 = vadd.f32 %v2726_v50, %v2690_v26  ;;  %v2917_v36 = vadd.f32 %v2916_v48, %v2880_v4 }
 0x2f8   : > { %v3107_v7 = vadd.f32 %v3106_v40, %v3070_v58  ;;  %v3297_v14 = vadd.f32 %v3296_v0, %v3260_v23  ;;  %v1784_v27 = vadd.f32 %v7906_v29, %v7904_v3  ;;  %v1288_v39 = vadd.f32 %v1287_v63, %v1038_v52  ;;  %v7996_v54 = vpop.f32.mrf.mxu2  ;;  %v8011_v4 = vpop.f32.mrf.mxu1 }
 0x2f9   : > { %v7983_v12 = vadd.f32 %v1785_v62, %v1536_v5  ;;  %v7985_v31 = vadd.f32 %v1290_v41, %v1041_v11  ;;  %v5883_v21 = vor.u32 %v6169_v44, %v5882_v19  ;;  %v5887_v16 = vor.u32 %v6168_v13, %v5884_v49 }
 0x2fa   : > { %v1931_v42 = vmul.f32 %v1784_v27, %v10241_v28  ;;  %v2057_v34 = vrot.slane %v1784_v27, 7  ;;  %v2247_v2 = vrot.slane %v1784_v27, 6  ;;  %v2437_v46 = vrot.slane %v1784_v27, 5 }
 0x2fb   : > { %v2627_v17 = vrot.slane %v1784_v27, 4  ;;  %v2817_v50 = vrot.slane %v1784_v27, 3  ;;  %v3007_v48 = vrot.slane %v1784_v27, 2  ;;  %v3197_v40 = vrot.slane %v1784_v27, 1 }
 0x2fc   : > { %v1998_v0 = vadd.f32 %v7913_v57, %v1931_v42  ;;  %v2121_v3 = vmul.f32 %v2057_v34, %v10241_v28  ;;  %v2311_v29 = vmul.f32 %v2247_v2, %v10241_v28  ;;  %v2501_v52 = vmul.f32 %v2437_v46, %v10241_v28  ;;  %v8009_v26 = vpop.f32.mrf.mxu0 }
 0x2fd   : > { %v2691_v63 = vmul.f32 %v2627_v17, %v10241_v28  ;;  %v2881_v32 = vmul.f32 %v2817_v50, %v10241_v28  ;;  %v3071_v10 = vmul.f32 %v3007_v48, %v10241_v28  ;;  %v3261_v8 = vmul.f32 %v3197_v40, %v10241_v28  ;;  %1080 = vmatmul.bf16.gmra.mxu0 %v5883_v21 }
 0x2fe   : > { %v2188_v57 = vadd.f32 %v7933_v59, %v2121_v3  ;;  %v2378_v22 = vadd.f32 %v7935_v30, %v2311_v29  ;;  %v2568_v43 = vadd.f32 %v7937_v61, %v2501_v52  ;;  %v1932_v6 = vmul.f32 %v1288_v39, %v10242_v33  ;;  %1578 = vmatmul.bf16.gmra.mxu2 %v5883_v21 }
 0x2ff   : > { %v2758_v20 = vadd.f32 %v7939_v24, %v2691_v63  ;;  %v2948_v5 = vadd.f32 %v7947_v1, %v2881_v32  ;;  %v3138_v62 = vadd.f32 %v7949_v51, %v3071_v10  ;;  %v3328_v60 = vadd.f32 %v7951_v35, %v3261_v8  ;;  %v10243_v35 = vld [vmem:[#allocation34_spill] sm:$0xff] }
 0x300   : > { %v1968_v15 = vadd.f32 %v7931_v25, %v1932_v6  ;;  %v2058_v18 = vrot.slane %v1288_v39, 7  ;;  %v2248_v37 = vrot.slane %v1288_v39, 6  ;;  %v2438_v59 = vrot.slane %v1288_v39, 5 }
 0x301   : > { %v2628_v53 = vrot.slane %v1288_v39, 4  ;;  %v2818_v30 = vrot.slane %v1288_v39, 3  ;;  %v3008_v9 = vrot.slane %v1288_v39, 2  ;;  %v3198_v61 = vrot.slane %v1288_v39, 1 }
 0x302   : > { %v2122_v24 = vmul.f32 %v2058_v18, %v10242_v33  ;;  %v2312_v1 = vmul.f32 %v2248_v37, %v10242_v33  ;;  %v2502_v51 = vmul.f32 %v2438_v59, %v10242_v33  ;;  %v1933_v25 = vmul.f32 %v7983_v12, %v10243_v35  ;;  %v8048_v37 = vpop.f32.mrf.mxu1 }
 0x303   : > { %v2692_v19 = vmul.f32 %v2628_v53, %v10242_v33  ;;  %v2882_v58 = vmul.f32 %v2818_v30, %v10242_v33  ;;  %v3072_v23 = vmul.f32 %v3008_v9, %v10242_v33  ;;  %v3262_v11 = vmul.f32 %v3198_v61, %v10242_v33 }
 0x304   : > { %v2158_v41 = vadd.f32 %v7968_v55, %v2122_v24  ;;  %v2348_v44 = vadd.f32 %v2347_v45, %v2312_v1  ;;  %v2538_v13 = vadd.f32 %v2537_v38, %v2502_v51  ;;  %v1999_v49 = vadd.f32 %v1998_v0, %v1933_v25  ;;  %v10244_v38 = vld [vmem:[#allocation35_spill] sm:$0xff]  ;;  %v8046_v18 = vpop.f32.mrf.mxu0  ;;  %v10245_v51 = vld [vmem:[#allocation36_spill] sm:$0xff] }
 0x305   : > { %v2728_v27 = vadd.f32 %v2727_v47, %v2692_v19  ;;  %v2918_v39 = vadd.f32 %v2917_v36, %v2882_v58  ;;  %v3108_v21 = vadd.f32 %v3107_v7, %v3072_v23  ;;  %v3298_v28 = vadd.f32 %v3297_v14, %v3262_v11  ;;  %v8032_v36 = vpop.f32.mrf.mxu2  ;;  %v8034_v7 = vpop.f32.mrf.mxu3 }
 0x306   : > { %v2059_v42 = vrot.slane %v7983_v12, 7  ;;  %v2249_v34 = vrot.slane %v7983_v12, 6  ;;  %v2439_v2 = vrot.slane %v7983_v12, 5  ;;  %v2629_v46 = vrot.slane %v7983_v12, 4  ;;  %1329 = vmatmul.bf16.gmra.mxu1 %v5887_v16  ;;  %1827 = vmatmul.bf16.gmra.mxu3 %v5887_v16 }
 0x307   : > { %v2819_v17 = vrot.slane %v7983_v12, 3  ;;  %v3009_v55 = vrot.slane %v7983_v12, 2  ;;  %v3199_v45 = vrot.slane %v7983_v12, 1  ;;  %v1934_v47 = vmul.f32 %v7985_v31, %v10244_v38 }
 0x308   : > { %v2123_v14 = vmul.f32 %v2059_v42, %v10243_v35  ;;  %v2313_v50 = vmul.f32 %v2249_v34, %v10243_v35  ;;  %v2503_v48 = vmul.f32 %v2439_v2, %v10243_v35  ;;  %v2693_v16 = vmul.f32 %v2629_v46, %v10243_v35 }
 0x309   : > { %v2883_v40 = vmul.f32 %v2819_v17, %v10243_v35  ;;  %v3073_v0 = vmul.f32 %v3009_v55, %v10243_v35  ;;  %v3263_v12 = vmul.f32 %v3199_v45, %v10243_v35  ;;  %v8043_v3 = vadd.f32 %v1968_v15, %v1934_v47  ;;  %v10246_v45 = vld [vmem:[#allocation37_spill] sm:$0xff] }
 0x30a   : > { %v2189_v29 = vadd.f32 %v2188_v57, %v2123_v14  ;;  %v2379_v52 = vadd.f32 %v2378_v22, %v2313_v50  ;;  %v2569_v63 = vadd.f32 %v2568_v43, %v2503_v48  ;;  %v2759_v32 = vadd.f32 %v2758_v20, %v2693_v16 }
 0x30b   : > { %v2949_v10 = vadd.f32 %v2948_v5, %v2883_v40  ;;  %v3139_v8 = vadd.f32 %v3138_v62, %v3073_v0  ;;  %v3329_v33 = vadd.f32 %v3328_v60, %v3263_v12  ;;  %v2060_v6 = vrot.slane %v7985_v31, 7  ;;  %v8089_v40 = vpop.f32.mrf.mxu1 }
 0x30c   : > { %v2250_v59 = vrot.slane %v7985_v31, 6  ;;  %v2440_v53 = vrot.slane %v7985_v31, 5  ;;  %v2630_v15 = vrot.slane %v7985_v31, 4  ;;  %v2820_v57 = vrot.slane %v7985_v31, 3  ;;  %v8087_v16 = vpop.f32.mrf.mxu0 }
 0x30d   : > { %v2124_v22 = vmul.f32 %v2060_v6, %v10244_v38  ;;  %v3010_v43 = vrot.slane %v7985_v31, 2  ;;  %v3200_v20 = vrot.slane %v7985_v31, 1  ;;  %v1789_v5 = vadd.f32 %v7998_v56, %v7996_v54  ;;  %v8072_v42 = vpop.f32.mrf.mxu2 }
 0x30e   : > { %v2314_v62 = vmul.f32 %v2250_v59, %v10244_v38  ;;  %v2504_v60 = vmul.f32 %v2440_v53, %v10244_v38  ;;  %v2694_v30 = vmul.f32 %v2630_v15, %v10244_v38  ;;  %v2884_v9 = vmul.f32 %v2820_v57, %v10244_v38  ;;  %v10248_v53 = vld [vmem:[#allocation45_spill] sm:$0xff] }
 0x30f   : > { %v2159_v61 = vadd.f32 %v2158_v41, %v2124_v22  ;;  %v3074_v24 = vmul.f32 %v3010_v43, %v10244_v38  ;;  %v3264_v1 = vmul.f32 %v3200_v20, %v10244_v38  ;;  %v1935_v35 = vmul.f32 %v1789_v5, %v10245_v51  ;;  %v8074_v41 = vpop.f32.mrf.mxu3  ;;  %v10247_v38 = vld [vmem:[#allocation38_spill] sm:$0xff] }
 0x310   : > { %v2349_v25 = vadd.f32 %v2348_v44, %v2314_v62  ;;  %v2539_v31 = vadd.f32 %v2538_v13, %v2504_v60  ;;  %v2729_v19 = vadd.f32 %v2728_v27, %v2694_v30  ;;  %v2919_v58 = vadd.f32 %v2918_v39, %v2884_v9 }
 0x311   : > { %v8066_v54 = vadd.f32 %v3108_v21, %v3074_v24  ;;  %v8068_v56 = vadd.f32 %v3298_v28, %v3264_v1  ;;  %v8070_v23 = vadd.f32 %v1999_v49, %v1935_v35  ;;  %v2061_v11 = vrot.slane %v1789_v5, 7 }
 0x312   : > { %v2251_v34 = vrot.slane %v1789_v5, 6  ;;  %v2441_v2 = vrot.slane %v1789_v5, 5  ;;  %v2631_v46 = vrot.slane %v1789_v5, 4  ;;  %v2821_v17 = vrot.slane %v1789_v5, 3 }
 0x313   : > { %v2125_v44 = vmul.f32 %v2061_v11, %v10245_v51  ;;  %v3011_v13 = vrot.slane %v1789_v5, 2  ;;  %v3201_v27 = vrot.slane %v1789_v5, 1  ;;  %v1293_v39 = vadd.f32 %v8011_v4, %v8009_v26 }
 0x314   : > { %v2315_v21 = vmul.f32 %v2251_v34, %v10245_v51  ;;  %v2505_v49 = vmul.f32 %v2441_v2, %v10245_v51  ;;  %v2695_v28 = vmul.f32 %v2631_v46, %v10245_v51  ;;  %v2885_v55 = vmul.f32 %v2821_v17, %v10245_v51 }
 0x315   : > { %v1711_v47 = vadd.f32 %v10247_v38, %v10246_v45  ;;  %v2190_v14 = vadd.f32 %v2189_v29, %v2125_v44  ;;  %v3075_v50 = vmul.f32 %v3011_v13, %v10245_v51  ;;  %v3265_v48 = vmul.f32 %v3201_v27, %v10245_v51  ;;  %v8106_v9 = vpop.f32.mrf.mxu2  ;;  %v10249_v38 = vld [vmem:[#allocation39_spill] sm:$0xff] }
 0x316   : > { %v2380_v26 = vadd.f32 %v2379_v52, %v2315_v21  ;;  %v2570_v4 = vadd.f32 %v2569_v63, %v2505_v49  ;;  %v2760_v0 = vadd.f32 %v2759_v32, %v2695_v28  ;;  %v8091_v12 = vadd.f32 %v2949_v10, %v2885_v55  ;;  %v8116_v21 = vpop.f32.mrf.mxu1 }
 0x317   : > { %v8093_v6 = vadd.f32 %v3139_v8, %v3075_v50  ;;  %v8095_v59 = vadd.f32 %v3329_v33, %v3265_v48  ;;  %v1936_v15 = vmul.f32 %v1293_v39, %v10248_v53  ;;  %v2062_v29 = vrot.slane %v1293_v39, 7  ;;  %v8108_v24 = vpop.f32.mrf.mxu3 }
 0x318   : > { %v2252_v57 = vrot.slane %v1293_v39, 6  ;;  %v2442_v22 = vrot.slane %v1293_v39, 5  ;;  %v2632_v43 = vrot.slane %v1293_v39, 4  ;;  %v2822_v20 = vrot.slane %v1293_v39, 3 }
 0x319   : > { %v2126_v5 = vmul.f32 %v2062_v29, %v10248_v53  ;;  %v3012_v62 = vrot.slane %v1293_v39, 2  ;;  %v3202_v60 = vrot.slane %v1293_v39, 1  ;;  %v1791_v52 = vadd.f32 %v8034_v7, %v8032_v36 }
 0x31a   : > { %v2316_v63 = vmul.f32 %v2252_v57, %v10248_v53  ;;  %v2506_v32 = vmul.f32 %v2442_v22, %v10248_v53  ;;  %v2696_v10 = vmul.f32 %v2632_v43, %v10248_v53  ;;  %v2886_v8 = vmul.f32 %v2822_v20, %v10248_v53  ;;  %v5892_v20 = vld [vmem:[%s10093_s1 + $0x278] sm:$0xf0] }
 0x31b   : > { %v1970_v33 = vadd.f32 %v8043_v3, %v1936_v15  ;;  %v2160_v30 = vadd.f32 %v2159_v61, %v2126_v5  ;;  %v3076_v51 = vmul.f32 %v3012_v62, %v10248_v53  ;;  %v3266_v36 = vmul.f32 %v3202_v60, %v10248_v53  ;;  %v6171_v15 = vld [vmem:[%s10093_s1 + $0x274] sm:$0xf0] }
 0x31c   : > { %v2350_v1 = vadd.f32 %v2349_v25, %v2316_v63  ;;  %v1937_v7 = vmul.f32 %v1791_v52, %v1711_v47  ;;  %v2540_v35 = vadd.f32 %v2539_v31, %v2506_v32  ;;  %v2730_v11 = vadd.f32 %v2729_v19, %v2696_v10  ;;  %v8114_v25 = vpop.f32.mrf.mxu0 }
 0x31d   : > { %v2920_v34 = vadd.f32 %v2919_v58, %v2886_v8  ;;  %v2063_v2 = vrot.slane %v1791_v52, 7  ;;  %v2253_v46 = vrot.slane %v1791_v52, 6  ;;  %v2443_v17 = vrot.slane %v1791_v52, 5  ;;  %v8143_v60 = vpop.f32.mrf.mxu2 }
 0x31e   : > { %v2633_v44 = vrot.slane %v1791_v52, 4  ;;  %v2823_v13 = vrot.slane %v1791_v52, 3  ;;  %v3013_v61 = vrot.slane %v1791_v52, 2  ;;  %v3203_v27 = vrot.slane %v1791_v52, 1 }
 0x31f   : > { %v2127_v3 = vmul.f32 %v2063_v2, %v1711_v47  ;;  %v1296_v39 = vadd.f32 %v8048_v37, %v8046_v18  ;;  %v3110_v49 = vadd.f32 %v8066_v54, %v3076_v51  ;;  %v2317_v31 = vmul.f32 %v2253_v46, %v1711_v47  ;;  %v5890_v54 = vld [vmem:[%s10093_s1 + $0x270] sm:$0xf]  ;;  %v8145_v52 = vpop.f32.mrf.mxu3  ;;  %v8157_v46 = vpop.f32.mrf.mxu1 }
 0x320   : > { %v2507_v19 = vmul.f32 %v2443_v17, %v1711_v47  ;;  %v2697_v58 = vmul.f32 %v2633_v44, %v1711_v47  ;;  %v3300_v28 = vadd.f32 %v8068_v56, %v3266_v36  ;;  %v2001_v55 = vadd.f32 %v8070_v23, %v1937_v7 }
 0x321   : > { %v2887_v45 = vmul.f32 %v2823_v13, %v1711_v47  ;;  %v1938_v50 = vmul.f32 %v1296_v39, %v10249_v38  ;;  %v8122_v48 = vadd.f32 %v2190_v14, %v2127_v3  ;;  %v8124_v53 = vadd.f32 %v2380_v26, %v2317_v31  ;;  %v6170_v14 = vld [vmem:[%s10093_s1 + $0x274] sm:$0xf] }
 0x322   : > { %v3077_v18 = vmul.f32 %v3013_v61, %v1711_v47  ;;  %v3267_v37 = vmul.f32 %v3203_v27, %v1711_v47  ;;  %v2571_v56 = vadd.f32 %v2570_v4, %v2507_v19  ;;  %v8132_v29 = vadd.f32 %v2760_v0, %v2697_v58 }
 0x323   : > { %v8134_v23 = vadd.f32 %v1970_v33, %v1938_v50  ;;  %v2064_v57 = vrot.slane %v1296_v39, 7  ;;  %v2254_v26 = vrot.slane %v1296_v39, 6  ;;  %v2444_v47 = vrot.slane %v1296_v39, 5 }
 0x324   : > { %v2634_v22 = vrot.slane %v1296_v39, 4  ;;  %v2824_v43 = vrot.slane %v1296_v39, 3  ;;  %v3014_v4 = vrot.slane %v1296_v39, 2  ;;  %v3204_v0 = vrot.slane %v1296_v39, 1  ;;  %v8155_v2 = vpop.f32.mrf.mxu0 }
 0x325   : > { %v2128_v5 = vmul.f32 %v2064_v57, %v10249_v38  ;;  %v5891_v62 = vor.u32 %v6171_v15, %v5890_v54  ;;  %v2318_v63 = vmul.f32 %v2254_v26, %v10249_v38  ;;  %v2508_v32 = vmul.f32 %v2444_v47, %v10249_v38  ;;  %v10252_v15 = vld [vmem:[#allocation42_spill] sm:$0xff] }
 0x326   : > { %v2698_v10 = vmul.f32 %v2634_v22, %v10249_v38  ;;  %v2888_v8 = vmul.f32 %v2824_v43, %v10249_v38  ;;  %v3078_v51 = vmul.f32 %v3014_v4, %v10249_v38  ;;  %v3268_v36 = vmul.f32 %v3204_v0, %v10249_v38 }
 0x327   : > { %v8151_v33 = vadd.f32 %v2160_v30, %v2128_v5  ;;  %1085 = vmatmul.bf16.gmra.mxu0 %v5891_v62  ;;  %v5895_v7 = vor.u32 %v6170_v14, %v5892_v20  ;;  %v8159_v17 = vadd.f32 %v2350_v1, %v2318_v63  ;;  %v8161_v44 = vadd.f32 %v2540_v35, %v2508_v32  ;;  %v8202_v43 = vpop.f32.mrf.mxu1 }
 0x328   : > { %v8163_v13 = vadd.f32 %v2730_v11, %v2698_v10  ;;  %v8165_v3 = vadd.f32 %v2920_v34, %v2888_v8  ;;  %1583 = vmatmul.bf16.gmra.mxu2 %v5891_v62  ;;  %v8167_v30 = vadd.f32 %v3110_v49, %v3078_v51  ;;  %v8169_v61 = vadd.f32 %v3300_v28, %v3268_v36  ;;  %v10250_v34 = vld [vmem:[#allocation41_spill] sm:$0xff]  ;;  %v5900_v10 = vld [vmem:[%s10093_s1 + $0x288] sm:$0xf0] }
 0x329   : > { %1334 = vmatmul.bf16.gmra.mxu1 %v5895_v7  ;;  %1832 = vmatmul.bf16.gmra.mxu3 %v5895_v7  ;;  %v1794_v27 = vadd.f32 %v8074_v41, %v8072_v42  ;;  %v2951_v39 = vadd.f32 %v8091_v12, %v2887_v45  ;;  %v3141_v1 = vadd.f32 %v8093_v6, %v3077_v18 }
 0x32a   : > { %v3331_v35 = vadd.f32 %v8095_v59, %v3267_v37  ;;  %v8178_v11 = vadd.f32 %v8089_v40, %v8087_v16  ;;  %v8186_v59 = vpop.f32.mrf.mxu2  ;;  %v8188_v16 = vpop.f32.mrf.mxu3  ;;  %v8232_v51 = vadd.f32 %v8108_v24, %v8106_v9 }
 0x32b   : > { %v1939_v49 = vmul.f32 %v1794_v27, %v10250_v34  ;;  %v2065_v31 = vrot.slane %v1794_v27, 7  ;;  %v2255_v19 = vrot.slane %v1794_v27, 6  ;;  %v2445_v58 = vrot.slane %v1794_v27, 5 }
 0x32c   : > { %v2635_v28 = vrot.slane %v1794_v27, 4  ;;  %v2825_v38 = vrot.slane %v1794_v27, 3  ;;  %v3015_v50 = vrot.slane %v1794_v27, 2  ;;  %v3205_v54 = vrot.slane %v1794_v27, 1  ;;  %v8200_v22 = vpop.f32.mrf.mxu0 }
 0x32d   : > { %v8181_v42 = vadd.f32 %v2001_v55, %v1939_v49  ;;  %v2129_v41 = vmul.f32 %v2065_v31, %v10250_v34  ;;  %v2319_v12 = vmul.f32 %v2255_v19, %v10250_v34  ;;  %v2509_v6 = vmul.f32 %v2445_v58, %v10250_v34  ;;  %v10251_v55 = vld [vmem:[#allocation40_spill] sm:$0xff] }
 0x32e   : > { %v2699_v40 = vmul.f32 %v2635_v28, %v10250_v34  ;;  %v2889_v45 = vmul.f32 %v2825_v38, %v10250_v34  ;;  %v3079_v18 = vmul.f32 %v3015_v50, %v10250_v34  ;;  %v3269_v37 = vmul.f32 %v3205_v54, %v10250_v34 }
 0x32f   : > { %v1218_v57 = vadd.f32 %v10252_v15, %v10251_v55  ;;  %v2192_v14 = vadd.f32 %v8122_v48, %v2129_v41  ;;  %v2382_v26 = vadd.f32 %v8124_v53, %v2319_v12  ;;  %v8198_v47 = vadd.f32 %v2571_v56, %v2509_v6  ;;  %v5898_v48 = vld [vmem:[%s10093_s1 + $0x280] sm:$0xf]  ;;  %v6173_v53 = vld [vmem:[%s10093_s1 + $0x284] sm:$0xf0]  ;;  %v6172_v56 = vld [vmem:[%s10093_s1 + $0x284] sm:$0xf] }
 0x330   : > { %v8205_v20 = vadd.f32 %v8132_v29, %v2699_v40  ;;  %v8207_v5 = vadd.f32 %v2951_v39, %v2889_v45  ;;  %v8209_v4 = vadd.f32 %v3141_v1, %v3079_v18  ;;  %v8211_v0 = vadd.f32 %v3331_v35, %v3269_v37  ;;  %v10253_v39 = vld [vmem:[#allocation43_spill] sm:$0xff]  ;;  %v10254_v1 = vld [vmem:[#allocation44_spill] sm:$0xff] }
 0x331   : > { %v1940_v29 = vmul.f32 %v8178_v11, %v1218_v57  ;;  %v2066_v62 = vrot.slane %v8178_v11, 7  ;;  %v2256_v63 = vrot.slane %v8178_v11, 6  ;;  %v2446_v32 = vrot.slane %v8178_v11, 5 }
 0x332   : > { %v2636_v8 = vrot.slane %v8178_v11, 4  ;;  %v5899_v27 = vor.u32 %v6173_v53, %v5898_v48  ;;  %v8236_v35 = vadd.f32 %v10254_v1, %v10253_v39  ;;  %v2826_v34 = vrot.slane %v8178_v11, 3  ;;  %v1554_v24 = vpop.f32.mrf.mxu2  ;;  %v1803_v28 = vpop.f32.mrf.mxu3 }
 0x333   : > { %v2130_v36 = vmul.f32 %v2066_v62, %v1218_v57  ;;  %v2320_v7 = vmul.f32 %v2256_v63, %v1218_v57  ;;  %v5903_v49 = vor.u32 %v6172_v56, %v5900_v10  ;;  %v8240_v31 = vadd.f32 %v8134_v23, %v1940_v29 }
 0x334   : > { %v2510_v58 = vmul.f32 %v2446_v32, %v1218_v57  ;;  %v3016_v9 = vrot.slane %v8178_v11, 2  ;;  %v2700_v50 = vmul.f32 %v2636_v8, %v1218_v57  ;;  %v3206_v54 = vrot.slane %v8178_v11, 1  ;;  %v8257_v40 = vpop.f32.mrf.mxu0 }
 0x335   : > { %v8243_v19 = vadd.f32 %v8151_v33, %v2130_v36  ;;  %v8247_v38 = vadd.f32 %v8159_v17, %v2320_v7  ;;  %v1941_v41 = vmul.f32 %v8232_v51, %v8236_v35  ;;  %v2067_v33 = vrot.slane %v8232_v51, 7  ;;  %10255 = vst [vmem:[#allocation2_spill] sm:$0xff] %v8257_v40  ;;  %v8259_v17 = vpop.f32.mrf.mxu1 }
 0x336   : > { %v2257_v12 = vrot.slane %v8232_v51, 6  ;;  %v2447_v6 = vrot.slane %v8232_v51, 5  ;;  %10256 = vst [vmem:[#allocation3_spill] sm:$0xff] %v8259_v17  ;;  %v2890_v45 = vmul.f32 %v2826_v34, %v1218_v57  ;;  %v2637_v11 = vrot.slane %v8232_v51, 4 }
 0x337   : > { %v3334_v23 = vmax.f32 %v8240_v31, %v8243_v19  ;;  %1090 = vmatmul.bf16.gmra.mxu0 %v5899_v27  ;;  %v8263_v18 = vadd.f32 %v8161_v44, %v2510_v58  ;;  %v2131_v55 = vmul.f32 %v2067_v33, %v8236_v35  ;;  %v3080_v48 = vmul.f32 %v3016_v9, %v1218_v57 }
 0x338   : > { %1588 = vmatmul.bf16.gmra.mxu2 %v5899_v27  ;;  %v2321_v15 = vmul.f32 %v2257_v12, %v8236_v35  ;;  %v3270_v53 = vmul.f32 %v3206_v54, %v1218_v57  ;;  %v8269_v56 = vadd.f32 %v8181_v42, %v1941_v41  ;;  %v8272_v29 = vadd.f32 %v8163_v13, %v2700_v50 }
 0x339   : > { %v3336_v37 = vmax.f32 %v3334_v23, %v8247_v38  ;;  %1339 = vmatmul.bf16.gmra.mxu1 %v5903_v49  ;;  %1837 = vmatmul.bf16.gmra.mxu3 %v5903_v49  ;;  %v8275_v44 = vadd.f32 %v2192_v14, %v2131_v55  ;;  %v2511_v63 = vmul.f32 %v2447_v6, %v8236_v35  ;;  %v2827_v42 = vrot.slane %v8232_v51, 3 }
 0x33a   : > { %v8279_v32 = vadd.f32 %v8165_v3, %v2890_v45  ;;  %v8281_v10 = vadd.f32 %v2382_v26, %v2321_v15  ;;  %v2701_v57 = vmul.f32 %v2637_v11, %v8236_v35  ;;  %v8290_v14 = vadd.f32 %v8116_v21, %v8114_v25  ;;  %v8296_v3 = vpop.f32.mrf.mxu2  ;;  %v8298_v26 = vpop.f32.mrf.mxu3 }
 0x33b   : > { %v3338_v62 = vmax.f32 %v3336_v37, %v8263_v18  ;;  %v3335_v13 = vmax.f32 %v8269_v56, %v8275_v44  ;;  %v8294_v36 = vadd.f32 %v8145_v52, %v8143_v60  ;;  %10259 = vst [vmem:[#allocation6_spill] sm:$0xff] %v8296_v3  ;;  %v8301_v7 = vadd.f32 %v8167_v30, %v3080_v48 }
 0x33c   : > { %10257 = vst [vmem:[#allocation4_spill] sm:$0xff] %v8290_v14  ;;  %v3017_v27 = vrot.slane %v8232_v51, 2  ;;  %v8306_v39 = vadd.f32 %v8202_v43, %v8200_v22  ;;  %v8310_v21 = vadd.f32 %v8198_v47, %v2511_v63  ;;  %v8313_v52 = vadd.f32 %v1803_v28, %v1554_v24  ;;  %v1061_v1 = vpop.f32.mrf.mxu0  ;;  %v5906_v22 = vld [vmem:[%s10093_s1 + $0x290] sm:$0xf]  ;;  %v6175_v43 = vld [vmem:[%s10093_s1 + $0x294] sm:$0xf0] }
 0x33d   : > { %v3340_v8 = vmax.f32 %v3338_v62, %v8272_v29  ;;  %10258 = vst [vmem:[#allocation5_spill] sm:$0xff] %v8294_v36  ;;  %v3337_v60 = vmax.f32 %v3335_v13, %v8281_v10  ;;  %v1310_v34 = vpop.f32.mrf.mxu1  ;;  %v2891_v30 = vmul.f32 %v2827_v42, %v8236_v35  ;;  %v3207_v49 = vrot.slane %v8232_v51, 1  ;;  %v6174_v51 = vld [vmem:[%s10093_s1 + $0x294] sm:$0xf]  ;;  %v5908_v28 = vld [vmem:[%s10093_s1 + $0x298] sm:$0xf0] }
 0x33e   : > { %10260 = vst [vmem:[#allocation7_spill] sm:$0xff] %v8298_v26  ;;  %v8324_v47 = vadd.f32 %v8169_v61, %v3270_v53  ;;  %v8328_v9 = vadd.f32 %v8205_v20, %v2701_v57  ;;  %v3081_v61 = vmul.f32 %v3017_v27, %v8236_v35  ;;  %v5907_v41 = vor.u32 %v6175_v43, %v5906_v22 }
 0x33f   : > { %10261 = vst [vmem:[#allocation8_spill] sm:$0xff] %v8306_v39  ;;  %v3342_v25 = vmax.f32 %v3340_v8, %v8279_v32  ;;  %v3339_v24 = vmax.f32 %v3337_v60, %v8310_v21  ;;  %v8341_v20 = vadd.f32 %v8207_v5, %v2891_v30  ;;  %v3271_v23 = vmul.f32 %v3207_v49, %v8236_v35 }
 0x340   : > { %10262 = vst [vmem:[#allocation9_spill] sm:$0xff] %v8313_v52  ;;  %v5911_v33 = vor.u32 %v6174_v51, %v5908_v28  ;;  %v6177_v51 = vld [vmem:[%s10093_s1 + $0x2a4] sm:$0xf0] }
 0x341   : > { %v3344_v58 = vmax.f32 %v3342_v25, %v8301_v7  ;;  %v3341_v54 = vmax.f32 %v3339_v24, %v8328_v9 }
 0x342   : > { %v1559_v37 = vpop.f32.mrf.mxu2  ;;  %v1808_v55 = vpop.f32.mrf.mxu3 }
 0x343   : > { %v3346_v50 = vmax.f32 %v3344_v58, %v8324_v47 }
 0x345   : > { %v3348_v12 = vsub.f32 %v8240_v31, %v3346_v50  ;;  %v3354_v6 = vsub.f32 %v8243_v19, %v3346_v50  ;;  %v3360_v45 = vsub.f32 %v8247_v38, %v3346_v50  ;;  %v3366_v11 = vsub.f32 %v8263_v18, %v3346_v50  ;;  %v8356_v38 = vpop.f32.mrf.mxu0  ;;  %v8358_v18 = vpop.f32.mrf.mxu1 }
 0x346   : > { %v3372_v15 = vsub.f32 %v8272_v29, %v3346_v50  ;;  %v3378_v48 = vsub.f32 %v8279_v32, %v3346_v50  ;;  %v3384_v5 = vsub.f32 %v8301_v7, %v3346_v50  ;;  %v3390_v53 = vsub.f32 %v8324_v47, %v3346_v50 }
 0x347   : > { %v3350_v35 = vmul.f32 1.442695, %v3348_v12  ;;  %v3356_v62 = vmul.f32 1.442695, %v3354_v6  ;;  %v8353_v31 = vadd.f32 %v8209_v4, %v3081_v61  ;;  %v3343_v19 = vmax.f32 %v3341_v54, %v8341_v20  ;;  %1095 = vmatmul.bf16.gmra.mxu0 %v5907_v41 }
 0x348   : > { %v3362_v63 = vmul.f32 1.442695, %v3360_v45  ;;  %1593 = vmatmul.bf16.gmra.mxu2 %v5907_v41  ;;  %v8360_v29 = vadd.f32 %v1808_v55, %v1559_v37  ;;  %v8363_v32 = vadd.f32 %v8211_v0, %v3271_v23  ;;  %v3368_v4 = vmul.f32 1.442695, %v3366_v11  ;;  %v5916_v23 = vld [vmem:[%s10093_s1 + $0x2a8] sm:$0xf0] }
 0x349   : > { %6244 = vpow2.f32 %v3350_v35  ;;  %v3345_v57 = vmax.f32 %v3343_v19, %v8353_v31  ;;  %1344 = vmatmul.bf16.gmra.mxu1 %v5911_v33  ;;  %1842 = vmatmul.bf16.gmra.mxu3 %v5911_v33  ;;  %v3374_v42 = vmul.f32 1.442695, %v3372_v15  ;;  %v3380_v13 = vmul.f32 1.442695, %v3378_v48 }
 0x34a   : > { %10263 = vst [vmem:[#allocation10_spill] sm:$0xff] %v8360_v29  ;;  %6246 = vpow2.f32 %v3356_v62  ;;  %v8369_v7 = vadd.f32 %v1310_v34, %v1061_v1  ;;  %v8377_v60 = vpop.f32.mrf.mxu2  ;;  %v8379_v30 = vpop.f32.mrf.mxu3 }
 0x34b   : > { %v8367_v8 = vmax.f32 %v3345_v57, %v8363_v32  ;;  %6248 = vpow2.f32 %v3362_v63  ;;  %10265 = vst [vmem:[#allocation12_spill] sm:$0xff] %v8377_v60 }
 0x34c   : > { %10264 = vst [vmem:[#allocation11_spill] sm:$0xff] %v8369_v7  ;;  %6250 = vpow2.f32 %v3368_v4 }
 0x34d   : > { %v3349_v27 = vsub.f32 %v8269_v56, %v8367_v8  ;;  %v3355_v0 = vsub.f32 %v8275_v44, %v8367_v8  ;;  %v3361_v25 = vsub.f32 %v8281_v10, %v8367_v8  ;;  %10266 = vst [vmem:[#allocation13_spill] sm:$0xff] %v8379_v30  ;;  %v3367_v49 = vsub.f32 %v8310_v21, %v8367_v8  ;;  %v5914_v44 = vld [vmem:[%s10093_s1 + $0x2a0] sm:$0xf]  ;;  %v1066_v47 = vpop.f32.mrf.mxu0  ;;  %v1315_v58 = vpop.f32.mrf.mxu1 }
 0x34e   : > { %v3373_v1 = vsub.f32 %v8328_v9, %v8367_v8  ;;  %v3379_v56 = vsub.f32 %v8341_v20, %v8367_v8  ;;  %6252 = vpow2.f32 %v3374_v42  ;;  %v3386_v10 = vmul.f32 1.442695, %v3384_v5  ;;  %v6176_v20 = vld [vmem:[%s10093_s1 + $0x2a4] sm:$0xf] }
 0x34f   : > { %v8390_v34 = vpop.eup %6244  ;;  %v3352_v22 = vmul.f32 1.442695, %v3349_v27  ;;  %v3358_v43 = vmul.f32 1.442695, %v3355_v0  ;;  %6254 = vpow2.f32 %v3380_v13  ;;  %v3392_v21 = vmul.f32 1.442695, %v3390_v53 }
 0x350   : > { %v8392_v24 = vpop.eup %6246  ;;  %v3364_v9 = vmul.f32 1.442695, %v3361_v25  ;;  %v3385_v50 = vsub.f32 %v8353_v31, %v8367_v8  ;;  %v3391_v61 = vsub.f32 %v8363_v32, %v8367_v8  ;;  %v3370_v41 = vmul.f32 1.442695, %v3367_v49 }
 0x351   : > { %v3396_v28 = vadd.f32 %v8392_v24, %v8390_v34  ;;  %6256 = vpow2.f32 %v3352_v22  ;;  %v8403_v54 = vpop.eup %6248  ;;  %v8411_v33 = vadd.f32 %v1315_v58, %v1066_v47  ;;  %v5915_v6 = vor.u32 %v6177_v51, %v5914_v44 }
 0x352   : > { %6258 = vpow2.f32 %v3358_v43  ;;  %v8414_v45 = vpop.eup %6250  ;;  %v3376_v11 = vmul.f32 1.442695, %v3373_v1  ;;  %v5919_v15 = vor.u32 %v6176_v20, %v5916_v23  ;;  %v1564_v48 = vpop.f32.mrf.mxu2  ;;  %v3382_v35 = vmul.f32 1.442695, %v3379_v56  ;;  %v6178_v23 = vld [vmem:[%s10093_s1 + $0x2b4] sm:$0xf] }
 0x353   : > { %6260 = vpow2.f32 %v3386_v10  ;;  %v3398_v12 = vadd.f32 %v8403_v54, %v3396_v28  ;;  %v1813_v5 = vpop.f32.mrf.mxu3  ;;  %v3388_v4 = vmul.f32 1.442695, %v3385_v50  ;;  %v3394_v0 = vmul.f32 1.442695, %v3391_v61  ;;  %v5922_v28 = vld [vmem:[%s10093_s1 + $0x2b0] sm:$0xf] }
 0x354   : > { %6262 = vpow2.f32 %v3364_v9  ;;  %v8416_v37 = vpop.eup %6252  ;;  %v8419_v62 = vadd.f32 %v1813_v5, %v1564_v48  ;;  %v6179_v50 = vld [vmem:[%s10093_s1 + $0x2b4] sm:$0xf0] }
 0x355   : > { %6264 = vpow2.f32 %v3392_v21  ;;  %v3400_v55 = vadd.f32 %v8414_v45, %v3398_v12  ;;  %v6255_v53 = vpop.eup %6254  ;;  %v8424_v63 = vpop.f32.mrf.mxu0  ;;  %v5924_v12 = vld [vmem:[%s10093_s1 + $0x2b8] sm:$0xf0] }
 0x356   : > { %6266 = vpow2.f32 %v3370_v41  ;;  %10267 = vst [vmem:[#allocation14_spill] sm:$0xff] %v8419_v62  ;;  %v8426_v32 = vpop.f32.mrf.mxu1  ;;  %v5927_v5 = vor.u32 %v6178_v23, %v5924_v12  ;;  %v8524_v12 = vadd.f32 %v8188_v16, %v8186_v59 }
 0x357   : > { %v8421_v31 = vpop.eup %6256  ;;  %v3402_v19 = vadd.f32 %v8416_v37, %v3400_v55  ;;  %1100 = vmatmul.bf16.gmra.mxu0 %v5915_v6  ;;  %6268 = vpow2.f32 %v3376_v11  ;;  %v5923_v11 = vor.u32 %v6179_v50, %v5922_v28  ;;  %v5940_v28 = vld [vmem:[%s10093_s1 + $0x2d8] sm:$0xf0]  ;;  %v8540_v59 = vadd.f32 %v8426_v32, %v8424_v63 }
 0x358   : > { %v8428_v57 = vpop.eup %6258  ;;  %1598 = vmatmul.bf16.gmra.mxu2 %v5915_v6  ;;  %6270 = vpow2.f32 %v3382_v35  ;;  %10274 = vst [vmem:[#allocation21_spill] sm:$0xff] %v8524_v12 }
 0x359   : > { %v6261_v42 = vpop.eup %6260  ;;  %v3404_v8 = vadd.f32 %v6255_v53, %v3402_v19  ;;  %v3397_v13 = vadd.f32 %v8428_v57, %v8421_v31  ;;  %1349 = vmatmul.bf16.gmra.mxu1 %v5919_v15  ;;  %1847 = vmatmul.bf16.gmra.mxu3 %v5919_v15  ;;  %6272 = vpow2.f32 %v3388_v4 }
 0x35a   : > { %v8432_v27 = vpop.eup %6262  ;;  %v8438_v22 = vpop.f32.mrf.mxu2  ;;  %6274 = vpow2.f32 %v3394_v0 }
 0x35b   : > { %v6265_v25 = vpop.eup %6264  ;;  %v3406_v49 = vadd.f32 %v6261_v42, %v3404_v8  ;;  %v3399_v1 = vadd.f32 %v8432_v27, %v3397_v13  ;;  %10268 = vst [vmem:[#allocation15_spill] sm:$0xff] %v8438_v22  ;;  %v8440_v43 = vpop.f32.mrf.mxu3 }
 0x35c   : > { %v8435_v56 = vpop.eup %6266  ;;  %10269 = vst [vmem:[#allocation16_spill] sm:$0xff] %v8440_v43 }
 0x35d   : > { %v3408_v44 = vadd.f32 %v6265_v25, %v3406_v49  ;;  %v3401_v10 = vadd.f32 %v8435_v56, %v3399_v1  ;;  %v8442_v47 = vpop.eup %6268  ;;  %v1071_v21 = vpop.f32.mrf.mxu0  ;;  %v5930_v49 = vld [vmem:[%s10093_s1 + $0x2c0] sm:$0xf] }
 0x35e   : > { %v1320_v9 = vpop.f32.mrf.mxu1  ;;  %v8445_v51 = vpop.eup %6270 }
 0x35f   : > { %6276 = vrcp.f32 %v3408_v44  ;;  %v3403_v58 = vadd.f32 %v8442_v47, %v3401_v10  ;;  %v8453_v61 = vadd.f32 %v1320_v9, %v1071_v21  ;;  %v8456_v20 = vpop.eup %6272  ;;  %v8514_v21 = vadd.f32 %v8157_v46, %v8155_v2  ;;  %v5946_v46 = vld [vmem:[%s10093_s1 + $0x2e0] sm:$0xf] }
 0x360   : > { %v8465_v55 = vpop.eup %6274  ;;  %v8528_v2 = vadd.f32 %v8358_v18, %v8356_v38 }
 0x361   : > { %v3405_v41 = vadd.f32 %v8445_v51, %v3403_v58  ;;  %v6182_v58 = vld [vmem:[%s10093_s1 + $0x2d4] sm:$0xf]  ;;  %10273 = vst [vmem:[#allocation20_spill] sm:$0xff] %v8514_v21  ;;  %v3494_v50 = vrot.slane %v8453_v61, 7  ;;  %v3882_v23 = vrot.slane %v8453_v61, 5 }
 0x362   : > { %v1569_v35 = vpop.f32.mrf.mxu2  ;;  %10275 = vst [vmem:[#allocation22_spill] sm:$0xff] %v8528_v2 }
 0x363   : > { %v3407_v6 = vadd.f32 %v8456_v20, %v3405_v41  ;;  %v1818_v19 = vpop.f32.mrf.mxu3  ;;  %v3688_v41 = vrot.slane %v8453_v61, 6 }
 0x365   : > { %v6277_v15 = vpop.eup %6276  ;;  %v3409_v48 = vadd.f32 %v8465_v55, %v3407_v6  ;;  %v6185_v6 = vld [vmem:[%s10093_s1 + $0x2e4] sm:$0xf0] }
 0x366   : > { %v8469_v4 = vmul.f32 %v6277_v15, %v8390_v34  ;;  %v8472_v8 = vmul.f32 %v6277_v15, %v8392_v24  ;;  %v8475_v13 = vmul.f32 %v6277_v15, %v8403_v54  ;;  %v8478_v0 = vmul.f32 %v6277_v15, %v8414_v45  ;;  %v6181_v24 = vld [vmem:[%s10093_s1 + $0x2c4] sm:$0xf0]  ;;  %v6180_v54 = vld [vmem:[%s10093_s1 + $0x2c4] sm:$0xf]  ;;  %v5932_v45 = vld [vmem:[%s10093_s1 + $0x2c8] sm:$0xf0]  ;;  %v1322_v9 = vpop.f32.mrf.mxu1 }
 0x367   : > { %v8484_v1 = vmul.f32 %v6277_v15, %v8416_v37  ;;  %v8486_v44 = vmul.f32 %v6277_v15, %v6255_v53  ;;  %v8488_v34 = vmul.f32 %v6277_v15, %v6261_v42  ;;  %v8490_v10 = vmul.f32 %v6277_v15, %v6265_v25  ;;  %1105 = vmatmul.bf16.gmra.mxu0 %v5923_v11  ;;  %v1073_v37 = vpop.f32.mrf.mxu0  ;;  %v5938_v42 = vld [vmem:[%s10093_s1 + $0x2d0] sm:$0xf]  ;;  %v6183_v25 = vld [vmem:[%s10093_s1 + $0x2d4] sm:$0xf0] }
 0x368   : > { %10270 = vst [vmem:[#allocation17_spill] sm:$0xff] %v8469_v4  ;;  %6278 = vrcp.f32 %v3409_v48  ;;  %1603 = vmatmul.bf16.gmra.mxu2 %v5923_v11  ;;  %v8501_v53 = vadd.f32 %v1818_v19, %v1569_v35  ;;  %v4076_v11 = vrot.slane %v8453_v61, 4  ;;  %v4270_v15 = vrot.slane %v8453_v61, 3 }
 0x369   : > { %10271 = vst [vmem:[#allocation18_spill] sm:$0xff] %v8472_v8  ;;  %1354 = vmatmul.bf16.gmra.mxu1 %v5927_v5  ;;  %1852 = vmatmul.bf16.gmra.mxu3 %v5927_v5  ;;  %v5931_v16 = vor.u32 %v6181_v24, %v5930_v49  ;;  %v3430_v38 = vmul.f32 %v8469_v4, %v8453_v61 }
 0x36a   : > { %10272 = vst [vmem:[#allocation19_spill] sm:$0xff] %v8501_v53  ;;  %v3560_v18 = vmul.f32 %v8472_v8, %v3494_v50  ;;  %v8545_v48 = vor.u32 %v6180_v54, %v5932_v45  ;;  %v1323_v5 = vadd.f32 %v1322_v9, %v1073_v37  ;;  %v8547_v35 = vor.u32 %v6183_v25, %v5938_v42  ;;  %v1571_v12 = vpop.f32.mrf.mxu2 }
 0x36b   : > { %v8549_v19 = vor.u32 %v6182_v58, %v5940_v28  ;;  %v8551_v36 = vor.u32 %v6185_v6, %v5946_v46  ;;  %v3754_v63 = vmul.f32 %v8475_v13, %v3688_v41  ;;  %v8556_v32 = vmul.f32 %v8469_v4, %v8411_v33  ;;  %v1820_v28 = vpop.f32.mrf.mxu3 }
 0x36c   : > { %v3624_v52 = vadd.f32 %v3560_v18, %v3430_v38  ;;  %v3948_v24 = vmul.f32 %v8478_v0, %v3882_v23  ;;  %v4142_v54 = vmul.f32 %v8484_v1, %v4076_v11  ;;  %v8561_v45 = vmul.f32 %v8486_v44, %v4270_v15 }
 0x36d   : > { %v4464_v37 = vrot.slane %v8453_v61, 2  ;;  %v3496_v46 = vrot.slane %v1323_v5, 7  ;;  %v3884_v11 = vrot.slane %v1323_v5, 5  ;;  %v4078_v15 = vrot.slane %v1323_v5, 4 }
 0x36e   : > { %v6279_v49 = vpop.eup %6278  ;;  %v3818_v6 = vadd.f32 %v3754_v63, %v3624_v52  ;;  %v4272_v38 = vrot.slane %v1323_v5, 3  ;;  %v4466_v18 = vrot.slane %v1323_v5, 2  ;;  %v3432_v26 = vmul.f32 %v8469_v4, %v1323_v5 }
 0x36f   : > { %v8565_v42 = vmul.f32 %v6279_v49, %v8421_v31  ;;  %v8568_v25 = vmul.f32 %v6279_v49, %v8428_v57  ;;  %v8571_v58 = vmul.f32 %v6279_v49, %v8432_v27  ;;  %v8574_v9 = vmul.f32 %v6279_v49, %v8435_v56  ;;  %v1076_v50 = vpop.f32.mrf.mxu0 }
 0x370   : > { %v8577_v41 = vmul.f32 %v6279_v49, %v8442_v47  ;;  %v8580_v23 = vmul.f32 %v6279_v49, %v8445_v51  ;;  %v8583_v31 = vmul.f32 %v6279_v49, %v8456_v20  ;;  %v8586_v57 = vmul.f32 %v6279_v49, %v8465_v55 }
 0x371   : > { %v3690_v27 = vrot.slane %v1323_v5, 6  ;;  %v4658_v56 = vrot.slane %v8453_v61, 1  ;;  %v3562_v51 = vmul.f32 %v8472_v8, %v3496_v46  ;;  %v4012_v3 = vadd.f32 %v3948_v24, %v3818_v6 }
 0x372   : > { %v4660_v20 = vrot.slane %v1323_v5, 1  ;;  %v8591_v21 = vadd.f32 %v1820_v28, %v1571_v12  ;;  %v4530_v49 = vmul.f32 %v8488_v34, %v4464_v37  ;;  %v3490_v52 = vrot.slane %v8411_v33, 7  ;;  %v1574_v63 = vpop.f32.mrf.mxu2  ;;  %v5948_v28 = vld [vmem:[%s10093_s1 + $0x2e8] sm:$0xf0] }
 0x373   : > { %v1325_v47 = vpop.f32.mrf.mxu1  ;;  %v3626_v61 = vadd.f32 %v3562_v51, %v3432_v26  ;;  %v3756_v14 = vmul.f32 %v8475_v13, %v3690_v27  ;;  %v3950_v29 = vmul.f32 %v8478_v0, %v3884_v11  ;;  %v8598_v39 = vmul.f32 %v8490_v10, %v4658_v56  ;;  %v6184_v26 = vld [vmem:[%s10093_s1 + $0x2e4] sm:$0xf] }
 0x374   : > { %10276 = vst [vmem:[#allocation23_spill] sm:$0xff] %v8591_v21  ;;  %v1326_v55 = vadd.f32 %v1325_v47, %v1076_v50  ;;  %v4144_v46 = vmul.f32 %v8484_v1, %v4078_v15  ;;  %v4206_v24 = vadd.f32 %v4142_v54, %v4012_v3  ;;  %v8602_v12 = vmul.f32 %v8486_v44, %v4272_v38 }
 0x375   : > { %v8605_v5 = vmul.f32 %v8488_v34, %v4466_v18  ;;  %v3820_v6 = vadd.f32 %v3756_v14, %v3626_v61  ;;  %v8614_v3 = vmul.f32 %v8490_v10, %v4660_v20  ;;  %v3492_v15 = vrot.slane %v8540_v59, 7 }
 0x376   : > { %v3498_v50 = vrot.slane %v1326_v55, 7  ;;  %v3692_v27 = vrot.slane %v1326_v55, 6  ;;  %v3886_v54 = vrot.slane %v1326_v55, 5  ;;  %v4080_v56 = vrot.slane %v1326_v55, 4 }
 0x377   : > { %1110 = vmatmul.bf16.gmra.mxu0 %v5931_v16  ;;  %v1078_v37 = vpop.f32.mrf.mxu0  ;;  %v4274_v11 = vrot.slane %v1326_v55, 3  ;;  %v3434_v18 = vmul.f32 %v8469_v4, %v1326_v55  ;;  %v4468_v51 = vrot.slane %v1326_v55, 2  ;;  %v4662_v30 = vrot.slane %v1326_v55, 1 }
 0x378   : > { %1608 = vmatmul.bf16.gmra.mxu2 %v5931_v16  ;;  %v3564_v47 = vmul.f32 %v8472_v8, %v3498_v50  ;;  %v8623_v20 = vor.u32 %v6184_v26, %v5948_v28  ;;  %v8627_v16 = vmul.f32 %v8469_v4, %v8540_v59  ;;  %v3556_v61 = vmul.f32 %v8472_v8, %v3490_v52 }
 0x379   : > { %1359 = vmatmul.bf16.gmra.mxu1 %v8545_v48  ;;  %v1823_v38 = vpop.f32.mrf.mxu3  ;;  %1857 = vmatmul.bf16.gmra.mxu3 %v8545_v48  ;;  %v3758_v40 = vmul.f32 %v8475_v13, %v3692_v27  ;;  %v3952_v50 = vmul.f32 %v8478_v0, %v3886_v54  ;;  %v4014_v62 = vadd.f32 %v3950_v29, %v3820_v6 }
 0x37a   : > { %v8621_v14 = vadd.f32 %v1823_v38, %v1574_v63  ;;  %10277 = vst [vmem:[#allocation24_spill] sm:$0xff] %v8627_v16  ;;  %v3628_v17 = vadd.f32 %v3564_v47, %v3434_v18  ;;  %v4146_v48 = vmul.f32 %v8484_v1, %v4080_v56  ;;  %v4340_v63 = vmul.f32 %v8486_v44, %v4274_v11  ;;  %v1576_v28 = vpop.f32.mrf.mxu2 }
 0x37b   : > { %v1327_v60 = vpop.f32.mrf.mxu1  ;;  %v4400_v26 = vadd.f32 %v8561_v45, %v4206_v24  ;;  %v4534_v43 = vmul.f32 %v8488_v34, %v4468_v51  ;;  %v8637_v52 = vmul.f32 %v8490_v10, %v4662_v30  ;;  %v8640_v18 = vmul.f32 %v8472_v8, %v3492_v15 }
 0x37c   : > { %v1328_v55 = vadd.f32 %v1327_v60, %v1078_v37  ;;  %v3822_v38 = vadd.f32 %v3758_v40, %v3628_v17  ;;  %v4208_v27 = vadd.f32 %v4144_v46, %v4014_v62  ;;  %v8644_v29 = vmul.f32 %v8565_v42, %v8621_v14 }
 0x37d   : > { %10278 = vst [vmem:[#allocation25_spill] sm:$0xff] %v8640_v18  ;;  %v3499_v60 = vrot.slane %v8621_v14, 7  ;;  %v8648_v37 = vadd.f32 %v3556_v61, %v8556_v32  ;;  %v4594_v6 = vadd.f32 %v4530_v49, %v4400_v26 }
 0x37e   : > { %v3500_v40 = vrot.slane %v1328_v55, 7  ;;  %v3694_v17 = vrot.slane %v1328_v55, 6  ;;  %v3888_v24 = vrot.slane %v1328_v55, 5  ;;  %v4016_v30 = vadd.f32 %v3952_v50, %v3822_v38 }
 0x37f   : > { %10279 = vst [vmem:[#allocation26_spill] sm:$0xff] %v8648_v37  ;;  %v1081_v45 = vpop.f32.mrf.mxu0  ;;  %v4082_v54 = vrot.slane %v1328_v55, 4  ;;  %v4276_v56 = vrot.slane %v1328_v55, 3  ;;  %v3436_v46 = vmul.f32 %v8469_v4, %v1328_v55  ;;  %v4470_v47 = vrot.slane %v1328_v55, 2 }
 0x380   : > { %v3566_v15 = vmul.f32 %v8472_v8, %v3500_v40  ;;  %v4664_v51 = vrot.slane %v1328_v55, 1  ;;  %v3760_v32 = vmul.f32 %v8475_v13, %v3694_v17  ;;  %v4210_v61 = vadd.f32 %v4146_v48, %v4016_v30 }
 0x381   : > { %v1825_v62 = vpop.f32.mrf.mxu3  ;;  %v3954_v38 = vmul.f32 %v8478_v0, %v3888_v24  ;;  %v4402_v11 = vadd.f32 %v8602_v12, %v4208_v27  ;;  %v4148_v40 = vmul.f32 %v8484_v1, %v4082_v54  ;;  %v4342_v55 = vmul.f32 %v8486_v44, %v4276_v56 }
 0x382   : > { %v8656_v49 = vadd.f32 %v1825_v62, %v1576_v28  ;;  %v3630_v26 = vadd.f32 %v3566_v15, %v3436_v46  ;;  %v4404_v21 = vadd.f32 %v4340_v63, %v4210_v61  ;;  %v1579_v17 = vpop.f32.mrf.mxu2  ;;  %v8663_v30 = vmul.f32 %v8488_v34, %v4470_v47  ;;  %v5954_v63 = vld [vmem:[%s10093_s1 + $0x2f0] sm:$0xf] }
 0x383   : > { %v1330_v50 = vpop.f32.mrf.mxu1  ;;  %v8666_v28 = vmul.f32 %v8490_v10, %v4664_v51  ;;  %v4596_v62 = vadd.f32 %v8605_v5, %v4402_v11  ;;  %v8670_v12 = vadd.f32 %v8598_v39, %v4594_v6  ;;  %v8673_v27 = vmul.f32 %v8568_v25, %v3499_v60  ;;  %v6187_v39 = vld [vmem:[%s10093_s1 + $0x2f4] sm:$0xf0]  ;;  %v6186_v60 = vld [vmem:[%s10093_s1 + $0x2f4] sm:$0xf]  ;;  %v5956_v6 = vld [vmem:[%s10093_s1 + $0x2f8] sm:$0xf0] }
 0x384   : > { %v1331_v7 = vadd.f32 %v1330_v50, %v1081_v45  ;;  %v3824_v48 = vadd.f32 %v3760_v32, %v3630_v26  ;;  %v8681_v56 = vmul.f32 %v8565_v42, %v8656_v49  ;;  %v3501_v5 = vrot.slane %v8656_v49, 7 }
 0x385   : > { %10280 = vst [vmem:[#allocation27_spill] sm:$0xff] %v8670_v12  ;;  %v4598_v47 = vadd.f32 %v4534_v43, %v4404_v21  ;;  %v8697_v51 = vadd.f32 %v8614_v3, %v4596_v62  ;;  %v8704_v21 = vor.u32 %v6187_v39, %v5954_v63  ;;  %v8706_v3 = vor.u32 %v6186_v60, %v5956_v6 }
 0x386   : > { %v3502_v46 = vrot.slane %v1331_v7, 7  ;;  %v3696_v24 = vrot.slane %v1331_v7, 6  ;;  %v3890_v45 = vrot.slane %v1331_v7, 5  ;;  %v4018_v54 = vadd.f32 %v3954_v38, %v3824_v48 }
 0x387   : > { %1115 = vmatmul.bf16.gmra.mxu0 %v8547_v35  ;;  %v3438_v11 = vmul.f32 %v8469_v4, %v1331_v7  ;;  %10281 = vst [vmem:[#allocation28_spill] sm:$0xff] %v8697_v51  ;;  %v1083_v32 = vpop.f32.mrf.mxu0  ;;  %v4084_v50 = vrot.slane %v1331_v7, 4  ;;  %v4278_v26 = vrot.slane %v1331_v7, 3  ;;  %v4472_v38 = vrot.slane %v1331_v7, 2 }
 0x388   : > { %1613 = vmatmul.bf16.gmra.mxu2 %v8547_v35  ;;  %v3568_v15 = vmul.f32 %v8472_v8, %v3502_v46  ;;  %v3762_v61 = vmul.f32 %v8475_v13, %v3696_v24  ;;  %v4666_v22 = vrot.slane %v1331_v7, 1  ;;  %v4212_v46 = vadd.f32 %v4148_v40, %v4018_v54 }
 0x389   : > { %1364 = vmatmul.bf16.gmra.mxu1 %v8549_v19  ;;  %v1828_v35 = vpop.f32.mrf.mxu3  ;;  %1862 = vmatmul.bf16.gmra.mxu3 %v8549_v19  ;;  %v3956_v62 = vmul.f32 %v8478_v0, %v3890_v45  ;;  %v8710_v53 = vmul.f32 %v8568_v25, %v3501_v5  ;;  %v4150_v18 = vmul.f32 %v8484_v1, %v4084_v50 }
 0x38a   : > { %v8702_v48 = vadd.f32 %v1828_v35, %v1579_v17  ;;  %v3632_v2 = vadd.f32 %v3568_v15, %v3438_v11  ;;  %v4344_v19 = vmul.f32 %v8486_v44, %v4278_v26  ;;  %v4538_v17 = vmul.f32 %v8488_v34, %v4472_v38  ;;  %v1581_v60 = vpop.f32.mrf.mxu2 }
 0x38b   : > { %v1332_v43 = vpop.f32.mrf.mxu1  ;;  %v8716_v7 = vmul.f32 %v8490_v10, %v4666_v22  ;;  %v4406_v40 = vadd.f32 %v4342_v55, %v4212_v46  ;;  %v8719_v63 = vadd.f32 %v8637_v52, %v4598_v47 }
 0x38c   : > { %v1333_v24 = vadd.f32 %v1332_v43, %v1083_v32  ;;  %v3826_v37 = vadd.f32 %v3762_v61, %v3632_v2  ;;  %v3503_v5 = vrot.slane %v8702_v48, 7  ;;  %v3697_v55 = vrot.slane %v8702_v48, 6 }
 0x38d   : > { %v3439_v50 = vmul.f32 %v8565_v42, %v8702_v48  ;;  %v3891_v26 = vrot.slane %v8702_v48, 5  ;;  %v4600_v43 = vadd.f32 %v8663_v30, %v4406_v40  ;;  %v4085_v30 = vrot.slane %v8702_v48, 4 }
 0x38e   : > { %v3504_v54 = vrot.slane %v1333_v24, 7  ;;  %v3698_v45 = vrot.slane %v1333_v24, 6  ;;  %v3892_v39 = vrot.slane %v1333_v24, 5  ;;  %v4020_v2 = vadd.f32 %v3956_v62, %v3826_v37 }
 0x38f   : > { %v4086_v6 = vrot.slane %v1333_v24, 4  ;;  %v4280_v11 = vrot.slane %v1333_v24, 3  ;;  %v4474_v15 = vrot.slane %v1333_v24, 2  ;;  %v3440_v35 = vmul.f32 %v8469_v4, %v1333_v24 }
 0x390   : > { %v3570_v32 = vmul.f32 %v8472_v8, %v3504_v54  ;;  %v4668_v22 = vrot.slane %v1333_v24, 1  ;;  %v3764_v52 = vmul.f32 %v8475_v13, %v3698_v45  ;;  %v4214_v47 = vadd.f32 %v4150_v18, %v4020_v2 }
 0x391   : > { %v1830_v61 = vpop.f32.mrf.mxu3  ;;  %v3958_v46 = vmul.f32 %v8478_v0, %v3892_v39  ;;  %v4152_v62 = vmul.f32 %v8484_v1, %v4086_v6  ;;  %v4346_v24 = vmul.f32 %v8486_v44, %v4280_v11  ;;  %v4540_v54 = vmul.f32 %v8488_v34, %v4474_v15 }
 0x392   : > { %v8729_v37 = vadd.f32 %v1830_v61, %v1581_v60  ;;  %v3634_v38 = vadd.f32 %v3570_v32, %v3440_v35  ;;  %v3569_v18 = vmul.f32 %v8568_v25, %v3503_v5  ;;  %v4408_v2 = vadd.f32 %v4344_v19, %v4214_v47 }
 0x393   : > { %v4734_v16 = vmul.f32 %v8490_v10, %v4668_v22  ;;  %v3763_v60 = vmul.f32 %v8571_v58, %v3697_v55  ;;  %v3957_v39 = vmul.f32 %v8574_v9, %v3891_v26  ;;  %v8743_v6 = vadd.f32 %v8666_v28, %v4600_v43 }
 0x394   : > { %v3828_v45 = vadd.f32 %v3764_v52, %v3634_v38  ;;  %v3505_v35 = vrot.slane %v8729_v37, 7  ;;  %v3633_v32 = vadd.f32 %v3569_v18, %v3439_v50  ;;  %v3699_v11 = vrot.slane %v8729_v37, 6 }
 0x395   : > { %v4279_v5 = vrot.slane %v8702_v48, 3  ;;  %v3441_v19 = vmul.f32 %v8565_v42, %v8729_v37  ;;  %v3893_v55 = vrot.slane %v8729_v37, 5  ;;  %v4602_v52 = vadd.f32 %v4538_v17, %v4408_v2 }
 0x396   : > { %v4022_v40 = vadd.f32 %v3958_v46, %v3828_v45  ;;  %v3571_v15 = vmul.f32 %v8568_v25, %v3505_v35  ;;  %v3827_v22 = vadd.f32 %v3763_v60, %v3633_v32  ;;  %v3765_v28 = vmul.f32 %v8571_v58, %v3699_v11 }
 0x397   : > { %1120 = vmatmul.bf16.gmra.mxu0 %v8551_v36  ;;  %v4087_v47 = vrot.slane %v8729_v37, 4  ;;  %v4151_v38 = vmul.f32 %v8577_v41, %v4085_v30  ;;  %v4281_v46 = vrot.slane %v8729_v37, 3  ;;  %v4473_v17 = vrot.slane %v8702_v48, 2 }
 0x398   : > { %1618 = vmatmul.bf16.gmra.mxu2 %v8551_v36  ;;  %v4216_v61 = vadd.f32 %v4152_v62, %v4022_v40  ;;  %v3635_v50 = vadd.f32 %v3571_v15, %v3441_v19  ;;  %v4021_v26 = vadd.f32 %v3957_v39, %v3827_v22  ;;  %v4475_v62 = vrot.slane %v8729_v37, 2 }
 0x399   : > { %1369 = vmatmul.bf16.gmra.mxu1 %v8623_v20  ;;  %1867 = vmatmul.bf16.gmra.mxu3 %v8623_v20  ;;  %v3959_v45 = vmul.f32 %v8574_v9, %v3893_v55  ;;  %v4667_v60 = vrot.slane %v8702_v48, 1  ;;  %v8766_v32 = vadd.f32 %v8716_v7, %v4602_v52  ;;  %v4153_v20 = vmul.f32 %v8577_v41, %v4087_v47 }
 0x39a   : > { %v4410_v43 = vadd.f32 %v4346_v24, %v4216_v61  ;;  %v3829_v18 = vadd.f32 %v3765_v28, %v3635_v50  ;;  %v4215_v2 = vadd.f32 %v4151_v38, %v4021_v26  ;;  %v4345_v24 = vmul.f32 %v8580_v23, %v4279_v5 }
 0x39b   : > { %v4347_v30 = vmul.f32 %v8580_v23, %v4281_v46  ;;  %v4539_v40 = vmul.f32 %v8583_v31, %v4473_v17  ;;  %v4541_v11 = vmul.f32 %v8583_v31, %v4475_v62  ;;  %v4669_v15 = vrot.slane %v8729_v37, 1 }
 0x39c   : > { %v4604_v35 = vadd.f32 %v4540_v54, %v4410_v43  ;;  %v4023_v39 = vadd.f32 %v3959_v45, %v3829_v18  ;;  %v4409_v19 = vadd.f32 %v4345_v24, %v4215_v2  ;;  %v4733_v48 = vmul.f32 %v8586_v57, %v4667_v60 }
 0x39d   : > { %v3629_v7 = vadd.f32 %v8673_v27, %v8644_v29  ;;  %v3631_v22 = vadd.f32 %v8710_v53, %v8681_v56  ;;  %v3695_v5 = vrot.slane %v8656_v49, 6  ;;  %v10282_v55 = vrot.slane %v8621_v14, 6 }
 0x39e   : > { %v4217_v54 = vadd.f32 %v4153_v20, %v4023_v39  ;;  %v8783_v52 = vadd.f32 %v4734_v16, %v4604_v35  ;;  %v3889_v28 = vrot.slane %v8656_v49, 5  ;;  %v10283_v47 = vrot.slane %v8621_v14, 5 }
 0x39f   : > { %v3759_v61 = vmul.f32 %v8571_v58, %v10282_v55  ;;  %v3761_v53 = vmul.f32 %v8571_v58, %v3695_v5  ;;  %v4083_v50 = vrot.slane %v8656_v49, 4  ;;  %v4603_v26 = vadd.f32 %v4539_v40, %v4409_v19 }
 0x3a0   : > { %v3953_v29 = vmul.f32 %v8574_v9, %v10283_v47  ;;  %v4411_v27 = vadd.f32 %v4347_v30, %v4217_v54  ;;  %v3955_v38 = vmul.f32 %v8574_v9, %v3889_v28  ;;  %v10284_v16 = vrot.slane %v8621_v14, 4 }
 0x3a1   : > { %v3823_v56 = vadd.f32 %v3759_v61, %v3629_v7  ;;  %v4275_v43 = vrot.slane %v8621_v14, 3  ;;  %v3825_v62 = vadd.f32 %v3761_v53, %v3631_v22  ;;  %v4277_v45 = vrot.slane %v8656_v49, 3 }
 0x3a2   : > { %v4147_v46 = vmul.f32 %v8577_v41, %v10284_v16  ;;  %v4605_v17 = vadd.f32 %v4541_v11, %v4411_v27  ;;  %v4735_v60 = vmul.f32 %v8586_v57, %v4669_v15  ;;  %v4469_v35 = vrot.slane %v8621_v14, 2 }
 0x3a3   : > { %v4017_v18 = vadd.f32 %v3953_v29, %v3823_v56  ;;  %v4471_v20 = vrot.slane %v8656_v49, 2  ;;  %v4663_v24 = vrot.slane %v8621_v14, 1  ;;  %v4019_v30 = vadd.f32 %v3955_v38, %v3825_v62 }
 0x3a4   : > { %v1086_v2 = vpop.f32.mrf.mxu0  ;;  %v4149_v40 = vmul.f32 %v8577_v41, %v4083_v50  ;;  %v8806_v7 = vadd.f32 %v4733_v48, %v4603_v26  ;;  %v8808_v54 = vadd.f32 %v4735_v60, %v4605_v17  ;;  %v4341_v15 = vmul.f32 %v8580_v23, %v4275_v43 }
 0x3a5   : > { %v4211_v11 = vadd.f32 %v4147_v46, %v4017_v18  ;;  %v4665_v22 = vrot.slane %v8656_v49, 1  ;;  %v4343_v55 = vmul.f32 %v8580_v23, %v4277_v45  ;;  %v4535_v61 = vmul.f32 %v8583_v31, %v4469_v35  ;;  %v10285_v35 = vld [vmem:[#allocation24_spill] sm:$0xff] }
 0x3a6   : > { %v1335_v19 = vpop.f32.mrf.mxu1  ;;  %v4213_v14 = vadd.f32 %v4149_v40, %v4019_v30  ;;  %v4537_v48 = vmul.f32 %v8583_v31, %v4471_v20  ;;  %v8818_v47 = vmul.f32 %v8586_v57, %v4663_v24  ;;  %v3684_v56 = vrot.slane %v8411_v33, 6  ;;  %v10286_v20 = vld [vmem:[#allocation25_spill] sm:$0xff] }
 0x3a7   : > { %v1336_v5 = vadd.f32 %v1335_v19, %v1086_v2  ;;  %1125 = vmatmul.bf16.gmra.mxu0 %v8704_v21  ;;  %v4405_v28 = vadd.f32 %v4341_v15, %v4211_v11  ;;  %v8821_v29 = vmul.f32 %v8586_v57, %v4665_v22  ;;  %v3686_v62 = vrot.slane %v8540_v59, 6 }
 0x3a8   : > { %1623 = vmatmul.bf16.gmra.mxu2 %v8704_v21  ;;  %v4407_v17 = vadd.f32 %v4343_v55, %v4213_v14  ;;  %v8834_v24 = vadd.f32 %v10286_v20, %v10285_v35  ;;  %v8846_v55 = vmul.f32 %v8475_v13, %v3684_v56 }
 0x3a9   : > { %1374 = vmatmul.bf16.gmra.mxu1 %v8706_v3  ;;  %v3506_v49 = vrot.slane %v1336_v5, 7  ;;  %v3700_v27 = vrot.slane %v1336_v5, 6  ;;  %v3894_v53 = vrot.slane %v1336_v5, 5  ;;  %1872 = vmatmul.bf16.gmra.mxu3 %v8706_v3  ;;  %v4088_v50 = vrot.slane %v1336_v5, 4 }
 0x3aa   : > { %v4282_v21 = vrot.slane %v1336_v5, 3  ;;  %v4476_v26 = vrot.slane %v1336_v5, 2  ;;  %v4670_v38 = vrot.slane %v1336_v5, 1  ;;  %v3442_v46 = vmul.f32 %v8469_v4, %v1336_v5 }
 0x3ab   : > { %v1584_v16 = vpop.f32.mrf.mxu2  ;;  %v3572_v43 = vmul.f32 %v8472_v8, %v3506_v49  ;;  %v3766_v2 = vmul.f32 %v8475_v13, %v3700_v27  ;;  %v3960_v60 = vmul.f32 %v8478_v0, %v3894_v53  ;;  %v4154_v3 = vmul.f32 %v8484_v1, %v4088_v50 }
 0x3ac   : > { %v1833_v18 = vpop.f32.mrf.mxu3  ;;  %v1088_v45 = vpop.f32.mrf.mxu0  ;;  %v4348_v11 = vmul.f32 %v8486_v44, %v4282_v21  ;;  %v4542_v19 = vmul.f32 %v8488_v34, %v4476_v26  ;;  %v4736_v22 = vmul.f32 %v8490_v10, %v4670_v38  ;;  %v8841_v5 = vadd.f32 %v4535_v61, %v4405_v28 }
 0x3ad   : > { %v8836_v30 = vadd.f32 %v1833_v18, %v1584_v16  ;;  %v3636_v40 = vadd.f32 %v3572_v43, %v3442_v46  ;;  %v8843_v14 = vadd.f32 %v4537_v48, %v4407_v17  ;;  %v8849_v53 = vmul.f32 %v8475_v13, %v3686_v62 }
 0x3ae   : > { %v1337_v15 = vpop.f32.mrf.mxu1 }
 0x3af   : > { %v1338_v49 = vadd.f32 %v1337_v15, %v1088_v45  ;;  %v3830_v27 = vadd.f32 %v3766_v2, %v3636_v40  ;;  %v3443_v21 = vmul.f32 %v8565_v42, %v8836_v30  ;;  %v3507_v26 = vrot.slane %v8836_v30, 7 }
 0x3b0   : > { %v3701_v61 = vrot.slane %v8836_v30, 6  ;;  %v3895_v16 = vrot.slane %v8836_v30, 5  ;;  %v4089_v20 = vrot.slane %v8836_v30, 4 }
 0x3b1   : > { %v3508_v48 = vrot.slane %v1338_v49, 7  ;;  %v3702_v38 = vrot.slane %v1338_v49, 6  ;;  %v3896_v56 = vrot.slane %v1338_v49, 5  ;;  %v4024_v46 = vadd.f32 %v3960_v60, %v3830_v27 }
 0x3b2   : > { %v4090_v43 = vrot.slane %v1338_v49, 4  ;;  %v4284_v17 = vrot.slane %v1338_v49, 3  ;;  %v4478_v62 = vrot.slane %v1338_v49, 2  ;;  %v3444_v45 = vmul.f32 %v8469_v4, %v1338_v49 }
 0x3b3   : > { %v1586_v18 = vpop.f32.mrf.mxu2  ;;  %v3574_v2 = vmul.f32 %v8472_v8, %v3508_v48  ;;  %v4672_v35 = vrot.slane %v1338_v49, 1  ;;  %v3768_v37 = vmul.f32 %v8475_v13, %v3702_v38  ;;  %v3962_v36 = vmul.f32 %v8478_v0, %v3896_v56 }
 0x3b4   : > { %v1835_v40 = vpop.f32.mrf.mxu3  ;;  %v1091_v15 = vpop.f32.mrf.mxu0  ;;  %v4218_v39 = vadd.f32 %v4154_v3, %v4024_v46  ;;  %v4283_v60 = vrot.slane %v8836_v30, 3  ;;  %v4156_v50 = vmul.f32 %v8484_v1, %v4090_v43  ;;  %v3573_v4 = vmul.f32 %v8568_v25, %v3507_v26 }
 0x3b5   : > { %v1836_v27 = vadd.f32 %v1835_v40, %v1586_v18  ;;  %v3638_v28 = vadd.f32 %v3574_v2, %v3444_v45  ;;  %v4350_v49 = vmul.f32 %v8486_v44, %v4284_v17  ;;  %v4544_v8 = vmul.f32 %v8488_v34, %v4478_v62 }
 0x3b6   : > { %v1340_v12 = vpop.f32.mrf.mxu1  ;;  %v4412_v48 = vadd.f32 %v4348_v11, %v4218_v39  ;;  %v4738_v51 = vmul.f32 %v8490_v10, %v4672_v35  ;;  %v3767_v46 = vmul.f32 %v8571_v58, %v3701_v61  ;;  %v3637_v45 = vadd.f32 %v3573_v4, %v3443_v21 }
 0x3b7   : > { %v8869_v38 = vadd.f32 %v1340_v12, %v1091_v15  ;;  %v3832_v56 = vadd.f32 %v3768_v37, %v3638_v28  ;;  %v3509_v3 = vrot.slane %v1836_v27, 7  ;;  %v3703_v2 = vrot.slane %v1836_v27, 6 }
 0x3b8   : > { %v4606_v18 = vadd.f32 %v4542_v19, %v4412_v48  ;;  %v3897_v43 = vrot.slane %v1836_v27, 5  ;;  %v3445_v26 = vmul.f32 %v8565_v42, %v1836_v27  ;;  %v3961_v39 = vmul.f32 %v8574_v9, %v3895_v16 }
 0x3b9   : > { %10287 = vst [vmem:[#allocation29_spill] sm:$0xff] %v8869_v38  ;;  %v4026_v40 = vadd.f32 %v3962_v36, %v3832_v56  ;;  %v3575_v17 = vmul.f32 %v8568_v25, %v3509_v3  ;;  %v3831_v11 = vadd.f32 %v3767_v46, %v3637_v45  ;;  %v4091_v62 = vrot.slane %v1836_v27, 4 }
 0x3ba   : > { %v4155_v12 = vmul.f32 %v8577_v41, %v4089_v20  ;;  %v4285_v35 = vrot.slane %v1836_v27, 3  ;;  %v4800_v15 = vadd.f32 %v4736_v22, %v4606_v18  ;;  %v3769_v4 = vmul.f32 %v8571_v58, %v3703_v2 }
 0x3bb   : > { %v1589_v37 = vpop.f32.mrf.mxu2  ;;  %v4220_v28 = vadd.f32 %v4156_v50, %v4026_v40  ;;  %v3639_v61 = vadd.f32 %v3575_v17, %v3445_v26  ;;  %v3963_v36 = vmul.f32 %v8574_v9, %v3897_v43  ;;  %v4025_v21 = vadd.f32 %v3961_v39, %v3831_v11 }
 0x3bc   : > { %v8877_v19 = vpop.f32.mrf.mxu0  ;;  %v4477_v48 = vrot.slane %v8836_v30, 2  ;;  %v4479_v56 = vrot.slane %v1836_v27, 2  ;;  %v1838_v16 = vpop.f32.mrf.mxu3  ;;  %v4671_v20 = vrot.slane %v8836_v30, 1  ;;  %v4673_v45 = vrot.slane %v1836_v27, 1 }
 0x3bd   : > { %v4414_v3 = vadd.f32 %v4350_v49, %v4220_v28  ;;  %v3833_v46 = vadd.f32 %v3769_v4, %v3639_v61  ;;  %v8882_v38 = vadd.f32 %v1838_v16, %v1589_v37  ;;  %v4157_v50 = vmul.f32 %v8577_v41, %v4091_v62  ;;  %v10289_v28 = vld [vmem:[#allocation26_spill] sm:$0xff] }
 0x3be   : > { %v8884_v22 = vpop.f32.mrf.mxu1  ;;  %v4219_v18 = vadd.f32 %v4155_v12, %v4025_v21  ;;  %v4349_v2 = vmul.f32 %v8580_v23, %v4283_v60  ;;  %v4351_v26 = vmul.f32 %v8580_v23, %v4285_v35  ;;  %v4543_v17 = vmul.f32 %v8583_v31, %v4477_v48 }
 0x3bf   : > { %10288 = vst [vmem:[#allocation30_spill] sm:$0xff] %v8882_v38  ;;  %v4608_v43 = vadd.f32 %v4544_v8, %v4414_v3  ;;  %v4027_v40 = vadd.f32 %v3963_v36, %v3833_v46  ;;  %v4545_v39 = vmul.f32 %v8583_v31, %v4479_v56  ;;  %v4737_v30 = vmul.f32 %v8586_v57, %v4671_v20 }
 0x3c0   : > { %v4413_v49 = vadd.f32 %v4349_v2, %v4219_v18  ;;  %v4739_v27 = vmul.f32 %v8586_v57, %v4673_v45  ;;  %v3814_v62 = vadd.f32 %v8846_v55, %v10289_v28  ;;  %v3816_v8 = vadd.f32 %v8849_v53, %v8834_v24 }
 0x3c1   : > { %v4802_v11 = vadd.f32 %v4738_v51, %v4608_v43  ;;  %v4221_v37 = vadd.f32 %v4157_v50, %v4027_v40  ;;  %v8899_v12 = vadd.f32 %v8818_v47, %v8841_v5  ;;  %v10290_v35 = vrot.slane %v8411_v33, 5 }
 0x3c2   : > { %v4607_v60 = vadd.f32 %v4543_v17, %v4413_v49  ;;  %v10291_v4 = vrot.slane %v8540_v59, 5  ;;  %v4072_v48 = vrot.slane %v8411_v33, 4  ;;  %v4074_v24 = vrot.slane %v8540_v59, 4 }
 0x3c3   : > { %v3944_v61 = vmul.f32 %v8478_v0, %v10290_v35  ;;  %v8907_v36 = vpop.f32.mrf.mxu2  ;;  %v4882_v21 = vpack.c.bf16 %v4802_v11, %v4800_v15  ;;  %v4415_v55 = vadd.f32 %v4351_v26, %v4221_v37  ;;  %v8913_v47 = vadd.f32 %v8821_v29, %v8843_v14 }
 0x3c4   : > { %v3946_v51 = vmul.f32 %v8478_v0, %v10291_v4  ;;  %10292 = vst [vmem:[#allocation31_spill] sm:$0xff] %v8907_v36  ;;  %v1096_v53 = vpop.f32.mrf.mxu0  ;;  %v4266_v16 = vrot.slane %v8411_v33, 3  ;;  %v8916_v3 = vpop.f32.mrf.mxu3  ;;  %v4138_v15 = vmul.f32 %v8484_v1, %v4072_v48  ;;  %v4140_v20 = vmul.f32 %v8484_v1, %v4074_v24 }
 0x3c5   : > { %v4008_v5 = vadd.f32 %v3944_v61, %v3814_v62  ;;  %10293 = vst [vmem:[#allocation32_spill] sm:$0xff] %v8916_v3  ;;  %5060 = vmatpush.bf16.msrb.mxu0 %v4882_v21  ;;  %v4609_v46 = vadd.f32 %v4545_v39, %v4415_v55  ;;  %v4268_v45 = vrot.slane %v8540_v59, 3  ;;  %v4801_v18 = vadd.f32 %v4737_v30, %v4607_v60 }
 0x3c6   : > { %v4010_v56 = vadd.f32 %v3946_v51, %v3816_v8  ;;  %v1345_v50 = vpop.f32.mrf.mxu1  ;;  %v4332_v2 = vmul.f32 %v8486_v44, %v4266_v16  ;;  %v4460_v29 = vrot.slane %v8411_v33, 2  ;;  %v4462_v14 = vrot.slane %v8540_v59, 2 }
 0x3c7   : > { %v8924_v43 = vadd.f32 %v1345_v50, %v1096_v53  ;;  %v4803_v40 = vadd.f32 %v4739_v27, %v4609_v46  ;;  %v4202_v26 = vadd.f32 %v4138_v15, %v4008_v5  ;;  %v4881_v49 = vpack.c.bf16 %v8808_v54, %v8806_v7  ;;  %v10296_v54 = vld [vmem:[#allocation19_spill] sm:$0xff] }
 0x3c8   : > { %v4204_v17 = vadd.f32 %v4140_v20, %v4010_v56  ;;  %v4879_v39 = vpack.c.bf16 %v8913_v47, %v8899_v12  ;;  %v4334_v11 = vmul.f32 %v8486_v44, %v4268_v45  ;;  %v4526_v30 = vmul.f32 %v8488_v34, %v4460_v29 }
 0x3c9   : > { %10294 = vst [vmem:[#allocation33_spill] sm:$0xff] %v8924_v43  ;;  %v10295_v37 = vpack.c.bf16 %v8783_v52, %v8766_v32  ;;  %v4883_v28 = vpack.c.bf16 %v4803_v40, %v4801_v18  ;;  %v4396_v62 = vadd.f32 %v4332_v2, %v4202_v26  ;;  %v4654_v27 = vrot.slane %v8411_v33, 1  ;;  %v10297_v52 = vld [vmem:[#allocation23_spill] sm:$0xff] }
 0x3ca   : > { %v4656_v8 = vrot.slane %v8540_v59, 1  ;;  %v4398_v60 = vadd.f32 %v4334_v11, %v4204_v17  ;;  %v4528_v7 = vmul.f32 %v8488_v34, %v4462_v14  ;;  %v3431_v12 = vmul.f32 %v8565_v42, %v10296_v54  ;;  %v10300_v11 = vld [vmem:[#allocation28_spill] sm:$0xff] }
 0x3cb   : > { %5061 = vmatpush.bf16.msrb.mxu0 %v10295_v37  ;;  %v3495_v35 = vrot.slane %v10296_v54, 7  ;;  %5238 = vmatpush.bf16.msrb.mxu2 %v4883_v28  ;;  %v1594_v61 = vpop.f32.mrf.mxu2  ;;  %v4590_v4 = vadd.f32 %v4526_v30, %v4396_v62  ;;  %v3497_v51 = vrot.slane %v10297_v52, 7  ;;  %v3689_v21 = vrot.slane %v10296_v54, 6  ;;  %v10301_v30 = vld [vmem:[#allocation27_spill] sm:$0xff] }
 0x3cc   : > { %v4722_v32 = vmul.f32 %v8490_v10, %v4656_v8  ;;  %v8944_v33 = vpop.f32.mrf.mxu0  ;;  %v4592_v59 = vadd.f32 %v4528_v7, %v4398_v60  ;;  %v3691_v48 = vrot.slane %v10297_v52, 6  ;;  %v3883_v24 = vrot.slane %v10296_v54, 5  ;;  %v1843_v53 = vpop.f32.mrf.mxu3 }
 0x3cd   : > { %v3561_v55 = vmul.f32 %v8568_v25, %v3495_v35  ;;  %v10298_v47 = vpack.c.bf16 %v8743_v6, %v8719_v63  ;;  %v4720_v5 = vmul.f32 %v8490_v10, %v4654_v27  ;;  %v3433_v56 = vmul.f32 %v8565_v42, %v10297_v52 }
 0x3ce   : > { %v3563_v16 = vmul.f32 %v8568_v25, %v3497_v51  ;;  %v3885_v46 = vrot.slane %v10297_v52, 5  ;;  %v8957_v15 = vadd.f32 %v1843_v53, %v1594_v61  ;;  %v8959_v20 = vpop.f32.mrf.mxu1  ;;  %v4786_v45 = vadd.f32 %v4722_v32, %v4592_v59 }
 0x3cf   : > { %5062 = vmatpush.bf16.msrb.mxu0 %v10298_v47  ;;  %v3625_v50 = vadd.f32 %v3561_v55, %v3431_v12  ;;  %v3755_v18 = vmul.f32 %v8571_v58, %v3689_v21  ;;  %5239 = vmatpush.bf16.msrb.mxu2 %v4881_v49  ;;  %v4784_v63 = vadd.f32 %v4720_v5, %v4590_v4  ;;  %v4077_v26 = vrot.slane %v10296_v54, 4  ;;  %v10304_v47 = vld [vmem:[#allocation17_spill] sm:$0xff] }
 0x3d0   : > { %10299 = vst [vmem:[#allocation34_spill] sm:$0xff] %v8957_v15  ;;  %v3627_v6 = vadd.f32 %v3563_v16, %v3433_v56  ;;  %v3757_v2 = vmul.f32 %v8571_v58, %v3691_v48  ;;  %v3949_v29 = vmul.f32 %v8574_v9, %v3883_v24  ;;  %v3951_v40 = vmul.f32 %v8574_v9, %v3885_v46 }
 0x3d1   : > { %v3819_v14 = vadd.f32 %v3755_v18, %v3625_v50  ;;  %v4079_v17 = vrot.slane %v10297_v52, 4  ;;  %v10302_v37 = vpack.c.bf16 %v10300_v11, %v10301_v30  ;;  %v4271_v49 = vrot.slane %v10296_v54, 3  ;;  %v10305_v18 = vld [vmem:[#allocation22_spill] sm:$0xff] }
 0x3d2   : > { %v3821_v28 = vadd.f32 %v3757_v2, %v3627_v6  ;;  %v4273_v62 = vrot.slane %v10297_v52, 3  ;;  %v4465_v27 = vrot.slane %v10296_v54, 2  ;;  %v4874_v8 = vpack.c.bf16 %v4786_v45, %v4784_v63  ;;  %v10307_v2 = vld [vmem:[#allocation18_spill] sm:$0xff] }
 0x3d3   : > { %5063 = vmatpush.bf16.msrb.mxu0 %v10302_v37  ;;  %v4013_v60 = vadd.f32 %v3949_v29, %v3819_v14  ;;  %v4143_v7 = vmul.f32 %v8577_v41, %v4077_v26  ;;  %v4467_v12 = vrot.slane %v10297_v52, 2  ;;  %5240 = vmatpush.bf16.msrb.mxu2 %v4879_v39  ;;  %v4145_v61 = vmul.f32 %v8577_v41, %v4079_v17  ;;  %v10303_v39 = vld [vmem:[#allocation11_spill] sm:$0xff] }
 0x3d4   : > { %v4015_v35 = vadd.f32 %v3951_v40, %v3821_v28  ;;  %v4337_v4 = vmul.f32 %v8580_v23, %v4271_v49  ;;  %v4339_v32 = vmul.f32 %v8580_v23, %v4273_v62  ;;  %v1101_v51 = vpop.f32.mrf.mxu0  ;;  %v4531_v59 = vmul.f32 %v8583_v31, %v4465_v27  ;;  %v10308_v49 = vld [vmem:[#allocation15_spill] sm:$0xff]  ;;  %v10309_v62 = vld [vmem:[#allocation16_spill] sm:$0xff] }
 0x3d5   : > { %v4207_v21 = vadd.f32 %v4143_v7, %v4013_v60  ;;  %v4659_v55 = vrot.slane %v10296_v54, 1  ;;  %v4661_v48 = vrot.slane %v10297_v52, 1  ;;  %v4533_v53 = vmul.f32 %v8583_v31, %v4467_v12 }
 0x3d6   : > { %v4209_v24 = vadd.f32 %v4145_v61, %v4015_v35  ;;  %v3422_v5 = vmul.f32 %v10304_v47, %v10303_v39  ;;  %v3486_v56 = vrot.slane %v10303_v39, 7  ;;  %v1350_v16 = vpop.f32.mrf.mxu1  ;;  %v3424_v54 = vmul.f32 %v10304_v47, %v10305_v18 }
 0x3d7   : > { %5064 = vmatpush.bf16.msrb.mxu0 %v4874_v8  ;;  %v4401_v46 = vadd.f32 %v4337_v4, %v4207_v21  ;;  %v4725_v45 = vmul.f32 %v8586_v57, %v4659_v55  ;;  %v4727_v50 = vmul.f32 %v8586_v57, %v4661_v48  ;;  %v8989_v63 = vadd.f32 %v1350_v16, %v1101_v51 }
 0x3d8   : > { %v4403_v52 = vadd.f32 %v4339_v32, %v4209_v24  ;;  %v3488_v6 = vrot.slane %v10305_v18, 7  ;;  %v3552_v29 = vmul.f32 %v10307_v2, %v3486_v56  ;;  %v3680_v40 = vrot.slane %v10303_v39, 6  ;;  %v9013_v56 = vpop.f32.mrf.mxu3 }
 0x3d9   : > { %10306 = vst [vmem:[#allocation35_spill] sm:$0xff] %v8989_v63  ;;  %v4595_v14 = vadd.f32 %v4531_v59, %v4401_v46  ;;  %v3682_v26 = vrot.slane %v10305_v18, 6  ;;  %v3874_v17 = vrot.slane %v10303_v39, 5  ;;  %v3876_v28 = vrot.slane %v10305_v18, 5 }
 0x3da   : > { %v4597_v11 = vadd.f32 %v4533_v53, %v4403_v52  ;;  %v3554_v30 = vmul.f32 %v10307_v2, %v3488_v6  ;;  %v3616_v37 = vadd.f32 %v3552_v29, %v3422_v5  ;;  %v9000_v27 = vadd.f32 %v10309_v62, %v10308_v49  ;;  %v9011_v5 = vpop.f32.mrf.mxu2  ;;  %10311 = vst [vmem:[#allocation37_spill] sm:$0xff] %v9013_v56 }
 0x3db   : > { %v4789_v8 = vadd.f32 %v4725_v45, %v4595_v14  ;;  %v3746_v60 = vmul.f32 %v8475_v13, %v3680_v40  ;;  %v3748_v7 = vmul.f32 %v8475_v13, %v3682_v26  ;;  %v3940_v61 = vmul.f32 %v8478_v0, %v3874_v17  ;;  %10310 = vst [vmem:[#allocation36_spill] sm:$0xff] %v9011_v5  ;;  %v10312_v17 = vld [vmem:[#allocation14_spill] sm:$0xff] }
 0x3dc   : > { %v4791_v12 = vadd.f32 %v4727_v50, %v4597_v11  ;;  %v3618_v35 = vadd.f32 %v3554_v30, %v3424_v54  ;;  %v4068_v4 = vrot.slane %v10303_v39, 4  ;;  %v4070_v51 = vrot.slane %v10305_v18, 4 }
 0x3dd   : > { %v3810_v32 = vadd.f32 %v3746_v60, %v3616_v37  ;;  %v4262_v21 = vrot.slane %v10303_v39, 3  ;;  %v4264_v59 = vrot.slane %v10305_v18, 3  ;;  %v3942_v24 = vmul.f32 %v8478_v0, %v3876_v28 }
 0x3de   : > { %v4877_v55 = vpack.c.bf16 %v4791_v12, %v4789_v8  ;;  %v3812_v48 = vadd.f32 %v3748_v7, %v3618_v35  ;;  %v4456_v53 = vrot.slane %v10303_v39, 2  ;;  %v4134_v46 = vmul.f32 %v8484_v1, %v4068_v4 }
 0x3df   : > { %v4004_v16 = vadd.f32 %v3940_v61, %v3810_v32  ;;  %v4136_v45 = vmul.f32 %v8484_v1, %v4070_v51  ;;  %v4328_v50 = vmul.f32 %v8486_v44, %v4262_v21  ;;  %v4330_v52 = vmul.f32 %v8486_v44, %v4264_v59 }
 0x3e0   : > { %5241 = vmatpush.bf16.msrb.mxu2 %v4877_v55  ;;  %v4006_v54 = vadd.f32 %v3942_v24, %v3812_v48  ;;  %v4458_v6 = vrot.slane %v10305_v18, 2  ;;  %v4650_v29 = vrot.slane %v10303_v39, 1  ;;  %v4522_v40 = vmul.f32 %v8488_v34, %v4456_v53 }
 0x3e1   : > { %v4198_v14 = vadd.f32 %v4134_v46, %v4004_v16  ;;  %v4652_v26 = vrot.slane %v10305_v18, 1  ;;  %v3427_v11 = vmul.f32 %v8565_v42, %v10312_v17  ;;  %v3429_v28 = vmul.f32 %v8565_v42, %v9000_v27 }
 0x3e2   : > { %v4200_v30 = vadd.f32 %v4136_v45, %v4006_v54  ;;  %v4524_v37 = vmul.f32 %v8488_v34, %v4458_v6  ;;  %v3491_v49 = vrot.slane %v10312_v17, 7  ;;  %v4716_v8 = vmul.f32 %v8490_v10, %v4650_v29 }
 0x3e3   : > { %v4392_v62 = vadd.f32 %v4328_v50, %v4198_v14  ;;  %v3493_v39 = vrot.slane %v9000_v27, 7  ;;  %v3685_v60 = vrot.slane %v10312_v17, 6  ;;  %v3687_v12 = vrot.slane %v9000_v27, 6 }
 0x3e4   : > { %v4394_v7 = vadd.f32 %v4330_v52, %v4200_v30  ;;  %v3557_v18 = vmul.f32 %v8568_v25, %v3491_v49  ;;  %v3879_v35 = vrot.slane %v10312_v17, 5  ;;  %v4718_v4 = vmul.f32 %v8490_v10, %v4652_v26  ;;  %v1599_v26 = vpop.f32.mrf.mxu2  ;;  %v10313_v30 = vld [vmem:[#allocation2_spill] sm:$0xff] }
 0x3e5   : > { %v4586_v61 = vadd.f32 %v4522_v40, %v4392_v62  ;;  %v3559_v32 = vmul.f32 %v8568_v25, %v3493_v39  ;;  %v3881_v51 = vrot.slane %v9000_v27, 5  ;;  %v3751_v55 = vmul.f32 %v8571_v58, %v3685_v60  ;;  %v10315_v39 = vld [vmem:[#allocation12_spill] sm:$0xff]  ;;  %v10316_v60 = vld [vmem:[#allocation13_spill] sm:$0xff] }
 0x3e6   : > { %v4588_v21 = vadd.f32 %v4524_v37, %v4394_v7  ;;  %v3621_v59 = vadd.f32 %v3557_v18, %v3427_v11  ;;  %v3753_v48 = vmul.f32 %v8571_v58, %v3687_v12  ;;  %v3945_v16 = vmul.f32 %v8574_v9, %v3879_v35  ;;  %v1848_v11 = vpop.f32.mrf.mxu3  ;;  %v10314_v37 = vld [vmem:[#allocation3_spill] sm:$0xff] }
 0x3e7   : > { %v4780_v24 = vadd.f32 %v4716_v8, %v4586_v61  ;;  %v3623_v53 = vadd.f32 %v3559_v32, %v3429_v28  ;;  %v4073_v46 = vrot.slane %v10312_v17, 4  ;;  %v4075_v54 = vrot.slane %v9000_v27, 4 }
 0x3e8   : > { %v4782_v45 = vadd.f32 %v4718_v4, %v4588_v21  ;;  %v3815_v50 = vadd.f32 %v3751_v55, %v3621_v59  ;;  %v4267_v52 = vrot.slane %v10312_v17, 3  ;;  %v3947_v29 = vmul.f32 %v8574_v9, %v3881_v51 }
 0x3e9   : > { %v3817_v6 = vadd.f32 %v3753_v48, %v3623_v53  ;;  %v4269_v14 = vrot.slane %v9000_v27, 3  ;;  %v4461_v40 = vrot.slane %v10312_v17, 2  ;;  %v9049_v28 = vadd.f32 %v10314_v37, %v10313_v30 }
 0x3ea   : > { %v4872_v49 = vpack.c.bf16 %v4782_v45, %v4780_v24  ;;  %v4009_v62 = vadd.f32 %v3945_v16, %v3815_v50  ;;  %v4139_v8 = vmul.f32 %v8577_v41, %v4073_v46  ;;  %v9054_v7 = vadd.f32 %v10316_v60, %v10315_v39  ;;  %v10318_v16 = vld [vmem:[#allocation8_spill] sm:$0xff] }
 0x3eb   : > { %v4011_v18 = vadd.f32 %v3947_v29, %v3817_v6  ;;  %v4141_v12 = vmul.f32 %v8577_v41, %v4075_v54  ;;  %v4463_v35 = vrot.slane %v9000_v27, 2  ;;  %v4333_v4 = vmul.f32 %v8580_v23, %v4267_v52 }
 0x3ec   : > { %5065 = vmatpush.bf16.msrb.mxu0 %v4872_v49  ;;  %v4203_v61 = vadd.f32 %v4139_v8, %v4009_v62  ;;  %v4655_v32 = vrot.slane %v10312_v17, 1  ;;  %v9060_v51 = vadd.f32 %v1848_v11, %v1599_v26  ;;  %v4335_v59 = vmul.f32 %v8580_v23, %v4269_v14 }
 0x3ed   : > { %v4205_v21 = vadd.f32 %v4141_v12, %v4011_v18  ;;  %v4527_v55 = vmul.f32 %v8583_v31, %v4461_v40  ;;  %v4657_v48 = vrot.slane %v9000_v27, 1  ;;  %v4529_v53 = vmul.f32 %v8583_v31, %v4463_v35 }
 0x3ee   : > { %10317 = vst [vmem:[#allocation38_spill] sm:$0xff] %v9060_v51  ;;  %v4397_v24 = vadd.f32 %v4333_v4, %v4203_v61  ;;  %v3418_v46 = vmul.f32 %v10304_v47, %v10318_v16  ;;  %v3482_v45 = vrot.slane %v10318_v16, 7  ;;  %v4721_v17 = vmul.f32 %v8586_v57, %v4655_v32 }
 0x3ef   : > { %v4399_v50 = vadd.f32 %v4335_v59, %v4205_v21  ;;  %v3420_v54 = vmul.f32 %v10304_v47, %v9049_v28  ;;  %v3484_v52 = vrot.slane %v9049_v28, 7  ;;  %v3676_v27 = vrot.slane %v10318_v16, 6 }
 0x3f0   : > { %v4591_v6 = vadd.f32 %v4527_v55, %v4397_v24  ;;  %v3548_v29 = vmul.f32 %v10307_v2, %v3482_v45  ;;  %v3678_v14 = vrot.slane %v9049_v28, 6  ;;  %v4723_v26 = vmul.f32 %v8586_v57, %v4657_v48 }
 0x3f1   : > { %v4593_v40 = vadd.f32 %v4529_v53, %v4399_v50  ;;  %v3550_v11 = vmul.f32 %v10307_v2, %v3484_v52  ;;  %v3870_v30 = vrot.slane %v10318_v16, 5  ;;  %v3742_v49 = vmul.f32 %v8475_v13, %v3676_v27 }
 0x3f2   : > { %v3612_v37 = vadd.f32 %v3548_v29, %v3418_v46  ;;  %v3744_v62 = vmul.f32 %v8475_v13, %v3678_v14  ;;  %v3872_v8 = vrot.slane %v9049_v28, 5  ;;  %v4785_v39 = vadd.f32 %v4721_v17, %v4591_v6 }
 0x3f3   : > { %v4787_v60 = vadd.f32 %v4723_v26, %v4593_v40  ;;  %v3614_v18 = vadd.f32 %v3550_v11, %v3420_v54  ;;  %v3936_v12 = vmul.f32 %v8478_v0, %v3870_v30  ;;  %v4064_v4 = vrot.slane %v10318_v16, 4  ;;  %v10319_v30 = vld [vmem:[#allocation10_spill] sm:$0xff] }
 0x3f4   : > { %v3806_v35 = vadd.f32 %v3742_v49, %v3612_v37  ;;  %v3938_v61 = vmul.f32 %v8478_v0, %v3872_v8  ;;  %v4066_v32 = vrot.slane %v9049_v28, 4  ;;  %v4258_v55 = vrot.slane %v10318_v16, 3 }
 0x3f5   : > { %v4875_v21 = vpack.c.bf16 %v4787_v60, %v4785_v39  ;;  %v3808_v59 = vadd.f32 %v3744_v62, %v3614_v18  ;;  %v4260_v48 = vrot.slane %v9049_v28, 3  ;;  %v4130_v53 = vmul.f32 %v8484_v1, %v4064_v4 }
 0x3f6   : > { %v4000_v24 = vadd.f32 %v3936_v12, %v3806_v35  ;;  %v4132_v46 = vmul.f32 %v8484_v1, %v4066_v32  ;;  %v4452_v45 = vrot.slane %v10318_v16, 2  ;;  %v4324_v17 = vmul.f32 %v8486_v44, %v4258_v55 }
 0x3f7   : > { %5242 = vmatpush.bf16.msrb.mxu2 %v4875_v21  ;;  %v4002_v50 = vadd.f32 %v3938_v61, %v3808_v59  ;;  %v4454_v54 = vrot.slane %v9049_v28, 2  ;;  %v4646_v52 = vrot.slane %v10318_v16, 1  ;;  %v4326_v29 = vmul.f32 %v8486_v44, %v4260_v48  ;;  %v9111_v21 = vpop.f32.mrf.mxu0  ;;  %v9113_v59 = vpop.f32.mrf.mxu1 }
 0x3f8   : > { %v4194_v6 = vadd.f32 %v4130_v53, %v4000_v24  ;;  %v4518_v27 = vmul.f32 %v8488_v34, %v4452_v45  ;;  %v4648_v14 = vrot.slane %v9049_v28, 1  ;;  %v3423_v37 = vmul.f32 %v8565_v42, %v10319_v30 }
 0x3f9   : > { %v4196_v40 = vadd.f32 %v4132_v46, %v4002_v50  ;;  %v4520_v26 = vmul.f32 %v8488_v34, %v4454_v54  ;;  %v4712_v11 = vmul.f32 %v8490_v10, %v4646_v52  ;;  %v3425_v62 = vmul.f32 %v8565_v42, %v9054_v7 }
 0x3fa   : > { %v4388_v49 = vadd.f32 %v4324_v17, %v4194_v6  ;;  %v3487_v16 = vrot.slane %v10319_v30, 7  ;;  %v3489_v8 = vrot.slane %v9054_v7, 7  ;;  %v4714_v60 = vmul.f32 %v8490_v10, %v4648_v14 }
 0x3fb   : > { %v4390_v39 = vadd.f32 %v4326_v29, %v4196_v40  ;;  %v3681_v28 = vrot.slane %v10319_v30, 6  ;;  %v3683_v18 = vrot.slane %v9054_v7, 6  ;;  %v3875_v4 = vrot.slane %v10319_v30, 5 }
 0x3fc   : > { %v4582_v12 = vadd.f32 %v4518_v27, %v4388_v49  ;;  %v3553_v35 = vmul.f32 %v8568_v25, %v3487_v16  ;;  %v3555_v61 = vmul.f32 %v8568_v25, %v3489_v8  ;;  %v3877_v24 = vrot.slane %v9054_v7, 5 }
 0x3fd   : > { %v4584_v32 = vadd.f32 %v4520_v26, %v4390_v39  ;;  %v3747_v55 = vmul.f32 %v8571_v58, %v3681_v28  ;;  %v3749_v48 = vmul.f32 %v8571_v58, %v3683_v18  ;;  %v3941_v50 = vmul.f32 %v8574_v9, %v3875_v4  ;;  %v10320_v4 = vld [vmem:[#allocation4_spill] sm:$0xff] }
 0x3fe   : > { %v4776_v53 = vadd.f32 %v4712_v11, %v4582_v12  ;;  %v3617_v46 = vadd.f32 %v3553_v35, %v3423_v37  ;;  %v3619_v45 = vadd.f32 %v3555_v61, %v3425_v62  ;;  %v3943_v54 = vmul.f32 %v8574_v9, %v3877_v24  ;;  %v10321_v24 = vld [vmem:[#allocation20_spill] sm:$0xff] }
 0x3ff   : > { %v4778_v17 = vadd.f32 %v4714_v60, %v4584_v32  ;;  %v4069_v52 = vrot.slane %v10319_v30, 4  ;;  %v4071_v6 = vrot.slane %v9054_v7, 4  ;;  %v4263_v14 = vrot.slane %v10319_v30, 3 }
 0x400   : > { %v3811_v29 = vadd.f32 %v3747_v55, %v3617_v46  ;;  %v3813_v27 = vadd.f32 %v3749_v48, %v3619_v45  ;;  %v4265_v40 = vrot.slane %v9054_v7, 3  ;;  %v4457_v49 = vrot.slane %v10319_v30, 2 }
 0x401   : > { %v4870_v26 = vpack.c.bf16 %v4778_v17, %v4776_v53  ;;  %v4135_v11 = vmul.f32 %v8577_v41, %v4069_v52  ;;  %v4137_v37 = vmul.f32 %v8577_v41, %v4071_v6  ;;  %v4329_v8 = vmul.f32 %v8580_v23, %v4263_v14  ;;  %v9145_v52 = vpop.f32.mrf.mxu3 }
 0x402   : > { %v4005_v62 = vadd.f32 %v3941_v50, %v3811_v29  ;;  %v4007_v16 = vadd.f32 %v3943_v54, %v3813_v27  ;;  %v4331_v39 = vmul.f32 %v8580_v23, %v4265_v40  ;;  %v4459_v60 = vrot.slane %v9054_v7, 2  ;;  %v9143_v54 = vpop.f32.mrf.mxu2  ;;  %v9151_v40 = vpop.f32.mrf.mxu0 }
 0x403   : > { %5066 = vmatpush.bf16.msrb.mxu0 %v4870_v26  ;;  %v4523_v28 = vmul.f32 %v8583_v31, %v4457_v49  ;;  %v4651_v18 = vrot.slane %v10319_v30, 1  ;;  %v4653_v12 = vrot.slane %v9054_v7, 1  ;;  %v3414_v32 = vmul.f32 %v10304_v47, %v10320_v4  ;;  %v9153_v26 = vpop.f32.mrf.mxu1 }
 0x404   : > { %v4199_v35 = vadd.f32 %v4135_v11, %v4005_v62  ;;  %v4201_v61 = vadd.f32 %v4137_v37, %v4007_v16  ;;  %v3478_v55 = vrot.slane %v10320_v4, 7  ;;  %v4525_v48 = vmul.f32 %v8583_v31, %v4459_v60 }
 0x405   : > { %v3416_v53 = vmul.f32 %v10304_v47, %v10321_v24  ;;  %v3480_v46 = vrot.slane %v10321_v24, 7  ;;  %v3672_v45 = vrot.slane %v10320_v4, 6  ;;  %v4717_v7 = vmul.f32 %v8586_v57, %v4651_v18 }
 0x406   : > { %v4393_v50 = vadd.f32 %v4329_v8, %v4199_v35  ;;  %v4395_v30 = vadd.f32 %v4331_v39, %v4201_v61  ;;  %v3544_v17 = vmul.f32 %v10307_v2, %v3478_v55  ;;  %v4719_v6 = vmul.f32 %v8586_v57, %v4653_v12 }
 0x407   : > { %v3546_v29 = vmul.f32 %v10307_v2, %v3480_v46  ;;  %v3674_v27 = vrot.slane %v10321_v24, 6  ;;  %v3738_v14 = vmul.f32 %v8475_v13, %v3672_v45  ;;  %v3866_v62 = vrot.slane %v10320_v4, 5 }
 0x408   : > { %v4587_v11 = vadd.f32 %v4523_v28, %v4393_v50  ;;  %v4589_v37 = vadd.f32 %v4525_v48, %v4395_v30  ;;  %v3608_v49 = vadd.f32 %v3544_v17, %v3414_v32  ;;  %v3868_v39 = vrot.slane %v10321_v24, 5  ;;  %v10322_v30 = vld [vmem:[#allocation6_spill] sm:$0xff]  ;;  %v10323_v17 = vld [vmem:[#allocation7_spill] sm:$0xff] }
 0x409   : > { %v3610_v16 = vadd.f32 %v3546_v29, %v3416_v53  ;;  %v3740_v8 = vmul.f32 %v8475_v13, %v3674_v27  ;;  %v4060_v60 = vrot.slane %v10320_v4, 4  ;;  %v3932_v61 = vmul.f32 %v8478_v0, %v3866_v62 }
 0x40a   : > { %v4781_v18 = vadd.f32 %v4717_v7, %v4587_v11  ;;  %v4783_v12 = vadd.f32 %v4719_v6, %v4589_v37  ;;  %v3802_v35 = vadd.f32 %v3738_v14, %v3608_v49  ;;  %v3934_v46 = vmul.f32 %v8478_v0, %v3868_v39 }
 0x40b   : > { %v3804_v55 = vadd.f32 %v3740_v8, %v3610_v16  ;;  %v4062_v28 = vrot.slane %v10321_v24, 4  ;;  %v4126_v32 = vmul.f32 %v8484_v1, %v4060_v60  ;;  %v4254_v45 = vrot.slane %v10320_v4, 3 }
 0x40c   : > { %v4873_v48 = vpack.c.bf16 %v4783_v12, %v4781_v18  ;;  %v3996_v53 = vadd.f32 %v3932_v61, %v3802_v35  ;;  %v4256_v50 = vrot.slane %v10321_v24, 3  ;;  %v9167_v7 = vadd.f32 %v10323_v17, %v10322_v30  ;;  %v10324_v12 = vld [vmem:[#allocation9_spill] sm:$0xff] }
 0x40d   : > { %v3998_v6 = vadd.f32 %v3934_v46, %v3804_v55  ;;  %v4128_v29 = vmul.f32 %v8484_v1, %v4062_v28  ;;  %v4448_v27 = vrot.slane %v10320_v4, 2  ;;  %v4320_v11 = vmul.f32 %v8486_v44, %v4254_v45  ;;  %v9181_v55 = vpop.f32.mrf.mxu2  ;;  %v9183_v46 = vpop.f32.mrf.mxu3 }
 0x40e   : > { %5243 = vmatpush.bf16.msrb.mxu2 %v4873_v48  ;;  %v4190_v14 = vadd.f32 %v4126_v32, %v3996_v53  ;;  %v4322_v37 = vmul.f32 %v8486_v44, %v4256_v50  ;;  %v4450_v49 = vrot.slane %v10321_v24, 2  ;;  %v4642_v8 = vrot.slane %v10320_v4, 1  ;;  %v9189_v48 = vpop.f32.mrf.mxu0  ;;  %v9191_v53 = vpop.f32.mrf.mxu1 }
 0x40f   : > { %v4192_v62 = vadd.f32 %v4128_v29, %v3998_v6  ;;  %v4514_v16 = vmul.f32 %v8488_v34, %v4448_v27  ;;  %v4644_v39 = vrot.slane %v10321_v24, 1  ;;  %v3419_v35 = vmul.f32 %v8565_v42, %v10324_v12 }
 0x410   : > { %v4384_v60 = vadd.f32 %v4320_v11, %v4190_v14  ;;  %v4516_v18 = vmul.f32 %v8488_v34, %v4450_v49  ;;  %v3483_v61 = vrot.slane %v10324_v12, 7  ;;  %v4708_v32 = vmul.f32 %v8490_v10, %v4642_v8 }
 0x411   : > { %v4386_v28 = vadd.f32 %v4322_v37, %v4192_v62  ;;  %v3421_v4 = vmul.f32 %v8565_v42, %v9167_v7  ;;  %v3485_v24 = vrot.slane %v9167_v7, 7  ;;  %v4710_v50 = vmul.f32 %v8490_v10, %v4644_v39 }
 0x412   : > { %v4578_v45 = vadd.f32 %v4514_v16, %v4384_v60  ;;  %v3549_v30 = vmul.f32 %v8568_v25, %v3483_v61  ;;  %v3677_v17 = vrot.slane %v10324_v12, 6  ;;  %v3679_v27 = vrot.slane %v9167_v7, 6 }
 0x413   : > { %v4580_v6 = vadd.f32 %v4516_v18, %v4386_v28  ;;  %v3551_v29 = vmul.f32 %v8568_v25, %v3485_v24  ;;  %v3871_v14 = vrot.slane %v10324_v12, 5  ;;  %v3873_v62 = vrot.slane %v9167_v7, 5 }
 0x414   : > { %v4772_v11 = vadd.f32 %v4708_v32, %v4578_v45  ;;  %v3613_v37 = vadd.f32 %v3549_v30, %v3419_v35  ;;  %v3743_v49 = vmul.f32 %v8571_v58, %v3677_v17  ;;  %v3745_v39 = vmul.f32 %v8571_v58, %v3679_v27 }
 0x415   : > { %v4774_v16 = vadd.f32 %v4710_v50, %v4580_v6  ;;  %v3615_v8 = vadd.f32 %v3551_v29, %v3421_v4  ;;  %v3937_v60 = vmul.f32 %v8574_v9, %v3871_v14  ;;  %v3939_v18 = vmul.f32 %v8574_v9, %v3873_v62  ;;  %v9211_v6 = vpop.f32.mrf.mxu2  ;;  %v9213_v29 = vpop.f32.mrf.mxu3 }
 0x416   : > { %v3807_v61 = vadd.f32 %v3743_v49, %v3613_v37  ;;  %v4065_v28 = vrot.slane %v10324_v12, 4  ;;  %v4067_v24 = vrot.slane %v9167_v7, 4  ;;  %v4259_v35 = vrot.slane %v10324_v12, 3  ;;  %v1111_v49 = vpop.f32.mrf.mxu0  ;;  %v1360_v62 = vpop.f32.mrf.mxu1 }
 0x417   : > { %v4868_v38 = vpack.c.bf16 %v4774_v16, %v4772_v11  ;;  %v3809_v32 = vadd.f32 %v3745_v39, %v3615_v8  ;;  %v4261_v45 = vrot.slane %v9167_v7, 3  ;;  %v4453_v17 = vrot.slane %v10324_v12, 2 }
 0x418   : > { %v4001_v30 = vadd.f32 %v3937_v60, %v3807_v61  ;;  %v4131_v4 = vmul.f32 %v8577_v41, %v4065_v28  ;;  %v4133_v50 = vmul.f32 %v8577_v41, %v4067_v24  ;;  %v4325_v14 = vmul.f32 %v8580_v23, %v4259_v35  ;;  %v10325_v28 = vld [vmem:[#allocation5_spill] sm:$0xff] }
 0x419   : > { %5067 = vmatpush.bf16.msrb.mxu0 %v4868_v38  ;;  %v4003_v27 = vadd.f32 %v3939_v18, %v3809_v32  ;;  %v4327_v11 = vmul.f32 %v8580_v23, %v4261_v45  ;;  %v4455_v37 = vrot.slane %v9167_v7, 2  ;;  %v4519_v8 = vmul.f32 %v8583_v31, %v4453_v17  ;;  %v10326_v35 = vld [vmem:[#allocation21_spill] sm:$0xff] }
 0x41a   : > { %v4195_v16 = vadd.f32 %v4131_v4, %v4001_v30  ;;  %v4647_v39 = vrot.slane %v10324_v12, 1  ;;  %v9222_v60 = vadd.f32 %v9153_v26, %v9151_v40  ;;  %v4649_v18 = vrot.slane %v9167_v7, 1 }
 0x41b   : > { %v4197_v61 = vadd.f32 %v4133_v50, %v4003_v27  ;;  %v4521_v38 = vmul.f32 %v8583_v31, %v4455_v37  ;;  %v3415_v24 = vmul.f32 %v8565_v42, %v10325_v28  ;;  %v3417_v45 = vmul.f32 %v8565_v42, %v10326_v35 }
 0x41c   : > { %v4389_v32 = vadd.f32 %v4325_v14, %v4195_v16  ;;  %v3479_v30 = vrot.slane %v10325_v28, 7  ;;  %v3481_v12 = vrot.slane %v10326_v35, 7  ;;  %v4713_v40 = vmul.f32 %v8586_v57, %v4647_v39 }
 0x41d   : > { %v4391_v4 = vadd.f32 %v4327_v11, %v4197_v61  ;;  %v4715_v26 = vmul.f32 %v8586_v57, %v4649_v18  ;;  %v3673_v50 = vrot.slane %v10325_v28, 6  ;;  %v3675_v14 = vrot.slane %v10326_v35, 6  ;;  %v1609_v15 = vpop.f32.mrf.mxu2 }
 0x41e   : > { %v4583_v17 = vadd.f32 %v4519_v8, %v4389_v32  ;;  %v3545_v7 = vmul.f32 %v8568_v25, %v3479_v30  ;;  %v3547_v27 = vmul.f32 %v8568_v25, %v3481_v12  ;;  %v3867_v3 = vrot.slane %v10325_v28, 5  ;;  %v1858_v8 = vpop.f32.mrf.mxu3  ;;  %v1113_v56 = vpop.f32.mrf.mxu0 }
 0x41f   : > { %v4585_v37 = vadd.f32 %v4521_v38, %v4391_v4  ;;  %v3739_v16 = vmul.f32 %v8571_v58, %v3673_v50  ;;  %v3869_v11 = vrot.slane %v10326_v35, 5  ;;  %v3741_v18 = vmul.f32 %v8571_v58, %v3675_v14  ;;  %v1362_v38 = vpop.f32.mrf.mxu1 }
 0x420   : > { %v4777_v61 = vadd.f32 %v4713_v40, %v4583_v17  ;;  %v3609_v39 = vadd.f32 %v3545_v7, %v3415_v24  ;;  %v3611_v36 = vadd.f32 %v3547_v27, %v3417_v45  ;;  %v3933_v30 = vmul.f32 %v8574_v9, %v3867_v3 }
 0x421   : > { %v4779_v32 = vadd.f32 %v4715_v26, %v4585_v37  ;;  %v3935_v12 = vmul.f32 %v8574_v9, %v3869_v11  ;;  %v4061_v5 = vrot.slane %v10325_v28, 4  ;;  %v4063_v51 = vrot.slane %v10326_v35, 4 }
 0x422   : > { %v3803_v4 = vadd.f32 %v3739_v16, %v3609_v39  ;;  %v3805_v50 = vadd.f32 %v3741_v18, %v3611_v36  ;;  %v4255_v24 = vrot.slane %v10325_v28, 3  ;;  %v4257_v45 = vrot.slane %v10326_v35, 3 }
 0x423   : > { %v4871_v40 = vpack.c.bf16 %v4779_v32, %v4777_v61  ;;  %v4127_v26 = vmul.f32 %v8577_v41, %v4061_v5  ;;  %v4129_v3 = vmul.f32 %v8577_v41, %v4063_v51  ;;  %v4449_v36 = vrot.slane %v10325_v28, 2 }
 0x424   : > { %v3997_v17 = vadd.f32 %v3933_v30, %v3803_v4  ;;  %v3999_v7 = vadd.f32 %v3935_v12, %v3805_v50  ;;  %v4321_v27 = vmul.f32 %v8580_v23, %v4255_v24  ;;  %v9254_v14 = vadd.f32 %v9183_v46, %v9181_v55 }
 0x425   : > { %5244 = vmatpush.bf16.msrb.mxu2 %v4871_v40  ;;  %v4323_v11 = vmul.f32 %v8580_v23, %v4257_v45  ;;  %v4451_v61 = vrot.slane %v10326_v35, 2  ;;  %v4515_v39 = vmul.f32 %v8583_v31, %v4449_v36  ;;  %v4643_v5 = vrot.slane %v10325_v28, 1  ;;  %v1611_v46 = vpop.f32.mrf.mxu2 }
 0x426   : > { %10327 = vst [vmem:[#allocation45_spill] sm:$0xff] %v9254_v14  ;;  %v4191_v37 = vadd.f32 %v4127_v26, %v3997_v17  ;;  %v4193_v16 = vadd.f32 %v4129_v3, %v3999_v7  ;;  %v4645_v51 = vrot.slane %v10326_v35, 1  ;;  %v9261_v18 = vadd.f32 %v1360_v62, %v1111_v49  ;;  %v1860_v4 = vpop.f32.mrf.mxu3  ;;  %v1116_v50 = vpop.f32.mrf.mxu0 }
 0x427   : > { %v4517_v12 = vmul.f32 %v8583_v31, %v4451_v61  ;;  %v9264_v55 = vadd.f32 %v1858_v8, %v1609_v15  ;;  %v1365_v40 = vpop.f32.mrf.mxu1  ;;  %v4709_v17 = vmul.f32 %v8586_v57, %v4643_v5 }
 0x428   : > { %v4385_v32 = vadd.f32 %v4321_v27, %v4191_v37  ;;  %v4387_v30 = vadd.f32 %v4323_v11, %v4193_v16  ;;  %v4711_v28 = vmul.f32 %v8586_v57, %v4645_v51 }
 0x429   : > { %10328 = vst [vmem:[#allocation39_spill] sm:$0xff] %v9264_v55 }
 0x42a   : > { %v4579_v24 = vadd.f32 %v4515_v39, %v4385_v32  ;;  %v4581_v45 = vadd.f32 %v4517_v12, %v4387_v30  ;;  %v9276_v30 = vadd.f32 %v8884_v22, %v8877_v19  ;;  %v9280_v12 = vadd.f32 %v8959_v20, %v8944_v33 }
 0x42b   : > { %v9296_v19 = vadd.f32 %v9213_v29, %v9211_v6  ;;  %v9298_v22 = vadd.f32 %v1362_v38, %v1113_v56  ;;  %v9300_v33 = vadd.f32 %v1860_v4, %v1611_v46  ;;  %v9302_v20 = vadd.f32 %v1365_v40, %v1116_v50 }
 0x42c   : > { %v4773_v7 = vadd.f32 %v4709_v17, %v4579_v24  ;;  %v4775_v35 = vadd.f32 %v4711_v28, %v4581_v45  ;;  %10329 = vst [vmem:[#allocation41_spill] sm:$0xff] %v9276_v30  ;;  %v9284_v24 = vadd.f32 %v9113_v59, %v9111_v21  ;;  %v9288_v45 = vadd.f32 %v9145_v52, %v9143_v54 }
 0x42d   : > { %v1614_v62 = vpop.f32.mrf.mxu2  ;;  %10330 = vst [vmem:[#allocation40_spill] sm:$0xff] %v9280_v12  ;;  %v9292_v17 = vadd.f32 %v9191_v53, %v9189_v48 }
 0x42e   : > { %v4869_v49 = vpack.c.bf16 %v4775_v35, %v4773_v7  ;;  %v1863_v26 = vpop.f32.mrf.mxu3  ;;  %v1118_v15 = vpop.f32.mrf.mxu0  ;;  %10331 = vst [vmem:[#allocation42_spill] sm:$0xff] %v9284_v24 }
 0x42f   : > { %v9268_v3 = vadd.f32 %v1863_v26, %v1614_v62  ;;  %v1367_v8 = vpop.f32.mrf.mxu1  ;;  %10332 = vst [vmem:[#allocation43_spill] sm:$0xff] %v9288_v45 }
 0x430   : > { %5245 = vmatpush.bf16.msrb.mxu2 %v4869_v49  ;;  %10333 = vst [vmem:[#allocation44_spill] sm:$0xff] %v9292_v17  ;;  %v9304_v21 = vadd.f32 %v1367_v8, %v1118_v15 }
 0x431   : > { %10334 = vst [vmem:[#allocation24_spill] sm:$0xff] %v9296_v19 }
 0x432   : > { %10335 = vst [vmem:[#allocation25_spill] sm:$0xff] %v9300_v33 }
 0x435   : > { %v1616_v27 = vpop.f32.mrf.mxu2 }
 0x436   : > { %v1865_v36 = vpop.f32.mrf.mxu3  ;;  %v1121_v37 = vpop.f32.mrf.mxu0 }
 0x437   : > { %v1370_v16 = vpop.f32.mrf.mxu1  ;;  %v9306_v59 = vadd.f32 %v1865_v36, %v1616_v27 }
 0x438   : > { %v9270_v32 = vadd.f32 %v1370_v16, %v1121_v37 }
 0x43a   : > { %v3470_v48 = vmul.f32 %v10304_v47, %v9270_v32  ;;  %v3534_v56 = vrot.slane %v9270_v32, 7  ;;  %v3728_v4 = vrot.slane %v9270_v32, 6  ;;  %v3922_v40 = vrot.slane %v9270_v32, 5 }
 0x43b   : > { %v4116_v27 = vrot.slane %v9270_v32, 4 }
 0x43c   : > { %v3600_v35 = vmul.f32 %v10307_v2, %v3534_v56  ;;  %v3794_v26 = vmul.f32 %v8475_v13, %v3728_v4  ;;  %v3988_v8 = vmul.f32 %v8478_v0, %v3922_v40 }
 0x43d   : > { %v1619_v11 = vpop.f32.mrf.mxu2 }
 0x43e   : > { %v1868_v61 = vpop.f32.mrf.mxu3  ;;  %v1123_v39 = vpop.f32.mrf.mxu0 }
 0x43f   : > { %v1372_v5 = vpop.f32.mrf.mxu1  ;;  %v9308_v54 = vadd.f32 %v1868_v61, %v1619_v11 }
 0x440   : > { %v9272_v51 = vadd.f32 %v1372_v5, %v1123_v39 }
 0x442   : > { %v3472_v53 = vmul.f32 %v10304_v47, %v9272_v51  ;;  %v3536_v6 = vrot.slane %v9272_v51, 7  ;;  %v3730_v50 = vrot.slane %v9272_v51, 6  ;;  %v3924_v62 = vrot.slane %v9272_v51, 5 }
 0x444   : > { %v3602_v49 = vmul.f32 %v10307_v2, %v3536_v6  ;;  %v3796_v15 = vmul.f32 %v8475_v13, %v3730_v50 }
 0x445   : > { %v1621_v52 = vpop.f32.mrf.mxu2 }
 0x446   : > { %v1870_v28 = vpop.f32.mrf.mxu3  ;;  %v1126_v38 = vpop.f32.mrf.mxu0  ;;  %v3666_v43 = vadd.f32 %v3602_v49, %v3472_v53  ;;  %v4312_v53 = vrot.slane %v9272_v51, 3 }
 0x447   : > { %v9316_v29 = vadd.f32 %v1870_v28, %v1621_v52  ;;  %v1375_v46 = vpop.f32.mrf.mxu1 }
 0x448   : > { %v1376_v7 = vadd.f32 %v1375_v46, %v1126_v38  ;;  %v3664_v38 = vadd.f32 %v3600_v35, %v3470_v48  ;;  %v4118_v48 = vrot.slane %v9272_v51, 4  ;;  %v4182_v35 = vmul.f32 %v8484_v1, %v4116_v27 }
 0x44a   : > { %v3474_v36 = vmul.f32 %v10304_v47, %v1376_v7  ;;  %v3538_v37 = vrot.slane %v1376_v7, 7  ;;  %v3732_v16 = vrot.slane %v1376_v7, 6  ;;  %v3926_v11 = vrot.slane %v1376_v7, 5 }
 0x44b   : > { %v4120_v61 = vrot.slane %v1376_v7, 4  ;;  %v4314_v39 = vrot.slane %v1376_v7, 3  ;;  %v4508_v5 = vrot.slane %v1376_v7, 2  ;;  %v4702_v52 = vrot.slane %v1376_v7, 1 }
 0x44c   : > { %v3604_v28 = vmul.f32 %v10307_v2, %v3538_v37  ;;  %v3798_v56 = vmul.f32 %v8475_v13, %v3732_v16  ;;  %v3992_v6 = vmul.f32 %v8478_v0, %v3926_v11  ;;  %v3858_v7 = vadd.f32 %v3794_v26, %v3664_v38 }
 0x44d   : > { %v4186_v46 = vmul.f32 %v8484_v1, %v4120_v61  ;;  %v4380_v4 = vmul.f32 %v8486_v44, %v4314_v39  ;;  %v4574_v50 = vmul.f32 %v8488_v34, %v4508_v5  ;;  %v4768_v40 = vmul.f32 %v8490_v10, %v4702_v52  ;;  %v1624_v30 = vpop.f32.mrf.mxu2 }
 0x44e   : > { %v1873_v45 = vpop.f32.mrf.mxu3  ;;  %v3668_v12 = vadd.f32 %v3604_v28, %v3474_v36  ;;  %v3990_v37 = vmul.f32 %v8478_v0, %v3924_v62  ;;  %v1128_v16 = vpop.f32.mrf.mxu0  ;;  %v4310_v61 = vrot.slane %v9270_v32, 3  ;;  %v3860_v52 = vadd.f32 %v3796_v15, %v3666_v43 }
 0x44f   : > { %v9337_v19 = vadd.f32 %v1873_v45, %v1624_v30  ;;  %v1377_v11 = vpop.f32.mrf.mxu1  ;;  %v4052_v14 = vadd.f32 %v3988_v8, %v3858_v7  ;;  %v4184_v36 = vmul.f32 %v8484_v1, %v4118_v48  ;;  %v4504_v30 = vrot.slane %v9270_v32, 2 }
 0x450   : > { %v1378_v39 = vadd.f32 %v1377_v11, %v1128_v16  ;;  %v3862_v5 = vadd.f32 %v3798_v56, %v3668_v12  ;;  %v4376_v49 = vmul.f32 %v8486_v44, %v4310_v61  ;;  %v4054_v33 = vadd.f32 %v3990_v37, %v3860_v52 }
 0x451   : > { %v4246_v55 = vadd.f32 %v4182_v35, %v4052_v14  ;;  %v4700_v37 = vrot.slane %v9272_v51, 1 }
 0x452   : > { %v3476_v45 = vmul.f32 %v10304_v47, %v1378_v39  ;;  %v3540_v62 = vrot.slane %v1378_v39, 7  ;;  %v3734_v26 = vrot.slane %v1378_v39, 6  ;;  %v3928_v28 = vrot.slane %v1378_v39, 5 }
 0x453   : > { %v4056_v27 = vadd.f32 %v3992_v6, %v3862_v5  ;;  %v4122_v38 = vrot.slane %v1378_v39, 4  ;;  %v4316_v24 = vrot.slane %v1378_v39, 3  ;;  %v4510_v16 = vrot.slane %v1378_v39, 2 }
 0x454   : > { %v3606_v43 = vmul.f32 %v10307_v2, %v3540_v62  ;;  %v3800_v12 = vmul.f32 %v8475_v13, %v3734_v26  ;;  %v3994_v15 = vmul.f32 %v8478_v0, %v3928_v28  ;;  %v4704_v8 = vrot.slane %v1378_v39, 1 }
 0x455   : > { %v4188_v56 = vmul.f32 %v8484_v1, %v4122_v38  ;;  %v4250_v7 = vadd.f32 %v4186_v46, %v4056_v27  ;;  %v4382_v11 = vmul.f32 %v8486_v44, %v4316_v24  ;;  %v4576_v48 = vmul.f32 %v8488_v34, %v4510_v16  ;;  %v1626_v61 = vpop.f32.mrf.mxu2 }
 0x456   : > { %v1875_v63 = vpop.f32.mrf.mxu3  ;;  %v3670_v6 = vadd.f32 %v3606_v43, %v3476_v45  ;;  %v4770_v5 = vmul.f32 %v8490_v10, %v4704_v8  ;;  %v4378_v28 = vmul.f32 %v8486_v44, %v4312_v53  ;;  %v4506_v39 = vrot.slane %v9272_v51, 2 }
 0x457   : > { %v9354_v62 = vadd.f32 %v1875_v63, %v1626_v61  ;;  %v4444_v26 = vadd.f32 %v4380_v4, %v4250_v7  ;;  %v4248_v46 = vadd.f32 %v4184_v36, %v4054_v33  ;;  %v4440_v27 = vadd.f32 %v4376_v49, %v4246_v55 }
 0x458   : > { %v3864_v38 = vadd.f32 %v3800_v12, %v3670_v6  ;;  %v4570_v24 = vmul.f32 %v8488_v34, %v4504_v30  ;;  %v4572_v17 = vmul.f32 %v8488_v34, %v4506_v39  ;;  %v4698_v45 = vrot.slane %v9270_v32, 1 }
 0x459   : > { %v4638_v16 = vadd.f32 %v4574_v50, %v4444_v26  ;;  %v4442_v63 = vadd.f32 %v4378_v28, %v4248_v46  ;;  %v3475_v4 = vmul.f32 %v8565_v42, %v9337_v19  ;;  %v4766_v55 = vmul.f32 %v8490_v10, %v4700_v37 }
 0x45a   : > { %v4058_v14 = vadd.f32 %v3994_v15, %v3864_v38  ;;  %v4634_v35 = vadd.f32 %v4570_v24, %v4440_v27  ;;  %v4764_v53 = vmul.f32 %v8490_v10, %v4698_v45  ;;  %v3477_v33 = vmul.f32 %v8565_v42, %v9354_v62 }
 0x45b   : > { %v4832_v52 = vadd.f32 %v4768_v40, %v4638_v16  ;;  %v4636_v36 = vadd.f32 %v4572_v17, %v4442_v63  ;;  %v3539_v32 = vrot.slane %v9337_v19, 7  ;;  %v3541_v51 = vrot.slane %v9354_v62, 7 }
 0x45c   : > { %v4252_v50 = vadd.f32 %v4188_v56, %v4058_v14  ;;  %v4828_v49 = vadd.f32 %v4764_v53, %v4634_v35  ;;  %v3733_v30 = vrot.slane %v9337_v19, 6  ;;  %v3735_v43 = vrot.slane %v9354_v62, 6 }
 0x45d   : > { %v3927_v40 = vrot.slane %v9337_v19, 5  ;;  %v4830_v15 = vadd.f32 %v4766_v55, %v4636_v36  ;;  %v3605_v8 = vmul.f32 %v8568_v25, %v3539_v32  ;;  %v3607_v7 = vmul.f32 %v8568_v25, %v3541_v51 }
 0x45e   : > { %v4446_v12 = vadd.f32 %v4382_v11, %v4252_v50  ;;  %v3799_v56 = vmul.f32 %v8571_v58, %v3733_v30  ;;  %v3801_v17 = vmul.f32 %v8571_v58, %v3735_v43  ;;  %v3929_v61 = vrot.slane %v9354_v62, 5 }
 0x45f   : > { %v3993_v6 = vmul.f32 %v8574_v9, %v3927_v40  ;;  %v4896_v28 = vpack.c.bf16 %v4830_v15, %v4828_v49  ;;  %v3669_v39 = vadd.f32 %v3605_v8, %v3475_v4  ;;  %v3671_v38 = vadd.f32 %v3607_v7, %v3477_v33 }
 0x460   : > { %v4640_v26 = vadd.f32 %v4576_v48, %v4446_v12  ;;  %v3995_v46 = vmul.f32 %v8574_v9, %v3929_v61  ;;  %v4121_v11 = vrot.slane %v9337_v19, 4  ;;  %v4123_v27 = vrot.slane %v9354_v62, 4 }
 0x461   : > { %v4315_v24 = vrot.slane %v9337_v19, 3  ;;  %v3863_v45 = vadd.f32 %v3799_v56, %v3669_v39  ;;  %v3865_v37 = vadd.f32 %v3801_v17, %v3671_v38  ;;  %v4317_v14 = vrot.slane %v9354_v62, 3 }
 0x462   : > { %v4834_v16 = vadd.f32 %v4770_v5, %v4640_v26  ;;  %v4187_v63 = vmul.f32 %v8577_v41, %v4121_v11  ;;  %v4189_v48 = vmul.f32 %v8577_v41, %v4123_v27  ;;  %v4509_v4 = vrot.slane %v9337_v19, 2 }
 0x463   : > { %v4381_v35 = vmul.f32 %v8580_v23, %v4315_v24  ;;  %v4057_v55 = vadd.f32 %v3993_v6, %v3863_v45  ;;  %v4059_v33 = vadd.f32 %v3995_v46, %v3865_v37  ;;  %v4383_v50 = vmul.f32 %v8580_v23, %v4317_v14 }
 0x464   : > { %v4898_v53 = vpack.c.bf16 %v4834_v16, %v4832_v52  ;;  %v4511_v36 = vrot.slane %v9354_v62, 2  ;;  %v4575_v5 = vmul.f32 %v8583_v31, %v4509_v4  ;;  %v4703_v32 = vrot.slane %v9337_v19, 1 }
 0x465   : > { %v4705_v51 = vrot.slane %v9354_v62, 1  ;;  %v4251_v49 = vadd.f32 %v4187_v63, %v4057_v55  ;;  %v4253_v30 = vadd.f32 %v4189_v48, %v4059_v33  ;;  %v3466_v43 = vmul.f32 %v10304_v47, %v9302_v20 }
 0x466   : > { %5149 = vmatpush.bf16.msrb.mxu1 %v4898_v53  ;;  %v3468_v52 = vmul.f32 %v10304_v47, %v9304_v21  ;;  %v4577_v40 = vmul.f32 %v8583_v31, %v4511_v36  ;;  %v4769_v12 = vmul.f32 %v8586_v57, %v4703_v32  ;;  %v3530_v8 = vrot.slane %v9302_v20, 7 }
 0x467   : > { %v4771_v15 = vmul.f32 %v8586_v57, %v4705_v51  ;;  %v4445_v19 = vadd.f32 %v4381_v35, %v4251_v49  ;;  %v4447_v7 = vadd.f32 %v4383_v50, %v4253_v30  ;;  %v3532_v62 = vrot.slane %v9304_v21, 7 }
 0x468   : > { %v3724_v56 = vrot.slane %v9302_v20, 6  ;;  %v3596_v17 = vmul.f32 %v10307_v2, %v3530_v8  ;;  %v3726_v61 = vrot.slane %v9304_v21, 6  ;;  %v3918_v6 = vrot.slane %v9302_v20, 5 }
 0x469   : > { %v3920_v26 = vrot.slane %v9304_v21, 5  ;;  %v4639_v39 = vadd.f32 %v4575_v5, %v4445_v19  ;;  %v4641_v38 = vadd.f32 %v4577_v40, %v4447_v7  ;;  %v3598_v46 = vmul.f32 %v10307_v2, %v3532_v62 }
 0x46a   : > { %5150 = vmatpush.bf16.msrb.mxu1 %v4896_v28  ;;  %v3790_v11 = vmul.f32 %v8475_v13, %v3724_v56  ;;  %v3660_v27 = vadd.f32 %v3596_v17, %v3466_v43  ;;  %v3792_v24 = vmul.f32 %v8475_v13, %v3726_v61  ;;  %v3984_v16 = vmul.f32 %v8478_v0, %v3918_v6 }
 0x46b   : > { %v3986_v45 = vmul.f32 %v8478_v0, %v3920_v26  ;;  %v4833_v37 = vadd.f32 %v4769_v12, %v4639_v39  ;;  %v4835_v14 = vadd.f32 %v4771_v15, %v4641_v38  ;;  %v3662_v63 = vadd.f32 %v3598_v46, %v3468_v52 }
 0x46c   : > { %v4112_v48 = vrot.slane %v9302_v20, 4  ;;  %v3854_v35 = vadd.f32 %v3790_v11, %v3660_v27  ;;  %v4114_v28 = vrot.slane %v9304_v21, 4  ;;  %v4306_v4 = vrot.slane %v9302_v20, 3 }
 0x46d   : > { %v4308_v53 = vrot.slane %v9304_v21, 3  ;;  %v4899_v55 = vpack.c.bf16 %v4835_v14, %v4833_v37  ;;  %v3856_v33 = vadd.f32 %v3792_v24, %v3662_v63  ;;  %v4500_v36 = vrot.slane %v9302_v20, 2 }
 0x46e   : > { %v4178_v50 = vmul.f32 %v8484_v1, %v4112_v48  ;;  %v4048_v5 = vadd.f32 %v3984_v16, %v3854_v35  ;;  %v4180_v32 = vmul.f32 %v8484_v1, %v4114_v28  ;;  %v4372_v51 = vmul.f32 %v8486_v44, %v4306_v4 }
 0x46f   : > { %v4374_v49 = vmul.f32 %v8486_v44, %v4308_v53  ;;  %5327 = vmatpush.bf16.msrb.mxu3 %v4899_v55  ;;  %v4050_v30 = vadd.f32 %v3986_v45, %v3856_v33  ;;  %v4502_v43 = vrot.slane %v9304_v21, 2  ;;  %v4566_v52 = vmul.f32 %v8488_v34, %v4500_v36 }
 0x470   : > { %v4694_v40 = vrot.slane %v9302_v20, 1  ;;  %v4242_v12 = vadd.f32 %v4178_v50, %v4048_v5  ;;  %v4696_v15 = vrot.slane %v9304_v21, 1  ;;  %v3471_v8 = vmul.f32 %v8565_v42, %v9308_v54 }
 0x471   : > { %v3473_v19 = vmul.f32 %v8565_v42, %v9316_v29  ;;  %v4244_v7 = vadd.f32 %v4180_v32, %v4050_v30  ;;  %v4568_v62 = vmul.f32 %v8488_v34, %v4502_v43  ;;  %v3535_v17 = vrot.slane %v9308_v54, 7 }
 0x472   : > { %v4760_v56 = vmul.f32 %v8490_v10, %v4694_v40  ;;  %v4436_v61 = vadd.f32 %v4372_v51, %v4242_v12  ;;  %v4762_v6 = vmul.f32 %v8490_v10, %v4696_v15  ;;  %v3537_v20 = vrot.slane %v9316_v29, 7 }
 0x473   : > { %v3729_v21 = vrot.slane %v9308_v54, 6  ;;  %v4438_v26 = vadd.f32 %v4374_v49, %v4244_v7  ;;  %v3601_v39 = vmul.f32 %v8568_v25, %v3535_v17  ;;  %v3731_v38 = vrot.slane %v9316_v29, 6 }
 0x474   : > { %v3923_v46 = vrot.slane %v9308_v54, 5  ;;  %v4630_v11 = vadd.f32 %v4566_v52, %v4436_v61  ;;  %v3603_v27 = vmul.f32 %v8568_v25, %v3537_v20  ;;  %v3925_v16 = vrot.slane %v9316_v29, 5 }
 0x475   : > { %v3795_v24 = vmul.f32 %v8571_v58, %v3729_v21  ;;  %v4632_v45 = vadd.f32 %v4568_v62, %v4438_v26  ;;  %v3665_v37 = vadd.f32 %v3601_v39, %v3471_v8  ;;  %v3797_v14 = vmul.f32 %v8571_v58, %v3731_v38 }
 0x476   : > { %v3989_v63 = vmul.f32 %v8574_v9, %v3923_v46  ;;  %v4824_v48 = vadd.f32 %v4760_v56, %v4630_v11  ;;  %v3667_v35 = vadd.f32 %v3603_v27, %v3473_v19  ;;  %v3991_v28 = vmul.f32 %v8574_v9, %v3925_v16 }
 0x477   : > { %v4117_v4 = vrot.slane %v9308_v54, 4  ;;  %v4826_v53 = vadd.f32 %v4762_v6, %v4632_v45  ;;  %v3859_v55 = vadd.f32 %v3795_v24, %v3665_v37  ;;  %v4119_v33 = vrot.slane %v9316_v29, 4 }
 0x478   : > { %v4311_v50 = vrot.slane %v9308_v54, 3  ;;  %v3861_v36 = vadd.f32 %v3797_v14, %v3667_v35  ;;  %v4313_v32 = vrot.slane %v9316_v29, 3  ;;  %v4505_v51 = vrot.slane %v9308_v54, 2 }
 0x479   : > { %v4183_v5 = vmul.f32 %v8577_v41, %v4117_v4  ;;  %v4894_v49 = vpack.c.bf16 %v4826_v53, %v4824_v48  ;;  %v4053_v30 = vadd.f32 %v3989_v63, %v3859_v55  ;;  %v4185_v43 = vmul.f32 %v8577_v41, %v4119_v33 }
 0x47a   : > { %v4377_v52 = vmul.f32 %v8580_v23, %v4311_v50  ;;  %v4055_v40 = vadd.f32 %v3991_v28, %v3861_v36  ;;  %v4379_v12 = vmul.f32 %v8580_v23, %v4313_v32  ;;  %v4507_v15 = vrot.slane %v9316_v29, 2 }
 0x47b   : > { %v4571_v8 = vmul.f32 %v8583_v31, %v4505_v51  ;;  %5151 = vmatpush.bf16.msrb.mxu1 %v4894_v49  ;;  %v4247_v19 = vadd.f32 %v4183_v5, %v4053_v30  ;;  %v4699_v7 = vrot.slane %v9308_v54, 1  ;;  %v4701_v62 = vrot.slane %v9316_v29, 1 }
 0x47c   : > { %v3462_v56 = vmul.f32 %v10304_v47, %v9261_v18  ;;  %v4249_v17 = vadd.f32 %v4185_v43, %v4055_v40  ;;  %v4573_v61 = vmul.f32 %v8583_v31, %v4507_v15  ;;  %v3464_v6 = vmul.f32 %v10304_v47, %v9298_v22 }
 0x47d   : > { %v3526_v20 = vrot.slane %v9261_v18, 7  ;;  %v4441_v21 = vadd.f32 %v4377_v52, %v4247_v19  ;;  %v4765_v26 = vmul.f32 %v8586_v57, %v4699_v7  ;;  %v4767_v39 = vmul.f32 %v8586_v57, %v4701_v62 }
 0x47e   : > { %v3528_v54 = vrot.slane %v9298_v22, 7  ;;  %v4443_v38 = vadd.f32 %v4379_v12, %v4249_v17  ;;  %v3720_v46 = vrot.slane %v9261_v18, 6  ;;  %v3722_v11 = vrot.slane %v9298_v22, 6 }
 0x47f   : > { %v3592_v29 = vmul.f32 %v10307_v2, %v3526_v20  ;;  %v4635_v27 = vadd.f32 %v4571_v8, %v4441_v21  ;;  %v3914_v16 = vrot.slane %v9261_v18, 5  ;;  %v3916_v45 = vrot.slane %v9298_v22, 5 }
 0x480   : > { %v3594_v24 = vmul.f32 %v10307_v2, %v3528_v54  ;;  %v4637_v37 = vadd.f32 %v4573_v61, %v4443_v38  ;;  %v3786_v63 = vmul.f32 %v8475_v13, %v3720_v46  ;;  %v3788_v48 = vmul.f32 %v8475_v13, %v3722_v11 }
 0x481   : > { %v3656_v14 = vadd.f32 %v3592_v29, %v3462_v56  ;;  %v4829_v35 = vadd.f32 %v4765_v26, %v4635_v27  ;;  %v3980_v4 = vmul.f32 %v8478_v0, %v3914_v16  ;;  %v3982_v53 = vmul.f32 %v8478_v0, %v3916_v45 }
 0x482   : > { %v3658_v28 = vadd.f32 %v3594_v24, %v3464_v6  ;;  %v4831_v55 = vadd.f32 %v4767_v39, %v4637_v37  ;;  %v4108_v50 = vrot.slane %v9261_v18, 4  ;;  %v4110_v36 = vrot.slane %v9298_v22, 4 }
 0x483   : > { %v3850_v33 = vadd.f32 %v3786_v63, %v3656_v14  ;;  %v4302_v32 = vrot.slane %v9261_v18, 3  ;;  %v4304_v51 = vrot.slane %v9298_v22, 3  ;;  %v4496_v49 = vrot.slane %v9261_v18, 2 }
 0x484   : > { %v3852_v5 = vadd.f32 %v3788_v48, %v3658_v28  ;;  %v4897_v30 = vpack.c.bf16 %v4831_v55, %v4829_v35  ;;  %v4174_v52 = vmul.f32 %v8484_v1, %v4108_v50  ;;  %v4176_v40 = vmul.f32 %v8484_v1, %v4110_v36 }
 0x485   : > { %v4044_v43 = vadd.f32 %v3980_v4, %v3850_v33  ;;  %v4368_v15 = vmul.f32 %v8486_v44, %v4302_v32  ;;  %v4370_v8 = vmul.f32 %v8486_v44, %v4304_v51  ;;  %v4498_v19 = vrot.slane %v9298_v22, 2 }
 0x486   : > { %v4046_v12 = vadd.f32 %v3982_v53, %v3852_v5  ;;  %5328 = vmatpush.bf16.msrb.mxu3 %v4897_v30  ;;  %v4562_v62 = vmul.f32 %v8488_v34, %v4496_v49  ;;  %v4690_v56 = vrot.slane %v9261_v18, 1  ;;  %v4692_v17 = vrot.slane %v9298_v22, 1 }
 0x487   : > { %v4238_v7 = vadd.f32 %v4174_v52, %v4044_v43  ;;  %v4564_v6 = vmul.f32 %v8488_v34, %v4498_v19  ;;  %v3467_v20 = vmul.f32 %v8565_v42, %v9268_v3  ;;  %v3469_v21 = vmul.f32 %v8565_v42, %v9306_v59 }
 0x488   : > { %v4240_v61 = vadd.f32 %v4176_v40, %v4046_v12  ;;  %v4756_v39 = vmul.f32 %v8490_v10, %v4690_v56  ;;  %v4758_v54 = vmul.f32 %v8490_v10, %v4692_v17  ;;  %v3531_v38 = vrot.slane %v9268_v3, 7 }
 0x489   : > { %v4432_v26 = vadd.f32 %v4368_v15, %v4238_v7  ;;  %v3533_v18 = vrot.slane %v9306_v59, 7  ;;  %v3725_v22 = vrot.slane %v9268_v3, 6  ;;  %v3727_v46 = vrot.slane %v9306_v59, 6 }
 0x48a   : > { %v4434_v29 = vadd.f32 %v4370_v8, %v4240_v61  ;;  %v3597_v27 = vmul.f32 %v8568_v25, %v3531_v38  ;;  %v3919_v24 = vrot.slane %v9268_v3, 5  ;;  %v3921_v16 = vrot.slane %v9306_v59, 5 }
 0x48b   : > { %v4626_v11 = vadd.f32 %v4562_v62, %v4432_v26  ;;  %v3599_v37 = vmul.f32 %v8568_v25, %v3533_v18  ;;  %v3791_v14 = vmul.f32 %v8571_v58, %v3725_v22  ;;  %v3793_v63 = vmul.f32 %v8571_v58, %v3727_v46 }
 0x48c   : > { %v4628_v45 = vadd.f32 %v4564_v6, %v4434_v29  ;;  %v3661_v35 = vadd.f32 %v3597_v27, %v3467_v20  ;;  %v3985_v28 = vmul.f32 %v8574_v9, %v3919_v24  ;;  %v3987_v4 = vmul.f32 %v8574_v9, %v3921_v16  ;;  %v10336_v20 = vld [vmem:[#allocation44_spill] sm:$0xff] }
 0x48d   : > { %v4820_v48 = vadd.f32 %v4756_v39, %v4626_v11  ;;  %v3663_v55 = vadd.f32 %v3599_v37, %v3469_v21  ;;  %v4113_v33 = vrot.slane %v9268_v3, 4  ;;  %v4115_v50 = vrot.slane %v9306_v59, 4 }
 0x48e   : > { %v4822_v53 = vadd.f32 %v4758_v54, %v4628_v45  ;;  %v3855_v36 = vadd.f32 %v3791_v14, %v3661_v35  ;;  %v4307_v5 = vrot.slane %v9268_v3, 3  ;;  %v4309_v32 = vrot.slane %v9306_v59, 3 }
 0x48f   : > { %v4501_v51 = vrot.slane %v9268_v3, 2  ;;  %v3857_v30 = vadd.f32 %v3793_v63, %v3663_v55  ;;  %v4179_v43 = vmul.f32 %v8577_v41, %v4113_v33  ;;  %v4181_v52 = vmul.f32 %v8577_v41, %v4115_v50 }
 0x490   : > { %v4892_v49 = vpack.c.bf16 %v4822_v53, %v4820_v48  ;;  %v4049_v40 = vadd.f32 %v3985_v28, %v3855_v36  ;;  %v4373_v12 = vmul.f32 %v8580_v23, %v4307_v5  ;;  %v4375_v15 = vmul.f32 %v8580_v23, %v4309_v32 }
 0x491   : > { %v4503_v8 = vrot.slane %v9306_v59, 2  ;;  %v4051_v19 = vadd.f32 %v3987_v4, %v3857_v30  ;;  %v4567_v7 = vmul.f32 %v8583_v31, %v4501_v51  ;;  %v4695_v62 = vrot.slane %v9268_v3, 1 }
 0x492   : > { %5152 = vmatpush.bf16.msrb.mxu1 %v4892_v49  ;;  %v4697_v56 = vrot.slane %v9306_v59, 1  ;;  %v4243_v17 = vadd.f32 %v4179_v43, %v4049_v40  ;;  %v3458_v6 = vmul.f32 %v10304_v47, %v9222_v60  ;;  %v3460_v21 = vmul.f32 %v10304_v47, %v10336_v20 }
 0x493   : > { %v4569_v61 = vmul.f32 %v8583_v31, %v4503_v8  ;;  %v4245_v26 = vadd.f32 %v4181_v52, %v4051_v19  ;;  %v4761_v39 = vmul.f32 %v8586_v57, %v4695_v62  ;;  %v3522_v38 = vrot.slane %v9222_v60, 7 }
 0x494   : > { %v4763_v54 = vmul.f32 %v8586_v57, %v4697_v56  ;;  %v4437_v29 = vadd.f32 %v4373_v12, %v4243_v17  ;;  %v3524_v3 = vrot.slane %v10336_v20, 7  ;;  %v3716_v59 = vrot.slane %v9222_v60, 6  ;;  %v10337_v17 = vld [vmem:[#allocation39_spill] sm:$0xff] }
 0x495   : > { %v3718_v18 = vrot.slane %v10336_v20, 6  ;;  %v4439_v22 = vadd.f32 %v4375_v15, %v4245_v26  ;;  %v3588_v46 = vmul.f32 %v10307_v2, %v3522_v38  ;;  %v3910_v11 = vrot.slane %v9222_v60, 5 }
 0x496   : > { %v3912_v27 = vrot.slane %v10336_v20, 5  ;;  %v4631_v24 = vadd.f32 %v4567_v7, %v4437_v29  ;;  %v3590_v16 = vmul.f32 %v10307_v2, %v3524_v3  ;;  %v3782_v45 = vmul.f32 %v8475_v13, %v3716_v59 }
 0x497   : > { %v3784_v37 = vmul.f32 %v8475_v13, %v3718_v18  ;;  %v4633_v14 = vadd.f32 %v4569_v61, %v4439_v22  ;;  %v3652_v63 = vadd.f32 %v3588_v46, %v3458_v6  ;;  %v3976_v48 = vmul.f32 %v8478_v0, %v3910_v11  ;;  %v10338_v6 = vld [vmem:[#allocation25_spill] sm:$0xff] }
 0x498   : > { %v3978_v35 = vmul.f32 %v8478_v0, %v3912_v27  ;;  %v4825_v28 = vadd.f32 %v4761_v39, %v4631_v24  ;;  %v3654_v4 = vadd.f32 %v3590_v16, %v3460_v21  ;;  %v4104_v53 = vrot.slane %v9222_v60, 4 }
 0x499   : > { %v4106_v55 = vrot.slane %v10336_v20, 4  ;;  %v4827_v33 = vadd.f32 %v4763_v54, %v4633_v14  ;;  %v3846_v50 = vadd.f32 %v3782_v45, %v3652_v63  ;;  %v4298_v36 = vrot.slane %v9222_v60, 3 }
 0x49a   : > { %v4300_v5 = vrot.slane %v10336_v20, 3  ;;  %v3848_v32 = vadd.f32 %v3784_v37, %v3654_v4  ;;  %v4170_v51 = vmul.f32 %v8484_v1, %v4104_v53  ;;  %v4492_v30 = vrot.slane %v9222_v60, 2 }
 0x49b   : > { %v4172_v49 = vmul.f32 %v8484_v1, %v4106_v55  ;;  %v4895_v43 = vpack.c.bf16 %v4827_v33, %v4825_v28  ;;  %v4040_v52 = vadd.f32 %v3976_v48, %v3846_v50  ;;  %v4364_v40 = vmul.f32 %v8486_v44, %v4298_v36 }
 0x49c   : > { %v4366_v12 = vmul.f32 %v8486_v44, %v4300_v5  ;;  %v4042_v15 = vadd.f32 %v3978_v35, %v3848_v32  ;;  %v4494_v8 = vrot.slane %v10336_v20, 2  ;;  %v4558_v19 = vmul.f32 %v8488_v34, %v4492_v30 }
 0x49d   : > { %v4686_v7 = vrot.slane %v9222_v60, 1  ;;  %5329 = vmatpush.bf16.msrb.mxu3 %v4895_v43  ;;  %v4234_v62 = vadd.f32 %v4170_v51, %v4040_v52  ;;  %v4688_v56 = vrot.slane %v10336_v20, 1  ;;  %v3463_v61 = vmul.f32 %v8565_v42, %v10337_v17 }
 0x49e   : > { %v3465_v21 = vmul.f32 %v8565_v42, %v10338_v6  ;;  %v4236_v26 = vadd.f32 %v4172_v49, %v4042_v15  ;;  %v4560_v39 = vmul.f32 %v8488_v34, %v4494_v8  ;;  %v3527_v38 = vrot.slane %v10337_v17, 7 }
 0x49f   : > { %v4752_v54 = vmul.f32 %v8490_v10, %v4686_v7  ;;  %v4428_v29 = vadd.f32 %v4364_v40, %v4234_v62  ;;  %v4754_v60 = vmul.f32 %v8490_v10, %v4688_v56  ;;  %v3529_v3 = vrot.slane %v10338_v6, 7  ;;  %v10339_v56 = vld [vmem:[#allocation35_spill] sm:$0xff] }
 0x4a0   : > { %v3721_v20 = vrot.slane %v10337_v17, 6  ;;  %v4430_v59 = vadd.f32 %v4366_v12, %v4236_v26  ;;  %v3593_v18 = vmul.f32 %v8568_v25, %v3527_v38  ;;  %v3723_v22 = vrot.slane %v10338_v6, 6 }
 0x4a1   : > { %v3915_v46 = vrot.slane %v10337_v17, 5  ;;  %v4622_v11 = vadd.f32 %v4558_v19, %v4428_v29  ;;  %v3595_v27 = vmul.f32 %v8568_v25, %v3529_v3  ;;  %v3917_v16 = vrot.slane %v10338_v6, 5 }
 0x4a2   : > { %v3787_v24 = vmul.f32 %v8571_v58, %v3721_v20  ;;  %v4624_v45 = vadd.f32 %v4560_v39, %v4430_v59  ;;  %v3657_v37 = vadd.f32 %v3593_v18, %v3463_v61  ;;  %v3789_v14 = vmul.f32 %v8571_v58, %v3723_v22  ;;  %v10340_v39 = vld [vmem:[#allocation42_spill] sm:$0xff] }
 0x4a3   : > { %v3981_v63 = vmul.f32 %v8574_v9, %v3915_v46  ;;  %v4816_v48 = vadd.f32 %v4752_v54, %v4622_v11  ;;  %v3659_v35 = vadd.f32 %v3595_v27, %v3465_v21  ;;  %v3983_v28 = vmul.f32 %v8574_v9, %v3917_v16 }
 0x4a4   : > { %v4109_v4 = vrot.slane %v10337_v17, 4  ;;  %v4818_v53 = vadd.f32 %v4754_v60, %v4624_v45  ;;  %v3851_v55 = vadd.f32 %v3787_v24, %v3657_v37  ;;  %v4111_v33 = vrot.slane %v10338_v6, 4 }
 0x4a5   : > { %v4303_v50 = vrot.slane %v10337_v17, 3  ;;  %v3853_v36 = vadd.f32 %v3789_v14, %v3659_v35  ;;  %v4305_v32 = vrot.slane %v10338_v6, 3  ;;  %v4497_v51 = vrot.slane %v10337_v17, 2 }
 0x4a6   : > { %v4175_v5 = vmul.f32 %v8577_v41, %v4109_v4  ;;  %v4890_v49 = vpack.c.bf16 %v4818_v53, %v4816_v48  ;;  %v4045_v30 = vadd.f32 %v3981_v63, %v3851_v55  ;;  %v4177_v43 = vmul.f32 %v8577_v41, %v4111_v33 }
 0x4a7   : > { %v4369_v52 = vmul.f32 %v8580_v23, %v4303_v50  ;;  %v4047_v40 = vadd.f32 %v3983_v28, %v3853_v36  ;;  %v4371_v12 = vmul.f32 %v8580_v23, %v4305_v32  ;;  %v4499_v15 = vrot.slane %v10338_v6, 2 }
 0x4a8   : > { %v4563_v8 = vmul.f32 %v8583_v31, %v4497_v51  ;;  %5153 = vmatpush.bf16.msrb.mxu1 %v4890_v49  ;;  %v4239_v19 = vadd.f32 %v4175_v5, %v4045_v30  ;;  %v4691_v7 = vrot.slane %v10337_v17, 1  ;;  %v4693_v62 = vrot.slane %v10338_v6, 1 }
 0x4a9   : > { %v3454_v61 = vmul.f32 %v10304_v47, %v10339_v56  ;;  %v4241_v21 = vadd.f32 %v4177_v43, %v4047_v40  ;;  %v4565_v26 = vmul.f32 %v8583_v31, %v4499_v15  ;;  %v3456_v54 = vmul.f32 %v10304_v47, %v10340_v39 }
 0x4aa   : > { %v3518_v38 = vrot.slane %v10339_v56, 7  ;;  %v4433_v29 = vadd.f32 %v4369_v52, %v4239_v19  ;;  %v4757_v60 = vmul.f32 %v8586_v57, %v4691_v7  ;;  %v4759_v3 = vmul.f32 %v8586_v57, %v4693_v62 }
 0x4ab   : > { %v3520_v17 = vrot.slane %v10340_v39, 7  ;;  %v4435_v20 = vadd.f32 %v4371_v12, %v4241_v21  ;;  %v3712_v59 = vrot.slane %v10339_v56, 6  ;;  %v3714_v18 = vrot.slane %v10340_v39, 6  ;;  %v10341_v21 = vld [vmem:[#allocation45_spill] sm:$0xff] }
 0x4ac   : > { %v3584_v6 = vmul.f32 %v10307_v2, %v3518_v38  ;;  %v4627_v22 = vadd.f32 %v4563_v8, %v4433_v29  ;;  %v3906_v11 = vrot.slane %v10339_v56, 5  ;;  %v3908_v27 = vrot.slane %v10340_v39, 5 }
 0x4ad   : > { %v3586_v46 = vmul.f32 %v10307_v2, %v3520_v17  ;;  %v4629_v24 = vadd.f32 %v4565_v26, %v4435_v20  ;;  %v3778_v45 = vmul.f32 %v8475_v13, %v3712_v59  ;;  %v3780_v37 = vmul.f32 %v8475_v13, %v3714_v18 }
 0x4ae   : > { %v3648_v16 = vadd.f32 %v3584_v6, %v3454_v61  ;;  %v4821_v14 = vadd.f32 %v4757_v60, %v4627_v22  ;;  %v3972_v48 = vmul.f32 %v8478_v0, %v3906_v11  ;;  %v3974_v35 = vmul.f32 %v8478_v0, %v3908_v27 }
 0x4af   : > { %v3650_v63 = vadd.f32 %v3586_v46, %v3456_v54  ;;  %v4823_v28 = vadd.f32 %v4759_v3, %v4629_v24  ;;  %v4100_v53 = vrot.slane %v10339_v56, 4  ;;  %v4102_v55 = vrot.slane %v10340_v39, 4  ;;  %v10342_v54 = vld [vmem:[#allocation24_spill] sm:$0xff] }
 0x4b0   : > { %v3842_v4 = vadd.f32 %v3778_v45, %v3648_v16  ;;  %v4294_v50 = vrot.slane %v10339_v56, 3  ;;  %v4296_v36 = vrot.slane %v10340_v39, 3  ;;  %v4488_v5 = vrot.slane %v10339_v56, 2 }
 0x4b1   : > { %v3844_v33 = vadd.f32 %v3780_v37, %v3650_v63  ;;  %v4893_v32 = vpack.c.bf16 %v4823_v28, %v4821_v14  ;;  %v4166_v49 = vmul.f32 %v8484_v1, %v4100_v53  ;;  %v4168_v30 = vmul.f32 %v8484_v1, %v4102_v55 }
 0x4b2   : > { %v4036_v51 = vadd.f32 %v3972_v48, %v3842_v4  ;;  %v4360_v52 = vmul.f32 %v8486_v44, %v4294_v50  ;;  %v4362_v40 = vmul.f32 %v8486_v44, %v4296_v36  ;;  %v4490_v12 = vrot.slane %v10340_v39, 2 }
 0x4b3   : > { %v4038_v43 = vadd.f32 %v3974_v35, %v3844_v33  ;;  %5330 = vmatpush.bf16.msrb.mxu3 %v4893_v32  ;;  %v4554_v8 = vmul.f32 %v8488_v34, %v4488_v5  ;;  %v4682_v19 = vrot.slane %v10339_v56, 1  ;;  %v4684_v7 = vrot.slane %v10340_v39, 1 }
 0x4b4   : > { %v4230_v15 = vadd.f32 %v4166_v49, %v4036_v51  ;;  %v4556_v61 = vmul.f32 %v8488_v34, %v4490_v12  ;;  %v3459_v26 = vmul.f32 %v8565_v42, %v10341_v21  ;;  %v3461_v38 = vmul.f32 %v8565_v42, %v10342_v54 }
 0x4b5   : > { %v4232_v62 = vadd.f32 %v4168_v30, %v4038_v43  ;;  %v4748_v60 = vmul.f32 %v8490_v10, %v4682_v19  ;;  %v4750_v3 = vmul.f32 %v8490_v10, %v4684_v7  ;;  %v3523_v17 = vrot.slane %v10341_v21, 7 }
 0x4b6   : > { %v4424_v29 = vadd.f32 %v4360_v52, %v4230_v15  ;;  %v3525_v56 = vrot.slane %v10342_v54, 7  ;;  %v3717_v39 = vrot.slane %v10341_v21, 6  ;;  %v3719_v6 = vrot.slane %v10342_v54, 6 }
 0x4b7   : > { %v4426_v20 = vadd.f32 %v4362_v40, %v4232_v62  ;;  %v3589_v18 = vmul.f32 %v8568_v25, %v3523_v17  ;;  %v3911_v22 = vrot.slane %v10341_v21, 5  ;;  %v3913_v46 = vrot.slane %v10342_v54, 5  ;;  %v10343_v62 = vld [vmem:[#allocation33_spill] sm:$0xff] }
 0x4b8   : > { %v4618_v59 = vadd.f32 %v4554_v8, %v4424_v29  ;;  %v3591_v27 = vmul.f32 %v8568_v25, %v3525_v56  ;;  %v3783_v24 = vmul.f32 %v8571_v58, %v3717_v39  ;;  %v3785_v16 = vmul.f32 %v8571_v58, %v3719_v6 }
 0x4b9   : > { %v4620_v11 = vadd.f32 %v4556_v61, %v4426_v20  ;;  %v3653_v37 = vadd.f32 %v3589_v18, %v3459_v26  ;;  %v3977_v14 = vmul.f32 %v8574_v9, %v3911_v22  ;;  %v3979_v63 = vmul.f32 %v8574_v9, %v3913_v46  ;;  %v10344_v26 = vld [vmem:[#allocation40_spill] sm:$0xff] }
 0x4ba   : > { %v4812_v45 = vadd.f32 %v4748_v60, %v4618_v59  ;;  %v3655_v35 = vadd.f32 %v3591_v27, %v3461_v38  ;;  %v4105_v28 = vrot.slane %v10341_v21, 4  ;;  %v4107_v4 = vrot.slane %v10342_v54, 4 }
 0x4bb   : > { %v4814_v48 = vadd.f32 %v4750_v3, %v4620_v11  ;;  %v3847_v53 = vadd.f32 %v3783_v24, %v3653_v37  ;;  %v4299_v55 = vrot.slane %v10341_v21, 3  ;;  %v4301_v33 = vrot.slane %v10342_v54, 3 }
 0x4bc   : > { %v4493_v50 = vrot.slane %v10341_v21, 2  ;;  %v3849_v5 = vadd.f32 %v3785_v16, %v3655_v35  ;;  %v4171_v32 = vmul.f32 %v8577_v41, %v4105_v28  ;;  %v4173_v51 = vmul.f32 %v8577_v41, %v4107_v4 }
 0x4bd   : > { %v4888_v36 = vpack.c.bf16 %v4814_v48, %v4812_v45  ;;  %v4041_v49 = vadd.f32 %v3977_v14, %v3847_v53  ;;  %v4365_v30 = vmul.f32 %v8580_v23, %v4299_v55  ;;  %v4367_v43 = vmul.f32 %v8580_v23, %v4301_v33 }
 0x4be   : > { %v4495_v52 = vrot.slane %v10342_v54, 2  ;;  %v4043_v40 = vadd.f32 %v3979_v63, %v3849_v5  ;;  %v4559_v12 = vmul.f32 %v8583_v31, %v4493_v50  ;;  %v4687_v15 = vrot.slane %v10341_v21, 1 }
 0x4bf   : > { %5154 = vmatpush.bf16.msrb.mxu1 %v4888_v36  ;;  %v4689_v8 = vrot.slane %v10342_v54, 1  ;;  %v4235_v19 = vadd.f32 %v4171_v32, %v4041_v49  ;;  %v3450_v61 = vmul.f32 %v10304_v47, %v10343_v62  ;;  %v3452_v38 = vmul.f32 %v10304_v47, %v10344_v26 }
 0x4c0   : > { %v4561_v7 = vmul.f32 %v8583_v31, %v4495_v52  ;;  %v4237_v29 = vadd.f32 %v4173_v51, %v4043_v40  ;;  %v4753_v60 = vmul.f32 %v8586_v57, %v4687_v15  ;;  %v3514_v17 = vrot.slane %v10343_v62, 7 }
 0x4c1   : > { %v4755_v3 = vmul.f32 %v8586_v57, %v4689_v8  ;;  %v4429_v20 = vadd.f32 %v4365_v30, %v4235_v19  ;;  %v3516_v21 = vrot.slane %v10344_v26, 7  ;;  %v3708_v54 = vrot.slane %v10343_v62, 6  ;;  %v10345_v19 = vld [vmem:[#allocation38_spill] sm:$0xff] }
 0x4c2   : > { %v3710_v56 = vrot.slane %v10344_v26, 6  ;;  %v4431_v39 = vadd.f32 %v4367_v43, %v4237_v29  ;;  %v3580_v6 = vmul.f32 %v10307_v2, %v3514_v17  ;;  %v3902_v59 = vrot.slane %v10343_v62, 5 }
 0x4c3   : > { %v3904_v18 = vrot.slane %v10344_v26, 5  ;;  %v4623_v22 = vadd.f32 %v4559_v12, %v4429_v20  ;;  %v3582_v46 = vmul.f32 %v10307_v2, %v3516_v21  ;;  %v3774_v11 = vmul.f32 %v8475_v13, %v3708_v54 }
 0x4c4   : > { %v3776_v27 = vmul.f32 %v8475_v13, %v3710_v56  ;;  %v4625_v24 = vadd.f32 %v4561_v7, %v4431_v39  ;;  %v3644_v16 = vadd.f32 %v3580_v6, %v3450_v61  ;;  %v3968_v45 = vmul.f32 %v8478_v0, %v3902_v59  ;;  %v10346_v61 = vld [vmem:[#allocation43_spill] sm:$0xff] }
 0x4c5   : > { %v3970_v37 = vmul.f32 %v8478_v0, %v3904_v18  ;;  %v4817_v14 = vadd.f32 %v4753_v60, %v4623_v22  ;;  %v3646_v63 = vadd.f32 %v3582_v46, %v3452_v38  ;;  %v4096_v48 = vrot.slane %v10343_v62, 4 }
 0x4c6   : > { %v4098_v35 = vrot.slane %v10344_v26, 4  ;;  %v4819_v28 = vadd.f32 %v4755_v3, %v4625_v24  ;;  %v3838_v4 = vadd.f32 %v3774_v11, %v3644_v16  ;;  %v4290_v53 = vrot.slane %v10343_v62, 3 }
 0x4c7   : > { %v4292_v55 = vrot.slane %v10344_v26, 3  ;;  %v3840_v33 = vadd.f32 %v3776_v27, %v3646_v63  ;;  %v4162_v50 = vmul.f32 %v8484_v1, %v4096_v48  ;;  %v4484_v5 = vrot.slane %v10343_v62, 2 }
 0x4c8   : > { %v4164_v36 = vmul.f32 %v8484_v1, %v4098_v35  ;;  %v4891_v32 = vpack.c.bf16 %v4819_v28, %v4817_v14  ;;  %v4032_v51 = vadd.f32 %v3968_v45, %v3838_v4  ;;  %v4356_v49 = vmul.f32 %v8486_v44, %v4290_v53 }
 0x4c9   : > { %v4358_v30 = vmul.f32 %v8486_v44, %v4292_v55  ;;  %v4034_v43 = vadd.f32 %v3970_v37, %v3840_v33  ;;  %v4486_v52 = vrot.slane %v10344_v26, 2  ;;  %v4550_v40 = vmul.f32 %v8488_v34, %v4484_v5 }
 0x4ca   : > { %v4678_v12 = vrot.slane %v10343_v62, 1  ;;  %5331 = vmatpush.bf16.msrb.mxu3 %v4891_v32  ;;  %v4226_v15 = vadd.f32 %v4162_v50, %v4032_v51  ;;  %v4680_v8 = vrot.slane %v10344_v26, 1  ;;  %v3455_v7 = vmul.f32 %v8565_v42, %v10345_v19 }
 0x4cb   : > { %v3457_v38 = vmul.f32 %v8565_v42, %v10346_v61  ;;  %v4228_v29 = vadd.f32 %v4164_v36, %v4034_v43  ;;  %v4552_v60 = vmul.f32 %v8488_v34, %v4486_v52  ;;  %v3519_v17 = vrot.slane %v10345_v19, 7 }
 0x4cc   : > { %v4744_v3 = vmul.f32 %v8490_v10, %v4678_v12  ;;  %v4420_v20 = vadd.f32 %v4356_v49, %v4226_v15  ;;  %v4746_v62 = vmul.f32 %v8490_v10, %v4680_v8  ;;  %v3521_v21 = vrot.slane %v10346_v61, 7  ;;  %v10347_v8 = vld [vmem:[#allocation29_spill] sm:$0xff] }
 0x4cd   : > { %v3713_v26 = vrot.slane %v10345_v19, 6  ;;  %v4422_v54 = vadd.f32 %v4358_v30, %v4228_v29  ;;  %v3585_v56 = vmul.f32 %v8568_v25, %v3519_v17  ;;  %v3715_v39 = vrot.slane %v10346_v61, 6 }
 0x4ce   : > { %v3907_v6 = vrot.slane %v10345_v19, 5  ;;  %v4614_v59 = vadd.f32 %v4550_v40, %v4420_v20  ;;  %v3587_v18 = vmul.f32 %v8568_v25, %v3521_v21  ;;  %v3909_v46 = vrot.slane %v10346_v61, 5 }
 0x4cf   : > { %v3779_v22 = vmul.f32 %v8571_v58, %v3713_v26  ;;  %v4616_v11 = vadd.f32 %v4552_v60, %v4422_v54  ;;  %v3649_v27 = vadd.f32 %v3585_v56, %v3455_v7  ;;  %v3781_v24 = vmul.f32 %v8571_v58, %v3715_v39  ;;  %v10348_v60 = vld [vmem:[#allocation41_spill] sm:$0xff] }
 0x4d0   : > { %v3973_v16 = vmul.f32 %v8574_v9, %v3907_v6  ;;  %v4808_v45 = vadd.f32 %v4744_v3, %v4614_v59  ;;  %v3651_v37 = vadd.f32 %v3587_v18, %v3457_v38  ;;  %v3975_v14 = vmul.f32 %v8574_v9, %v3909_v46 }
 0x4d1   : > { %v4101_v63 = vrot.slane %v10345_v19, 4  ;;  %v4810_v48 = vadd.f32 %v4746_v62, %v4616_v11  ;;  %v3843_v35 = vadd.f32 %v3779_v22, %v3649_v27  ;;  %v4103_v28 = vrot.slane %v10346_v61, 4 }
 0x4d2   : > { %v4295_v4 = vrot.slane %v10345_v19, 3  ;;  %v3845_v53 = vadd.f32 %v3781_v24, %v3651_v37  ;;  %v4297_v33 = vrot.slane %v10346_v61, 3  ;;  %v4489_v50 = vrot.slane %v10345_v19, 2 }
 0x4d3   : > { %v4167_v55 = vmul.f32 %v8577_v41, %v4101_v63  ;;  %v4886_v36 = vpack.c.bf16 %v4810_v48, %v4808_v45  ;;  %v4037_v5 = vadd.f32 %v3973_v16, %v3843_v35  ;;  %v4169_v32 = vmul.f32 %v8577_v41, %v4103_v28 }
 0x4d4   : > { %v4361_v51 = vmul.f32 %v8580_v23, %v4295_v4  ;;  %v4039_v49 = vadd.f32 %v3975_v14, %v3845_v53  ;;  %v4363_v30 = vmul.f32 %v8580_v23, %v4297_v33  ;;  %v4491_v43 = vrot.slane %v10346_v61, 2  ;;  %v10350_v53 = vld [vmem:[#allocation37_spill] sm:$0xff] }
 0x4d5   : > { %v4555_v52 = vmul.f32 %v8583_v31, %v4489_v50  ;;  %5155 = vmatpush.bf16.msrb.mxu1 %v4886_v36  ;;  %v4231_v40 = vadd.f32 %v4167_v55, %v4037_v5  ;;  %v4683_v12 = vrot.slane %v10345_v19, 1  ;;  %v4685_v15 = vrot.slane %v10346_v61, 1 }
 0x4d6   : > { %v3446_v7 = vmul.f32 %v10304_v47, %v10347_v8  ;;  %v4233_v38 = vadd.f32 %v4169_v32, %v4039_v49  ;;  %v4557_v29 = vmul.f32 %v8583_v31, %v4491_v43  ;;  %v3448_v3 = vmul.f32 %v10304_v47, %v10348_v60 }
 0x4d7   : > { %v3510_v17 = vrot.slane %v10347_v8, 7  ;;  %v4425_v20 = vadd.f32 %v4361_v51, %v4231_v40  ;;  %v4749_v62 = vmul.f32 %v8586_v57, %v4683_v12  ;;  %v4751_v21 = vmul.f32 %v8586_v57, %v4685_v15 }
 0x4d8   : > { %v3512_v19 = vrot.slane %v10348_v60, 7  ;;  %v4427_v26 = vadd.f32 %v4363_v30, %v4233_v38  ;;  %v3704_v54 = vrot.slane %v10347_v8, 6  ;;  %v3706_v56 = vrot.slane %v10348_v60, 6 }
 0x4d9   : > { %v3576_v61 = vmul.f32 %v10307_v2, %v3510_v17  ;;  %v4619_v39 = vadd.f32 %v4555_v52, %v4425_v20  ;;  %v3898_v47 = vrot.slane %v10347_v8, 5  ;;  %v3900_v59 = vrot.slane %v10348_v60, 5 }
 0x4da   : > { %v3578_v6 = vmul.f32 %v10307_v2, %v3512_v19  ;;  %v4621_v18 = vadd.f32 %v4557_v29, %v4427_v26  ;;  %v3770_v46 = vmul.f32 %v8475_v13, %v3704_v54  ;;  %v3772_v11 = vmul.f32 %v8475_v13, %v3706_v56  ;;  %v10349_v13 = vld [vmem:[#allocation36_spill] sm:$0xff] }
 0x4db   : > { %v3640_v22 = vadd.f32 %v3576_v61, %v3446_v7  ;;  %v4813_v27 = vadd.f32 %v4749_v62, %v4619_v39  ;;  %v3964_v16 = vmul.f32 %v8478_v0, %v3898_v47  ;;  %v3966_v45 = vmul.f32 %v8478_v0, %v3900_v59  ;;  %v10351_v7 = vld [vmem:[#allocation34_spill] sm:$0xff] }
 0x4dc   : > { %v3642_v24 = vadd.f32 %v3578_v6, %v3448_v3  ;;  %v4815_v37 = vadd.f32 %v4751_v21, %v4621_v18  ;;  %v4092_v2 = vrot.slane %v10347_v8, 4  ;;  %v4094_v63 = vrot.slane %v10348_v60, 4 }
 0x4dd   : > { %v3834_v14 = vadd.f32 %v3770_v46, %v3640_v22  ;;  %v4286_v35 = vrot.slane %v10347_v8, 3  ;;  %v4288_v28 = vrot.slane %v10348_v60, 3  ;;  %v4480_v4 = vrot.slane %v10347_v8, 2 }
 0x4de   : > { %v3836_v48 = vadd.f32 %v3772_v11, %v3642_v24  ;;  %v9739_v55 = vadd.f32 %v10350_v53, %v10349_v13  ;;  %v4889_v33 = vpack.c.bf16 %v4815_v37, %v4813_v27  ;;  %v4158_v0 = vmul.f32 %v8484_v1, %v4092_v2  ;;  %v10353_v37 = vld [vmem:[#allocation32_spill] sm:$0xff] }
 0x4df   : > { %v4028_v50 = vadd.f32 %v3964_v16, %v3834_v14  ;;  %v4160_v5 = vmul.f32 %v8484_v1, %v4094_v63  ;;  %v4352_v32 = vmul.f32 %v8486_v44, %v4286_v35  ;;  %v4482_v51 = vrot.slane %v10348_v60, 2 }
 0x4e0   : > { %v4030_v36 = vadd.f32 %v3966_v45, %v3836_v48  ;;  %5332 = vmatpush.bf16.msrb.mxu3 %v4889_v33  ;;  %v4354_v30 = vmul.f32 %v8486_v44, %v4288_v28  ;;  %v4674_v43 = vrot.slane %v10347_v8, 1  ;;  %v4676_v52 = vrot.slane %v10348_v60, 1  ;;  %v10352_v45 = vld [vmem:[#allocation31_spill] sm:$0xff] }
 0x4e1   : > { %v4222_v49 = vadd.f32 %v4158_v0, %v4028_v50  ;;  %v4546_v12 = vmul.f32 %v8488_v34, %v4480_v4  ;;  %v4548_v15 = vmul.f32 %v8488_v34, %v4482_v51  ;;  %v3451_v1 = vmul.f32 %v8565_v42, %v10351_v7 }
 0x4e2   : > { %v4224_v40 = vadd.f32 %v4160_v5, %v4030_v36  ;;  %v4740_v29 = vmul.f32 %v8490_v10, %v4674_v43  ;;  %v3453_v3 = vmul.f32 %v8565_v42, %v9739_v55  ;;  %v3515_v44 = vrot.slane %v10351_v7, 7 }
 0x4e3   : > { %v4416_v38 = vadd.f32 %v4352_v32, %v4222_v49  ;;  %v3517_v8 = vrot.slane %v9739_v55, 7  ;;  %v3709_v60 = vrot.slane %v10351_v7, 6  ;;  %v3711_v20 = vrot.slane %v9739_v55, 6 }
 0x4e4   : > { %v4418_v17 = vadd.f32 %v4354_v30, %v4224_v40  ;;  %v4742_v34 = vmul.f32 %v8490_v10, %v4676_v52  ;;  %v3581_v21 = vmul.f32 %v8568_v25, %v3515_v44  ;;  %v3903_v19 = vrot.slane %v10351_v7, 5  ;;  %v10354_v30 = vld [vmem:[#allocation30_spill] sm:$0xff] }
 0x4e5   : > { %v4610_v62 = vadd.f32 %v4546_v12, %v4416_v38  ;;  %v3583_v61 = vmul.f32 %v8568_v25, %v3517_v8  ;;  %v3775_v54 = vmul.f32 %v8571_v58, %v3709_v60  ;;  %v3905_v56 = vrot.slane %v9739_v55, 5 }
 0x4e6   : > { %v4612_v26 = vadd.f32 %v4548_v15, %v4418_v17  ;;  %v3645_v6 = vadd.f32 %v3581_v21, %v3451_v1  ;;  %v3777_v47 = vmul.f32 %v8571_v58, %v3711_v20  ;;  %v3969_v59 = vmul.f32 %v8574_v9, %v3903_v19 }
 0x4e7   : > { %v4804_v39 = vadd.f32 %v4740_v29, %v4610_v62  ;;  %v3647_v22 = vadd.f32 %v3583_v61, %v3453_v3  ;;  %v4097_v10 = vrot.slane %v10351_v7, 4  ;;  %v4099_v46 = vrot.slane %v9739_v55, 4 }
 0x4e8   : > { %v4806_v18 = vadd.f32 %v4742_v34, %v4612_v26  ;;  %v3839_v11 = vadd.f32 %v3775_v54, %v3645_v6  ;;  %v4291_v27 = vrot.slane %v10351_v7, 3  ;;  %v4293_v24 = vrot.slane %v9739_v55, 3  ;;  %v5962_v6 = vld [vmem:[%s10094_s2] sm:$0xf] }
 0x4e9   : > { %v4485_v16 = vrot.slane %v10351_v7, 2  ;;  %v9774_v14 = vadd.f32 %v10353_v37, %v10352_v45  ;;  %v3841_v63 = vadd.f32 %v3777_v47, %v3647_v22  ;;  %v3971_v48 = vmul.f32 %v8574_v9, %v3905_v56  ;;  %v6188_v22 = vld [vmem:[%s10094_s2 + $0x4] sm:$0xf] }
 0x4ea   : > { %v4884_v2 = vpack.c.bf16 %v4806_v18, %v4804_v39  ;;  %v4033_v35 = vadd.f32 %v3969_v59, %v3839_v11  ;;  %v4163_v28 = vmul.f32 %v8577_v41, %v4097_v10  ;;  %v4165_v4 = vmul.f32 %v8577_v41, %v4099_v46  ;;  %v5964_v10 = vld [vmem:[%s10094_s2 + $0x8] sm:$0xf0] }
 0x4eb   : > { %v4487_v13 = vrot.slane %v9739_v55, 2  ;;  %v4035_v53 = vadd.f32 %v3971_v48, %v3841_v63  ;;  %v4357_v33 = vmul.f32 %v8580_v23, %v4291_v27  ;;  %v4359_v50 = vmul.f32 %v8580_v23, %v4293_v24 }
 0x4ec   : > { %5156 = vmatpush.bf16.msrb.mxu1 %v4884_v2  ;;  %v4679_v0 = vrot.slane %v10351_v7, 1  ;;  %v4227_v36 = vadd.f32 %v4163_v28, %v4033_v35  ;;  %v4551_v5 = vmul.f32 %v8583_v31, %v4485_v16  ;;  %v4681_v51 = vrot.slane %v9739_v55, 1 }
 0x4ed   : > { %v4553_v32 = vmul.f32 %v8583_v31, %v4487_v13  ;;  %v4229_v49 = vadd.f32 %v4165_v4, %v4035_v53  ;;  %v3447_v43 = vmul.f32 %v8565_v42, %v10354_v30  ;;  %v3449_v52 = vmul.f32 %v8565_v42, %v9774_v14 }
 0x4ee   : > { %v3511_v40 = vrot.slane %v10354_v30, 7  ;;  %v4421_v12 = vadd.f32 %v4357_v33, %v4227_v36  ;;  %v3513_v15 = vrot.slane %v9774_v14, 7  ;;  %v3705_v7 = vrot.slane %v10354_v30, 6 }
 0x4ef   : > { %v3707_v1 = vrot.slane %v9774_v14, 6  ;;  %v4423_v38 = vadd.f32 %v4359_v50, %v4229_v49  ;;  %v4745_v29 = vmul.f32 %v8586_v57, %v4679_v0  ;;  %v3899_v3 = vrot.slane %v10354_v30, 5 }
 0x4f0   : > { %v3577_v55 = vmul.f32 %v8568_v25, %v3511_v40  ;;  %v4615_v44 = vadd.f32 %v4551_v5, %v4421_v12  ;;  %v4747_v17 = vmul.f32 %v8586_v57, %v4681_v51  ;;  %v3579_v42 = vmul.f32 %v8568_v25, %v3513_v15  ;;  %v5978_v40 = vld [vmem:[%s10094_s2 + $0x20] sm:$0xf]  ;;  %v6193_v12 = vld [vmem:[%s10094_s2 + $0x24] sm:$0xf0]  ;;  %v6192_v15 = vld [vmem:[%s10094_s2 + $0x24] sm:$0xf] }
 0x4f1   : > { %v3901_v8 = vrot.slane %v9774_v14, 5  ;;  %v4617_v60 = vadd.f32 %v4553_v32, %v4423_v38  ;;  %v3771_v62 = vmul.f32 %v8571_v58, %v3705_v7  ;;  %v3773_v34 = vmul.f32 %v8571_v58, %v3707_v1  ;;  %v6189_v58 = vld [vmem:[%s10094_s2 + $0x4] sm:$0xf0]  ;;  %v5980_v7 = vld [vmem:[%s10094_s2 + $0x28] sm:$0xf0] }
 0x4f2   : > { %v3641_v20 = vadd.f32 %v3577_v55, %v3447_v43  ;;  %v3643_v21 = vadd.f32 %v3579_v42, %v3449_v52  ;;  %v3965_v19 = vmul.f32 %v8574_v9, %v3899_v3  ;;  %v4093_v26 = vrot.slane %v10354_v30, 4  ;;  %v6195_v55 = vld [vmem:[%s10094_s2 + $0x34] sm:$0xf0]  ;;  %v6194_v3 = vld [vmem:[%s10094_s2 + $0x34] sm:$0xf] }
 0x4f3   : > { %v4095_v61 = vrot.slane %v9774_v14, 4  ;;  %v4809_v54 = vadd.f32 %v4745_v29, %v4615_v44  ;;  %v4811_v56 = vadd.f32 %v4747_v17, %v4617_v60  ;;  %v4287_v25 = vrot.slane %v10354_v30, 3  ;;  %v5986_v29 = vld [vmem:[%s10094_s2 + $0x30] sm:$0xf]  ;;  %v5988_v44 = vld [vmem:[%s10094_s2 + $0x38] sm:$0xf0] }
 0x4f4   : > { %v3835_v39 = vadd.f32 %v3771_v62, %v3641_v20  ;;  %v3837_v47 = vadd.f32 %v3773_v34, %v3643_v21  ;;  %v3967_v59 = vmul.f32 %v8574_v9, %v3901_v8  ;;  %v4289_v18 = vrot.slane %v9774_v14, 3  ;;  %v5994_v8 = vld [vmem:[%s10094_s2 + $0x40] sm:$0xf]  ;;  %v6197_v60 = vld [vmem:[%s10094_s2 + $0x44] sm:$0xf0] }
 0x4f5   : > { %v4887_v46 = vpack.c.bf16 %v4811_v56, %v4809_v54  ;;  %v4159_v27 = vmul.f32 %v8577_v41, %v4093_v26  ;;  %v4481_v24 = vrot.slane %v10354_v30, 2  ;;  %v4161_v45 = vmul.f32 %v8577_v41, %v4095_v61  ;;  %v6196_v20 = vld [vmem:[%s10094_s2 + $0x44] sm:$0xf]  ;;  %v5996_v62 = vld [vmem:[%s10094_s2 + $0x48] sm:$0xf0] }
 0x4f6   : > { %v4029_v11 = vadd.f32 %v3965_v19, %v3835_v39  ;;  %v4031_v16 = vadd.f32 %v3967_v59, %v3837_v47  ;;  %v4483_v9 = vrot.slane %v9774_v14, 2  ;;  %v4353_v2 = vmul.f32 %v8580_v23, %v4287_v25  ;;  %v6002_v19 = vld [vmem:[%s10094_s2 + $0x50] sm:$0xf]  ;;  %v6199_v26 = vld [vmem:[%s10094_s2 + $0x54] sm:$0xf0] }
 0x4f7   : > { %5333 = vmatpush.bf16.msrb.mxu3 %v4887_v46  ;;  %v5963_v63 = vor.u32 %v6189_v58, %v5962_v6  ;;  %v5967_v48 = vor.u32 %v6188_v22, %v5964_v10  ;;  %v4355_v28 = vmul.f32 %v8580_v23, %v4289_v18  ;;  %v4675_v4 = vrot.slane %v10354_v30, 1  ;;  %v6191_v30 = vld [vmem:[%s10094_s2 + $0x14] sm:$0xf0]  ;;  %v6198_v61 = vld [vmem:[%s10094_s2 + $0x54] sm:$0xf] }
 0x4f8   : > { %v4223_v37 = vadd.f32 %v4159_v27, %v4029_v11  ;;  %v4225_v35 = vadd.f32 %v4161_v45, %v4031_v16  ;;  %v4677_v13 = vrot.slane %v9774_v14, 1  ;;  %v4547_v33 = vmul.f32 %v8583_v31, %v4481_v24  ;;  %v5970_v14 = vld [vmem:[%s10094_s2 + $0x10] sm:$0xf]  ;;  %v6004_v54 = vld [vmem:[%s10094_s2 + $0x58] sm:$0xf0] }
 0x4f9   : > { %5246 = vmatmul.bf16.vlgmr.msrb.gmra.mxu2 %v5963_v63  ;;  %5068 = vmatmul.bf16.vlgmr.msrb.gmra.mxu0 %v5963_v63  ;;  %v4549_v50 = vmul.f32 %v8583_v31, %v4483_v9  ;;  %v4741_v5 = vmul.f32 %v8586_v57, %v4675_v4  ;;  %v6190_v31 = vld [vmem:[%s10094_s2 + $0x14] sm:$0xf]  ;;  %v5971_v43 = vor.u32 %v6191_v30, %v5970_v14  ;;  %v6010_v25 = vld [vmem:[%s10094_s2 + $0x60] sm:$0xf]  ;;  %v6201_v6 = vld [vmem:[%s10094_s2 + $0x64] sm:$0xf0] }
 0x4fa   : > { %v4417_v53 = vadd.f32 %v4353_v2, %v4223_v37  ;;  %v4419_v41 = vadd.f32 %v4355_v28, %v4225_v35  ;;  %5157 = vmatmul.bf16.vlgmr.msrb.gmra.mxu1 %v5967_v48  ;;  %v4743_v32 = vmul.f32 %v8586_v57, %v4677_v13  ;;  %v5972_v57 = vld [vmem:[%s10094_s2 + $0x18] sm:$0xf0]  ;;  %v5979_v1 = vor.u32 %v6193_v12, %v5978_v40  ;;  %v6200_v58 = vld [vmem:[%s10094_s2 + $0x64] sm:$0xf]  ;;  %v6012_v47 = vld [vmem:[%s10094_s2 + $0x68] sm:$0xf0] }
 0x4fb   : > { %v5975_v52 = vor.u32 %v6190_v31, %v5972_v57  ;;  %v5983_v38 = vor.u32 %v6192_v15, %v5980_v7  ;;  %v5987_v17 = vor.u32 %v6195_v55, %v5986_v29  ;;  %v5991_v42 = vor.u32 %v6194_v3, %v5988_v44  ;;  %v6018_v22 = vld [vmem:[%s10094_s2 + $0x70] sm:$0xf]  ;;  %v6203_v10 = vld [vmem:[%s10094_s2 + $0x74] sm:$0xf0]  ;;  %v6202_v46 = vld [vmem:[%s10094_s2 + $0x74] sm:$0xf] }
 0x4fc   : > { %v4611_v0 = vadd.f32 %v4547_v33, %v4417_v53  ;;  %v4613_v36 = vadd.f32 %v4549_v50, %v4419_v41  ;;  %v5995_v34 = vor.u32 %v6197_v60, %v5994_v8  ;;  %v5999_v21 = vor.u32 %v6196_v20, %v5996_v62  ;;  %v6020_v11 = vld [vmem:[%s10094_s2 + $0x78] sm:$0xf0]  ;;  %v6026_v16 = vld [vmem:[%s10094_s2 + $0x80] sm:$0xf]  ;;  %v6205_v45 = vld [vmem:[%s10094_s2 + $0x84] sm:$0xf0] }
 0x4fd   : > { %v6003_v56 = vor.u32 %v6199_v26, %v6002_v19  ;;  %v6007_v39 = vor.u32 %v6198_v61, %v6004_v54  ;;  %v6011_v59 = vor.u32 %v6201_v6, %v6010_v25  ;;  %v6015_v18 = vor.u32 %v6200_v58, %v6012_v47  ;;  %v6204_v9 = vld [vmem:[%s10094_s2 + $0x84] sm:$0xf]  ;;  %v6028_v37 = vld [vmem:[%s10094_s2 + $0x88] sm:$0xf0]  ;;  %v6034_v41 = vld [vmem:[%s10094_s2 + $0x90] sm:$0xf] }
 0x4fe   : > { %v4805_v23 = vadd.f32 %v4741_v5, %v4611_v0  ;;  %v4807_v51 = vadd.f32 %v4743_v32, %v4613_v36  ;;  %v6019_v27 = vor.u32 %v6203_v10, %v6018_v22  ;;  %v6023_v24 = vor.u32 %v6202_v46, %v6020_v11  ;;  %v6207_v50 = vld [vmem:[%s10094_s2 + $0x94] sm:$0xf0]  ;;  %v6206_v0 = vld [vmem:[%s10094_s2 + $0x94] sm:$0xf]  ;;  %v6036_v36 = vld [vmem:[%s10094_s2 + $0x98] sm:$0xf0] }
 0x4ff   : > { %v6027_v2 = vor.u32 %v6205_v45, %v6026_v16  ;;  %v6031_v63 = vor.u32 %v6204_v9, %v6028_v37  ;;  %v6035_v32 = vor.u32 %v6207_v50, %v6034_v41  ;;  %v6042_v7 = vld [vmem:[%s10094_s2 + $0xa0] sm:$0xf]  ;;  %v6044_v29 = vld [vmem:[%s10094_s2 + $0xa8] sm:$0xf0]  ;;  %v6050_v54 = vld [vmem:[%s10094_s2 + $0xb0] sm:$0xf] }
 0x500   : > { %v4885_v49 = vpack.c.bf16 %v4807_v51, %v4805_v23  ;;  %v6039_v23 = vor.u32 %v6206_v0, %v6036_v36  ;;  %v6052_v25 = vld [vmem:[%s10094_s2 + $0xb8] sm:$0xf0]  ;;  %v6058_v37 = vld [vmem:[%s10094_s2 + $0xc0] sm:$0xf] }
 0x502   : > { %5334 = vmatpush.bf16.msrb.mxu3 %v4885_v49 }
 0x505   : > { %5335 = vmatmul.bf16.vlgmr.msrb.gmra.mxu3 %v5967_v48 }
 0x509   : > { %5251 = vmatmul.bf16.gmra.mxu2 %v5971_v43  ;;  %5073 = vmatmul.bf16.gmra.mxu0 %v5971_v43 }
 0x50a   : > { %5162 = vmatmul.bf16.gmra.mxu1 %v5975_v52 }
 0x515   : > { %5340 = vmatmul.bf16.gmra.mxu3 %v5975_v52 }
 0x519   : > { %5256 = vmatmul.bf16.gmra.mxu2 %v5979_v1  ;;  %5078 = vmatmul.bf16.gmra.mxu0 %v5979_v1  ;;  %v6209_v1 = vld [vmem:[%s10094_s2 + $0xa4] sm:$0xf0] }
 0x51a   : > { %5167 = vmatmul.bf16.gmra.mxu1 %v5983_v38  ;;  %v6043_v3 = vor.u32 %v6209_v1, %v6042_v7 }
 0x525   : > { %5345 = vmatmul.bf16.gmra.mxu3 %v5983_v38  ;;  %v6208_v38 = vld [vmem:[%s10094_s2 + $0xa4] sm:$0xf] }
 0x526   : > { %v6047_v44 = vor.u32 %v6208_v38, %v6044_v29 }
 0x529   : > { %5261 = vmatmul.bf16.gmra.mxu2 %v5987_v17  ;;  %5083 = vmatmul.bf16.gmra.mxu0 %v5987_v17 }
 0x52a   : > { %5172 = vmatmul.bf16.gmra.mxu1 %v5991_v42 }
 0x535   : > { %5350 = vmatmul.bf16.gmra.mxu3 %v5991_v42 }
 0x539   : > { %5266 = vmatmul.bf16.gmra.mxu2 %v5995_v34  ;;  %5088 = vmatmul.bf16.gmra.mxu0 %v5995_v34 }
 0x53a   : > { %5177 = vmatmul.bf16.gmra.mxu1 %v5999_v21 }
 0x545   : > { %5355 = vmatmul.bf16.gmra.mxu3 %v5999_v21 }
 0x549   : > { %5271 = vmatmul.bf16.gmra.mxu2 %v6003_v56  ;;  %5093 = vmatmul.bf16.gmra.mxu0 %v6003_v56  ;;  %v6211_v56 = vld [vmem:[%s10094_s2 + $0xb4] sm:$0xf0] }
 0x54a   : > { %5182 = vmatmul.bf16.gmra.mxu1 %v6007_v39  ;;  %v6051_v58 = vor.u32 %v6211_v56, %v6050_v54 }
 0x555   : > { %5360 = vmatmul.bf16.gmra.mxu3 %v6007_v39  ;;  %v6210_v39 = vld [vmem:[%s10094_s2 + $0xb4] sm:$0xf] }
 0x556   : > { %v6055_v47 = vor.u32 %v6210_v39, %v6052_v25 }
 0x559   : > { %5276 = vmatmul.bf16.gmra.mxu2 %v6011_v59  ;;  %5098 = vmatmul.bf16.gmra.mxu0 %v6011_v59 }
 0x55a   : > { %5187 = vmatmul.bf16.gmra.mxu1 %v6015_v18 }
 0x565   : > { %5365 = vmatmul.bf16.gmra.mxu3 %v6015_v18 }
 0x569   : > { %5281 = vmatmul.bf16.gmra.mxu2 %v6019_v27  ;;  %5103 = vmatmul.bf16.gmra.mxu0 %v6019_v27 }
 0x56a   : > { %5192 = vmatmul.bf16.gmra.mxu1 %v6023_v24 }
 0x575   : > { %5370 = vmatmul.bf16.gmra.mxu3 %v6023_v24 }
 0x576   : > { %v5069_v48 = vpop.f32.mrf.mxu0 }
 0x577   : > { %v5158_v35 = vpop.f32.mrf.mxu1 }
 0x578   : > { %v5159_v28 = vadd.f32 %v5158_v35, %v5069_v48  ;;  %v6060_v48 = vld [vmem:[%s10094_s2 + $0xc8] sm:$0xf0] }
 0x579   : > { %5286 = vmatmul.bf16.gmra.mxu2 %v6027_v2  ;;  %5108 = vmatmul.bf16.gmra.mxu0 %v6027_v2  ;;  %v6213_v2 = vld [vmem:[%s10094_s2 + $0xc4] sm:$0xf0] }
 0x57a   : > { %5416 = vst [vmem:[%s9933_s11] sm:$0xff] %v5159_v28  ;;  %5197 = vmatmul.bf16.gmra.mxu1 %v6031_v63  ;;  %v6059_v28 = vor.u32 %v6213_v2, %v6058_v37 }
 0x57c   : > { %v5247_v4 = vpop.f32.mrf.mxu2 }
 0x57e   : > { %v5071_v13 = vpop.f32.mrf.mxu0 }
 0x57f   : > { %v5160_v53 = vpop.f32.mrf.mxu1 }
 0x580   : > { %v5161_v33 = vadd.f32 %v5160_v53, %v5071_v13 }
 0x582   : > { %5418 = vst [vmem:[%s9933_s11 + $0x10] sm:$0xff] %v5161_v33 }
 0x584   : > { %v5249_v5 = vpop.f32.mrf.mxu2 }
 0x585   : > { %5375 = vmatmul.bf16.gmra.mxu3 %v6031_v63  ;;  %v6212_v63 = vld [vmem:[%s10094_s2 + $0xc4] sm:$0xf] }
 0x586   : > { %v5074_v51 = vpop.f32.mrf.mxu0 }
 0x587   : > { %v5163_v49 = vpop.f32.mrf.mxu1 }
 0x588   : > { %v5336_v14 = vpop.f32.mrf.mxu3  ;;  %v5164_v30 = vadd.f32 %v5163_v49, %v5074_v51  ;;  %v6066_v49 = vld [vmem:[%s10094_s2 + $0xd0] sm:$0xf] }
 0x589   : > { %v5337_v31 = vadd.f32 %v5336_v14, %v5247_v4  ;;  %5291 = vmatmul.bf16.gmra.mxu2 %v6035_v32  ;;  %5113 = vmatmul.bf16.gmra.mxu0 %v6035_v32  ;;  %v6063_v4 = vor.u32 %v6212_v63, %v6060_v48  ;;  %v6215_v14 = vld [vmem:[%s10094_s2 + $0xd4] sm:$0xf0] }
 0x58a   : > { %5420 = vst [vmem:[%s9933_s11 + $0x20] sm:$0xff] %v5164_v30  ;;  %5202 = vmatmul.bf16.gmra.mxu1 %v6039_v23  ;;  %v6214_v30 = vld [vmem:[%s10094_s2 + $0xd4] sm:$0xf] }
 0x58b   : > { %5417 = vst [vmem:[%s9933_s11 + $0x8] sm:$0xff] %v5337_v31  ;;  %v6068_v31 = vld [vmem:[%s10094_s2 + $0xd8] sm:$0xf0] }
 0x58c   : > { %v5252_v57 = vpop.f32.mrf.mxu2 }
 0x58e   : > { %v5076_v43 = vpop.f32.mrf.mxu0 }
 0x58f   : > { %v5165_v52 = vpop.f32.mrf.mxu1 }
 0x590   : > { %v5338_v40 = vpop.f32.mrf.mxu3  ;;  %v5166_v12 = vadd.f32 %v5165_v52, %v5076_v43  ;;  %v6067_v43 = vor.u32 %v6215_v14, %v6066_v49  ;;  %v6071_v52 = vor.u32 %v6214_v30, %v6068_v31 }
 0x591   : > { %v5339_v15 = vadd.f32 %v5338_v40, %v5249_v5 }
 0x592   : > { %5422 = vst [vmem:[%s9933_s11 + $0x30] sm:$0xff] %v5166_v12 }
 0x593   : > { %5419 = vst [vmem:[%s9933_s11 + $0x18] sm:$0xff] %v5339_v15 }
 0x594   : > { %v5254_v55 = vpop.f32.mrf.mxu2 }
 0x595   : > { %5380 = vmatmul.bf16.gmra.mxu3 %v6039_v23 }
 0x596   : > { %v5079_v17 = vpop.f32.mrf.mxu0 }
 0x597   : > { %v5168_v42 = vpop.f32.mrf.mxu1 }
 0x598   : > { %v5341_v8 = vpop.f32.mrf.mxu3  ;;  %v5169_v60 = vadd.f32 %v5168_v42, %v5079_v17  ;;  %v6074_v42 = vld [vmem:[%s10094_s2 + $0xe0] sm:$0xf] }
 0x599   : > { %v5342_v20 = vadd.f32 %v5341_v8, %v5252_v57  ;;  %5296 = vmatmul.bf16.gmra.mxu2 %v6043_v3  ;;  %5118 = vmatmul.bf16.gmra.mxu0 %v6043_v3  ;;  %v6217_v8 = vld [vmem:[%s10094_s2 + $0xe4] sm:$0xf0] }
 0x59a   : > { %5424 = vst [vmem:[%s9933_s11 + $0x40] sm:$0xff] %v5169_v60  ;;  %5207 = vmatmul.bf16.gmra.mxu1 %v6047_v44  ;;  %v6216_v60 = vld [vmem:[%s10094_s2 + $0xe4] sm:$0xf] }
 0x59b   : > { %5421 = vst [vmem:[%s9933_s11 + $0x28] sm:$0xff] %v5342_v20  ;;  %v6076_v20 = vld [vmem:[%s10094_s2 + $0xe8] sm:$0xf0] }
 0x59c   : > { %v5257_v62 = vpop.f32.mrf.mxu2 }
 0x59e   : > { %v5081_v34 = vpop.f32.mrf.mxu0 }
 0x59f   : > { %v5170_v21 = vpop.f32.mrf.mxu1 }
 0x5a0   : > { %v5343_v19 = vpop.f32.mrf.mxu3  ;;  %v5171_v26 = vadd.f32 %v5170_v21, %v5081_v34  ;;  %v6075_v34 = vor.u32 %v6217_v8, %v6074_v42  ;;  %v6079_v21 = vor.u32 %v6216_v60, %v6076_v20 }
 0x5a1   : > { %v5344_v61 = vadd.f32 %v5343_v19, %v5254_v55 }
 0x5a2   : > { %5426 = vst [vmem:[%s9933_s11 + $0x50] sm:$0xff] %v5171_v26 }
 0x5a3   : > { %5423 = vst [vmem:[%s9933_s11 + $0x38] sm:$0xff] %v5344_v61 }
 0x5a4   : > { %v5259_v6 = vpop.f32.mrf.mxu2 }
 0x5a5   : > { %5385 = vmatmul.bf16.gmra.mxu3 %v6047_v44 }
 0x5a6   : > { %v5084_v59 = vpop.f32.mrf.mxu0 }
 0x5a7   : > { %v5173_v18 = vpop.f32.mrf.mxu1 }
 0x5a8   : > { %v5346_v22 = vpop.f32.mrf.mxu3  ;;  %v5174_v10 = vadd.f32 %v5173_v18, %v5084_v59  ;;  %v6082_v18 = vld [vmem:[%s10094_s2 + $0xf0] sm:$0xf] }
 0x5a9   : > { %v5347_v46 = vadd.f32 %v5346_v22, %v5257_v62  ;;  %5301 = vmatmul.bf16.gmra.mxu2 %v6051_v58  ;;  %5123 = vmatmul.bf16.gmra.mxu0 %v6051_v58  ;;  %v6219_v22 = vld [vmem:[%s10094_s2 + $0xf4] sm:$0xf0] }
 0x5aa   : > { %5428 = vst [vmem:[%s9933_s11 + $0x60] sm:$0xff] %v5174_v10  ;;  %5212 = vmatmul.bf16.gmra.mxu1 %v6055_v47  ;;  %v6218_v10 = vld [vmem:[%s10094_s2 + $0xf4] sm:$0xf] }
 0x5ab   : > { %5425 = vst [vmem:[%s9933_s11 + $0x48] sm:$0xff] %v5347_v46  ;;  %v6084_v46 = vld [vmem:[%s10094_s2 + $0xf8] sm:$0xf0] }
 0x5ac   : > { %v5262_v11 = vpop.f32.mrf.mxu2 }
 0x5ae   : > { %v5086_v27 = vpop.f32.mrf.mxu0 }
 0x5af   : > { %v5175_v24 = vpop.f32.mrf.mxu1 }
 0x5b0   : > { %v5348_v16 = vpop.f32.mrf.mxu3  ;;  %v5176_v45 = vadd.f32 %v5175_v24, %v5086_v27  ;;  %v6083_v27 = vor.u32 %v6219_v22, %v6082_v18  ;;  %v6087_v24 = vor.u32 %v6218_v10, %v6084_v46 }
 0x5b1   : > { %v5349_v9 = vadd.f32 %v5348_v16, %v5259_v6 }
 0x5b2   : > { %5430 = vst [vmem:[%s9933_s11 + $0x70] sm:$0xff] %v5176_v45 }
 0x5b3   : > { %5427 = vst [vmem:[%s9933_s11 + $0x58] sm:$0xff] %v5349_v9 }
 0x5b4   : > { %v5264_v35 = vpop.f32.mrf.mxu2 }
 0x5b5   : > { %5390 = vmatmul.bf16.gmra.mxu3 %v6055_v47 }
 0x5b6   : > { %v5089_v13 = vpop.f32.mrf.mxu0 }
 0x5b7   : > { %v5178_v53 = vpop.f32.mrf.mxu1 }
 0x5b8   : > { %v5351_v33 = vpop.f32.mrf.mxu3  ;;  %v5179_v41 = vadd.f32 %v5178_v53, %v5089_v13 }
 0x5b9   : > { %v5352_v50 = vadd.f32 %v5351_v33, %v5262_v11  ;;  %5306 = vmatmul.bf16.gmra.mxu2 %v6059_v28  ;;  %5128 = vmatmul.bf16.gmra.mxu0 %v6059_v28 }
 0x5ba   : > { %5432 = vst [vmem:[%s9933_s11 + $0x80] sm:$0xff] %v5179_v41  ;;  %5217 = vmatmul.bf16.gmra.mxu1 %v6063_v4 }
 0x5bb   : > { %5429 = vst [vmem:[%s9933_s11 + $0x68] sm:$0xff] %v5352_v50 }
 0x5bc   : > { %v5267_v0 = vpop.f32.mrf.mxu2 }
 0x5be   : > { %v5091_v36 = vpop.f32.mrf.mxu0 }
 0x5bf   : > { %v5180_v5 = vpop.f32.mrf.mxu1 }
 0x5c0   : > { %v5353_v32 = vpop.f32.mrf.mxu3  ;;  %v5181_v23 = vadd.f32 %v5180_v5, %v5091_v36 }
 0x5c1   : > { %v5354_v51 = vadd.f32 %v5353_v32, %v5264_v35 }
 0x5c2   : > { %5434 = vst [vmem:[%s9933_s11 + $0x90] sm:$0xff] %v5181_v23 }
 0x5c3   : > { %5431 = vst [vmem:[%s9933_s11 + $0x78] sm:$0xff] %v5354_v51 }
 0x5c4   : > { %v5269_v57 = vpop.f32.mrf.mxu2 }
 0x5c5   : > { %5395 = vmatmul.bf16.gmra.mxu3 %v6063_v4 }
 0x5c6   : > { %v5094_v40 = vpop.f32.mrf.mxu0 }
 0x5c7   : > { %v5183_v12 = vpop.f32.mrf.mxu1 }
 0x5c8   : > { %v5356_v15 = vpop.f32.mrf.mxu3  ;;  %v5184_v7 = vadd.f32 %v5183_v12, %v5094_v40 }
 0x5c9   : > { %v5357_v1 = vadd.f32 %v5356_v15, %v5267_v0  ;;  %5311 = vmatmul.bf16.gmra.mxu2 %v6067_v43  ;;  %5133 = vmatmul.bf16.gmra.mxu0 %v6067_v43 }
 0x5ca   : > { %5436 = vst [vmem:[%s9933_s11 + $0xa0] sm:$0xff] %v5184_v7  ;;  %5222 = vmatmul.bf16.gmra.mxu1 %v6071_v52 }
 0x5cb   : > { %5433 = vst [vmem:[%s9933_s11 + $0x88] sm:$0xff] %v5357_v1 }
 0x5cc   : > { %v5272_v38 = vpop.f32.mrf.mxu2 }
 0x5ce   : > { %v5096_v29 = vpop.f32.mrf.mxu0 }
 0x5cf   : > { %v5185_v55 = vpop.f32.mrf.mxu1 }
 0x5d0   : > { %v5358_v3 = vpop.f32.mrf.mxu3  ;;  %v5186_v44 = vadd.f32 %v5185_v55, %v5096_v29 }
 0x5d1   : > { %v5359_v17 = vadd.f32 %v5358_v3, %v5269_v57 }
 0x5d2   : > { %5438 = vst [vmem:[%s9933_s11 + $0xb0] sm:$0xff] %v5186_v44 }
 0x5d3   : > { %5435 = vst [vmem:[%s9933_s11 + $0x98] sm:$0xff] %v5359_v17 }
 0x5d4   : > { %v5274_v62 = vpop.f32.mrf.mxu2 }
 0x5d5   : > { %5400 = vmatmul.bf16.gmra.mxu3 %v6071_v52 }
 0x5d6   : > { %v5099_v19 = vpop.f32.mrf.mxu0 }
 0x5d7   : > { %v5188_v26 = vpop.f32.mrf.mxu1 }
 0x5d8   : > { %v5361_v61 = vpop.f32.mrf.mxu3  ;;  %v5189_v54 = vadd.f32 %v5188_v26, %v5099_v19 }
 0x5d9   : > { %v5362_v56 = vadd.f32 %v5361_v61, %v5272_v38  ;;  %5316 = vmatmul.bf16.gmra.mxu2 %v6075_v34  ;;  %5138 = vmatmul.bf16.gmra.mxu0 %v6075_v34 }
 0x5da   : > { %5440 = vst [vmem:[%s9933_s11 + $0xc0] sm:$0xff] %v5189_v54  ;;  %5227 = vmatmul.bf16.gmra.mxu1 %v6079_v21 }
 0x5db   : > { %5437 = vst [vmem:[%s9933_s11 + $0xa8] sm:$0xff] %v5362_v56 }
 0x5dc   : > { %v5277_v39 = vpop.f32.mrf.mxu2 }
 0x5de   : > { %v5101_v25 = vpop.f32.mrf.mxu0 }
 0x5df   : > { %v5190_v6 = vpop.f32.mrf.mxu1 }
 0x5e0   : > { %v5363_v58 = vpop.f32.mrf.mxu3  ;;  %v5191_v47 = vadd.f32 %v5190_v6, %v5101_v25 }
 0x5e1   : > { %v5364_v59 = vadd.f32 %v5363_v58, %v5274_v62 }
 0x5e2   : > { %5442 = vst [vmem:[%s9933_s11 + $0xd0] sm:$0xff] %v5191_v47 }
 0x5e3   : > { %5439 = vst [vmem:[%s9933_s11 + $0xb8] sm:$0xff] %v5364_v59 }
 0x5e4   : > { %v5279_v11 = vpop.f32.mrf.mxu2 }
 0x5e5   : > { %5405 = vmatmul.bf16.gmra.mxu3 %v6079_v21 }
 0x5e6   : > { %v5104_v16 = vpop.f32.mrf.mxu0 }
 0x5e7   : > { %v5193_v45 = vpop.f32.mrf.mxu1 }
 0x5e8   : > { %v5366_v9 = vpop.f32.mrf.mxu3  ;;  %v5194_v37 = vadd.f32 %v5193_v45, %v5104_v16 }
 0x5e9   : > { %v5367_v2 = vadd.f32 %v5366_v9, %v5277_v39  ;;  %5321 = vmatmul.bf16.gmra.mxu2 %v6083_v27  ;;  %5143 = vmatmul.bf16.gmra.mxu0 %v6083_v27 }
 0x5ea   : > { %5444 = vst [vmem:[%s9933_s11 + $0xe0] sm:$0xff] %v5194_v37  ;;  %5232 = vmatmul.bf16.gmra.mxu1 %v6087_v24 }
 0x5eb   : > { %5441 = vst [vmem:[%s9933_s11 + $0xc8] sm:$0xff] %v5367_v2 }
 0x5ec   : > { %v5282_v63 = vpop.f32.mrf.mxu2 }
 0x5ee   : > { %v5106_v48 = vpop.f32.mrf.mxu0 }
 0x5ef   : > { %v5195_v35 = vpop.f32.mrf.mxu1 }
 0x5f0   : > { %v5368_v28 = vpop.f32.mrf.mxu3  ;;  %v5196_v4 = vadd.f32 %v5195_v35, %v5106_v48 }
 0x5f1   : > { %v5369_v13 = vadd.f32 %v5368_v28, %v5279_v11 }
 0x5f2   : > { %5446 = vst [vmem:[%s9933_s11 + $0xf0] sm:$0xff] %v5196_v4 }
 0x5f3   : > { %5443 = vst [vmem:[%s9933_s11 + $0xd8] sm:$0xff] %v5369_v13 }
 0x5f4   : > { %v5284_v53 = vpop.f32.mrf.mxu2 }
 0x5f5   : > { %5410 = vmatmul.bf16.gmra.mxu3 %v6087_v24 }
 0x5f6   : > { %v5109_v33 = vpop.f32.mrf.mxu0 }
 0x5f7   : > { %v5198_v41 = vpop.f32.mrf.mxu1 }
 0x5f8   : > { %v5371_v50 = vpop.f32.mrf.mxu3  ;;  %v5199_v0 = vadd.f32 %v5198_v41, %v5109_v33 }
 0x5f9   : > { %v5372_v36 = vadd.f32 %v5371_v50, %v5282_v63 }
 0x5fa   : > { %5448 = vst [vmem:[%s9933_s11 + $0x100] sm:$0xff] %v5199_v0 }
 0x5fb   : > { %5445 = vst [vmem:[%s9933_s11 + $0xe8] sm:$0xff] %v5372_v36 }
 0x5fc   : > { %v5287_v5 = vpop.f32.mrf.mxu2 }
 0x5fe   : > { %v5111_v32 = vpop.f32.mrf.mxu0 }
 0x5ff   : > { %v5200_v23 = vpop.f32.mrf.mxu1 }
 0x600   : > { %v5373_v51 = vpop.f32.mrf.mxu3  ;;  %v5201_v49 = vadd.f32 %v5200_v23, %v5111_v32 }
 0x601   : > { %v5374_v14 = vadd.f32 %v5373_v51, %v5284_v53 }
 0x602   : > { %5450 = vst [vmem:[%s9933_s11 + $0x110] sm:$0xff] %v5201_v49 }
 0x603   : > { %5447 = vst [vmem:[%s9933_s11 + $0xf8] sm:$0xff] %v5374_v14 }
 0x604   : > { %v5289_v30 = vpop.f32.mrf.mxu2 }
 0x606   : > { %v5114_v31 = vpop.f32.mrf.mxu0 }
 0x607   : > { %v5203_v57 = vpop.f32.mrf.mxu1 }
 0x608   : > { %v5376_v43 = vpop.f32.mrf.mxu3  ;;  %v5204_v52 = vadd.f32 %v5203_v57, %v5114_v31 }
 0x609   : > { %v5377_v40 = vadd.f32 %v5376_v43, %v5287_v5 }
 0x60a   : > { %5452 = vst [vmem:[%s9933_s11 + $0x120] sm:$0xff] %v5204_v52 }
 0x60b   : > { %5449 = vst [vmem:[%s9933_s11 + $0x108] sm:$0xff] %v5377_v40 }
 0x60c   : > { %v5292_v12 = vpop.f32.mrf.mxu2 }
 0x60e   : > { %v5116_v15 = vpop.f32.mrf.mxu0 }
 0x60f   : > { %v5205_v7 = vpop.f32.mrf.mxu1 }
 0x610   : > { %v5378_v1 = vpop.f32.mrf.mxu3  ;;  %v5206_v38 = vadd.f32 %v5205_v7, %v5116_v15 }
 0x611   : > { %v5379_v29 = vadd.f32 %v5378_v1, %v5289_v30 }
 0x612   : > { %5454 = vst [vmem:[%s9933_s11 + $0x130] sm:$0xff] %v5206_v38 }
 0x613   : > { %5451 = vst [vmem:[%s9933_s11 + $0x118] sm:$0xff] %v5379_v29 }
 0x614   : > { %v5294_v55 = vpop.f32.mrf.mxu2 }
 0x616   : > { %v5119_v3 = vpop.f32.mrf.mxu0 }
 0x617   : > { %v5208_v44 = vpop.f32.mrf.mxu1 }
 0x618   : > { %v5381_v17 = vpop.f32.mrf.mxu3  ;;  %v5209_v42 = vadd.f32 %v5208_v44, %v5119_v3 }
 0x619   : > { %v5382_v8 = vadd.f32 %v5381_v17, %v5292_v12 }
 0x61a   : > { %5456 = vst [vmem:[%s9933_s11 + $0x140] sm:$0xff] %v5209_v42 }
 0x61b   : > { %5453 = vst [vmem:[%s9933_s11 + $0x128] sm:$0xff] %v5382_v8 }
 0x61c   : > { %v5297_v60 = vpop.f32.mrf.mxu2 }
 0x61e   : > { %v5121_v20 = vpop.f32.mrf.mxu0 }
 0x61f   : > { %v5210_v62 = vpop.f32.mrf.mxu1 }
 0x620   : > { %v5383_v34 = vpop.f32.mrf.mxu3  ;;  %v5211_v21 = vadd.f32 %v5210_v62, %v5121_v20 }
 0x621   : > { %v5384_v19 = vadd.f32 %v5383_v34, %v5294_v55 }
 0x622   : > { %5458 = vst [vmem:[%s9933_s11 + $0x150] sm:$0xff] %v5211_v21 }
 0x623   : > { %5455 = vst [vmem:[%s9933_s11 + $0x138] sm:$0xff] %v5384_v19 }
 0x624   : > { %v5299_v26 = vpop.f32.mrf.mxu2 }
 0x626   : > { %v5124_v61 = vpop.f32.mrf.mxu0 }
 0x627   : > { %v5213_v54 = vpop.f32.mrf.mxu1 }
 0x628   : > { %v5386_v56 = vpop.f32.mrf.mxu3  ;;  %v5214_v39 = vadd.f32 %v5213_v54, %v5124_v61 }
 0x629   : > { %v5387_v25 = vadd.f32 %v5386_v56, %v5297_v60 }
 0x62a   : > { %5460 = vst [vmem:[%s9933_s11 + $0x160] sm:$0xff] %v5214_v39 }
 0x62b   : > { %5457 = vst [vmem:[%s9933_s11 + $0x148] sm:$0xff] %v5387_v25 }
 0x62c   : > { %v5302_v6 = vpop.f32.mrf.mxu2 }
 0x62e   : > { %v5126_v58 = vpop.f32.mrf.mxu0 }
 0x62f   : > { %v5215_v47 = vpop.f32.mrf.mxu1 }
 0x630   : > { %v5388_v59 = vpop.f32.mrf.mxu3  ;;  %v5216_v18 = vadd.f32 %v5215_v47, %v5126_v58 }
 0x631   : > { %v5389_v22 = vadd.f32 %v5388_v59, %v5299_v26 }
 0x632   : > { %5462 = vst [vmem:[%s9933_s11 + $0x170] sm:$0xff] %v5216_v18 }
 0x633   : > { %5459 = vst [vmem:[%s9933_s11 + $0x158] sm:$0xff] %v5389_v22 }
 0x634   : > { %v5304_v10 = vpop.f32.mrf.mxu2 }
 0x636   : > { %v5129_v46 = vpop.f32.mrf.mxu0 }
 0x637   : > { %v5218_v11 = vpop.f32.mrf.mxu1 }
 0x638   : > { %v5391_v27 = vpop.f32.mrf.mxu3  ;;  %v5219_v24 = vadd.f32 %v5218_v11, %v5129_v46 }
 0x639   : > { %v5392_v16 = vadd.f32 %v5391_v27, %v5302_v6 }
 0x63a   : > { %5464 = vst [vmem:[%s9933_s11 + $0x180] sm:$0xff] %v5219_v24 }
 0x63b   : > { %5461 = vst [vmem:[%s9933_s11 + $0x168] sm:$0xff] %v5392_v16 }
 0x63c   : > { %v5307_v45 = vpop.f32.mrf.mxu2 }
 0x63e   : > { %v5131_v9 = vpop.f32.mrf.mxu0 }
 0x63f   : > { %v5220_v37 = vpop.f32.mrf.mxu1 }
 0x640   : > { %v5393_v2 = vpop.f32.mrf.mxu3  ;;  %v5221_v63 = vadd.f32 %v5220_v37, %v5131_v9 }
 0x641   : > { %v5394_v48 = vadd.f32 %v5393_v2, %v5304_v10 }
 0x642   : > { %5466 = vst [vmem:[%s9933_s11 + $0x190] sm:$0xff] %v5221_v63 }
 0x643   : > { %5463 = vst [vmem:[%s9933_s11 + $0x178] sm:$0xff] %v5394_v48 }
 0x644   : > { %v5309_v35 = vpop.f32.mrf.mxu2 }
 0x646   : > { %v5134_v28 = vpop.f32.mrf.mxu0 }
 0x647   : > { %v5223_v4 = vpop.f32.mrf.mxu1 }
 0x648   : > { %v5396_v13 = vpop.f32.mrf.mxu3  ;;  %v5224_v53 = vadd.f32 %v5223_v4, %v5134_v28 }
 0x649   : > { %v5397_v33 = vadd.f32 %v5396_v13, %v5307_v45 }
 0x64a   : > { %5468 = vst [vmem:[%s9933_s11 + $0x1a0] sm:$0xff] %v5224_v53 }
 0x64b   : > { %5465 = vst [vmem:[%s9933_s11 + $0x188] sm:$0xff] %v5397_v33 }
 0x64c   : > { %v5312_v41 = vpop.f32.mrf.mxu2 }
 0x64e   : > { %v5136_v50 = vpop.f32.mrf.mxu0 }
 0x64f   : > { %v5225_v0 = vpop.f32.mrf.mxu1 }
 0x650   : > { %v5398_v36 = vpop.f32.mrf.mxu3  ;;  %v5226_v5 = vadd.f32 %v5225_v0, %v5136_v50 }
 0x651   : > { %v5399_v32 = vadd.f32 %v5398_v36, %v5309_v35 }
 0x652   : > { %5470 = vst [vmem:[%s9933_s11 + $0x1b0] sm:$0xff] %v5226_v5 }
 0x653   : > { %5467 = vst [vmem:[%s9933_s11 + $0x198] sm:$0xff] %v5399_v32 }
 0x654   : > { %v5314_v14 = vpop.f32.mrf.mxu2 }
 0x656   : > { %v5139_v23 = vpop.f32.mrf.mxu0 }
 0x657   : > { %v5228_v51 = vpop.f32.mrf.mxu1 }
 0x658   : > { %v5401_v49 = vpop.f32.mrf.mxu3  ;;  %v5229_v30 = vadd.f32 %v5228_v51, %v5139_v23 }
 0x659   : > { %v5402_v31 = vadd.f32 %v5401_v49, %v5312_v41 }
 0x65a   : > { %5472 = vst [vmem:[%s9933_s11 + $0x1c0] sm:$0xff] %v5229_v30 }
 0x65b   : > { %5469 = vst [vmem:[%s9933_s11 + $0x1a8] sm:$0xff] %v5402_v31 }
 0x65c   : > { %v5317_v15 = vpop.f32.mrf.mxu2 }
 0x65e   : > { %v5141_v57 = vpop.f32.mrf.mxu0 }
 0x65f   : > { %v5230_v43 = vpop.f32.mrf.mxu1 }
 0x660   : > { %v5403_v52 = vpop.f32.mrf.mxu3  ;;  %v5231_v40 = vadd.f32 %v5230_v43, %v5141_v57 }
 0x661   : > { %v5404_v12 = vadd.f32 %v5403_v52, %v5314_v14 }
 0x662   : > { %5474 = vst [vmem:[%s9933_s11 + $0x1d0] sm:$0xff] %v5231_v40 }
 0x663   : > { %5471 = vst [vmem:[%s9933_s11 + $0x1b8] sm:$0xff] %v5404_v12 }
 0x664   : > { %v5319_v3 = vpop.f32.mrf.mxu2 }
 0x666   : > { %v5144_v7 = vpop.f32.mrf.mxu0 }
 0x667   : > { %v5233_v1 = vpop.f32.mrf.mxu1 }
 0x668   : > { %v5406_v38 = vpop.f32.mrf.mxu3  ;;  %v5234_v29 = vadd.f32 %v5233_v1, %v5144_v7 }
 0x669   : > { %v5407_v55 = vadd.f32 %v5406_v38, %v5317_v15 }
 0x66a   : > { %5476 = vst [vmem:[%s9933_s11 + $0x1e0] sm:$0xff] %v5234_v29 }
 0x66b   : > { %5473 = vst [vmem:[%s9933_s11 + $0x1c8] sm:$0xff] %v5407_v55 }
 0x66c   : > { %v5322_v20 = vpop.f32.mrf.mxu2 }
 0x66e   : > { %v5146_v44 = vpop.f32.mrf.mxu0 }
 0x66f   : > { %v5235_v17 = vpop.f32.mrf.mxu1 }
 0x670   : > { %v5408_v42 = vpop.f32.mrf.mxu3  ;;  %v5236_v8 = vadd.f32 %v5235_v17, %v5146_v44 }
 0x671   : > { %v5409_v60 = vadd.f32 %v5408_v42, %v5319_v3 }
 0x672   : > { %5478 = vst [vmem:[%s9933_s11 + $0x1f0] sm:$0xff] %v5236_v8 }
 0x673   : > { %5475 = vst [vmem:[%s9933_s11 + $0x1d8] sm:$0xff] %v5409_v60 }
 0x674   : > { %v5324_v21 = vpop.f32.mrf.mxu2 }
 0x678   : > { %v5411_v62 = vpop.f32.mrf.mxu3 }
 0x679   : > { %v5412_v34 = vadd.f32 %v5411_v62, %v5322_v20 }
 0x67b   : > { %5477 = vst [vmem:[%s9933_s11 + $0x1e8] sm:$0xff] %v5412_v34 }
 0x680   : > { %v5413_v19 = vpop.f32.mrf.mxu3 }
 0x681   : > { %v5414_v26 = vadd.f32 %v5413_v19, %v5324_v21 }
 0x683   : > { %5479 = vst [vmem:[%s9933_s11 + $0x1f8] sm:$0xff] %v5414_v26 }
 0x684 PF: > { %s13_s14 = sadd.s32 1, %s6302_s14   ;;  %s10355_s12 = smov %s6298_s13 }
 0x685   : > { %p10_p5 = scmp.ge.s32.totalorder %s13_s14, 4   ;;  %s10356_s13 = smov %s10358_s15 }
 0x687   :  { %12 = sbr.rel (!%p10_p5) target bundleno = 2 (0x2), region = 62 }

</bundles_post_ra>
